<compile_context>
chip_gen: v7x
topology: tpu7x:2x2x1
jax: 0.10.0
libtpu: 0.0.40
codegen_flags: <defaults>
</compile_context>

<pallas_src>
import functools

import jax
import jax.numpy as jnp
from jax.experimental import pallas as pl
from jax.experimental.pallas import tpu as pltpu

_BF16 = jnp.bfloat16

# Single-step kernels (no grid) => no pipelining / double-buffering.  The limit
# is generous for these small shapes; at large configs size it from the actual
# stacked-weight + activation footprint (v7x has only 64 MiB physical VMEM).
_COMPILER_PARAMS = pltpu.CompilerParams(vmem_limit_bytes=64 * 1024 * 1024)


# ----------------------------------------------------------------------------
# Fused CNN stack: every grouped 'valid' conv layer = one MXU matmul
# (im2col @ block-diagonal weight), whole stack & whole batch in one kernel.
# ----------------------------------------------------------------------------
def _cnn_stack_kernel(x_ref, *refs, kernel_size, n_layers):
    """x_ref: (B, S, Cin0) f32 — channels in lanes, (batch, time) in rows, so
    each layer is a single (B*Lout, K*Cin) @ (K*Cin, Cout) matmul."""
    o_ref = refs[-1]
    wrefs = refs[:-1]
    K = kernel_size
    y = x_ref[...]                                            # (B, S, Cin) f32
    for layer in range(n_layers):
        w = wrefs[2 * layer][...]                             # (K*Cin, Cout) bf16
        b = wrefs[2 * layer + 1][...]                         # (1, Cout)    f32
        nb, length, cin = y.shape
        lout = length - K + 1
        # im2col columns ordered (k, cin) to match the block-diagonal weights.
        # TODO(synk): at realistic sequence lengths replace the K shifted
        # slices + lane concat with K accumulated matmuls (or pltpu.roll).
        cols = jnp.concatenate([y[:, k:k + lout, :] for k in range(K)], axis=2)
        y = jnp.dot(cols.reshape(nb * lout, K * cin).astype(_BF16), w,
                    preferred_element_type=jnp.float32) + b
        y = y.reshape(nb, lout, w.shape[1])
    o_ref[...] = y.astype(o_ref.dtype)


def cnn_stack(x_bsc, conv_params, kernel_size, out_len):
    """x_bsc: (B, S, C) f32.  conv_params: [(W^T (K*Cin, Cout) bf16, b (1, Cout) f32)]."""
    B, S, _ = x_bsc.shape
    c_out = conv_params[-1][0].shape[1]
    flat = [a for wb in conv_params for a in wb]
    return pl.pallas_call(
        functools.partial(_cnn_stack_kernel, kernel_size=kernel_size,
                          n_layers=len(conv_params)),
        out_shape=jax.ShapeDtypeStruct((B, out_len, c_out), _BF16),
        compiler_params=_COMPILER_PARAMS,
    )(x_bsc, *flat)


def _blockdiag_conv_weight(w, groups):
    """torch Conv1d weight (Cout, Cin//groups, K) -> dense block-diagonal
    (Cout, K*Cin) so the grouped 'valid' conv is im2col(x) @ W^T with im2col
    columns ordered (k, cin)."""
    c_out, cin_pg, K = w.shape
    cout_pg = c_out // groups
    c_in = groups * cin_pg
    wt = jnp.transpose(w, (2, 0, 1))                      # (K, Cout, cin_pg)
    wd = jnp.zeros((K, c_out, c_in), w.dtype)
    for g in range(groups):
        wd = wd.at[:, g * cout_pg:(g + 1) * cout_pg,
                   g * cin_pg:(g + 1) * cin_pg].set(
            wt[:, g * cout_pg:(g + 1) * cout_pg, :])
    return jnp.transpose(wd, (1, 0, 2)).reshape(c_out, K * c_in)


# ----------------------------------------------------------------------------
# TransformerBlock math (runs on VMEM-resident arrays inside a stage kernel)
# ----------------------------------------------------------------------------
def _transformer_block(x3, wqkv, bqkv, wout, bout, ln2g, ln2b,
                       wff1, bff1, wff2, bff2, ln3g, ln3b,
                       hsum, hsum_t, num_heads):
    """One TransformerBlock on (d0, d1, E); attention runs along axis 0
    (PyTorch batch_first=False convention, reproduced literally)."""
    d0, d1, E = x3.shape
    dh = E // num_heads
    scale = 1.0 / float(dh) ** 0.5
    x2 = x3.reshape(d0 * d1, E)

    # Packed QKV projection: one (E, 3E) MXU matmul, bf16 in / f32 accumulate.
    qkv = jnp.dot(x2.astype(_BF16), wqkv,
                  preferred_element_type=jnp.float32) + bqkv
    q = qkv[:, 0 * E:1 * E].reshape(d0, d1, E)
    k = qkv[:, 1 * E:2 * E].reshape(d0, d1, E)
    v = qkv[:, 2 * E:3 * E].reshape(d0, d1, E)

    # All d0^2 (query, key) pairs batched into ONE head-reduction matmul
    # (fills the MXU M dimension instead of d0^2 tiny dots).
    prod = q[:, None, :, :] * k[None, :, :, :]                # (d0, d0, d1, E)
    s = scale * jnp.dot(prod.reshape(d0 * d0 * d1, E).astype(_BF16), hsum,
                        preferred_element_type=jnp.float32)
    s = s.reshape(d0, d0, d1, num_heads)

    # Softmax over the key axis (axis 1); exact division (tiny tensors).
    m = jnp.max(s, axis=1, keepdims=True)
    p = jnp.exp(s - m)
    w = p / jnp.sum(p, axis=1, keepdims=True)                 # (d0, d0, d1, H)

    # Broadcast the per-head weights back to E lanes with ONE matmul, then
    # weight the values on the VPU and reduce over the key axis.
    wb = jnp.dot(w.reshape(d0 * d0 * d1, num_heads).astype(_BF16), hsum_t,
                 preferred_element_type=jnp.float32).reshape(d0, d0, d1, E)
    attn = jnp.sum(wb * v[None, :, :, :], axis=1).reshape(d0 * d1, E)

    # Output projection + residual + LayerNorm (f32 statistics, eps=1e-5).
    attn = jnp.dot(attn.astype(_BF16), wout,
                   preferred_element_type=jnp.float32) + bout
    h = x2 + attn
    mu = jnp.mean(h, axis=-1, keepdims=True)
    hc = h - mu
    var = jnp.mean(hc * hc, axis=-1, keepdims=True)
    h = hc * jax.lax.rsqrt(var + 1e-5) * ln2g + ln2b

    # Feed-forward + residual + LayerNorm.
    f = jnp.dot(h.astype(_BF16), wff1, preferred_element_type=jnp.float32) + bff1
    f = jnp.maximum(f, 0.0)
    f = jnp.dot(f.astype(_BF16), wff2, preferred_element_type=jnp.float32) + bff2
    y = h + f
    mu = jnp.mean(y, axis=-1, keepdims=True)
    yc = y - mu
    var = jnp.mean(yc * yc, axis=-1, keepdims=True)
    y = yc * jax.lax.rsqrt(var + 1e-5) * ln3g + ln3b
    return y.reshape(d0, d1, E)


# ----------------------------------------------------------------------------
# Fused encoder stage: latent map + positional add + all blocks (+ decoder)
# in ONE pallas_call; per-layer weights stacked along a leading layer axis.
# ----------------------------------------------------------------------------
def _stage_kernel(x_ref, mapw_ref, add_ref, hsum_ref, hsumT_ref, *rest,
                  num_heads, num_layers, d0, d1, decode):
    blk_refs = rest[:12]
    o_ref = rest[-1]
    E = mapw_ref.shape[1]

    h = jnp.dot(x_ref[...].astype(_BF16), mapw_ref[...],
                preferred_element_type=jnp.float32)
    x3 = h.reshape(d0, d1, E) + add_ref[...][None]            # pos (+ bias) add

    hsum = hsum_ref[...]
    hsum_t = hsumT_ref[...]
    for layer in range(num_layers):        # stacked weights: one slab per layer
        p = [r[layer] for r in blk_refs]
        x3 = _transformer_block(x3, *p, hsum=hsum, hsum_t=hsum_t,
                                num_heads=num_heads)

    if not decode:
        o_ref[...] = x3.reshape(d0 * d1, E).astype(o_ref.dtype)
        return

    # Fused regression decoder: relu(fc2(x)) -> fc3.
    w2_ref, b2_ref, w3_ref, b3_ref = rest[12:16]
    y2 = x3.reshape(d0 * d1, E)
    hd = jnp.dot(y2.astype(_BF16), w2_ref[...],
                 preferred_element_type=jnp.float32) + b2_ref[...]
    hd = jnp.maximum(hd, 0.0)
    if o_ref.shape[1] == 1:
        # An N=1 MXU matmul wastes the array; do fc3 as a VPU reduction.
        o_ref[...] = jnp.sum(hd * w3_ref[...], axis=-1, keepdims=True) + b3_ref[...]
    else:
        o_ref[...] = jnp.dot(hd.astype(_BF16), w3_ref[...],
                             preferred_element_type=jnp.float32) + b3_ref[...]


def encoder_stage(x2d, map_w, add, stack, hsum, hsum_t, *, d0, d1, num_heads,
                  decoder=None):
    """x2d: (d0*d1, Kin).  Returns (d0*d1, E) bf16, or (d0*d1, OUT) f32 when a
    fused decoder (w2, b2, w3, b3) is supplied."""
    M = x2d.shape[0]
    E = map_w.shape[1]
    num_layers = stack[0].shape[0]
    if decoder is None:
        extra = ()
        out_shape = jax.ShapeDtypeStruct((M, E), _BF16)
    else:
        extra = tuple(decoder)
        out_dim = decoder[3].shape[1]
        out_shape = jax.ShapeDtypeStruct((M, out_dim), jnp.float32)
    return pl.pallas_call(
        functools.partial(_stage_kernel, num_heads=num_heads,
                          num_layers=num_layers, d0=d0, d1=d1,
                          decode=decoder is not None),
        out_shape=out_shape,
        compiler_params=_COMPILER_PARAMS,
    )(x2d, map_w, add, hsum, hsum_t, *stack, *extra)


# ----------------------------------------------------------------------------
# Forward pass (only tiny reshapes / transposes in XLA between the 4 kernels)
# ----------------------------------------------------------------------------
def eegformer_forward(x, fp, cfg):
    B, C, S = x.shape
    D = cfg["conv_dim"]
    E = cfg["latent_dim"]
    H = cfg["num_heads"]
    K = cfg["kernel_size"]
    n_cnn = cfg["n_cnn_layers"]
    Lp = S - n_cnn * (K - 1)   # = S - 2*n_cnn for the reference's kernel_size=3

    # --- CNN1D: whole grouped-conv stack, whole batch, one kernel ---
    x_bsc = jnp.transpose(x, (0, 2, 1)).astype(jnp.float32)        # (B, S, C)
    y = cnn_stack(x_bsc, fp["conv"], kernel_size=K, out_len=Lp)    # (B, Lp, C*D)
    tok0 = jnp.transpose(y, (0, 2, 1)).reshape(B * C * D, Lp)      # tiny XLA op

    # --- Regional transformer stage (latent map + all blocks, one kernel) ---
    # TODO(synk): the original `x.permute(3, 0, 1)` on the 4-D CNN output is
    # invalid; the encoder is fed the CNN output directly (the CNN's
    # reshape/permute and RegionalTransformer's inverse permute cancel).
    tok = encoder_stage(tok0, fp["reg_map"], fp["reg_add"], fp["reg_stack"],
                        fp["hsum"], fp["hsumT"], d0=B, d1=C * D, num_heads=H)

    # --- Synchronous transformer stage ---
    # TODO(synk): the original applies nn.MultiheadAttention to a 4-D tensor
    # (invalid); (n_channels, conv_dim) is folded into one token axis.
    tok = encoder_stage(tok, fp["sync_map"], fp["sync_add"], fp["sync_stack"],
                        fp["hsum"], fp["hsumT"], d0=B, d1=C * D, num_heads=H)

    # x.view(batch, conv_dim, n_channels, latent) is a pure reinterpretation.
    x_temp = tok.reshape(B, D, C, E).reshape(B * D, C * E)

    # --- Temporal transformer stage + fused regression decoder ---
    # TODO(synk): the original `x_map.view(batch, D, n_channels*seq)` is
    # shape-inconsistent; the (B, D, E) layout is kept.
    out = encoder_stage(x_temp, fp["temp_map"], fp["temp_add"], fp["temp_stack"],
                        fp["hsum"], fp["hsumT"], d0=B, d1=D, num_heads=H,
                        decoder=(fp["dec_w2"], fp["dec_b2"],
                                 fp["dec_w3"], fp["dec_b3"]))
    return out.reshape(B, D, cfg["output_dim"])


# ----------------------------------------------------------------------------
# Parameters (torch-layout construction) + one-time kernel-ready preparation
# ----------------------------------------------------------------------------
def make_block_params(key, E, H, ff_dim):
    del H
    ks = jax.random.split(key, 4)
    s = 0.1
    return {
        "w_qkv": jax.random.normal(ks[0], (E, 3 * E)) * s,
        "b_qkv": jnp.zeros((3 * E,), jnp.float32),
        "w_out": jax.random.normal(ks[1], (E, E)) * s,
        "b_out": jnp.zeros((E,), jnp.float32),
        "ln2_g": jnp.ones((E,), jnp.float32),
        "ln2_b": jnp.zeros((E,), jnp.float32),
        "w_ff1": jax.random.normal(ks[2], (E, ff_dim)) * s,
        "b_ff1": jnp.zeros((ff_dim,), jnp.float32),
        "w_ff2": jax.random.normal(ks[3], (ff_dim, E)) * s,
        "b_ff2": jnp.zeros((E,), jnp.float32),
        "ln3_g": jnp.ones((E,), jnp.float32),
        "ln3_b": jnp.zeros((E,), jnp.float32),
    }


def make_params(key, *, n_channels, seq_len, conv_dim, kernel_size, n_cnn_layers,
                latent_dim, num_heads, ff_dim, num_layers, hidden_dim, output_dim):
    C, D, E = n_channels, conv_dim, latent_dim
    Lp = seq_len - 2 * n_cnn_layers
    keys = iter(jax.random.split(key, 64))
    s = 0.1
    convs = []
    for _ in range(n_cnn_layers - 1):
        convs.append((
            jax.random.normal(next(keys), (C * D, (C * D) // D, kernel_size)) * s,
            jnp.zeros((C * D,), jnp.float32),
        ))
    return {
        "conv0_w": jax.random.normal(next(keys), (C * D, 1, kernel_size)) * s,
        "conv0_b": jnp.zeros((C * D,), jnp.float32),
        "convs": convs,
        "reg_map": jax.random.normal(next(keys), (Lp, E)) * s,
        "reg_pos": jax.random.normal(next(keys), (E,)) * s,
        "reg_blocks": [make_block_params(next(keys), E, num_heads, ff_dim)
                       for _ in range(num_layers)],
        "sync_map": jax.random.normal(next(keys), (E, E)) * s,
        "sync_pos": jax.random.normal(next(keys), (E,)) * s,
        "sync_blocks": [make_block_params(next(keys), E, num_heads, ff_dim)
                        for _ in range(num_layers)],
        "temp_lin_w": jax.random.normal(next(keys), (C * E, E)) * s,
        "temp_lin_b": jnp.zeros((E,), jnp.float32),
        "temp_pos": jax.random.normal(next(keys), (1, D, E)) * s,
        "temp_blocks": [make_block_params(next(keys), E, num_heads, ff_dim)
                        for _ in range(num_layers)],
        "fc2_w": jax.random.normal(next(keys), (E, hidden_dim)) * s,
        "fc2_b": jnp.zeros((hidden_dim,), jnp.float32),
        "fc3_w": jax.random.normal(next(keys), (hidden_dim, output_dim)) * s,
        "fc3_b": jnp.zeros((output_dim,), jnp.float32),
    }


_BLOCK_KEYS = (("w_qkv", True), ("b_qkv", False), ("w_out", True), ("b_out", False),
               ("ln2_g", False), ("ln2_b", False), ("w_ff1", True), ("b_ff1", False),
               ("w_ff2", True), ("b_ff2", False), ("ln3_g", False), ("ln3_b", False))


def _stack_stage(blocks):
    """Stack per-layer block params along a leading layer axis so one kernel
    runs a whole stage with all weights VMEM-resident."""
    out = []
    for key, is_weight in _BLOCK_KEYS:
        if is_weight:
            out.append(jnp.stack([b[key].astype(_BF16) for b in blocks]))
        else:
            out.append(jnp.stack([b[key].reshape(1, -1).astype(jnp.float32)
                                  for b in blocks]))
    return out


def prepare_params(params, cfg):
    """One-time conversion to kernel-ready layout: block-diagonal conv weights,
    bf16 matmul weights, (1, N) f32 biases / LayerNorm params, stacked per-stage
    block weights, one-hot head matrices."""
    C, D = cfg["n_channels"], cfg["conv_dim"]
    E, H = cfg["latent_dim"], cfg["num_heads"]
    dh = E // H

    def row(v):
        return v.reshape(1, -1).astype(jnp.float32)

    conv = [(jnp.transpose(_blockdiag_conv_weight(params["conv0_w"], C)).astype(_BF16),
             row(params["conv0_b"]))]
    for (wc, bc) in params["convs"]:
        conv.append((jnp.transpose(_blockdiag_conv_weight(wc, D)).astype(_BF16),
                     row(bc)))

    # One-hot head reduction / broadcast matrices (exact in bf16), built once.
    hsum = (jnp.arange(E)[:, None] // dh ==
            jnp.arange(H)[None, :]).astype(_BF16)             # (E, H)
    hsum_t = jnp.transpose(hsum)                              # (H, E)

    out_dim = params["fc3_w"].shape[1]
    if out_dim == 1:
        dec_w3 = params["fc3_w"].reshape(1, -1).astype(jnp.float32)   # (1, HID)
        dec_b3 = params["fc3_b"].reshape(1, 1).astype(jnp.float32)
    else:
        dec_w3 = params["fc3_w"].astype(_BF16)
        dec_b3 = row(params["fc3_b"])

    return {
        "conv": conv,
        "hsum": hsum, "hsumT": hsum_t,
        "reg_map": params["reg_map"].astype(_BF16), "reg_add": row(params["reg_pos"]),
        "reg_stack": _stack_stage(params["reg_blocks"]),
        "sync_map": params["sync_map"].astype(_BF16), "sync_add": row(params["sync_pos"]),
        "sync_stack": _stack_stage(params["sync_blocks"]),
        "temp_map": params["temp_lin_w"].astype(_BF16),
        "temp_add": (params["temp_pos"].reshape(-1, E)
                     + params["temp_lin_b"].reshape(1, E)).astype(jnp.float32),
        "temp_stack": _stack_stage(params["temp_blocks"]),
        "dec_w2": params["fc2_w"].astype(_BF16), "dec_b2": row(params["fc2_b"]),
        "dec_w3": dec_w3, "dec_b3": dec_b3,
    }


if __name__ == "__main__":
    # Small, self-consistent configuration.
    B, C, S = 2, 4, 16            # batch, EEG channels, raw sequence length
    D, K, NCNN = 8, 3, 2          # conv_dimension_length, kernel_size, cnn layers
    E, H, FF, NL = 32, 4, 64, 2   # latent/input dim, heads, ff dim, layers
    HID, OUT = 32, 1              # decoder hidden dim, regression output dim

    key = jax.random.PRNGKey(0)
    kx, kp = jax.random.split(key)
    x = jax.random.normal(kx, (B, C, S), dtype=jnp.float32)
    params = make_params(
        kp, n_channels=C, seq_len=S, conv_dim=D, kernel_size=K,
        n_cnn_layers=NCNN, latent_dim=E, num_heads=H, ff_dim=FF,
        num_layers=NL, hidden_dim=HID, output_dim=OUT)
    cfg = dict(n_channels=C, conv_dim=D, kernel_size=K, n_cnn_layers=NCNN,
               latent_dim=E, num_heads=H, output_dim=OUT)

    fast_params = prepare_params(params, cfg)
    fwd = jax.jit(functools.partial(eegformer_forward, cfg=cfg))

    out = jax.block_until_ready(fwd(x, fast_params))
    assert out.shape == (B, D, OUT), out.shape
    assert bool(jnp.all(jnp.isfinite(out)))
    print("KERNEL_OK")
</pallas_src>

<mosaic_0001>
module attributes {stable_mosaic.version = 11 : i64} {
  func.func @_cnn_stack_kernel(%arg0: memref<2x16x4xf32, #tpu.memory_space<vmem>>, %arg1: memref<12x32xbf16, #tpu.memory_space<vmem>>, %arg2: memref<1x32xf32, #tpu.memory_space<vmem>>, %arg3: memref<96x32xbf16, #tpu.memory_space<vmem>>, %arg4: memref<1x32xf32, #tpu.memory_space<vmem>>, %arg5: memref<2x12x32xbf16, #tpu.memory_space<vmem>>) attributes {dimension_semantics = [], scalar_prefetch = 0 : i64, scratch_operands = 0 : i64, tpu.core_type = #tpu.core_type<tc>} {
    %c0 = arith.constant 0 : index
    %c0_0 = arith.constant 0 : index
    %c0_1 = arith.constant 0 : index
    %0 = vector.load %arg0[%c0, %c0_0, %c0_1] : memref<2x16x4xf32, #tpu.memory_space<vmem>>, vector<2x16x4xf32>
    %c0_2 = arith.constant 0 : index
    %c0_3 = arith.constant 0 : index
    %1 = vector.load %arg1[%c0_2, %c0_3] : memref<12x32xbf16, #tpu.memory_space<vmem>>, vector<12x32xbf16>
    %c0_4 = arith.constant 0 : index
    %c0_5 = arith.constant 0 : index
    %2 = vector.load %arg2[%c0_4, %c0_5] : memref<1x32xf32, #tpu.memory_space<vmem>>, vector<1x32xf32>
    %3 = vector.extract_strided_slice %0 {offsets = [0, 0, 0], sizes = [2, 14, 4], strides = [1, 1, 1]} : vector<2x16x4xf32> to vector<2x14x4xf32>
    %4 = vector.extract_strided_slice %0 {offsets = [0, 1, 0], sizes = [2, 14, 4], strides = [1, 1, 1]} : vector<2x16x4xf32> to vector<2x14x4xf32>
    %5 = vector.extract_strided_slice %0 {offsets = [0, 2, 0], sizes = [2, 14, 4], strides = [1, 1, 1]} : vector<2x16x4xf32> to vector<2x14x4xf32>
    %6 = tpu.concatenate %3, %4, %5 in 2 : vector<2x14x4xf32>, vector<2x14x4xf32>, vector<2x14x4xf32> -> vector<2x14x12xf32>
    %7 = vector.shape_cast %6 : vector<2x14x12xf32> to vector<28x12xf32>
    %8 = arith.truncf %7 : vector<28x12xf32> to vector<28x12xbf16>
    %cst = arith.constant dense<0.000000e+00> : vector<28x32xf32>
    %9 = tpu.matmul %8, %1, %cst {dimension_numbers = #tpu.dot_dimension_numbers<[1], [0], [0], [1], [0, 0, 1, 1], [], []>} : vector<28x12xbf16>, vector<12x32xbf16>, vector<28x32xf32> -> vector<28x32xf32>
    %10 = vector.broadcast %2 : vector<1x32xf32> to vector<28x32xf32>
    %11 = arith.addf %9, %10 : vector<28x32xf32>
    %12 = vector.shape_cast %11 : vector<28x32xf32> to vector<2x14x32xf32>
    %c0_6 = arith.constant 0 : index
    %c0_7 = arith.constant 0 : index
    %13 = vector.load %arg3[%c0_6, %c0_7] : memref<96x32xbf16, #tpu.memory_space<vmem>>, vector<96x32xbf16>
    %c0_8 = arith.constant 0 : index
    %c0_9 = arith.constant 0 : index
    %14 = vector.load %arg4[%c0_8, %c0_9] : memref<1x32xf32, #tpu.memory_space<vmem>>, vector<1x32xf32>
    %15 = vector.extract_strided_slice %12 {offsets = [0, 0, 0], sizes = [2, 12, 32], strides = [1, 1, 1]} : vector<2x14x32xf32> to vector<2x12x32xf32>
    %16 = vector.extract_strided_slice %12 {offsets = [0, 1, 0], sizes = [2, 12, 32], strides = [1, 1, 1]} : vector<2x14x32xf32> to vector<2x12x32xf32>
    %17 = vector.extract_strided_slice %12 {offsets = [0, 2, 0], sizes = [2, 12, 32], strides = [1, 1, 1]} : vector<2x14x32xf32> to vector<2x12x32xf32>
    %18 = tpu.concatenate %15, %16, %17 in 2 : vector<2x12x32xf32>, vector<2x12x32xf32>, vector<2x12x32xf32> -> vector<2x12x96xf32>
    %19 = vector.shape_cast %18 : vector<2x12x96xf32> to vector<24x96xf32>
    %20 = arith.truncf %19 : vector<24x96xf32> to vector<24x96xbf16>
    %cst_10 = arith.constant dense<0.000000e+00> : vector<24x32xf32>
    %21 = tpu.matmul %20, %13, %cst_10 {dimension_numbers = #tpu.dot_dimension_numbers<[1], [0], [0], [1], [0, 0, 1, 1], [], []>} : vector<24x96xbf16>, vector<96x32xbf16>, vector<24x32xf32> -> vector<24x32xf32>
    %22 = vector.broadcast %14 : vector<1x32xf32> to vector<24x32xf32>
    %23 = arith.addf %21, %22 : vector<24x32xf32>
    %24 = vector.shape_cast %23 : vector<24x32xf32> to vector<2x12x32xf32>
    %25 = arith.truncf %24 : vector<2x12x32xf32> to vector<2x12x32xbf16>
    %c0_11 = arith.constant 0 : index
    %c0_12 = arith.constant 0 : index
    %c0_13 = arith.constant 0 : index
    %26 = vector.load %arg5[%c0_11, %c0_12, %c0_13] : memref<2x12x32xbf16, #tpu.memory_space<vmem>>, vector<2x12x32xbf16>
    tpu.vector_store %arg5[%c0_11, %c0_12, %c0_13], %25 {strides = array<i32>} : memref<2x12x32xbf16, #tpu.memory_space<vmem>>, vector<2x12x32xbf16>,
    return
  }
}

module attributes {stable_mosaic.version = 11 : i64} {
  func.func @_stage_kernel(%arg0: memref<64x12xbf16, #tpu.memory_space<vmem>>, %arg1: memref<12x32xbf16, #tpu.memory_space<vmem>>, %arg2: memref<1x32xf32, #tpu.memory_space<vmem>>, %arg3: memref<32x4xbf16, #tpu.memory_space<vmem>>, %arg4: memref<4x32xbf16, #tpu.memory_space<vmem>>, %arg5: memref<2x32x96xbf16, #tpu.memory_space<vmem>>, %arg6: memref<2x1x96xf32, #tpu.memory_space<vmem>>, %arg7: memref<2x32x32xbf16, #tpu.memory_space<vmem>>, %arg8: memref<2x1x32xf32, #tpu.memory_space<vmem>>, %arg9: memref<2x1x32xf32, #tpu.memory_space<vmem>>, %arg10: memref<2x1x32xf32, #tpu.memory_space<vmem>>, %arg11: memref<2x32x64xbf16, #tpu.memory_space<vmem>>, %arg12: memref<2x1x64xf32, #tpu.memory_space<vmem>>, %arg13: memref<2x64x32xbf16, #tpu.memory_space<vmem>>, %arg14: memref<2x1x32xf32, #tpu.memory_space<vmem>>, %arg15: memref<2x1x32xf32, #tpu.memory_space<vmem>>, %arg16: memref<2x1x32xf32, #tpu.memory_space<vmem>>, %arg17: memref<64x32xbf16, #tpu.memory_space<vmem>>) attributes {dimension_semantics = [], scalar_prefetch = 0 : i64, scratch_operands = 0 : i64, tpu.core_type = #tpu.core_type<tc>} {
    %c0 = arith.constant 0 : index
    %c0_0 = arith.constant 0 : index
    %0 = vector.load %arg0[%c0, %c0_0] : memref<64x12xbf16, #tpu.memory_space<vmem>>, vector<64x12xbf16>
    %c0_1 = arith.constant 0 : index
    %c0_2 = arith.constant 0 : index
    %1 = vector.load %arg1[%c0_1, %c0_2] : memref<12x32xbf16, #tpu.memory_space<vmem>>, vector<12x32xbf16>
    %cst = arith.constant dense<0.000000e+00> : vector<64x32xf32>
    %2 = tpu.matmul %0, %1, %cst {dimension_numbers = #tpu.dot_dimension_numbers<[1], [0], [0], [1], [0, 0, 1, 1], [], []>} : vector<64x12xbf16>, vector<12x32xbf16>, vector<64x32xf32> -> vector<64x32xf32>
    %3 = vector.shape_cast %2 : vector<64x32xf32> to vector<2x32x32xf32>
    %c0_3 = arith.constant 0 : index
    %c0_4 = arith.constant 0 : index
    %4 = vector.load %arg2[%c0_3, %c0_4] : memref<1x32xf32, #tpu.memory_space<vmem>>, vector<1x32xf32>
    %5 = vector.shape_cast %4 : vector<1x32xf32> to vector<1x1x32xf32>
    %6 = vector.broadcast %5 : vector<1x1x32xf32> to vector<2x32x32xf32>
    %7 = arith.addf %3, %6 : vector<2x32x32xf32>
    %c0_5 = arith.constant 0 : index
    %c0_6 = arith.constant 0 : index
    %8 = vector.load %arg3[%c0_5, %c0_6] : memref<32x4xbf16, #tpu.memory_space<vmem>>, vector<32x4xbf16>
    %c0_7 = arith.constant 0 : index
    %c0_8 = arith.constant 0 : index
    %9 = vector.load %arg4[%c0_7, %c0_8] : memref<4x32xbf16, #tpu.memory_space<vmem>>, vector<4x32xbf16>
    %c0_9 = arith.constant 0 : index
    %c0_10 = arith.constant 0 : index
    %c0_11 = arith.constant 0 : index
    %10 = vector.load %arg5[%c0_9, %c0_10, %c0_11] : memref<2x32x96xbf16, #tpu.memory_space<vmem>>, vector<1x32x96xbf16>
    %11 = vector.shape_cast %10 : vector<1x32x96xbf16> to vector<32x96xbf16>
    %c0_12 = arith.constant 0 : index
    %c0_13 = arith.constant 0 : index
    %c0_14 = arith.constant 0 : index
    %12 = vector.load %arg6[%c0_12, %c0_13, %c0_14] : memref<2x1x96xf32, #tpu.memory_space<vmem>>, vector<1x1x96xf32>
    %13 = vector.shape_cast %12 : vector<1x1x96xf32> to vector<1x96xf32>
    %c0_15 = arith.constant 0 : index
    %c0_16 = arith.constant 0 : index
    %c0_17 = arith.constant 0 : index
    %14 = vector.load %arg7[%c0_15, %c0_16, %c0_17] : memref<2x32x32xbf16, #tpu.memory_space<vmem>>, vector<1x32x32xbf16>
    %15 = vector.shape_cast %14 : vector<1x32x32xbf16> to vector<32x32xbf16>
    %c0_18 = arith.constant 0 : index
    %c0_19 = arith.constant 0 : index
    %c0_20 = arith.constant 0 : index
    %16 = vector.load %arg8[%c0_18, %c0_19, %c0_20] : memref<2x1x32xf32, #tpu.memory_space<vmem>>, vector<1x1x32xf32>
    %17 = vector.shape_cast %16 : vector<1x1x32xf32> to vector<1x32xf32>
    %c0_21 = arith.constant 0 : index
    %c0_22 = arith.constant 0 : index
    %c0_23 = arith.constant 0 : index
    %18 = vector.load %arg9[%c0_21, %c0_22, %c0_23] : memref<2x1x32xf32, #tpu.memory_space<vmem>>, vector<1x1x32xf32>
    %19 = vector.shape_cast %18 : vector<1x1x32xf32> to vector<1x32xf32>
    %c0_24 = arith.constant 0 : index
    %c0_25 = arith.constant 0 : index
    %c0_26 = arith.constant 0 : index
    %20 = vector.load %arg10[%c0_24, %c0_25, %c0_26] : memref<2x1x32xf32, #tpu.memory_space<vmem>>, vector<1x1x32xf32>
    %21 = vector.shape_cast %20 : vector<1x1x32xf32> to vector<1x32xf32>
    %c0_27 = arith.constant 0 : index
    %c0_28 = arith.constant 0 : index
    %c0_29 = arith.constant 0 : index
    %22 = vector.load %arg11[%c0_27, %c0_28, %c0_29] : memref<2x32x64xbf16, #tpu.memory_space<vmem>>, vector<1x32x64xbf16>
    %23 = vector.shape_cast %22 : vector<1x32x64xbf16> to vector<32x64xbf16>
    %c0_30 = arith.constant 0 : index
    %c0_31 = arith.constant 0 : index
    %c0_32 = arith.constant 0 : index
    %24 = vector.load %arg12[%c0_30, %c0_31, %c0_32] : memref<2x1x64xf32, #tpu.memory_space<vmem>>, vector<1x1x64xf32>
    %25 = vector.shape_cast %24 : vector<1x1x64xf32> to vector<1x64xf32>
    %c0_33 = arith.constant 0 : index
    %c0_34 = arith.constant 0 : index
    %c0_35 = arith.constant 0 : index
    %26 = vector.load %arg13[%c0_33, %c0_34, %c0_35] : memref<2x64x32xbf16, #tpu.memory_space<vmem>>, vector<1x64x32xbf16>
    %27 = vector.shape_cast %26 : vector<1x64x32xbf16> to vector<64x32xbf16>
    %c0_36 = arith.constant 0 : index
    %c0_37 = arith.constant 0 : index
    %c0_38 = arith.constant 0 : index
    %28 = vector.load %arg14[%c0_36, %c0_37, %c0_38] : memref<2x1x32xf32, #tpu.memory_space<vmem>>, vector<1x1x32xf32>
    %29 = vector.shape_cast %28 : vector<1x1x32xf32> to vector<1x32xf32>
    %c0_39 = arith.constant 0 : index
    %c0_40 = arith.constant 0 : index
    %c0_41 = arith.constant 0 : index
    %30 = vector.load %arg15[%c0_39, %c0_40, %c0_41] : memref<2x1x32xf32, #tpu.memory_space<vmem>>, vector<1x1x32xf32>
    %31 = vector.shape_cast %30 : vector<1x1x32xf32> to vector<1x32xf32>
    %c0_42 = arith.constant 0 : index
    %c0_43 = arith.constant 0 : index
    %c0_44 = arith.constant 0 : index
    %32 = vector.load %arg16[%c0_42, %c0_43, %c0_44] : memref<2x1x32xf32, #tpu.memory_space<vmem>>, vector<1x1x32xf32>
    %33 = vector.shape_cast %32 : vector<1x1x32xf32> to vector<1x32xf32>
    %34 = vector.shape_cast %7 : vector<2x32x32xf32> to vector<64x32xf32>
    %35 = arith.truncf %34 : vector<64x32xf32> to vector<64x32xbf16>
    %cst_45 = arith.constant dense<0.000000e+00> : vector<64x96xf32>
    %36 = tpu.matmul %35, %11, %cst_45 {dimension_numbers = #tpu.dot_dimension_numbers<[1], [0], [0], [1], [0, 0, 1, 1], [], []>} : vector<64x32xbf16>, vector<32x96xbf16>, vector<64x96xf32> -> vector<64x96xf32>
    %37 = vector.broadcast %13 : vector<1x96xf32> to vector<64x96xf32>
    %38 = arith.addf %36, %37 : vector<64x96xf32>
    %39 = vector.extract_strided_slice %38 {offsets = [0, 0], sizes = [64, 32], strides = [1, 1]} : vector<64x96xf32> to vector<64x32xf32>
    %40 = vector.shape_cast %39 : vector<64x32xf32> to vector<2x32x32xf32>
    %41 = vector.extract_strided_slice %38 {offsets = [0, 32], sizes = [64, 32], strides = [1, 1]} : vector<64x96xf32> to vector<64x32xf32>
    %42 = vector.shape_cast %41 : vector<64x32xf32> to vector<2x32x32xf32>
    %43 = vector.extract_strided_slice %38 {offsets = [0, 64], sizes = [64, 32], strides = [1, 1]} : vector<64x96xf32> to vector<64x32xf32>
    %44 = vector.shape_cast %43 : vector<64x32xf32> to vector<2x32x32xf32>
    %45 = vector.shape_cast %40 : vector<2x32x32xf32> to vector<2x1x32x32xf32>
    %46 = vector.shape_cast %42 : vector<2x32x32xf32> to vector<1x2x32x32xf32>
    %47 = vector.broadcast %45 : vector<2x1x32x32xf32> to vector<2x2x32x32xf32>
    %48 = vector.broadcast %46 : vector<1x2x32x32xf32> to vector<2x2x32x32xf32>
    %49 = arith.mulf %47, %48 : vector<2x2x32x32xf32>
    %50 = vector.shape_cast %49 : vector<2x2x32x32xf32> to vector<128x32xf32>
    %51 = arith.truncf %50 : vector<128x32xf32> to vector<128x32xbf16>
    %cst_46 = arith.constant dense<0.000000e+00> : vector<128x4xf32>
    %52 = tpu.matmul %51, %8, %cst_46 {dimension_numbers = #tpu.dot_dimension_numbers<[1], [0], [0], [1], [0, 0, 1, 1], [], []>} : vector<128x32xbf16>, vector<32x4xbf16>, vector<128x4xf32> -> vector<128x4xf32>
    %cst_47 = arith.constant 0.353553385 : f32
    %53 = vector.broadcast %cst_47 : f32 to vector<128x4xf32>
    %54 = arith.mulf %53, %52 : vector<128x4xf32>
    %55 = vector.shape_cast %54 : vector<128x4xf32> to vector<2x2x32x4xf32>
    %cst_48 = arith.constant dense<0xFF800000> : vector<2x32x4xf32>
    %56 = vector.multi_reduction <maximumf>, %55, %cst_48 [1] : vector<2x2x32x4xf32> to vector<2x32x4xf32>
    %57 = vector.shape_cast %56 : vector<2x32x4xf32> to vector<2x1x32x4xf32>
    %58 = vector.broadcast %57 : vector<2x1x32x4xf32> to vector<2x2x32x4xf32>
    %59 = arith.subf %55, %58 : vector<2x2x32x4xf32>
    %60 = math.exp %59 : vector<2x2x32x4xf32>
    %cst_49 = arith.constant dense<0.000000e+00> : vector<2x32x4xf32>
    %61 = vector.multi_reduction <add>, %60, %cst_49 [1] : vector<2x2x32x4xf32> to vector<2x32x4xf32>
    %62 = vector.shape_cast %61 : vector<2x32x4xf32> to vector<2x1x32x4xf32>
    %63 = vector.broadcast %62 : vector<2x1x32x4xf32> to vector<2x2x32x4xf32>
    %64 = arith.divf %60, %63 : vector<2x2x32x4xf32>
    %65 = vector.shape_cast %64 : vector<2x2x32x4xf32> to vector<128x4xf32>
    %66 = arith.truncf %65 : vector<128x4xf32> to vector<128x4xbf16>
    %cst_50 = arith.constant dense<0.000000e+00> : vector<128x32xf32>
    %67 = tpu.matmul %66, %9, %cst_50 {dimension_numbers = #tpu.dot_dimension_numbers<[1], [0], [0], [1], [0, 0, 1, 1], [], []>} : vector<128x4xbf16>, vector<4x32xbf16>, vector<128x32xf32> -> vector<128x32xf32>
    %68 = vector.shape_cast %67 : vector<128x32xf32> to vector<2x2x32x32xf32>
    %69 = vector.shape_cast %44 : vector<2x32x32xf32> to vector<1x2x32x32xf32>
    %70 = vector.broadcast %69 : vector<1x2x32x32xf32> to vector<2x2x32x32xf32>
    %71 = arith.mulf %68, %70 : vector<2x2x32x32xf32>
    %cst_51 = arith.constant dense<0.000000e+00> : vector<2x32x32xf32>
    %72 = vector.multi_reduction <add>, %71, %cst_51 [1] : vector<2x2x32x32xf32> to vector<2x32x32xf32>
    %73 = vector.shape_cast %72 : vector<2x32x32xf32> to vector<64x32xf32>
    %74 = arith.truncf %73 : vector<64x32xf32> to vector<64x32xbf16>
    %cst_52 = arith.constant dense<0.000000e+00> : vector<64x32xf32>
    %75 = tpu.matmul %74, %15, %cst_52 {dimension_numbers = #tpu.dot_dimension_numbers<[1], [0], [0], [1], [0, 0, 1, 1], [], []>} : vector<64x32xbf16>, vector<32x32xbf16>, vector<64x32xf32> -> vector<64x32xf32>
    %76 = vector.broadcast %17 : vector<1x32xf32> to vector<64x32xf32>
    %77 = arith.addf %75, %76 : vector<64x32xf32>
    %78 = arith.addf %34, %77 : vector<64x32xf32>
    %cst_53 = arith.constant dense<0.000000e+00> : vector<64xf32>
    %79 = vector.multi_reduction <add>, %78, %cst_53 [1] : vector<64x32xf32> to vector<64xf32>
    %80 = vector.shape_cast %79 : vector<64xf32> to vector<64x1xf32>
    %cst_54 = arith.constant 3.200000e+01 : f32
    %81 = vector.broadcast %cst_54 : f32 to vector<64x1xf32>
    %82 = arith.divf %80, %81 : vector<64x1xf32>
    %83 = vector.broadcast %82 : vector<64x1xf32> to vector<64x32xf32>
    %84 = arith.subf %78, %83 : vector<64x32xf32>
    %85 = arith.mulf %84, %84 : vector<64x32xf32>
    %cst_55 = arith.constant dense<0.000000e+00> : vector<64xf32>
    %86 = vector.multi_reduction <add>, %85, %cst_55 [1] : vector<64x32xf32> to vector<64xf32>
    %87 = vector.shape_cast %86 : vector<64xf32> to vector<64x1xf32>
    %cst_56 = arith.constant 3.200000e+01 : f32
    %88 = vector.broadcast %cst_56 : f32 to vector<64x1xf32>
    %89 = arith.divf %87, %88 : vector<64x1xf32>
    %cst_57 = arith.constant 9.99999974E-6 : f32
    %90 = vector.broadcast %cst_57 : f32 to vector<64x1xf32>
    %91 = arith.addf %89, %90 : vector<64x1xf32>
    %92 = math.rsqrt %91 : vector<64x1xf32>
    %93 = vector.broadcast %92 : vector<64x1xf32> to vector<64x32xf32>
    %94 = arith.mulf %84, %93 : vector<64x32xf32>
    %95 = vector.broadcast %19 : vector<1x32xf32> to vector<64x32xf32>
    %96 = arith.mulf %94, %95 : vector<64x32xf32>
    %97 = vector.broadcast %21 : vector<1x32xf32> to vector<64x32xf32>
    %98 = arith.addf %96, %97 : vector<64x32xf32>
    %99 = arith.truncf %98 : vector<64x32xf32> to vector<64x32xbf16>
    %cst_58 = arith.constant dense<0.000000e+00> : vector<64x64xf32>
    %100 = tpu.matmul %99, %23, %cst_58 {dimension_numbers = #tpu.dot_dimension_numbers<[1], [0], [0], [1], [0, 0, 1, 1], [], []>} : vector<64x32xbf16>, vector<32x64xbf16>, vector<64x64xf32> -> vector<64x64xf32>
    %101 = vector.broadcast %25 : vector<1x64xf32> to vector<64x64xf32>
    %102 = arith.addf %100, %101 : vector<64x64xf32>
    %cst_59 = arith.constant 0.000000e+00 : f32
    %103 = vector.broadcast %cst_59 : f32 to vector<64x64xf32>
    %104 = arith.maximumf %102, %103 : vector<64x64xf32>
    %105 = arith.truncf %104 : vector<64x64xf32> to vector<64x64xbf16>
    %cst_60 = arith.constant dense<0.000000e+00> : vector<64x32xf32>
    %106 = tpu.matmul %105, %27, %cst_60 {dimension_numbers = #tpu.dot_dimension_numbers<[1], [0], [0], [1], [0, 0, 1, 1], [], []>} : vector<64x64xbf16>, vector<64x32xbf16>, vector<64x32xf32> -> vector<64x32xf32>
    %107 = vector.broadcast %29 : vector<1x32xf32> to vector<64x32xf32>
    %108 = arith.addf %106, %107 : vector<64x32xf32>
    %109 = arith.addf %98, %108 : vector<64x32xf32>
    %cst_61 = arith.constant dense<0.000000e+00> : vector<64xf32>
    %110 = vector.multi_reduction <add>, %109, %cst_61 [1] : vector<64x32xf32> to vector<64xf32>
    %111 = vector.shape_cast %110 : vector<64xf32> to vector<64x1xf32>
    %cst_62 = arith.constant 3.200000e+01 : f32
    %112 = vector.broadcast %cst_62 : f32 to vector<64x1xf32>
    %113 = arith.divf %111, %112 : vector<64x1xf32>
    %114 = vector.broadcast %113 : vector<64x1xf32> to vector<64x32xf32>
    %115 = arith.subf %109, %114 : vector<64x32xf32>
    %116 = arith.mulf %115, %115 : vector<64x32xf32>
    %cst_63 = arith.constant dense<0.000000e+00> : vector<64xf32>
    %117 = vector.multi_reduction <add>, %116, %cst_63 [1] : vector<64x32xf32> to vector<64xf32>
    %118 = vector.shape_cast %117 : vector<64xf32> to vector<64x1xf32>
    %cst_64 = arith.constant 3.200000e+01 : f32
    %119 = vector.broadcast %cst_64 : f32 to vector<64x1xf32>
    %120 = arith.divf %118, %119 : vector<64x1xf32>
    %cst_65 = arith.constant 9.99999974E-6 : f32
    %121 = vector.broadcast %cst_65 : f32 to vector<64x1xf32>
    %122 = arith.addf %120, %121 : vector<64x1xf32>
    %123 = math.rsqrt %122 : vector<64x1xf32>
    %124 = vector.broadcast %123 : vector<64x1xf32> to vector<64x32xf32>
    %125 = arith.mulf %115, %124 : vector<64x32xf32>
    %126 = vector.broadcast %31 : vector<1x32xf32> to vector<64x32xf32>
    %127 = arith.mulf %125, %126 : vector<64x32xf32>
    %128 = vector.broadcast %33 : vector<1x32xf32> to vector<64x32xf32>
    %129 = arith.addf %127, %128 : vector<64x32xf32>
    %130 = vector.shape_cast %129 : vector<64x32xf32> to vector<2x32x32xf32>
    %c1 = arith.constant 1 : index
    %c0_66 = arith.constant 0 : index
    %c0_67 = arith.constant 0 : index
    %131 = vector.load %arg5[%c1, %c0_66, %c0_67] : memref<2x32x96xbf16, #tpu.memory_space<vmem>>, vector<1x32x96xbf16>
    %132 = vector.shape_cast %131 : vector<1x32x96xbf16> to vector<32x96xbf16>
    %c1_68 = arith.constant 1 : index
    %c0_69 = arith.constant 0 : index
    %c0_70 = arith.constant 0 : index
    %133 = vector.load %arg6[%c1_68, %c0_69, %c0_70] : memref<2x1x96xf32, #tpu.memory_space<vmem>>, vector<1x1x96xf32>
    %134 = vector.shape_cast %133 : vector<1x1x96xf32> to vector<1x96xf32>
    %c1_71 = arith.constant 1 : index
    %c0_72 = arith.constant 0 : index
    %c0_73 = arith.constant 0 : index
    %135 = vector.load %arg7[%c1_71, %c0_72, %c0_73] : memref<2x32x32xbf16, #tpu.memory_space<vmem>>, vector<1x32x32xbf16>
    %136 = vector.shape_cast %135 : vector<1x32x32xbf16> to vector<32x32xbf16>
    %c1_74 = arith.constant 1 : index
    %c0_75 = arith.constant 0 : index
    %c0_76 = arith.constant 0 : index
    %137 = vector.load %arg8[%c1_74, %c0_75, %c0_76] : memref<2x1x32xf32, #tpu.memory_space<vmem>>, vector<1x1x32xf32>
    %138 = vector.shape_cast %137 : vector<1x1x32xf32> to vector<1x32xf32>
    %c1_77 = arith.constant 1 : index
    %c0_78 = arith.constant 0 : index
    %c0_79 = arith.constant 0 : index
    %139 = vector.load %arg9[%c1_77, %c0_78, %c0_79] : memref<2x1x32xf32, #tpu.memory_space<vmem>>, vector<1x1x32xf32>
    %140 = vector.shape_cast %139 : vector<1x1x32xf32> to vector<1x32xf32>
    %c1_80 = arith.constant 1 : index
    %c0_81 = arith.constant 0 : index
    %c0_82 = arith.constant 0 : index
    %141 = vector.load %arg10[%c1_80, %c0_81, %c0_82] : memref<2x1x32xf32, #tpu.memory_space<vmem>>, vector<1x1x32xf32>
    %142 = vector.shape_cast %141 : vector<1x1x32xf32> to vector<1x32xf32>
    %c1_83 = arith.constant 1 : index
    %c0_84 = arith.constant 0 : index
    %c0_85 = arith.constant 0 : index
    %143 = vector.load %arg11[%c1_83, %c0_84, %c0_85] : memref<2x32x64xbf16, #tpu.memory_space<vmem>>, vector<1x32x64xbf16>
    %144 = vector.shape_cast %143 : vector<1x32x64xbf16> to vector<32x64xbf16>
    %c1_86 = arith.constant 1 : index
    %c0_87 = arith.constant 0 : index
    %c0_88 = arith.constant 0 : index
    %145 = vector.load %arg12[%c1_86, %c0_87, %c0_88] : memref<2x1x64xf32, #tpu.memory_space<vmem>>, vector<1x1x64xf32>
    %146 = vector.shape_cast %145 : vector<1x1x64xf32> to vector<1x64xf32>
    %c1_89 = arith.constant 1 : index
    %c0_90 = arith.constant 0 : index
    %c0_91 = arith.constant 0 : index
    %147 = vector.load %arg13[%c1_89, %c0_90, %c0_91] : memref<2x64x32xbf16, #tpu.memory_space<vmem>>, vector<1x64x32xbf16>
    %148 = vector.shape_cast %147 : vector<1x64x32xbf16> to vector<64x32xbf16>
    %c1_92 = arith.constant 1 : index
    %c0_93 = arith.constant 0 : index
    %c0_94 = arith.constant 0 : index
    %149 = vector.load %arg14[%c1_92, %c0_93, %c0_94] : memref<2x1x32xf32, #tpu.memory_space<vmem>>, vector<1x1x32xf32>
    %150 = vector.shape_cast %149 : vector<1x1x32xf32> to vector<1x32xf32>
    %c1_95 = arith.constant 1 : index
    %c0_96 = arith.constant 0 : index
    %c0_97 = arith.constant 0 : index
    %151 = vector.load %arg15[%c1_95, %c0_96, %c0_97] : memref<2x1x32xf32, #tpu.memory_space<vmem>>, vector<1x1x32xf32>
    %152 = vector.shape_cast %151 : vector<1x1x32xf32> to vector<1x32xf32>
    %c1_98 = arith.constant 1 : index
    %c0_99 = arith.constant 0 : index
    %c0_100 = arith.constant 0 : index
    %153 = vector.load %arg16[%c1_98, %c0_99, %c0_100] : memref<2x1x32xf32, #tpu.memory_space<vmem>>, vector<1x1x32xf32>
    %154 = vector.shape_cast %153 : vector<1x1x32xf32> to vector<1x32xf32>
    %155 = vector.shape_cast %130 : vector<2x32x32xf32> to vector<64x32xf32>
    %156 = arith.truncf %155 : vector<64x32xf32> to vector<64x32xbf16>
    %cst_101 = arith.constant dense<0.000000e+00> : vector<64x96xf32>
    %157 = tpu.matmul %156, %132, %cst_101 {dimension_numbers = #tpu.dot_dimension_numbers<[1], [0], [0], [1], [0, 0, 1, 1], [], []>} : vector<64x32xbf16>, vector<32x96xbf16>, vector<64x96xf32> -> vector<64x96xf32>
    %158 = vector.broadcast %134 : vector<1x96xf32> to vector<64x96xf32>
    %159 = arith.addf %157, %158 : vector<64x96xf32>
    %160 = vector.extract_strided_slice %159 {offsets = [0, 0], sizes = [64, 32], strides = [1, 1]} : vector<64x96xf32> to vector<64x32xf32>
    %161 = vector.shape_cast %160 : vector<64x32xf32> to vector<2x32x32xf32>
    %162 = vector.extract_strided_slice %159 {offsets = [0, 32], sizes = [64, 32], strides = [1, 1]} : vector<64x96xf32> to vector<64x32xf32>
    %163 = vector.shape_cast %162 : vector<64x32xf32> to vector<2x32x32xf32>
    %164 = vector.extract_strided_slice %159 {offsets = [0, 64], sizes = [64, 32], strides = [1, 1]} : vector<64x96xf32> to vector<64x32xf32>
    %165 = vector.shape_cast %164 : vector<64x32xf32> to vector<2x32x32xf32>
    %166 = vector.shape_cast %161 : vector<2x32x32xf32> to vector<2x1x32x32xf32>
    %167 = vector.shape_cast %163 : vector<2x32x32xf32> to vector<1x2x32x32xf32>
    %168 = vector.broadcast %166 : vector<2x1x32x32xf32> to vector<2x2x32x32xf32>
    %169 = vector.broadcast %167 : vector<1x2x32x32xf32> to vector<2x2x32x32xf32>
    %170 = arith.mulf %168, %169 : vector<2x2x32x32xf32>
    %171 = vector.shape_cast %170 : vector<2x2x32x32xf32> to vector<128x32xf32>
    %172 = arith.truncf %171 : vector<128x32xf32> to vector<128x32xbf16>
    %cst_102 = arith.constant dense<0.000000e+00> : vector<128x4xf32>
    %173 = tpu.matmul %172, %8, %cst_102 {dimension_numbers = #tpu.dot_dimension_numbers<[1], [0], [0], [1], [0, 0, 1, 1], [], []>} : vector<128x32xbf16>, vector<32x4xbf16>, vector<128x4xf32> -> vector<128x4xf32>
    %cst_103 = arith.constant 0.353553385 : f32
    %174 = vector.broadcast %cst_103 : f32 to vector<128x4xf32>
    %175 = arith.mulf %174, %173 : vector<128x4xf32>
    %176 = vector.shape_cast %175 : vector<128x4xf32> to vector<2x2x32x4xf32>
    %cst_104 = arith.constant dense<0xFF800000> : vector<2x32x4xf32>
    %177 = vector.multi_reduction <maximumf>, %176, %cst_104 [1] : vector<2x2x32x4xf32> to vector<2x32x4xf32>
    %178 = vector.shape_cast %177 : vector<2x32x4xf32> to vector<2x1x32x4xf32>
    %179 = vector.broadcast %178 : vector<2x1x32x4xf32> to vector<2x2x32x4xf32>
    %180 = arith.subf %176, %179 : vector<2x2x32x4xf32>
    %181 = math.exp %180 : vector<2x2x32x4xf32>
    %cst_105 = arith.constant dense<0.000000e+00> : vector<2x32x4xf32>
    %182 = vector.multi_reduction <add>, %181, %cst_105 [1] : vector<2x2x32x4xf32> to vector<2x32x4xf32>
    %183 = vector.shape_cast %182 : vector<2x32x4xf32> to vector<2x1x32x4xf32>
    %184 = vector.broadcast %183 : vector<2x1x32x4xf32> to vector<2x2x32x4xf32>
    %185 = arith.divf %181, %184 : vector<2x2x32x4xf32>
    %186 = vector.shape_cast %185 : vector<2x2x32x4xf32> to vector<128x4xf32>
    %187 = arith.truncf %186 : vector<128x4xf32> to vector<128x4xbf16>
    %cst_106 = arith.constant dense<0.000000e+00> : vector<128x32xf32>
    %188 = tpu.matmul %187, %9, %cst_106 {dimension_numbers = #tpu.dot_dimension_numbers<[1], [0], [0], [1], [0, 0, 1, 1], [], []>} : vector<128x4xbf16>, vector<4x32xbf16>, vector<128x32xf32> -> vector<128x32xf32>
    %189 = vector.shape_cast %188 : vector<128x32xf32> to vector<2x2x32x32xf32>
    %190 = vector.shape_cast %165 : vector<2x32x32xf32> to vector<1x2x32x32xf32>
    %191 = vector.broadcast %190 : vector<1x2x32x32xf32> to vector<2x2x32x32xf32>
    %192 = arith.mulf %189, %191 : vector<2x2x32x32xf32>
    %cst_107 = arith.constant dense<0.000000e+00> : vector<2x32x32xf32>
    %193 = vector.multi_reduction <add>, %192, %cst_107 [1] : vector<2x2x32x32xf32> to vector<2x32x32xf32>
    %194 = vector.shape_cast %193 : vector<2x32x32xf32> to vector<64x32xf32>
    %195 = arith.truncf %194 : vector<64x32xf32> to vector<64x32xbf16>
    %cst_108 = arith.constant dense<0.000000e+00> : vector<64x32xf32>
    %196 = tpu.matmul %195, %136, %cst_108 {dimension_numbers = #tpu.dot_dimension_numbers<[1], [0], [0], [1], [0, 0, 1, 1], [], []>} : vector<64x32xbf16>, vector<32x32xbf16>, vector<64x32xf32> -> vector<64x32xf32>
    %197 = vector.broadcast %138 : vector<1x32xf32> to vector<64x32xf32>
    %198 = arith.addf %196, %197 : vector<64x32xf32>
    %199 = arith.addf %155, %198 : vector<64x32xf32>
    %cst_109 = arith.constant dense<0.000000e+00> : vector<64xf32>
    %200 = vector.multi_reduction <add>, %199, %cst_109 [1] : vector<64x32xf32> to vector<64xf32>
    %201 = vector.shape_cast %200 : vector<64xf32> to vector<64x1xf32>
    %cst_110 = arith.constant 3.200000e+01 : f32
    %202 = vector.broadcast %cst_110 : f32 to vector<64x1xf32>
    %203 = arith.divf %201, %202 : vector<64x1xf32>
    %204 = vector.broadcast %203 : vector<64x1xf32> to vector<64x32xf32>
    %205 = arith.subf %199, %204 : vector<64x32xf32>
    %206 = arith.mulf %205, %205 : vector<64x32xf32>
    %cst_111 = arith.constant dense<0.000000e+00> : vector<64xf32>
    %207 = vector.multi_reduction <add>, %206, %cst_111 [1] : vector<64x32xf32> to vector<64xf32>
    %208 = vector.shape_cast %207 : vector<64xf32> to vector<64x1xf32>
    %cst_112 = arith.constant 3.200000e+01 : f32
    %209 = vector.broadcast %cst_112 : f32 to vector<64x1xf32>
    %210 = arith.divf %208, %209 : vector<64x1xf32>
    %cst_113 = arith.constant 9.99999974E-6 : f32
    %211 = vector.broadcast %cst_113 : f32 to vector<64x1xf32>
    %212 = arith.addf %210, %211 : vector<64x1xf32>
    %213 = math.rsqrt %212 : vector<64x1xf32>
    %214 = vector.broadcast %213 : vector<64x1xf32> to vector<64x32xf32>
    %215 = arith.mulf %205, %214 : vector<64x32xf32>
    %216 = vector.broadcast %140 : vector<1x32xf32> to vector<64x32xf32>
    %217 = arith.mulf %215, %216 : vector<64x32xf32>
    %218 = vector.broadcast %142 : vector<1x32xf32> to vector<64x32xf32>
    %219 = arith.addf %217, %218 : vector<64x32xf32>
    %220 = arith.truncf %219 : vector<64x32xf32> to vector<64x32xbf16>
    %cst_114 = arith.constant dense<0.000000e+00> : vector<64x64xf32>
    %221 = tpu.matmul %220, %144, %cst_114 {dimension_numbers = #tpu.dot_dimension_numbers<[1], [0], [0], [1], [0, 0, 1, 1], [], []>} : vector<64x32xbf16>, vector<32x64xbf16>, vector<64x64xf32> -> vector<64x64xf32>
    %222 = vector.broadcast %146 : vector<1x64xf32> to vector<64x64xf32>
    %223 = arith.addf %221, %222 : vector<64x64xf32>
    %cst_115 = arith.constant 0.000000e+00 : f32
    %224 = vector.broadcast %cst_115 : f32 to vector<64x64xf32>
    %225 = arith.maximumf %223, %224 : vector<64x64xf32>
    %226 = arith.truncf %225 : vector<64x64xf32> to vector<64x64xbf16>
    %cst_116 = arith.constant dense<0.000000e+00> : vector<64x32xf32>
    %227 = tpu.matmul %226, %148, %cst_116 {dimension_numbers = #tpu.dot_dimension_numbers<[1], [0], [0], [1], [0, 0, 1, 1], [], []>} : vector<64x64xbf16>, vector<64x32xbf16>, vector<64x32xf32> -> vector<64x32xf32>
    %228 = vector.broadcast %150 : vector<1x32xf32> to vector<64x32xf32>
    %229 = arith.addf %227, %228 : vector<64x32xf32>
    %230 = arith.addf %219, %229 : vector<64x32xf32>
    %cst_117 = arith.constant dense<0.000000e+00> : vector<64xf32>
    %231 = vector.multi_reduction <add>, %230, %cst_117 [1] : vector<64x32xf32> to vector<64xf32>
    %232 = vector.shape_cast %231 : vector<64xf32> to vector<64x1xf32>
    %cst_118 = arith.constant 3.200000e+01 : f32
    %233 = vector.broadcast %cst_118 : f32 to vector<64x1xf32>
    %234 = arith.divf %232, %233 : vector<64x1xf32>
    %235 = vector.broadcast %234 : vector<64x1xf32> to vector<64x32xf32>
    %236 = arith.subf %230, %235 : vector<64x32xf32>
    %237 = arith.mulf %236, %236 : vector<64x32xf32>
    %cst_119 = arith.constant dense<0.000000e+00> : vector<64xf32>
    %238 = vector.multi_reduction <add>, %237, %cst_119 [1] : vector<64x32xf32> to vector<64xf32>
    %239 = vector.shape_cast %238 : vector<64xf32> to vector<64x1xf32>
    %cst_120 = arith.constant 3.200000e+01 : f32
    %240 = vector.broadcast %cst_120 : f32 to vector<64x1xf32>
    %241 = arith.divf %239, %240 : vector<64x1xf32>
    %cst_121 = arith.constant 9.99999974E-6 : f32
    %242 = vector.broadcast %cst_121 : f32 to vector<64x1xf32>
    %243 = arith.addf %241, %242 : vector<64x1xf32>
    %244 = math.rsqrt %243 : vector<64x1xf32>
    %245 = vector.broadcast %244 : vector<64x1xf32> to vector<64x32xf32>
    %246 = arith.mulf %236, %245 : vector<64x32xf32>
    %247 = vector.broadcast %152 : vector<1x32xf32> to vector<64x32xf32>
    %248 = arith.mulf %246, %247 : vector<64x32xf32>
    %249 = vector.broadcast %154 : vector<1x32xf32> to vector<64x32xf32>
    %250 = arith.addf %248, %249 : vector<64x32xf32>
    %251 = vector.shape_cast %250 : vector<64x32xf32> to vector<2x32x32xf32>
    %252 = vector.shape_cast %251 : vector<2x32x32xf32> to vector<64x32xf32>
    %253 = arith.truncf %252 : vector<64x32xf32> to vector<64x32xbf16>
    %c0_122 = arith.constant 0 : index
    %c0_123 = arith.constant 0 : index
    %254 = vector.load %arg17[%c0_122, %c0_123] : memref<64x32xbf16, #tpu.memory_space<vmem>>, vector<64x32xbf16>
    tpu.vector_store %arg17[%c0_122, %c0_123], %253 {strides = array<i32>} : memref<64x32xbf16, #tpu.memory_space<vmem>>, vector<64x32xbf16>,
    return
  }
}

module attributes {stable_mosaic.version = 11 : i64} {
  func.func @_stage_kernel(%arg0: memref<64x32xbf16, #tpu.memory_space<vmem>>, %arg1: memref<32x32xbf16, #tpu.memory_space<vmem>>, %arg2: memref<1x32xf32, #tpu.memory_space<vmem>>, %arg3: memref<32x4xbf16, #tpu.memory_space<vmem>>, %arg4: memref<4x32xbf16, #tpu.memory_space<vmem>>, %arg5: memref<2x32x96xbf16, #tpu.memory_space<vmem>>, %arg6: memref<2x1x96xf32, #tpu.memory_space<vmem>>, %arg7: memref<2x32x32xbf16, #tpu.memory_space<vmem>>, %arg8: memref<2x1x32xf32, #tpu.memory_space<vmem>>, %arg9: memref<2x1x32xf32, #tpu.memory_space<vmem>>, %arg10: memref<2x1x32xf32, #tpu.memory_space<vmem>>, %arg11: memref<2x32x64xbf16, #tpu.memory_space<vmem>>, %arg12: memref<2x1x64xf32, #tpu.memory_space<vmem>>, %arg13: memref<2x64x32xbf16, #tpu.memory_space<vmem>>, %arg14: memref<2x1x32xf32, #tpu.memory_space<vmem>>, %arg15: memref<2x1x32xf32, #tpu.memory_space<vmem>>, %arg16: memref<2x1x32xf32, #tpu.memory_space<vmem>>, %arg17: memref<64x32xbf16, #tpu.memory_space<vmem>>) attributes {dimension_semantics = [], scalar_prefetch = 0 : i64, scratch_operands = 0 : i64, tpu.core_type = #tpu.core_type<tc>} {
    %c0 = arith.constant 0 : index
    %c0_0 = arith.constant 0 : index
    %0 = vector.load %arg0[%c0, %c0_0] : memref<64x32xbf16, #tpu.memory_space<vmem>>, vector<64x32xbf16>
    %c0_1 = arith.constant 0 : index
    %c0_2 = arith.constant 0 : index
    %1 = vector.load %arg1[%c0_1, %c0_2] : memref<32x32xbf16, #tpu.memory_space<vmem>>, vector<32x32xbf16>
    %cst = arith.constant dense<0.000000e+00> : vector<64x32xf32>
    %2 = tpu.matmul %0, %1, %cst {dimension_numbers = #tpu.dot_dimension_numbers<[1], [0], [0], [1], [0, 0, 1, 1], [], []>} : vector<64x32xbf16>, vector<32x32xbf16>, vector<64x32xf32> -> vector<64x32xf32>
    %3 = vector.shape_cast %2 : vector<64x32xf32> to vector<2x32x32xf32>
    %c0_3 = arith.constant 0 : index
    %c0_4 = arith.constant 0 : index
    %4 = vector.load %arg2[%c0_3, %c0_4] : memref<1x32xf32, #tpu.memory_space<vmem>>, vector<1x32xf32>
    %5 = vector.shape_cast %4 : vector<1x32xf32> to vector<1x1x32xf32>
    %6 = vector.broadcast %5 : vector<1x1x32xf32> to vector<2x32x32xf32>
    %7 = arith.addf %3, %6 : vector<2x32x32xf32>
    %c0_5 = arith.constant 0 : index
    %c0_6 = arith.constant 0 : index
    %8 = vector.load %arg3[%c0_5, %c0_6] : memref<32x4xbf16, #tpu.memory_space<vmem>>, vector<32x4xbf16>
    %c0_7 = arith.constant 0 : index
    %c0_8 = arith.constant 0 : index
    %9 = vector.load %arg4[%c0_7, %c0_8] : memref<4x32xbf16, #tpu.memory_space<vmem>>, vector<4x32xbf16>
    %c0_9 = arith.constant 0 : index
    %c0_10 = arith.constant 0 : index
    %c0_11 = arith.constant 0 : index
    %10 = vector.load %arg5[%c0_9, %c0_10, %c0_11] : memref<2x32x96xbf16, #tpu.memory_space<vmem>>, vector<1x32x96xbf16>
    %11 = vector.shape_cast %10 : vector<1x32x96xbf16> to vector<32x96xbf16>
    %c0_12 = arith.constant 0 : index
    %c0_13 = arith.constant 0 : index
    %c0_14 = arith.constant 0 : index
    %12 = vector.load %arg6[%c0_12, %c0_13, %c0_14] : memref<2x1x96xf32, #tpu.memory_space<vmem>>, vector<1x1x96xf32>
    %13 = vector.shape_cast %12 : vector<1x1x96xf32> to vector<1x96xf32>
    %c0_15 = arith.constant 0 : index
    %c0_16 = arith.constant 0 : index
    %c0_17 = arith.constant 0 : index
    %14 = vector.load %arg7[%c0_15, %c0_16, %c0_17] : memref<2x32x32xbf16, #tpu.memory_space<vmem>>, vector<1x32x32xbf16>
    %15 = vector.shape_cast %14 : vector<1x32x32xbf16> to vector<32x32xbf16>
    %c0_18 = arith.constant 0 : index
    %c0_19 = arith.constant 0 : index
    %c0_20 = arith.constant 0 : index
    %16 = vector.load %arg8[%c0_18, %c0_19, %c0_20] : memref<2x1x32xf32, #tpu.memory_space<vmem>>, vector<1x1x32xf32>
    %17 = vector.shape_cast %16 : vector<1x1x32xf32> to vector<1x32xf32>
    %c0_21 = arith.constant 0 : index
    %c0_22 = arith.constant 0 : index
    %c0_23 = arith.constant 0 : index
    %18 = vector.load %arg9[%c0_21, %c0_22, %c0_23] : memref<2x1x32xf32, #tpu.memory_space<vmem>>, vector<1x1x32xf32>
    %19 = vector.shape_cast %18 : vector<1x1x32xf32> to vector<1x32xf32>
    %c0_24 = arith.constant 0 : index
    %c0_25 = arith.constant 0 : index
    %c0_26 = arith.constant 0 : index
    %20 = vector.load %arg10[%c0_24, %c0_25, %c0_26] : memref<2x1x32xf32, #tpu.memory_space<vmem>>, vector<1x1x32xf32>
    %21 = vector.shape_cast %20 : vector<1x1x32xf32> to vector<1x32xf32>
    %c0_27 = arith.constant 0 : index
    %c0_28 = arith.constant 0 : index
    %c0_29 = arith.constant 0 : index
    %22 = vector.load %arg11[%c0_27, %c0_28, %c0_29] : memref<2x32x64xbf16, #tpu.memory_space<vmem>>, vector<1x32x64xbf16>
    %23 = vector.shape_cast %22 : vector<1x32x64xbf16> to vector<32x64xbf16>
    %c0_30 = arith.constant 0 : index
    %c0_31 = arith.constant 0 : index
    %c0_32 = arith.constant 0 : index
    %24 = vector.load %arg12[%c0_30, %c0_31, %c0_32] : memref<2x1x64xf32, #tpu.memory_space<vmem>>, vector<1x1x64xf32>
    %25 = vector.shape_cast %24 : vector<1x1x64xf32> to vector<1x64xf32>
    %c0_33 = arith.constant 0 : index
    %c0_34 = arith.constant 0 : index
    %c0_35 = arith.constant 0 : index
    %26 = vector.load %arg13[%c0_33, %c0_34, %c0_35] : memref<2x64x32xbf16, #tpu.memory_space<vmem>>, vector<1x64x32xbf16>
    %27 = vector.shape_cast %26 : vector<1x64x32xbf16> to vector<64x32xbf16>
    %c0_36 = arith.constant 0 : index
    %c0_37 = arith.constant 0 : index
    %c0_38 = arith.constant 0 : index
    %28 = vector.load %arg14[%c0_36, %c0_37, %c0_38] : memref<2x1x32xf32, #tpu.memory_space<vmem>>, vector<1x1x32xf32>
    %29 = vector.shape_cast %28 : vector<1x1x32xf32> to vector<1x32xf32>
    %c0_39 = arith.constant 0 : index
    %c0_40 = arith.constant 0 : index
    %c0_41 = arith.constant 0 : index
    %30 = vector.load %arg15[%c0_39, %c0_40, %c0_41] : memref<2x1x32xf32, #tpu.memory_space<vmem>>, vector<1x1x32xf32>
    %31 = vector.shape_cast %30 : vector<1x1x32xf32> to vector<1x32xf32>
    %c0_42 = arith.constant 0 : index
    %c0_43 = arith.constant 0 : index
    %c0_44 = arith.constant 0 : index
    %32 = vector.load %arg16[%c0_42, %c0_43, %c0_44] : memref<2x1x32xf32, #tpu.memory_space<vmem>>, vector<1x1x32xf32>
    %33 = vector.shape_cast %32 : vector<1x1x32xf32> to vector<1x32xf32>
    %34 = vector.shape_cast %7 : vector<2x32x32xf32> to vector<64x32xf32>
    %35 = arith.truncf %34 : vector<64x32xf32> to vector<64x32xbf16>
    %cst_45 = arith.constant dense<0.000000e+00> : vector<64x96xf32>
    %36 = tpu.matmul %35, %11, %cst_45 {dimension_numbers = #tpu.dot_dimension_numbers<[1], [0], [0], [1], [0, 0, 1, 1], [], []>} : vector<64x32xbf16>, vector<32x96xbf16>, vector<64x96xf32> -> vector<64x96xf32>
    %37 = vector.broadcast %13 : vector<1x96xf32> to vector<64x96xf32>
    %38 = arith.addf %36, %37 : vector<64x96xf32>
    %39 = vector.extract_strided_slice %38 {offsets = [0, 0], sizes = [64, 32], strides = [1, 1]} : vector<64x96xf32> to vector<64x32xf32>
    %40 = vector.shape_cast %39 : vector<64x32xf32> to vector<2x32x32xf32>
    %41 = vector.extract_strided_slice %38 {offsets = [0, 32], sizes = [64, 32], strides = [1, 1]} : vector<64x96xf32> to vector<64x32xf32>
    %42 = vector.shape_cast %41 : vector<64x32xf32> to vector<2x32x32xf32>
    %43 = vector.extract_strided_slice %38 {offsets = [0, 64], sizes = [64, 32], strides = [1, 1]} : vector<64x96xf32> to vector<64x32xf32>
    %44 = vector.shape_cast %43 : vector<64x32xf32> to vector<2x32x32xf32>
    %45 = vector.shape_cast %40 : vector<2x32x32xf32> to vector<2x1x32x32xf32>
    %46 = vector.shape_cast %42 : vector<2x32x32xf32> to vector<1x2x32x32xf32>
    %47 = vector.broadcast %45 : vector<2x1x32x32xf32> to vector<2x2x32x32xf32>
    %48 = vector.broadcast %46 : vector<1x2x32x32xf32> to vector<2x2x32x32xf32>
    %49 = arith.mulf %47, %48 : vector<2x2x32x32xf32>
    %50 = vector.shape_cast %49 : vector<2x2x32x32xf32> to vector<128x32xf32>
    %51 = arith.truncf %50 : vector<128x32xf32> to vector<128x32xbf16>
    %cst_46 = arith.constant dense<0.000000e+00> : vector<128x4xf32>
    %52 = tpu.matmul %51, %8, %cst_46 {dimension_numbers = #tpu.dot_dimension_numbers<[1], [0], [0], [1], [0, 0, 1, 1], [], []>} : vector<128x32xbf16>, vector<32x4xbf16>, vector<128x4xf32> -> vector<128x4xf32>
    %cst_47 = arith.constant 0.353553385 : f32
    %53 = vector.broadcast %cst_47 : f32 to vector<128x4xf32>
    %54 = arith.mulf %53, %52 : vector<128x4xf32>
    %55 = vector.shape_cast %54 : vector<128x4xf32> to vector<2x2x32x4xf32>
    %cst_48 = arith.constant dense<0xFF800000> : vector<2x32x4xf32>
    %56 = vector.multi_reduction <maximumf>, %55, %cst_48 [1] : vector<2x2x32x4xf32> to vector<2x32x4xf32>
    %57 = vector.shape_cast %56 : vector<2x32x4xf32> to vector<2x1x32x4xf32>
    %58 = vector.broadcast %57 : vector<2x1x32x4xf32> to vector<2x2x32x4xf32>
    %59 = arith.subf %55, %58 : vector<2x2x32x4xf32>
    %60 = math.exp %59 : vector<2x2x32x4xf32>
    %cst_49 = arith.constant dense<0.000000e+00> : vector<2x32x4xf32>
    %61 = vector.multi_reduction <add>, %60, %cst_49 [1] : vector<2x2x32x4xf32> to vector<2x32x4xf32>
    %62 = vector.shape_cast %61 : vector<2x32x4xf32> to vector<2x1x32x4xf32>
    %63 = vector.broadcast %62 : vector<2x1x32x4xf32> to vector<2x2x32x4xf32>
    %64 = arith.divf %60, %63 : vector<2x2x32x4xf32>
    %65 = vector.shape_cast %64 : vector<2x2x32x4xf32> to vector<128x4xf32>
    %66 = arith.truncf %65 : vector<128x4xf32> to vector<128x4xbf16>
    %cst_50 = arith.constant dense<0.000000e+00> : vector<128x32xf32>
    %67 = tpu.matmul %66, %9, %cst_50 {dimension_numbers = #tpu.dot_dimension_numbers<[1], [0], [0], [1], [0, 0, 1, 1], [], []>} : vector<128x4xbf16>, vector<4x32xbf16>, vector<128x32xf32> -> vector<128x32xf32>
    %68 = vector.shape_cast %67 : vector<128x32xf32> to vector<2x2x32x32xf32>
    %69 = vector.shape_cast %44 : vector<2x32x32xf32> to vector<1x2x32x32xf32>
    %70 = vector.broadcast %69 : vector<1x2x32x32xf32> to vector<2x2x32x32xf32>
    %71 = arith.mulf %68, %70 : vector<2x2x32x32xf32>
    %cst_51 = arith.constant dense<0.000000e+00> : vector<2x32x32xf32>
    %72 = vector.multi_reduction <add>, %71, %cst_51 [1] : vector<2x2x32x32xf32> to vector<2x32x32xf32>
    %73 = vector.shape_cast %72 : vector<2x32x32xf32> to vector<64x32xf32>
    %74 = arith.truncf %73 : vector<64x32xf32> to vector<64x32xbf16>
    %cst_52 = arith.constant dense<0.000000e+00> : vector<64x32xf32>
    %75 = tpu.matmul %74, %15, %cst_52 {dimension_numbers = #tpu.dot_dimension_numbers<[1], [0], [0], [1], [0, 0, 1, 1], [], []>} : vector<64x32xbf16>, vector<32x32xbf16>, vector<64x32xf32> -> vector<64x32xf32>
    %76 = vector.broadcast %17 : vector<1x32xf32> to vector<64x32xf32>
    %77 = arith.addf %75, %76 : vector<64x32xf32>
    %78 = arith.addf %34, %77 : vector<64x32xf32>
    %cst_53 = arith.constant dense<0.000000e+00> : vector<64xf32>
    %79 = vector.multi_reduction <add>, %78, %cst_53 [1] : vector<64x32xf32> to vector<64xf32>
    %80 = vector.shape_cast %79 : vector<64xf32> to vector<64x1xf32>
    %cst_54 = arith.constant 3.200000e+01 : f32
    %81 = vector.broadcast %cst_54 : f32 to vector<64x1xf32>
    %82 = arith.divf %80, %81 : vector<64x1xf32>
    %83 = vector.broadcast %82 : vector<64x1xf32> to vector<64x32xf32>
    %84 = arith.subf %78, %83 : vector<64x32xf32>
    %85 = arith.mulf %84, %84 : vector<64x32xf32>
    %cst_55 = arith.constant dense<0.000000e+00> : vector<64xf32>
    %86 = vector.multi_reduction <add>, %85, %cst_55 [1] : vector<64x32xf32> to vector<64xf32>
    %87 = vector.shape_cast %86 : vector<64xf32> to vector<64x1xf32>
    %cst_56 = arith.constant 3.200000e+01 : f32
    %88 = vector.broadcast %cst_56 : f32 to vector<64x1xf32>
    %89 = arith.divf %87, %88 : vector<64x1xf32>
    %cst_57 = arith.constant 9.99999974E-6 : f32
    %90 = vector.broadcast %cst_57 : f32 to vector<64x1xf32>
    %91 = arith.addf %89, %90 : vector<64x1xf32>
    %92 = math.rsqrt %91 : vector<64x1xf32>
    %93 = vector.broadcast %92 : vector<64x1xf32> to vector<64x32xf32>
    %94 = arith.mulf %84, %93 : vector<64x32xf32>
    %95 = vector.broadcast %19 : vector<1x32xf32> to vector<64x32xf32>
    %96 = arith.mulf %94, %95 : vector<64x32xf32>
    %97 = vector.broadcast %21 : vector<1x32xf32> to vector<64x32xf32>
    %98 = arith.addf %96, %97 : vector<64x32xf32>
    %99 = arith.truncf %98 : vector<64x32xf32> to vector<64x32xbf16>
    %cst_58 = arith.constant dense<0.000000e+00> : vector<64x64xf32>
    %100 = tpu.matmul %99, %23, %cst_58 {dimension_numbers = #tpu.dot_dimension_numbers<[1], [0], [0], [1], [0, 0, 1, 1], [], []>} : vector<64x32xbf16>, vector<32x64xbf16>, vector<64x64xf32> -> vector<64x64xf32>
    %101 = vector.broadcast %25 : vector<1x64xf32> to vector<64x64xf32>
    %102 = arith.addf %100, %101 : vector<64x64xf32>
    %cst_59 = arith.constant 0.000000e+00 : f32
    %103 = vector.broadcast %cst_59 : f32 to vector<64x64xf32>
    %104 = arith.maximumf %102, %103 : vector<64x64xf32>
    %105 = arith.truncf %104 : vector<64x64xf32> to vector<64x64xbf16>
    %cst_60 = arith.constant dense<0.000000e+00> : vector<64x32xf32>
    %106 = tpu.matmul %105, %27, %cst_60 {dimension_numbers = #tpu.dot_dimension_numbers<[1], [0], [0], [1], [0, 0, 1, 1], [], []>} : vector<64x64xbf16>, vector<64x32xbf16>, vector<64x32xf32> -> vector<64x32xf32>
    %107 = vector.broadcast %29 : vector<1x32xf32> to vector<64x32xf32>
    %108 = arith.addf %106, %107 : vector<64x32xf32>
    %109 = arith.addf %98, %108 : vector<64x32xf32>
    %cst_61 = arith.constant dense<0.000000e+00> : vector<64xf32>
    %110 = vector.multi_reduction <add>, %109, %cst_61 [1] : vector<64x32xf32> to vector<64xf32>
    %111 = vector.shape_cast %110 : vector<64xf32> to vector<64x1xf32>
    %cst_62 = arith.constant 3.200000e+01 : f32
    %112 = vector.broadcast %cst_62 : f32 to vector<64x1xf32>
    %113 = arith.divf %111, %112 : vector<64x1xf32>
    %114 = vector.broadcast %113 : vector<64x1xf32> to vector<64x32xf32>
    %115 = arith.subf %109, %114 : vector<64x32xf32>
    %116 = arith.mulf %115, %115 : vector<64x32xf32>
    %cst_63 = arith.constant dense<0.000000e+00> : vector<64xf32>
    %117 = vector.multi_reduction <add>, %116, %cst_63 [1] : vector<64x32xf32> to vector<64xf32>
    %118 = vector.shape_cast %117 : vector<64xf32> to vector<64x1xf32>
    %cst_64 = arith.constant 3.200000e+01 : f32
    %119 = vector.broadcast %cst_64 : f32 to vector<64x1xf32>
    %120 = arith.divf %118, %119 : vector<64x1xf32>
    %cst_65 = arith.constant 9.99999974E-6 : f32
    %121 = vector.broadcast %cst_65 : f32 to vector<64x1xf32>
    %122 = arith.addf %120, %121 : vector<64x1xf32>
    %123 = math.rsqrt %122 : vector<64x1xf32>
    %124 = vector.broadcast %123 : vector<64x1xf32> to vector<64x32xf32>
    %125 = arith.mulf %115, %124 : vector<64x32xf32>
    %126 = vector.broadcast %31 : vector<1x32xf32> to vector<64x32xf32>
    %127 = arith.mulf %125, %126 : vector<64x32xf32>
    %128 = vector.broadcast %33 : vector<1x32xf32> to vector<64x32xf32>
    %129 = arith.addf %127, %128 : vector<64x32xf32>
    %130 = vector.shape_cast %129 : vector<64x32xf32> to vector<2x32x32xf32>
    %c1 = arith.constant 1 : index
    %c0_66 = arith.constant 0 : index
    %c0_67 = arith.constant 0 : index
    %131 = vector.load %arg5[%c1, %c0_66, %c0_67] : memref<2x32x96xbf16, #tpu.memory_space<vmem>>, vector<1x32x96xbf16>
    %132 = vector.shape_cast %131 : vector<1x32x96xbf16> to vector<32x96xbf16>
    %c1_68 = arith.constant 1 : index
    %c0_69 = arith.constant 0 : index
    %c0_70 = arith.constant 0 : index
    %133 = vector.load %arg6[%c1_68, %c0_69, %c0_70] : memref<2x1x96xf32, #tpu.memory_space<vmem>>, vector<1x1x96xf32>
    %134 = vector.shape_cast %133 : vector<1x1x96xf32> to vector<1x96xf32>
    %c1_71 = arith.constant 1 : index
    %c0_72 = arith.constant 0 : index
    %c0_73 = arith.constant 0 : index
    %135 = vector.load %arg7[%c1_71, %c0_72, %c0_73] : memref<2x32x32xbf16, #tpu.memory_space<vmem>>, vector<1x32x32xbf16>
    %136 = vector.shape_cast %135 : vector<1x32x32xbf16> to vector<32x32xbf16>
    %c1_74 = arith.constant 1 : index
    %c0_75 = arith.constant 0 : index
    %c0_76 = arith.constant 0 : index
    %137 = vector.load %arg8[%c1_74, %c0_75, %c0_76] : memref<2x1x32xf32, #tpu.memory_space<vmem>>, vector<1x1x32xf32>
    %138 = vector.shape_cast %137 : vector<1x1x32xf32> to vector<1x32xf32>
    %c1_77 = arith.constant 1 : index
    %c0_78 = arith.constant 0 : index
    %c0_79 = arith.constant 0 : index
    %139 = vector.load %arg9[%c1_77, %c0_78, %c0_79] : memref<2x1x32xf32, #tpu.memory_space<vmem>>, vector<1x1x32xf32>
    %140 = vector.shape_cast %139 : vector<1x1x32xf32> to vector<1x32xf32>
    %c1_80 = arith.constant 1 : index
    %c0_81 = arith.constant 0 : index
    %c0_82 = arith.constant 0 : index
    %141 = vector.load %arg10[%c1_80, %c0_81, %c0_82] : memref<2x1x32xf32, #tpu.memory_space<vmem>>, vector<1x1x32xf32>
    %142 = vector.shape_cast %141 : vector<1x1x32xf32> to vector<1x32xf32>
    %c1_83 = arith.constant 1 : index
    %c0_84 = arith.constant 0 : index
    %c0_85 = arith.constant 0 : index
    %143 = vector.load %arg11[%c1_83, %c0_84, %c0_85] : memref<2x32x64xbf16, #tpu.memory_space<vmem>>, vector<1x32x64xbf16>
    %144 = vector.shape_cast %143 : vector<1x32x64xbf16> to vector<32x64xbf16>
    %c1_86 = arith.constant 1 : index
    %c0_87 = arith.constant 0 : index
    %c0_88 = arith.constant 0 : index
    %145 = vector.load %arg12[%c1_86, %c0_87, %c0_88] : memref<2x1x64xf32, #tpu.memory_space<vmem>>, vector<1x1x64xf32>
    %146 = vector.shape_cast %145 : vector<1x1x64xf32> to vector<1x64xf32>
    %c1_89 = arith.constant 1 : index
    %c0_90 = arith.constant 0 : index
    %c0_91 = arith.constant 0 : index
    %147 = vector.load %arg13[%c1_89, %c0_90, %c0_91] : memref<2x64x32xbf16, #tpu.memory_space<vmem>>, vector<1x64x32xbf16>
    %148 = vector.shape_cast %147 : vector<1x64x32xbf16> to vector<64x32xbf16>
    %c1_92 = arith.constant 1 : index
    %c0_93 = arith.constant 0 : index
    %c0_94 = arith.constant 0 : index
    %149 = vector.load %arg14[%c1_92, %c0_93, %c0_94] : memref<2x1x32xf32, #tpu.memory_space<vmem>>, vector<1x1x32xf32>
    %150 = vector.shape_cast %149 : vector<1x1x32xf32> to vector<1x32xf32>
    %c1_95 = arith.constant 1 : index
    %c0_96 = arith.constant 0 : index
    %c0_97 = arith.constant 0 : index
    %151 = vector.load %arg15[%c1_95, %c0_96, %c0_97] : memref<2x1x32xf32, #tpu.memory_space<vmem>>, vector<1x1x32xf32>
    %152 = vector.shape_cast %151 : vector<1x1x32xf32> to vector<1x32xf32>
    %c1_98 = arith.constant 1 : index
    %c0_99 = arith.constant 0 : index
    %c0_100 = arith.constant 0 : index
    %153 = vector.load %arg16[%c1_98, %c0_99, %c0_100] : memref<2x1x32xf32, #tpu.memory_space<vmem>>, vector<1x1x32xf32>
    %154 = vector.shape_cast %153 : vector<1x1x32xf32> to vector<1x32xf32>
    %155 = vector.shape_cast %130 : vector<2x32x32xf32> to vector<64x32xf32>
    %156 = arith.truncf %155 : vector<64x32xf32> to vector<64x32xbf16>
    %cst_101 = arith.constant dense<0.000000e+00> : vector<64x96xf32>
    %157 = tpu.matmul %156, %132, %cst_101 {dimension_numbers = #tpu.dot_dimension_numbers<[1], [0], [0], [1], [0, 0, 1, 1], [], []>} : vector<64x32xbf16>, vector<32x96xbf16>, vector<64x96xf32> -> vector<64x96xf32>
    %158 = vector.broadcast %134 : vector<1x96xf32> to vector<64x96xf32>
    %159 = arith.addf %157, %158 : vector<64x96xf32>
    %160 = vector.extract_strided_slice %159 {offsets = [0, 0], sizes = [64, 32], strides = [1, 1]} : vector<64x96xf32> to vector<64x32xf32>
    %161 = vector.shape_cast %160 : vector<64x32xf32> to vector<2x32x32xf32>
    %162 = vector.extract_strided_slice %159 {offsets = [0, 32], sizes = [64, 32], strides = [1, 1]} : vector<64x96xf32> to vector<64x32xf32>
    %163 = vector.shape_cast %162 : vector<64x32xf32> to vector<2x32x32xf32>
    %164 = vector.extract_strided_slice %159 {offsets = [0, 64], sizes = [64, 32], strides = [1, 1]} : vector<64x96xf32> to vector<64x32xf32>
    %165 = vector.shape_cast %164 : vector<64x32xf32> to vector<2x32x32xf32>
    %166 = vector.shape_cast %161 : vector<2x32x32xf32> to vector<2x1x32x32xf32>
    %167 = vector.shape_cast %163 : vector<2x32x32xf32> to vector<1x2x32x32xf32>
    %168 = vector.broadcast %166 : vector<2x1x32x32xf32> to vector<2x2x32x32xf32>
    %169 = vector.broadcast %167 : vector<1x2x32x32xf32> to vector<2x2x32x32xf32>
    %170 = arith.mulf %168, %169 : vector<2x2x32x32xf32>
    %171 = vector.shape_cast %170 : vector<2x2x32x32xf32> to vector<128x32xf32>
    %172 = arith.truncf %171 : vector<128x32xf32> to vector<128x32xbf16>
    %cst_102 = arith.constant dense<0.000000e+00> : vector<128x4xf32>
    %173 = tpu.matmul %172, %8, %cst_102 {dimension_numbers = #tpu.dot_dimension_numbers<[1], [0], [0], [1], [0, 0, 1, 1], [], []>} : vector<128x32xbf16>, vector<32x4xbf16>, vector<128x4xf32> -> vector<128x4xf32>
    %cst_103 = arith.constant 0.353553385 : f32
    %174 = vector.broadcast %cst_103 : f32 to vector<128x4xf32>
    %175 = arith.mulf %174, %173 : vector<128x4xf32>
    %176 = vector.shape_cast %175 : vector<128x4xf32> to vector<2x2x32x4xf32>
    %cst_104 = arith.constant dense<0xFF800000> : vector<2x32x4xf32>
    %177 = vector.multi_reduction <maximumf>, %176, %cst_104 [1] : vector<2x2x32x4xf32> to vector<2x32x4xf32>
    %178 = vector.shape_cast %177 : vector<2x32x4xf32> to vector<2x1x32x4xf32>
    %179 = vector.broadcast %178 : vector<2x1x32x4xf32> to vector<2x2x32x4xf32>
    %180 = arith.subf %176, %179 : vector<2x2x32x4xf32>
    %181 = math.exp %180 : vector<2x2x32x4xf32>
    %cst_105 = arith.constant dense<0.000000e+00> : vector<2x32x4xf32>
    %182 = vector.multi_reduction <add>, %181, %cst_105 [1] : vector<2x2x32x4xf32> to vector<2x32x4xf32>
    %183 = vector.shape_cast %182 : vector<2x32x4xf32> to vector<2x1x32x4xf32>
    %184 = vector.broadcast %183 : vector<2x1x32x4xf32> to vector<2x2x32x4xf32>
    %185 = arith.divf %181, %184 : vector<2x2x32x4xf32>
    %186 = vector.shape_cast %185 : vector<2x2x32x4xf32> to vector<128x4xf32>
    %187 = arith.truncf %186 : vector<128x4xf32> to vector<128x4xbf16>
    %cst_106 = arith.constant dense<0.000000e+00> : vector<128x32xf32>
    %188 = tpu.matmul %187, %9, %cst_106 {dimension_numbers = #tpu.dot_dimension_numbers<[1], [0], [0], [1], [0, 0, 1, 1], [], []>} : vector<128x4xbf16>, vector<4x32xbf16>, vector<128x32xf32> -> vector<128x32xf32>
    %189 = vector.shape_cast %188 : vector<128x32xf32> to vector<2x2x32x32xf32>
    %190 = vector.shape_cast %165 : vector<2x32x32xf32> to vector<1x2x32x32xf32>
    %191 = vector.broadcast %190 : vector<1x2x32x32xf32> to vector<2x2x32x32xf32>
    %192 = arith.mulf %189, %191 : vector<2x2x32x32xf32>
    %cst_107 = arith.constant dense<0.000000e+00> : vector<2x32x32xf32>
    %193 = vector.multi_reduction <add>, %192, %cst_107 [1] : vector<2x2x32x32xf32> to vector<2x32x32xf32>
    %194 = vector.shape_cast %193 : vector<2x32x32xf32> to vector<64x32xf32>
    %195 = arith.truncf %194 : vector<64x32xf32> to vector<64x32xbf16>
    %cst_108 = arith.constant dense<0.000000e+00> : vector<64x32xf32>
    %196 = tpu.matmul %195, %136, %cst_108 {dimension_numbers = #tpu.dot_dimension_numbers<[1], [0], [0], [1], [0, 0, 1, 1], [], []>} : vector<64x32xbf16>, vector<32x32xbf16>, vector<64x32xf32> -> vector<64x32xf32>
    %197 = vector.broadcast %138 : vector<1x32xf32> to vector<64x32xf32>
    %198 = arith.addf %196, %197 : vector<64x32xf32>
    %199 = arith.addf %155, %198 : vector<64x32xf32>
    %cst_109 = arith.constant dense<0.000000e+00> : vector<64xf32>
    %200 = vector.multi_reduction <add>, %199, %cst_109 [1] : vector<64x32xf32> to vector<64xf32>
    %201 = vector.shape_cast %200 : vector<64xf32> to vector<64x1xf32>
    %cst_110 = arith.constant 3.200000e+01 : f32
    %202 = vector.broadcast %cst_110 : f32 to vector<64x1xf32>
    %203 = arith.divf %201, %202 : vector<64x1xf32>
    %204 = vector.broadcast %203 : vector<64x1xf32> to vector<64x32xf32>
    %205 = arith.subf %199, %204 : vector<64x32xf32>
    %206 = arith.mulf %205, %205 : vector<64x32xf32>
    %cst_111 = arith.constant dense<0.000000e+00> : vector<64xf32>
    %207 = vector.multi_reduction <add>, %206, %cst_111 [1] : vector<64x32xf32> to vector<64xf32>
    %208 = vector.shape_cast %207 : vector<64xf32> to vector<64x1xf32>
    %cst_112 = arith.constant 3.200000e+01 : f32
    %209 = vector.broadcast %cst_112 : f32 to vector<64x1xf32>
    %210 = arith.divf %208, %209 : vector<64x1xf32>
    %cst_113 = arith.constant 9.99999974E-6 : f32
    %211 = vector.broadcast %cst_113 : f32 to vector<64x1xf32>
    %212 = arith.addf %210, %211 : vector<64x1xf32>
    %213 = math.rsqrt %212 : vector<64x1xf32>
    %214 = vector.broadcast %213 : vector<64x1xf32> to vector<64x32xf32>
    %215 = arith.mulf %205, %214 : vector<64x32xf32>
    %216 = vector.broadcast %140 : vector<1x32xf32> to vector<64x32xf32>
    %217 = arith.mulf %215, %216 : vector<64x32xf32>
    %218 = vector.broadcast %142 : vector<1x32xf32> to vector<64x32xf32>
    %219 = arith.addf %217, %218 : vector<64x32xf32>
    %220 = arith.truncf %219 : vector<64x32xf32> to vector<64x32xbf16>
    %cst_114 = arith.constant dense<0.000000e+00> : vector<64x64xf32>
    %221 = tpu.matmul %220, %144, %cst_114 {dimension_numbers = #tpu.dot_dimension_numbers<[1], [0], [0], [1], [0, 0, 1, 1], [], []>} : vector<64x32xbf16>, vector<32x64xbf16>, vector<64x64xf32> -> vector<64x64xf32>
    %222 = vector.broadcast %146 : vector<1x64xf32> to vector<64x64xf32>
    %223 = arith.addf %221, %222 : vector<64x64xf32>
    %cst_115 = arith.constant 0.000000e+00 : f32
    %224 = vector.broadcast %cst_115 : f32 to vector<64x64xf32>
    %225 = arith.maximumf %223, %224 : vector<64x64xf32>
    %226 = arith.truncf %225 : vector<64x64xf32> to vector<64x64xbf16>
    %cst_116 = arith.constant dense<0.000000e+00> : vector<64x32xf32>
    %227 = tpu.matmul %226, %148, %cst_116 {dimension_numbers = #tpu.dot_dimension_numbers<[1], [0], [0], [1], [0, 0, 1, 1], [], []>} : vector<64x64xbf16>, vector<64x32xbf16>, vector<64x32xf32> -> vector<64x32xf32>
    %228 = vector.broadcast %150 : vector<1x32xf32> to vector<64x32xf32>
    %229 = arith.addf %227, %228 : vector<64x32xf32>
    %230 = arith.addf %219, %229 : vector<64x32xf32>
    %cst_117 = arith.constant dense<0.000000e+00> : vector<64xf32>
    %231 = vector.multi_reduction <add>, %230, %cst_117 [1] : vector<64x32xf32> to vector<64xf32>
    %232 = vector.shape_cast %231 : vector<64xf32> to vector<64x1xf32>
    %cst_118 = arith.constant 3.200000e+01 : f32
    %233 = vector.broadcast %cst_118 : f32 to vector<64x1xf32>
    %234 = arith.divf %232, %233 : vector<64x1xf32>
    %235 = vector.broadcast %234 : vector<64x1xf32> to vector<64x32xf32>
    %236 = arith.subf %230, %235 : vector<64x32xf32>
    %237 = arith.mulf %236, %236 : vector<64x32xf32>
    %cst_119 = arith.constant dense<0.000000e+00> : vector<64xf32>
    %238 = vector.multi_reduction <add>, %237, %cst_119 [1] : vector<64x32xf32> to vector<64xf32>
    %239 = vector.shape_cast %238 : vector<64xf32> to vector<64x1xf32>
    %cst_120 = arith.constant 3.200000e+01 : f32
    %240 = vector.broadcast %cst_120 : f32 to vector<64x1xf32>
    %241 = arith.divf %239, %240 : vector<64x1xf32>
    %cst_121 = arith.constant 9.99999974E-6 : f32
    %242 = vector.broadcast %cst_121 : f32 to vector<64x1xf32>
    %243 = arith.addf %241, %242 : vector<64x1xf32>
    %244 = math.rsqrt %243 : vector<64x1xf32>
    %245 = vector.broadcast %244 : vector<64x1xf32> to vector<64x32xf32>
    %246 = arith.mulf %236, %245 : vector<64x32xf32>
    %247 = vector.broadcast %152 : vector<1x32xf32> to vector<64x32xf32>
    %248 = arith.mulf %246, %247 : vector<64x32xf32>
    %249 = vector.broadcast %154 : vector<1x32xf32> to vector<64x32xf32>
    %250 = arith.addf %248, %249 : vector<64x32xf32>
    %251 = vector.shape_cast %250 : vector<64x32xf32> to vector<2x32x32xf32>
    %252 = vector.shape_cast %251 : vector<2x32x32xf32> to vector<64x32xf32>
    %253 = arith.truncf %252 : vector<64x32xf32> to vector<64x32xbf16>
    %c0_122 = arith.constant 0 : index
    %c0_123 = arith.constant 0 : index
    %254 = vector.load %arg17[%c0_122, %c0_123] : memref<64x32xbf16, #tpu.memory_space<vmem>>, vector<64x32xbf16>
    tpu.vector_store %arg17[%c0_122, %c0_123], %253 {strides = array<i32>} : memref<64x32xbf16, #tpu.memory_space<vmem>>, vector<64x32xbf16>,
    return
  }
}

module attributes {stable_mosaic.version = 11 : i64} {
  func.func @_stage_kernel(%arg0: memref<16x128xbf16, #tpu.memory_space<vmem>>, %arg1: memref<128x32xbf16, #tpu.memory_space<vmem>>, %arg2: memref<8x32xf32, #tpu.memory_space<vmem>>, %arg3: memref<32x4xbf16, #tpu.memory_space<vmem>>, %arg4: memref<4x32xbf16, #tpu.memory_space<vmem>>, %arg5: memref<2x32x96xbf16, #tpu.memory_space<vmem>>, %arg6: memref<2x1x96xf32, #tpu.memory_space<vmem>>, %arg7: memref<2x32x32xbf16, #tpu.memory_space<vmem>>, %arg8: memref<2x1x32xf32, #tpu.memory_space<vmem>>, %arg9: memref<2x1x32xf32, #tpu.memory_space<vmem>>, %arg10: memref<2x1x32xf32, #tpu.memory_space<vmem>>, %arg11: memref<2x32x64xbf16, #tpu.memory_space<vmem>>, %arg12: memref<2x1x64xf32, #tpu.memory_space<vmem>>, %arg13: memref<2x64x32xbf16, #tpu.memory_space<vmem>>, %arg14: memref<2x1x32xf32, #tpu.memory_space<vmem>>, %arg15: memref<2x1x32xf32, #tpu.memory_space<vmem>>, %arg16: memref<2x1x32xf32, #tpu.memory_space<vmem>>, %arg17: memref<32x32xbf16, #tpu.memory_space<vmem>>, %arg18: memref<1x32xf32, #tpu.memory_space<vmem>>, %arg19: memref<1x32xf32, #tpu.memory_space<vmem>>, %arg20: memref<1x1xf32, #tpu.memory_space<vmem>>, %arg21: memref<16x1xf32, #tpu.memory_space<vmem>>) attributes {dimension_semantics = [], scalar_prefetch = 0 : i64, scratch_operands = 0 : i64, tpu.core_type = #tpu.core_type<tc>} {
    %c0 = arith.constant 0 : index
    %c0_0 = arith.constant 0 : index
    %0 = vector.load %arg0[%c0, %c0_0] : memref<16x128xbf16, #tpu.memory_space<vmem>>, vector<16x128xbf16>
    %c0_1 = arith.constant 0 : index
    %c0_2 = arith.constant 0 : index
    %1 = vector.load %arg1[%c0_1, %c0_2] : memref<128x32xbf16, #tpu.memory_space<vmem>>, vector<128x32xbf16>
    %cst = arith.constant dense<0.000000e+00> : vector<16x32xf32>
    %2 = tpu.matmul %0, %1, %cst {dimension_numbers = #tpu.dot_dimension_numbers<[1], [0], [0], [1], [0, 0, 1, 1], [], []>} : vector<16x128xbf16>, vector<128x32xbf16>, vector<16x32xf32> -> vector<16x32xf32>
    %3 = vector.shape_cast %2 : vector<16x32xf32> to vector<2x8x32xf32>
    %c0_3 = arith.constant 0 : index
    %c0_4 = arith.constant 0 : index
    %4 = vector.load %arg2[%c0_3, %c0_4] : memref<8x32xf32, #tpu.memory_space<vmem>>, vector<8x32xf32>
    %5 = vector.shape_cast %4 : vector<8x32xf32> to vector<1x8x32xf32>
    %6 = vector.broadcast %5 : vector<1x8x32xf32> to vector<2x8x32xf32>
    %7 = arith.addf %3, %6 : vector<2x8x32xf32>
    %c0_5 = arith.constant 0 : index
    %c0_6 = arith.constant 0 : index
    %8 = vector.load %arg3[%c0_5, %c0_6] : memref<32x4xbf16, #tpu.memory_space<vmem>>, vector<32x4xbf16>
    %c0_7 = arith.constant 0 : index
    %c0_8 = arith.constant 0 : index
    %9 = vector.load %arg4[%c0_7, %c0_8] : memref<4x32xbf16, #tpu.memory_space<vmem>>, vector<4x32xbf16>
    %c0_9 = arith.constant 0 : index
    %c0_10 = arith.constant 0 : index
    %c0_11 = arith.constant 0 : index
    %10 = vector.load %arg5[%c0_9, %c0_10, %c0_11] : memref<2x32x96xbf16, #tpu.memory_space<vmem>>, vector<1x32x96xbf16>
    %11 = vector.shape_cast %10 : vector<1x32x96xbf16> to vector<32x96xbf16>
    %c0_12 = arith.constant 0 : index
    %c0_13 = arith.constant 0 : index
    %c0_14 = arith.constant 0 : index
    %12 = vector.load %arg6[%c0_12, %c0_13, %c0_14] : memref<2x1x96xf32, #tpu.memory_space<vmem>>, vector<1x1x96xf32>
    %13 = vector.shape_cast %12 : vector<1x1x96xf32> to vector<1x96xf32>
    %c0_15 = arith.constant 0 : index
    %c0_16 = arith.constant 0 : index
    %c0_17 = arith.constant 0 : index
    %14 = vector.load %arg7[%c0_15, %c0_16, %c0_17] : memref<2x32x32xbf16, #tpu.memory_space<vmem>>, vector<1x32x32xbf16>
    %15 = vector.shape_cast %14 : vector<1x32x32xbf16> to vector<32x32xbf16>
    %c0_18 = arith.constant 0 : index
    %c0_19 = arith.constant 0 : index
    %c0_20 = arith.constant 0 : index
    %16 = vector.load %arg8[%c0_18, %c0_19, %c0_20] : memref<2x1x32xf32, #tpu.memory_space<vmem>>, vector<1x1x32xf32>
    %17 = vector.shape_cast %16 : vector<1x1x32xf32> to vector<1x32xf32>
    %c0_21 = arith.constant 0 : index
    %c0_22 = arith.constant 0 : index
    %c0_23 = arith.constant 0 : index
    %18 = vector.load %arg9[%c0_21, %c0_22, %c0_23] : memref<2x1x32xf32, #tpu.memory_space<vmem>>, vector<1x1x32xf32>
    %19 = vector.shape_cast %18 : vector<1x1x32xf32> to vector<1x32xf32>
    %c0_24 = arith.constant 0 : index
    %c0_25 = arith.constant 0 : index
    %c0_26 = arith.constant 0 : index
    %20 = vector.load %arg10[%c0_24, %c0_25, %c0_26] : memref<2x1x32xf32, #tpu.memory_space<vmem>>, vector<1x1x32xf32>
    %21 = vector.shape_cast %20 : vector<1x1x32xf32> to vector<1x32xf32>
    %c0_27 = arith.constant 0 : index
    %c0_28 = arith.constant 0 : index
    %c0_29 = arith.constant 0 : index
    %22 = vector.load %arg11[%c0_27, %c0_28, %c0_29] : memref<2x32x64xbf16, #tpu.memory_space<vmem>>, vector<1x32x64xbf16>
    %23 = vector.shape_cast %22 : vector<1x32x64xbf16> to vector<32x64xbf16>
    %c0_30 = arith.constant 0 : index
    %c0_31 = arith.constant 0 : index
    %c0_32 = arith.constant 0 : index
    %24 = vector.load %arg12[%c0_30, %c0_31, %c0_32] : memref<2x1x64xf32, #tpu.memory_space<vmem>>, vector<1x1x64xf32>
    %25 = vector.shape_cast %24 : vector<1x1x64xf32> to vector<1x64xf32>
    %c0_33 = arith.constant 0 : index
    %c0_34 = arith.constant 0 : index
    %c0_35 = arith.constant 0 : index
    %26 = vector.load %arg13[%c0_33, %c0_34, %c0_35] : memref<2x64x32xbf16, #tpu.memory_space<vmem>>, vector<1x64x32xbf16>
    %27 = vector.shape_cast %26 : vector<1x64x32xbf16> to vector<64x32xbf16>
    %c0_36 = arith.constant 0 : index
    %c0_37 = arith.constant 0 : index
    %c0_38 = arith.constant 0 : index
    %28 = vector.load %arg14[%c0_36, %c0_37, %c0_38] : memref<2x1x32xf32, #tpu.memory_space<vmem>>, vector<1x1x32xf32>
    %29 = vector.shape_cast %28 : vector<1x1x32xf32> to vector<1x32xf32>
    %c0_39 = arith.constant 0 : index
    %c0_40 = arith.constant 0 : index
    %c0_41 = arith.constant 0 : index
    %30 = vector.load %arg15[%c0_39, %c0_40, %c0_41] : memref<2x1x32xf32, #tpu.memory_space<vmem>>, vector<1x1x32xf32>
    %31 = vector.shape_cast %30 : vector<1x1x32xf32> to vector<1x32xf32>
    %c0_42 = arith.constant 0 : index
    %c0_43 = arith.constant 0 : index
    %c0_44 = arith.constant 0 : index
    %32 = vector.load %arg16[%c0_42, %c0_43, %c0_44] : memref<2x1x32xf32, #tpu.memory_space<vmem>>, vector<1x1x32xf32>
    %33 = vector.shape_cast %32 : vector<1x1x32xf32> to vector<1x32xf32>
    %34 = vector.shape_cast %7 : vector<2x8x32xf32> to vector<16x32xf32>
    %35 = arith.truncf %34 : vector<16x32xf32> to vector<16x32xbf16>
    %cst_45 = arith.constant dense<0.000000e+00> : vector<16x96xf32>
    %36 = tpu.matmul %35, %11, %cst_45 {dimension_numbers = #tpu.dot_dimension_numbers<[1], [0], [0], [1], [0, 0, 1, 1], [], []>} : vector<16x32xbf16>, vector<32x96xbf16>, vector<16x96xf32> -> vector<16x96xf32>
    %37 = vector.broadcast %13 : vector<1x96xf32> to vector<16x96xf32>
    %38 = arith.addf %36, %37 : vector<16x96xf32>
    %39 = vector.extract_strided_slice %38 {offsets = [0, 0], sizes = [16, 32], strides = [1, 1]} : vector<16x96xf32> to vector<16x32xf32>
    %40 = vector.shape_cast %39 : vector<16x32xf32> to vector<2x8x32xf32>
    %41 = vector.extract_strided_slice %38 {offsets = [0, 32], sizes = [16, 32], strides = [1, 1]} : vector<16x96xf32> to vector<16x32xf32>
    %42 = vector.shape_cast %41 : vector<16x32xf32> to vector<2x8x32xf32>
    %43 = vector.extract_strided_slice %38 {offsets = [0, 64], sizes = [16, 32], strides = [1, 1]} : vector<16x96xf32> to vector<16x32xf32>
    %44 = vector.shape_cast %43 : vector<16x32xf32> to vector<2x8x32xf32>
    %45 = vector.shape_cast %40 : vector<2x8x32xf32> to vector<2x1x8x32xf32>
    %46 = vector.shape_cast %42 : vector<2x8x32xf32> to vector<1x2x8x32xf32>
    %47 = vector.broadcast %45 : vector<2x1x8x32xf32> to vector<2x2x8x32xf32>
    %48 = vector.broadcast %46 : vector<1x2x8x32xf32> to vector<2x2x8x32xf32>
    %49 = arith.mulf %47, %48 : vector<2x2x8x32xf32>
    %50 = vector.shape_cast %49 : vector<2x2x8x32xf32> to vector<32x32xf32>
    %51 = arith.truncf %50 : vector<32x32xf32> to vector<32x32xbf16>
    %cst_46 = arith.constant dense<0.000000e+00> : vector<32x4xf32>
    %52 = tpu.matmul %51, %8, %cst_46 {dimension_numbers = #tpu.dot_dimension_numbers<[1], [0], [0], [1], [0, 0, 1, 1], [], []>} : vector<32x32xbf16>, vector<32x4xbf16>, vector<32x4xf32> -> vector<32x4xf32>
    %cst_47 = arith.constant 0.353553385 : f32
    %53 = vector.broadcast %cst_47 : f32 to vector<32x4xf32>
    %54 = arith.mulf %53, %52 : vector<32x4xf32>
    %55 = vector.shape_cast %54 : vector<32x4xf32> to vector<2x2x8x4xf32>
    %cst_48 = arith.constant dense<0xFF800000> : vector<2x8x4xf32>
    %56 = vector.multi_reduction <maximumf>, %55, %cst_48 [1] : vector<2x2x8x4xf32> to vector<2x8x4xf32>
    %57 = vector.shape_cast %56 : vector<2x8x4xf32> to vector<2x1x8x4xf32>
    %58 = vector.broadcast %57 : vector<2x1x8x4xf32> to vector<2x2x8x4xf32>
    %59 = arith.subf %55, %58 : vector<2x2x8x4xf32>
    %60 = math.exp %59 : vector<2x2x8x4xf32>
    %cst_49 = arith.constant dense<0.000000e+00> : vector<2x8x4xf32>
    %61 = vector.multi_reduction <add>, %60, %cst_49 [1] : vector<2x2x8x4xf32> to vector<2x8x4xf32>
    %62 = vector.shape_cast %61 : vector<2x8x4xf32> to vector<2x1x8x4xf32>
    %63 = vector.broadcast %62 : vector<2x1x8x4xf32> to vector<2x2x8x4xf32>
    %64 = arith.divf %60, %63 : vector<2x2x8x4xf32>
    %65 = vector.shape_cast %64 : vector<2x2x8x4xf32> to vector<32x4xf32>
    %66 = arith.truncf %65 : vector<32x4xf32> to vector<32x4xbf16>
    %cst_50 = arith.constant dense<0.000000e+00> : vector<32x32xf32>
    %67 = tpu.matmul %66, %9, %cst_50 {dimension_numbers = #tpu.dot_dimension_numbers<[1], [0], [0], [1], [0, 0, 1, 1], [], []>} : vector<32x4xbf16>, vector<4x32xbf16>, vector<32x32xf32> -> vector<32x32xf32>
    %68 = vector.shape_cast %67 : vector<32x32xf32> to vector<2x2x8x32xf32>
    %69 = vector.shape_cast %44 : vector<2x8x32xf32> to vector<1x2x8x32xf32>
    %70 = vector.broadcast %69 : vector<1x2x8x32xf32> to vector<2x2x8x32xf32>
    %71 = arith.mulf %68, %70 : vector<2x2x8x32xf32>
    %cst_51 = arith.constant dense<0.000000e+00> : vector<2x8x32xf32>
    %72 = vector.multi_reduction <add>, %71, %cst_51 [1] : vector<2x2x8x32xf32> to vector<2x8x32xf32>
    %73 = vector.shape_cast %72 : vector<2x8x32xf32> to vector<16x32xf32>
    %74 = arith.truncf %73 : vector<16x32xf32> to vector<16x32xbf16>
    %cst_52 = arith.constant dense<0.000000e+00> : vector<16x32xf32>
    %75 = tpu.matmul %74, %15, %cst_52 {dimension_numbers = #tpu.dot_dimension_numbers<[1], [0], [0], [1], [0, 0, 1, 1], [], []>} : vector<16x32xbf16>, vector<32x32xbf16>, vector<16x32xf32> -> vector<16x32xf32>
    %76 = vector.broadcast %17 : vector<1x32xf32> to vector<16x32xf32>
    %77 = arith.addf %75, %76 : vector<16x32xf32>
    %78 = arith.addf %34, %77 : vector<16x32xf32>
    %cst_53 = arith.constant dense<0.000000e+00> : vector<16xf32>
    %79 = vector.multi_reduction <add>, %78, %cst_53 [1] : vector<16x32xf32> to vector<16xf32>
    %80 = vector.shape_cast %79 : vector<16xf32> to vector<16x1xf32>
    %cst_54 = arith.constant 3.200000e+01 : f32
    %81 = vector.broadcast %cst_54 : f32 to vector<16x1xf32>
    %82 = arith.divf %80, %81 : vector<16x1xf32>
    %83 = vector.broadcast %82 : vector<16x1xf32> to vector<16x32xf32>
    %84 = arith.subf %78, %83 : vector<16x32xf32>
    %85 = arith.mulf %84, %84 : vector<16x32xf32>
    %cst_55 = arith.constant dense<0.000000e+00> : vector<16xf32>
    %86 = vector.multi_reduction <add>, %85, %cst_55 [1] : vector<16x32xf32> to vector<16xf32>
    %87 = vector.shape_cast %86 : vector<16xf32> to vector<16x1xf32>
    %cst_56 = arith.constant 3.200000e+01 : f32
    %88 = vector.broadcast %cst_56 : f32 to vector<16x1xf32>
    %89 = arith.divf %87, %88 : vector<16x1xf32>
    %cst_57 = arith.constant 9.99999974E-6 : f32
    %90 = vector.broadcast %cst_57 : f32 to vector<16x1xf32>
    %91 = arith.addf %89, %90 : vector<16x1xf32>
    %92 = math.rsqrt %91 : vector<16x1xf32>
    %93 = vector.broadcast %92 : vector<16x1xf32> to vector<16x32xf32>
    %94 = arith.mulf %84, %93 : vector<16x32xf32>
    %95 = vector.broadcast %19 : vector<1x32xf32> to vector<16x32xf32>
    %96 = arith.mulf %94, %95 : vector<16x32xf32>
    %97 = vector.broadcast %21 : vector<1x32xf32> to vector<16x32xf32>
    %98 = arith.addf %96, %97 : vector<16x32xf32>
    %99 = arith.truncf %98 : vector<16x32xf32> to vector<16x32xbf16>
    %cst_58 = arith.constant dense<0.000000e+00> : vector<16x64xf32>
    %100 = tpu.matmul %99, %23, %cst_58 {dimension_numbers = #tpu.dot_dimension_numbers<[1], [0], [0], [1], [0, 0, 1, 1], [], []>} : vector<16x32xbf16>, vector<32x64xbf16>, vector<16x64xf32> -> vector<16x64xf32>
    %101 = vector.broadcast %25 : vector<1x64xf32> to vector<16x64xf32>
    %102 = arith.addf %100, %101 : vector<16x64xf32>
    %cst_59 = arith.constant 0.000000e+00 : f32
    %103 = vector.broadcast %cst_59 : f32 to vector<16x64xf32>
    %104 = arith.maximumf %102, %103 : vector<16x64xf32>
    %105 = arith.truncf %104 : vector<16x64xf32> to vector<16x64xbf16>
    %cst_60 = arith.constant dense<0.000000e+00> : vector<16x32xf32>
    %106 = tpu.matmul %105, %27, %cst_60 {dimension_numbers = #tpu.dot_dimension_numbers<[1], [0], [0], [1], [0, 0, 1, 1], [], []>} : vector<16x64xbf16>, vector<64x32xbf16>, vector<16x32xf32> -> vector<16x32xf32>
    %107 = vector.broadcast %29 : vector<1x32xf32> to vector<16x32xf32>
    %108 = arith.addf %106, %107 : vector<16x32xf32>
    %109 = arith.addf %98, %108 : vector<16x32xf32>
    %cst_61 = arith.constant dense<0.000000e+00> : vector<16xf32>
    %110 = vector.multi_reduction <add>, %109, %cst_61 [1] : vector<16x32xf32> to vector<16xf32>
    %111 = vector.shape_cast %110 : vector<16xf32> to vector<16x1xf32>
    %cst_62 = arith.constant 3.200000e+01 : f32
    %112 = vector.broadcast %cst_62 : f32 to vector<16x1xf32>
    %113 = arith.divf %111, %112 : vector<16x1xf32>
    %114 = vector.broadcast %113 : vector<16x1xf32> to vector<16x32xf32>
    %115 = arith.subf %109, %114 : vector<16x32xf32>
    %116 = arith.mulf %115, %115 : vector<16x32xf32>
    %cst_63 = arith.constant dense<0.000000e+00> : vector<16xf32>
    %117 = vector.multi_reduction <add>, %116, %cst_63 [1] : vector<16x32xf32> to vector<16xf32>
    %118 = vector.shape_cast %117 : vector<16xf32> to vector<16x1xf32>
    %cst_64 = arith.constant 3.200000e+01 : f32
    %119 = vector.broadcast %cst_64 : f32 to vector<16x1xf32>
    %120 = arith.divf %118, %119 : vector<16x1xf32>
    %cst_65 = arith.constant 9.99999974E-6 : f32
    %121 = vector.broadcast %cst_65 : f32 to vector<16x1xf32>
    %122 = arith.addf %120, %121 : vector<16x1xf32>
    %123 = math.rsqrt %122 : vector<16x1xf32>
    %124 = vector.broadcast %123 : vector<16x1xf32> to vector<16x32xf32>
    %125 = arith.mulf %115, %124 : vector<16x32xf32>
    %126 = vector.broadcast %31 : vector<1x32xf32> to vector<16x32xf32>
    %127 = arith.mulf %125, %126 : vector<16x32xf32>
    %128 = vector.broadcast %33 : vector<1x32xf32> to vector<16x32xf32>
    %129 = arith.addf %127, %128 : vector<16x32xf32>
    %130 = vector.shape_cast %129 : vector<16x32xf32> to vector<2x8x32xf32>
    %c1 = arith.constant 1 : index
    %c0_66 = arith.constant 0 : index
    %c0_67 = arith.constant 0 : index
    %131 = vector.load %arg5[%c1, %c0_66, %c0_67] : memref<2x32x96xbf16, #tpu.memory_space<vmem>>, vector<1x32x96xbf16>
    %132 = vector.shape_cast %131 : vector<1x32x96xbf16> to vector<32x96xbf16>
    %c1_68 = arith.constant 1 : index
    %c0_69 = arith.constant 0 : index
    %c0_70 = arith.constant 0 : index
    %133 = vector.load %arg6[%c1_68, %c0_69, %c0_70] : memref<2x1x96xf32, #tpu.memory_space<vmem>>, vector<1x1x96xf32>
    %134 = vector.shape_cast %133 : vector<1x1x96xf32> to vector<1x96xf32>
    %c1_71 = arith.constant 1 : index
    %c0_72 = arith.constant 0 : index
    %c0_73 = arith.constant 0 : index
    %135 = vector.load %arg7[%c1_71, %c0_72, %c0_73] : memref<2x32x32xbf16, #tpu.memory_space<vmem>>, vector<1x32x32xbf16>
    %136 = vector.shape_cast %135 : vector<1x32x32xbf16> to vector<32x32xbf16>
    %c1_74 = arith.constant 1 : index
    %c0_75 = arith.constant 0 : index
    %c0_76 = arith.constant 0 : index
    %137 = vector.load %arg8[%c1_74, %c0_75, %c0_76] : memref<2x1x32xf32, #tpu.memory_space<vmem>>, vector<1x1x32xf32>
    %138 = vector.shape_cast %137 : vector<1x1x32xf32> to vector<1x32xf32>
    %c1_77 = arith.constant 1 : index
    %c0_78 = arith.constant 0 : index
    %c0_79 = arith.constant 0 : index
    %139 = vector.load %arg9[%c1_77, %c0_78, %c0_79] : memref<2x1x32xf32, #tpu.memory_space<vmem>>, vector<1x1x32xf32>
    %140 = vector.shape_cast %139 : vector<1x1x32xf32> to vector<1x32xf32>
    %c1_80 = arith.constant 1 : index
    %c0_81 = arith.constant 0 : index
    %c0_82 = arith.constant 0 : index
    %141 = vector.load %arg10[%c1_80, %c0_81, %c0_82] : memref<2x1x32xf32, #tpu.memory_space<vmem>>, vector<1x1x32xf32>
    %142 = vector.shape_cast %141 : vector<1x1x32xf32> to vector<1x32xf32>
    %c1_83 = arith.constant 1 : index
    %c0_84 = arith.constant 0 : index
    %c0_85 = arith.constant 0 : index
    %143 = vector.load %arg11[%c1_83, %c0_84, %c0_85] : memref<2x32x64xbf16, #tpu.memory_space<vmem>>, vector<1x32x64xbf16>
    %144 = vector.shape_cast %143 : vector<1x32x64xbf16> to vector<32x64xbf16>
    %c1_86 = arith.constant 1 : index
    %c0_87 = arith.constant 0 : index
    %c0_88 = arith.constant 0 : index
    %145 = vector.load %arg12[%c1_86, %c0_87, %c0_88] : memref<2x1x64xf32, #tpu.memory_space<vmem>>, vector<1x1x64xf32>
    %146 = vector.shape_cast %145 : vector<1x1x64xf32> to vector<1x64xf32>
    %c1_89 = arith.constant 1 : index
    %c0_90 = arith.constant 0 : index
    %c0_91 = arith.constant 0 : index
    %147 = vector.load %arg13[%c1_89, %c0_90, %c0_91] : memref<2x64x32xbf16, #tpu.memory_space<vmem>>, vector<1x64x32xbf16>
    %148 = vector.shape_cast %147 : vector<1x64x32xbf16> to vector<64x32xbf16>
    %c1_92 = arith.constant 1 : index
    %c0_93 = arith.constant 0 : index
    %c0_94 = arith.constant 0 : index
    %149 = vector.load %arg14[%c1_92, %c0_93, %c0_94] : memref<2x1x32xf32, #tpu.memory_space<vmem>>, vector<1x1x32xf32>
    %150 = vector.shape_cast %149 : vector<1x1x32xf32> to vector<1x32xf32>
    %c1_95 = arith.constant 1 : index
    %c0_96 = arith.constant 0 : index
    %c0_97 = arith.constant 0 : index
    %151 = vector.load %arg15[%c1_95, %c0_96, %c0_97] : memref<2x1x32xf32, #tpu.memory_space<vmem>>, vector<1x1x32xf32>
    %152 = vector.shape_cast %151 : vector<1x1x32xf32> to vector<1x32xf32>
    %c1_98 = arith.constant 1 : index
    %c0_99 = arith.constant 0 : index
    %c0_100 = arith.constant 0 : index
    %153 = vector.load %arg16[%c1_98, %c0_99, %c0_100] : memref<2x1x32xf32, #tpu.memory_space<vmem>>, vector<1x1x32xf32>
    %154 = vector.shape_cast %153 : vector<1x1x32xf32> to vector<1x32xf32>
    %155 = vector.shape_cast %130 : vector<2x8x32xf32> to vector<16x32xf32>
    %156 = arith.truncf %155 : vector<16x32xf32> to vector<16x32xbf16>
    %cst_101 = arith.constant dense<0.000000e+00> : vector<16x96xf32>
    %157 = tpu.matmul %156, %132, %cst_101 {dimension_numbers = #tpu.dot_dimension_numbers<[1], [0], [0], [1], [0, 0, 1, 1], [], []>} : vector<16x32xbf16>, vector<32x96xbf16>, vector<16x96xf32> -> vector<16x96xf32>
    %158 = vector.broadcast %134 : vector<1x96xf32> to vector<16x96xf32>
    %159 = arith.addf %157, %158 : vector<16x96xf32>
    %160 = vector.extract_strided_slice %159 {offsets = [0, 0], sizes = [16, 32], strides = [1, 1]} : vector<16x96xf32> to vector<16x32xf32>
    %161 = vector.shape_cast %160 : vector<16x32xf32> to vector<2x8x32xf32>
    %162 = vector.extract_strided_slice %159 {offsets = [0, 32], sizes = [16, 32], strides = [1, 1]} : vector<16x96xf32> to vector<16x32xf32>
    %163 = vector.shape_cast %162 : vector<16x32xf32> to vector<2x8x32xf32>
    %164 = vector.extract_strided_slice %159 {offsets = [0, 64], sizes = [16, 32], strides = [1, 1]} : vector<16x96xf32> to vector<16x32xf32>
    %165 = vector.shape_cast %164 : vector<16x32xf32> to vector<2x8x32xf32>
    %166 = vector.shape_cast %161 : vector<2x8x32xf32> to vector<2x1x8x32xf32>
    %167 = vector.shape_cast %163 : vector<2x8x32xf32> to vector<1x2x8x32xf32>
    %168 = vector.broadcast %166 : vector<2x1x8x32xf32> to vector<2x2x8x32xf32>
    %169 = vector.broadcast %167 : vector<1x2x8x32xf32> to vector<2x2x8x32xf32>
    %170 = arith.mulf %168, %169 : vector<2x2x8x32xf32>
    %171 = vector.shape_cast %170 : vector<2x2x8x32xf32> to vector<32x32xf32>
    %172 = arith.truncf %171 : vector<32x32xf32> to vector<32x32xbf16>
    %cst_102 = arith.constant dense<0.000000e+00> : vector<32x4xf32>
    %173 = tpu.matmul %172, %8, %cst_102 {dimension_numbers = #tpu.dot_dimension_numbers<[1], [0], [0], [1], [0, 0, 1, 1], [], []>} : vector<32x32xbf16>, vector<32x4xbf16>, vector<32x4xf32> -> vector<32x4xf32>
    %cst_103 = arith.constant 0.353553385 : f32
    %174 = vector.broadcast %cst_103 : f32 to vector<32x4xf32>
    %175 = arith.mulf %174, %173 : vector<32x4xf32>
    %176 = vector.shape_cast %175 : vector<32x4xf32> to vector<2x2x8x4xf32>
    %cst_104 = arith.constant dense<0xFF800000> : vector<2x8x4xf32>
    %177 = vector.multi_reduction <maximumf>, %176, %cst_104 [1] : vector<2x2x8x4xf32> to vector<2x8x4xf32>
    %178 = vector.shape_cast %177 : vector<2x8x4xf32> to vector<2x1x8x4xf32>
    %179 = vector.broadcast %178 : vector<2x1x8x4xf32> to vector<2x2x8x4xf32>
    %180 = arith.subf %176, %179 : vector<2x2x8x4xf32>
    %181 = math.exp %180 : vector<2x2x8x4xf32>
    %cst_105 = arith.constant dense<0.000000e+00> : vector<2x8x4xf32>
    %182 = vector.multi_reduction <add>, %181, %cst_105 [1] : vector<2x2x8x4xf32> to vector<2x8x4xf32>
    %183 = vector.shape_cast %182 : vector<2x8x4xf32> to vector<2x1x8x4xf32>
    %184 = vector.broadcast %183 : vector<2x1x8x4xf32> to vector<2x2x8x4xf32>
    %185 = arith.divf %181, %184 : vector<2x2x8x4xf32>
    %186 = vector.shape_cast %185 : vector<2x2x8x4xf32> to vector<32x4xf32>
    %187 = arith.truncf %186 : vector<32x4xf32> to vector<32x4xbf16>
    %cst_106 = arith.constant dense<0.000000e+00> : vector<32x32xf32>
    %188 = tpu.matmul %187, %9, %cst_106 {dimension_numbers = #tpu.dot_dimension_numbers<[1], [0], [0], [1], [0, 0, 1, 1], [], []>} : vector<32x4xbf16>, vector<4x32xbf16>, vector<32x32xf32> -> vector<32x32xf32>
    %189 = vector.shape_cast %188 : vector<32x32xf32> to vector<2x2x8x32xf32>
    %190 = vector.shape_cast %165 : vector<2x8x32xf32> to vector<1x2x8x32xf32>
    %191 = vector.broadcast %190 : vector<1x2x8x32xf32> to vector<2x2x8x32xf32>
    %192 = arith.mulf %189, %191 : vector<2x2x8x32xf32>
    %cst_107 = arith.constant dense<0.000000e+00> : vector<2x8x32xf32>
    %193 = vector.multi_reduction <add>, %192, %cst_107 [1] : vector<2x2x8x32xf32> to vector<2x8x32xf32>
    %194 = vector.shape_cast %193 : vector<2x8x32xf32> to vector<16x32xf32>
    %195 = arith.truncf %194 : vector<16x32xf32> to vector<16x32xbf16>
    %cst_108 = arith.constant dense<0.000000e+00> : vector<16x32xf32>
    %196 = tpu.matmul %195, %136, %cst_108 {dimension_numbers = #tpu.dot_dimension_numbers<[1], [0], [0], [1], [0, 0, 1, 1], [], []>} : vector<16x32xbf16>, vector<32x32xbf16>, vector<16x32xf32> -> vector<16x32xf32>
    %197 = vector.broadcast %138 : vector<1x32xf32> to vector<16x32xf32>
    %198 = arith.addf %196, %197 : vector<16x32xf32>
    %199 = arith.addf %155, %198 : vector<16x32xf32>
    %cst_109 = arith.constant dense<0.000000e+00> : vector<16xf32>
    %200 = vector.multi_reduction <add>, %199, %cst_109 [1] : vector<16x32xf32> to vector<16xf32>
    %201 = vector.shape_cast %200 : vector<16xf32> to vector<16x1xf32>
    %cst_110 = arith.constant 3.200000e+01 : f32
    %202 = vector.broadcast %cst_110 : f32 to vector<16x1xf32>
    %203 = arith.divf %201, %202 : vector<16x1xf32>
    %204 = vector.broadcast %203 : vector<16x1xf32> to vector<16x32xf32>
    %205 = arith.subf %199, %204 : vector<16x32xf32>
    %206 = arith.mulf %205, %205 : vector<16x32xf32>
    %cst_111 = arith.constant dense<0.000000e+00> : vector<16xf32>
    %207 = vector.multi_reduction <add>, %206, %cst_111 [1] : vector<16x32xf32> to vector<16xf32>
    %208 = vector.shape_cast %207 : vector<16xf32> to vector<16x1xf32>
    %cst_112 = arith.constant 3.200000e+01 : f32
    %209 = vector.broadcast %cst_112 : f32 to vector<16x1xf32>
    %210 = arith.divf %208, %209 : vector<16x1xf32>
    %cst_113 = arith.constant 9.99999974E-6 : f32
    %211 = vector.broadcast %cst_113 : f32 to vector<16x1xf32>
    %212 = arith.addf %210, %211 : vector<16x1xf32>
    %213 = math.rsqrt %212 : vector<16x1xf32>
    %214 = vector.broadcast %213 : vector<16x1xf32> to vector<16x32xf32>
    %215 = arith.mulf %205, %214 : vector<16x32xf32>
    %216 = vector.broadcast %140 : vector<1x32xf32> to vector<16x32xf32>
    %217 = arith.mulf %215, %216 : vector<16x32xf32>
    %218 = vector.broadcast %142 : vector<1x32xf32> to vector<16x32xf32>
    %219 = arith.addf %217, %218 : vector<16x32xf32>
    %220 = arith.truncf %219 : vector<16x32xf32> to vector<16x32xbf16>
    %cst_114 = arith.constant dense<0.000000e+00> : vector<16x64xf32>
    %221 = tpu.matmul %220, %144, %cst_114 {dimension_numbers = #tpu.dot_dimension_numbers<[1], [0], [0], [1], [0, 0, 1, 1], [], []>} : vector<16x32xbf16>, vector<32x64xbf16>, vector<16x64xf32> -> vector<16x64xf32>
    %222 = vector.broadcast %146 : vector<1x64xf32> to vector<16x64xf32>
    %223 = arith.addf %221, %222 : vector<16x64xf32>
    %cst_115 = arith.constant 0.000000e+00 : f32
    %224 = vector.broadcast %cst_115 : f32 to vector<16x64xf32>
    %225 = arith.maximumf %223, %224 : vector<16x64xf32>
    %226 = arith.truncf %225 : vector<16x64xf32> to vector<16x64xbf16>
    %cst_116 = arith.constant dense<0.000000e+00> : vector<16x32xf32>
    %227 = tpu.matmul %226, %148, %cst_116 {dimension_numbers = #tpu.dot_dimension_numbers<[1], [0], [0], [1], [0, 0, 1, 1], [], []>} : vector<16x64xbf16>, vector<64x32xbf16>, vector<16x32xf32> -> vector<16x32xf32>
    %228 = vector.broadcast %150 : vector<1x32xf32> to vector<16x32xf32>
    %229 = arith.addf %227, %228 : vector<16x32xf32>
    %230 = arith.addf %219, %229 : vector<16x32xf32>
    %cst_117 = arith.constant dense<0.000000e+00> : vector<16xf32>
    %231 = vector.multi_reduction <add>, %230, %cst_117 [1] : vector<16x32xf32> to vector<16xf32>
    %232 = vector.shape_cast %231 : vector<16xf32> to vector<16x1xf32>
    %cst_118 = arith.constant 3.200000e+01 : f32
    %233 = vector.broadcast %cst_118 : f32 to vector<16x1xf32>
    %234 = arith.divf %232, %233 : vector<16x1xf32>
    %235 = vector.broadcast %234 : vector<16x1xf32> to vector<16x32xf32>
    %236 = arith.subf %230, %235 : vector<16x32xf32>
    %237 = arith.mulf %236, %236 : vector<16x32xf32>
    %cst_119 = arith.constant dense<0.000000e+00> : vector<16xf32>
    %238 = vector.multi_reduction <add>, %237, %cst_119 [1] : vector<16x32xf32> to vector<16xf32>
    %239 = vector.shape_cast %238 : vector<16xf32> to vector<16x1xf32>
    %cst_120 = arith.constant 3.200000e+01 : f32
    %240 = vector.broadcast %cst_120 : f32 to vector<16x1xf32>
    %241 = arith.divf %239, %240 : vector<16x1xf32>
    %cst_121 = arith.constant 9.99999974E-6 : f32
    %242 = vector.broadcast %cst_121 : f32 to vector<16x1xf32>
    %243 = arith.addf %241, %242 : vector<16x1xf32>
    %244 = math.rsqrt %243 : vector<16x1xf32>
    %245 = vector.broadcast %244 : vector<16x1xf32> to vector<16x32xf32>
    %246 = arith.mulf %236, %245 : vector<16x32xf32>
    %247 = vector.broadcast %152 : vector<1x32xf32> to vector<16x32xf32>
    %248 = arith.mulf %246, %247 : vector<16x32xf32>
    %249 = vector.broadcast %154 : vector<1x32xf32> to vector<16x32xf32>
    %250 = arith.addf %248, %249 : vector<16x32xf32>
    %251 = vector.shape_cast %250 : vector<16x32xf32> to vector<2x8x32xf32>
    %252 = vector.shape_cast %251 : vector<2x8x32xf32> to vector<16x32xf32>
    %253 = arith.truncf %252 : vector<16x32xf32> to vector<16x32xbf16>
    %c0_122 = arith.constant 0 : index
    %c0_123 = arith.constant 0 : index
    %254 = vector.load %arg17[%c0_122, %c0_123] : memref<32x32xbf16, #tpu.memory_space<vmem>>, vector<32x32xbf16>
    %cst_124 = arith.constant dense<0.000000e+00> : vector<16x32xf32>
    %255 = tpu.matmul %253, %254, %cst_124 {dimension_numbers = #tpu.dot_dimension_numbers<[1], [0], [0], [1], [0, 0, 1, 1], [], []>} : vector<16x32xbf16>, vector<32x32xbf16>, vector<16x32xf32> -> vector<16x32xf32>
    %c0_125 = arith.constant 0 : index
    %c0_126 = arith.constant 0 : index
    %256 = vector.load %arg18[%c0_125, %c0_126] : memref<1x32xf32, #tpu.memory_space<vmem>>, vector<1x32xf32>
    %257 = vector.broadcast %256 : vector<1x32xf32> to vector<16x32xf32>
    %258 = arith.addf %255, %257 : vector<16x32xf32>
    %cst_127 = arith.constant 0.000000e+00 : f32
    %259 = vector.broadcast %cst_127 : f32 to vector<16x32xf32>
    %260 = arith.maximumf %258, %259 : vector<16x32xf32>
    %c0_128 = arith.constant 0 : index
    %c0_129 = arith.constant 0 : index
    %261 = vector.load %arg19[%c0_128, %c0_129] : memref<1x32xf32, #tpu.memory_space<vmem>>, vector<1x32xf32>
    %262 = vector.broadcast %261 : vector<1x32xf32> to vector<16x32xf32>
    %263 = arith.mulf %260, %262 : vector<16x32xf32>
    %cst_130 = arith.constant dense<0.000000e+00> : vector<16xf32>
    %264 = vector.multi_reduction <add>, %263, %cst_130 [1] : vector<16x32xf32> to vector<16xf32>
    %265 = vector.shape_cast %264 : vector<16xf32> to vector<16x1xf32>
    %c0_131 = arith.constant 0 : index
    %c0_132 = arith.constant 0 : index
    %266 = vector.load %arg20[%c0_131, %c0_132] : memref<1x1xf32, #tpu.memory_space<vmem>>, vector<1x1xf32>
    %267 = vector.broadcast %266 : vector<1x1xf32> to vector<16x1xf32>
    %268 = arith.addf %265, %267 : vector<16x1xf32>
    %c0_133 = arith.constant 0 : index
    %c0_134 = arith.constant 0 : index
    %269 = vector.load %arg21[%c0_133, %c0_134] : memref<16x1xf32, #tpu.memory_space<vmem>>, vector<16x1xf32>
    tpu.vector_store %arg21[%c0_133, %c0_134], %268 {strides = array<i32>} : memref<16x1xf32, #tpu.memory_space<vmem>>, vector<16x1xf32>,
    return
  }
}

</mosaic_0001>

<bundles_post_ra>
// kernel: eegformer_forward.4
= control target key start
LH: loop header
LB: loop body
LE: loop exit
PB: predicated region body
PF: predicated region fallthrough
CT: control target
= control target key end

     0   :  { %10 = vsyncpa [#allocation3], 0  ;;  %s1163_s0 = inlined_call_operand.hbm [shape: f32[2,16,4], index: 0, kind: input, shape index: {}]   ;;  %s1164_s1 = inlined_call_operand.hbm [shape: bf16[12,32], index: 1, kind: input, shape index: {}]   ;;  %s1165_s2 = inlined_call_operand.hbm [shape: f32[1,32], index: 2, kind: input, shape index: {}]   ;;  %s1166_s3 = inlined_call_operand.hbm [shape: bf16[96,32], index: 3, kind: input, shape index: {}]   ;;  %s1167_s4 = inlined_call_operand.hbm [shape: f32[1,32], index: 4, kind: input, shape index: {}]   ;;  %s1168_s5 = inlined_call_operand.hbm [shape: bf16[2,12,32], index: 5, kind: output, shape index: {}]  }
   0x1   :  { %11 = vsyncpa [#allocation6], 0 }
   0x2   :  { %12 = vsyncpa [#allocation9], 0 }
   0x3   :  { %13 = vsyncpa [#allocation4], 0  ;;  %s963_s18 = smov [#allocation5]   ;;  %s823_s22 = scalar_lea.hbm %s1164_s1, 128 }
   0x4   :  { %s31_s19 = sshll.u32 %s963_s18, 4  ;;  %p824_p0 = scmp.ne.s32.totalorder %s1164_s1, %s823_s22  ;;  %s32_s19 = int_to_ptr.vmem [resolvable:$true] %s31_s19 }
   0x5   :  { %p827_p1 = scmp.lt.u32.totalorder %s823_s22, %s1164_s1 }
   0x7   :  { %p829_p2 = pnand %p827_p1, %p824_p0 }
   0x9   :  { %832 = shalt.err (!%p829_p2)
}
   0xa   :  { %s833_s27 = scalar_lea.vmem %s32_s19, 128  ;;  %p838_p4 = scmp.lt.s32.totalorder %s32_s19, %s32_s19 }
   0xb   :  { %p834_p3 = scmp.ne.s32.totalorder %s32_s19, %s833_s27  ;;  %p839_p5 = scmp.lt.s32.totalorder %s833_s27, %s833_s27 }
   0xd   :  { %p840_p6 = por %p839_p5, %p838_p4 }
   0xf   :  { %p841_p7 = pnand %p840_p6, %p834_p3 }
  0x11   :  { %844 = shalt.err (!%p841_p7)
}
  0x12   :  { %s964_s28 = smov 64   ;;  %s965_s29 = smov 4  }
  0x13   :  { %37 = dma.hbm_to_vmem [thread:$0]  %s1164_s1, 128, %s32_s19, [#allocation6], %s964_s28, %s964_s28, %s965_s29  }
  0x14   :  { %s966_s7 = smov [#allocation8]   ;;  %s967_s9 = smov [#allocation2]  }
  0x15   :  { %s53_s8 = sshll.u32 %s966_s7, 4  ;;  %s19_s10 = sshll.u32 %s967_s9, 4  ;;  %s54_s8 = int_to_ptr.vmem [resolvable:$true] %s53_s8  ;;  %s20_s10 = int_to_ptr.vmem [resolvable:$true] %s19_s10 }
  0x16   :  { %s845_s13 = scalar_lea.hbm %s1166_s3, 768 }
  0x17   :  { %p846_p8 = scmp.ne.s32.totalorder %s1166_s3, %s845_s13  ;;  %p849_p9 = scmp.lt.u32.totalorder %s845_s13, %s1166_s3 }
  0x19   :  { %p851_p10 = pnand %p849_p9, %p846_p8 }
  0x1b   :  { %854 = shalt.err (!%p851_p10)
}
  0x1c   :  { %s855_s1 = scalar_lea.vmem %s54_s8, 768  ;;  %p860_p12 = scmp.lt.s32.totalorder %s54_s8, %s54_s8 }
  0x1d   :  { %p856_p11 = scmp.ne.s32.totalorder %s54_s8, %s855_s1  ;;  %p861_p13 = scmp.lt.s32.totalorder %s855_s1, %s855_s1 }
  0x1f   :  { %p862_p0 = por %p861_p13, %p860_p12 }
  0x21   :  { %p863_p1 = pnand %p862_p0, %p856_p11 }
  0x23   :  { %866 = shalt.err (!%p863_p1)
}
  0x24   :  { %59 = dma.hbm_to_vmem [thread:$0]  %s1166_s3, 768, %s54_s8, [#allocation9], %s964_s28, %s964_s28, %s965_s29  }
  0x25   :  { %s867_s22 = scalar_lea.hbm %s1163_s0, 512 }
  0x26   :  { %p868_p2 = scmp.ne.s32.totalorder %s1163_s0, %s867_s22  ;;  %p871_p3 = scmp.lt.u32.totalorder %s867_s22, %s1163_s0 }
  0x28   :  { %p873_p4 = pnand %p871_p3, %p868_p2 }
  0x2a   :  { %876 = shalt.err (!%p873_p4)
}
  0x2b   :  { %s877_s27 = scalar_lea.vmem %s20_s10, 512  ;;  %p882_p6 = scmp.lt.s32.totalorder %s20_s10, %s20_s10 }
  0x2c   :  { %p878_p5 = scmp.ne.s32.totalorder %s20_s10, %s877_s27  ;;  %p883_p7 = scmp.lt.s32.totalorder %s877_s27, %s877_s27 }
  0x2e   :  { %p884_p8 = por %p883_p7, %p882_p6 }
  0x30   :  { %p885_p9 = pnand %p884_p8, %p878_p5 }
  0x32   :  { %888 = shalt.err (!%p885_p9)
}
  0x33   :  { %s968_s3 = smov 128   ;;  %s969_s30 = smov 8  }
  0x34   :  { %25 = dma.hbm_to_vmem [thread:$0]  %s1163_s0, 512, %s20_s10, [#allocation3], %s968_s3, %s968_s3, %s969_s30  }
  0x35   :  { %s970_s8 = smov [#allocation7]   ;;  %s971_s11 = smov [#allocation10]  }
  0x36   :  { %s44_s9 = sshll.u32 %s970_s8, 4  ;;  %s66_s12 = sshll.u32 %s971_s11, 4  ;;  %s45_s9 = int_to_ptr.vmem [resolvable:$true] %s44_s9  ;;  %s67_s12 = int_to_ptr.vmem [resolvable:$true] %s66_s12 }
  0x37   :  { %s889_s15 = scalar_lea.hbm %s1165_s2, 16 }
  0x38   :  { %p890_p10 = scmp.ne.s32.totalorder %s1165_s2, %s889_s15  ;;  %p893_p11 = scmp.lt.u32.totalorder %s889_s15, %s1165_s2 }
  0x3a   :  { %p895_p12 = pnand %p893_p11, %p890_p10 }
  0x3c   :  { %898 = shalt.err (!%p895_p12)
}
  0x3d   :  { %s899_s0 = scalar_lea.vmem %s45_s9, 16  ;;  %s903_s10 = scalar_lea.vmem %s45_s9, 32 }
  0x3e   :  { %p900_p13 = scmp.ne.s32.totalorder %s45_s9, %s899_s0  ;;  %p904_p0 = scmp.lt.s32.totalorder %s45_s9, %s45_s9 }
  0x3f   :  { %p905_p1 = scmp.lt.s32.totalorder %s903_s10, %s899_s0 }
  0x41   :  { %p906_p2 = por %p905_p1, %p904_p0 }
  0x43   :  { %p907_p3 = pnand %p906_p2, %p900_p13 }
  0x45   :  { %910 = shalt.err (!%p907_p3)
}
  0x46   :  { %47 = dma.hbm_to_vmem [thread:$0]  %s1165_s2, 16, %s45_s9, [#allocation6]  }
  0x47   :  { %s911_s23 = scalar_lea.hbm %s1167_s4, 16 }
  0x48   :  { %p912_p4 = scmp.ne.s32.totalorder %s1167_s4, %s911_s23  ;;  %p915_p5 = scmp.lt.u32.totalorder %s911_s23, %s1167_s4 }
  0x4a   :  { %p917_p6 = pnand %p915_p5, %p912_p4 }
  0x4c   :  { %920 = shalt.err (!%p917_p6)
}
  0x4d   :  { %s921_s3 = scalar_lea.vmem %s67_s12, 16  ;;  %s925_s6 = scalar_lea.vmem %s67_s12, 32 }
  0x4e   :  { %p922_p7 = scmp.ne.s32.totalorder %s67_s12, %s921_s3  ;;  %p926_p8 = scmp.lt.s32.totalorder %s67_s12, %s67_s12 }
  0x4f   :  { %p927_p9 = scmp.lt.s32.totalorder %s925_s6, %s921_s3 }
  0x51   :  { %p928_p10 = por %p927_p9, %p926_p8 }
  0x53   :  { %p929_p11 = pnand %p928_p10, %p922_p7 }
  0x55   :  { %932 = shalt.err (!%p929_p11)
}
  0x56   :  { %69 = dma.hbm_to_vmem [thread:$0]  %s1167_s4, 16, %s67_s12, [#allocation9]  }
  0x57   :  { %955 = dma.done.wait [#allocation3], 512  }
  0x58   :  { %956 = vsyncadd [#allocation3], 4294966784 }
  0x59   :  { %957 = dma.done.wait [#allocation6], 144  }
  0x5a   :  { %958 = vsyncadd [#allocation6], 4294967152 }
  0x5b   :  { %959 = dma.done.wait [#allocation9], 784  }
  0x5c   :  { %960 = vsyncadd [#allocation9], 4294966512  ;;  %v87_v0 = vld [vmem:[#allocation2 + $0x8] sm:$0xff]  ;;  %v86_v1 = vld [vmem:[#allocation2] sm:$0xff]  ;;  %vm97_vm0 = vcmask 1046528   ;;  %vm116_vm1 = vcmask 1045504   ;;  %v153_v20 = vlaneseq }
  0x5d   :  { %v88_v2 = vld [vmem:[#allocation2 + $0x10] sm:$0xff]  ;;  %v99_v3 = vrot.slane %v87_v0, 1  ;;  %v98_v4 = vrot.slane %v86_v1, 1  ;;  %v117_v5 = vrot.slane %v86_v1, 2  ;;  %v118_v6 = vrot.slane %v87_v0, 2  ;;  %v89_v7 = vld [vmem:[#allocation2 + $0x18] sm:$0xff] }
  0x5e   :  { %v101_v8 = vrot.slane %v88_v2, 1  ;;  %v102_v9 = vrot.slane %v89_v7, 1  ;;  %v120_v10 = vrot.slane %v88_v2, 2  ;;  %v121_v11 = vrot.slane %v89_v7, 2  ;;  %v816_v16 = vld [vmem:[#allocation5] sm:$0x3f]  }
  0x5f   :  { %106 = vrot.lane.b32.xlu1 %v99_v3, %s965_s29  ;;  %v100_v12 = vsel %vm97_vm0, %v98_v4, %v99_v3  ;;  %v119_v13 = vsel %vm116_vm1, %v117_v5, %v118_v6  ;;  %803 = vmatprep.subr.msk.bf16.mxu0 %vm116_vm1, %v816_v16  ;;  %v299_v17 = vsel %vm116_vm1, %v816_v16, 0  ;;  %v972_v18 = vmov 1983009808   ;;  %s973_s4 = smov 32  }
  0x60   :  { %104 = vrot.lane.b32.xlu0 %v100_v12, %s965_s29  ;;  %v103_v14 = vsel %vm97_vm0, %v101_v8, %v102_v9  ;;  %v122_v15 = vsel %vm116_vm1, %v120_v10, %v121_v11  ;;  %782 = vmatpush3.bf16.msra.mxu0 %v299_v17  ;;  %v151_v19 = vunpack.c.l.s4 %v972_v18  ;;  %v154_v22 = vshrl.u32 %v153_v20, 7 }
  0x61   :  { %vm135_vm2 = vcmask 31744   ;;  %vm140_vm3 = vcmask 64512   ;;  %vm291_vm4 = vcmask 97280   ;;  %vm581_vm5 = vcmask 523264  }
  0x62   :  { %v152_v21 = vunpack.c.0.s8 %v151_v19  ;;  %vm576_vm6 = vcmask 261120   ;;  %vm642_vm7 = vcmask 785408   ;;  %vm726_vm8 = vcmask 254976  }
  0x63   :  { %123 = vrot.lane.b32.xlu1 %v119_v13, %s969_s30  ;;  %v817_v13 = vld [vmem:[#allocation8] sm:$0xff]   ;;  %vm724_vm9 = vcmask 257024  }
  0x64   :  { %108 = vrot.lane.b32.xlu0 %v103_v14, %s965_s29  ;;  %v1086_v25 = vsub.s32 %v152_v21, %v154_v22  ;;  %v818_v14 = vld [vmem:[#allocation8 + $0x8] sm:$0xff]   ;;  %787 = vmatprep.subr.bf16.mxu1 %v817_v13 }
  0x65   :  { %788 = vmatpush3.bf16.msra.mxu1 %v817_v13 }
  0x66   :  { %789 = vmatprep.subr.bf16.mxu1 %v818_v14 }
  0x67   :  { %125 = vrot.lane.b32.xlu1 %v118_v6, %s969_s30 }
  0x68   :  { %127 = vrot.lane.b32.xlu0 %v122_v15, %s969_s30  ;;  %v749_v15 = vld [vmem:[#allocation7] ss:$0 sm:$0xff] }
  0x69   :  { %790 = vmatpush3.bf16.msra.mxu1 %v818_v14 }
  0x6b   :  { %129 = vrot.lane.b32.xlu1 %v121_v11, %s969_s30  ;;  %s974_s30 = smov [#allocation11]  }
  0x6c   :  { %110 = vrot.lane.b32.xlu0 %v102_v9, %s965_s29  ;;  %s735_s8 = sshll.u32 %s974_s30, 4  ;;  %s736_s8 = int_to_ptr.vmem [resolvable:$true] %s735_s8 }
  0x6d   :  { %s933_s9 = scalar_lea.vmem %s736_s8, 256  ;;  %p938_p13 = scmp.lt.s32.totalorder %s736_s8, %s736_s8 }
  0x6e   :  { %p934_p12 = scmp.ne.s32.totalorder %s736_s8, %s933_s9  ;;  %p939_p0 = scmp.lt.s32.totalorder %s933_s9, %s933_s9 }
  0x70   :  { %p940_p1 = por %p939_p0, %p938_p13 }
  0x72   :  { %p941_p2 = pnand %p940_p1, %p934_p12 }
  0xd1   :  { %v107_v23 = vpop.permute.xlu1 %106 }
  0xd2   :  { %v105_v24 = vpop.permute.xlu0 %104  ;;  %v137_v32 = vsel %vm135_vm2, %v87_v0, %v107_v23 }
  0xd3   :  { %v136_v26 = vsel %vm135_vm2, %v86_v1, %v105_v24 }
  0xd5   :  { %v124_v27 = vpop.permute.xlu1 %123 }
  0xd6   :  { %v141_v28 = vsel %vm140_vm3, %v136_v26, %v124_v27  ;;  %v109_v29 = vpop.permute.xlu0 %108 }
  0xd7   :  { %v149_v30 = vcombine.high %v141_v28, %v141_v28  ;;  %v156_v31 = vrot.slane %v141_v28, %v1086_v25  ;;  %v138_v39 = vsel %vm135_vm2, %v88_v2, %v109_v29  ;;  %v819_v29 = vld [vmem:[#allocation8 + $0x10] sm:$0xff]  }
  0xd8   :  { %791 = vmatprep.subr.bf16.mxu1 %v819_v29 }
  0xd9   :  { %v163_v33 = vrot.slane %v149_v30, %v1086_v25  ;;  %v126_v34 = vpop.permute.xlu1 %125  ;;  %v164_v35 = vcombine.high %v156_v31, %v156_v31  ;;  %792 = vmatpush3.bf16.msra.mxu1 %v819_v29 }
  0xda   :  { %v142_v36 = vsel %vm140_vm3, %v137_v32, %v126_v34  ;;  %v128_v37 = vpop.permute.xlu0 %127 }
  0xdb   :  { %v165_v38 = vcombine.high %v163_v33, %v163_v33  ;;  %v166_v40 = vcombine.high %v142_v36, %v142_v36  ;;  %v173_v41 = vrot.slane %v142_v36, %v1086_v25  ;;  %v143_v42 = vsel %vm140_vm3, %v138_v39, %v128_v37 }
  0xdc   :  { %v182_v46 = vcombine.high %v143_v42, %v143_v42  ;;  %v215_v48 = vcombine.low %v156_v31, %v164_v35  ;;  %v189_v49 = vrot.slane %v143_v42, %v1086_v25 }
  0xdd   :  { %v216_v43 = vcombine.low %v163_v33, %v165_v38  ;;  %v180_v44 = vrot.slane %v166_v40, %v1086_v25  ;;  %v181_v45 = vcombine.high %v173_v41, %v173_v41  ;;  %v130_v47 = vpop.permute.xlu1 %129 }
  0xde   :  { %v111_v50 = vpop.permute.xlu0 %110  ;;  %v196_v52 = vrot.slane %v182_v46, %v1086_v25  ;;  %v197_v54 = vcombine.high %v189_v49, %v189_v49  ;;  %v223_v62 = vrot.slane %v215_v48, %v1086_v25 }
  0xdf   :  { %v232_v51 = vcombine.low %v173_v41, %v181_v45  ;;  %v139_v53 = vsel %vm135_vm2, %v89_v7, %v111_v50  ;;  %v233_v55 = vcombine.low %v180_v44, %v189_v49  ;;  %v230_v57 = vrot.slane %v216_v43, %v1086_v25  ;;  %v820_v45 = vld [vmem:[#allocation8 + $0x18] sm:$0xff]  }
  0xe0   :  { %v144_v56 = vsel %vm140_vm3, %v139_v53, %v130_v47  ;;  %v198_v58 = vcombine.high %v196_v52, %v196_v52  ;;  %v249_v61 = vcombine.low %v197_v54, %v196_v52  ;;  %793 = vmatprep.subr.bf16.mxu1 %v820_v45 }
  0xe1   :  { %v199_v59 = vcombine.high %v144_v56, %v144_v56  ;;  %v206_v60 = vrot.slane %v144_v56, %v1086_v25  ;;  %v240_v63 = vrot.slane %v232_v51, %v1086_v25  ;;  %v247_v0 = vrot.slane %v233_v55, %v1086_v25  ;;  %794 = vmatpush3.bf16.msra.mxu1 %v820_v45 }
  0xe2   :  { %v231_v4 = vcombine.low %v223_v62, %v230_v57  ;;  %v257_v6 = vrot.slane %v249_v61, %v1086_v25  ;;  %v821_v62 = vld [vmem:[#allocation8 + $0x20] sm:$0xff]  }
  0xe3   :  { %v213_v1 = vrot.slane %v199_v59, %v1086_v25  ;;  %v214_v2 = vcombine.high %v206_v60, %v206_v60  ;;  %v250_v3 = vcombine.low %v198_v58, %v206_v60  ;;  %v248_v5 = vcombine.low %v240_v63, %v247_v0  ;;  %795 = vmatprep.subr.bf16.mxu1 %v821_v62 }
  0xe5   :  { %v264_v7 = vrot.slane %v250_v3, %v1086_v25  ;;  %v266_v8 = vcombine.low %v214_v2, %v213_v1  ;;  %v278_v9 = vpack.c.bf16 %v248_v5, %v231_v4  ;;  %796 = vmatpush3.bf16.msra.mxu1 %v821_v62 }
  0xe7   :  { %v265_v10 = vcombine.low %v257_v6, %v264_v7  ;;  %v273_v11 = vrot.slane %v266_v8, %v1086_v25  ;;  %783 = vmatprep.mubr.msk.bf16.mxu0 %vm291_vm4, %v278_v9 }
  0xe9   :  { %v279_v12 = vpack.c.bf16 %v273_v11, %v265_v10 }
  0xeb   :  { %784 = vmatmul.mubr.msk.bf16.vlgmr.msra.gmra.mrb[0].mxu0 %vm291_vm4, %v279_v12  ;;  %v822_v12 = vld [vmem:[#allocation8 + $0x28] sm:$0xff]  }
  0xec   :  { %797 = vmatprep.subr.bf16.mxu1 %v822_v12 }
  0xed   :  { %798 = vmatpush3.bf16.msra.mxu1 %v822_v12 }
 0x1be   :  { %v785_v16 = vpop.f32.mrb[0].mxu0 }
 0x1bf   :  { %v344_v17 = vadd.f32 %v785_v16, %v749_v15  ;;  %v335_v18 = vpop.f32.mrb[1].mxu0 }
 0x1c0   :  { %v336_v19 = vadd.f32 %v749_v15, %v335_v18  ;;  %v786_v20 = vpop.f32.mrb[2].mxu0 }
 0x1c1   :  { %v388_v21 = vcombine.high %v344_v17, %v344_v17  ;;  %v395_v22 = vrot.slane %v344_v17, %v1086_v25  ;;  %v347_v23 = vadd.f32 %v786_v20, %v749_v15  ;;  %v338_v24 = vpop.f32.mrb[3].mxu0 }
 0x1c2   :  { %v354_v26 = vcombine.high %v336_v19, %v336_v19  ;;  %v361_v27 = vrot.slane %v336_v19, %v1086_v25  ;;  %v339_v28 = vadd.f32 %v749_v15, %v338_v24 }
 0x1c3   :  { %v402_v30 = vrot.slane %v388_v21, %v1086_v25  ;;  %v403_v31 = vcombine.high %v395_v22, %v395_v22  ;;  %v1115_v32 = vrot.slane %v347_v23, %v1086_v25 }
 0x1c4   :  { %v368_v33 = vrot.slane %v354_v26, %v1086_v25  ;;  %v369_v34 = vcombine.high %v361_v27, %v361_v27  ;;  %v371_v35 = vcombine.high %v339_v28, %v339_v28  ;;  %v378_v36 = vrot.slane %v339_v28, %v1086_v25 }
 0x1c5   :  { %v452_v37 = vcombine.low %v403_v31, %v402_v30  ;;  %v404_v38 = vcombine.high %v402_v30, %v402_v30  ;;  %v412_v39 = vcombine.high %v1115_v32, %v1115_v32  ;;  %v539_v40 = vcombine.low %v395_v22, %v403_v31 }
 0x1c6   :  { %v426_v41 = vcombine.low %v361_v27, %v369_v34  ;;  %v385_v42 = vrot.slane %v371_v35, %v1086_v25  ;;  %v386_v43 = vcombine.high %v378_v36, %v378_v36  ;;  %v370_v44 = vcombine.high %v368_v33, %v368_v33 }
 0x1c7   :  { %v468_v46 = vcombine.low %v404_v38, %v1115_v32  ;;  %v540_v47 = vcombine.low %v402_v30, %v404_v38  ;;  %v547_v48 = vrot.slane %v539_v40, %v1086_v25  ;;  %v494_v49 = vrot.slane %v412_v39, %v1086_v25 }
 0x1c8   :  { %v434_v50 = vrot.slane %v426_v41, %v1086_v25  ;;  %v387_v51 = vcombine.high %v385_v42, %v385_v42  ;;  %v443_v52 = vcombine.low %v378_v36, %v386_v43  ;;  %v514_v53 = vcombine.low %v369_v34, %v368_v33 }
 0x1c9   :  { %v554_v54 = vrot.slane %v540_v47, %v1086_v25  ;;  %v475_v55 = vrot.slane %v468_v46, %v1086_v25  ;;  %v515_v56 = vcombine.low %v370_v44, %v378_v36  ;;  %v427_v57 = vcombine.low %v368_v33, %v370_v44 }
 0x1ca   :  { %v451_v58 = vcombine.low %v387_v51, %v395_v22  ;;  %v522_v59 = vrot.slane %v514_v53, %v1086_v25  ;;  %v450_v60 = vrot.slane %v443_v52, %v1086_v25  ;;  %v486_v61 = vrot.slane %v385_v42, %v1086_v25 }
 0x1cb   :  { %v555_v63 = vcombine.low %v547_v48, %v554_v54  ;;  %v495_v0 = vcombine.low %v475_v55, %v494_v49  ;;  %v529_v1 = vrot.slane %v515_v56, %v1086_v25  ;;  %v441_v2 = vrot.slane %v427_v57, %v1086_v25 }
 0x1cc   :  { %v487_v3 = vcombine.low %v450_v60, %v486_v61  ;;  %v459_v4 = vrot.slane %v451_v58, %v1086_v25  ;;  %v466_v5 = vrot.slane %v452_v37, %v1086_v25  ;;  %v531_v14 = vcombine.low %v386_v43, %v385_v42  ;;  %v753_v43 = vld [vmem:[#allocation10] ss:$0 sm:$0xff] }
 0x1cd   :  { %568 = vrot.lane.b32.xlu0 %v555_v63, %s964_s28  ;;  %v500_v6 = vrot.slane %v495_v0, 1  ;;  %v530_v7 = vcombine.low %v522_v59, %v529_v1  ;;  %v442_v8 = vcombine.low %v434_v50, %v441_v2  ;;  %v556_v16 = vcombine.low %v1115_v32, %v412_v39 }
 0x1ce   :  { %v467_v9 = vcombine.low %v459_v4, %v466_v5  ;;  %v497_v10 = vrot.slane %v487_v3, 1  ;;  %v538_v18 = vrot.slane %v531_v14, %v1086_v25 }
 0x1cf   :  { %508 = vrot.lane.b32.xlu1 %v500_v6, %s973_s4  ;;  %v496_v11 = vrot.slane %v442_v8, 1  ;;  %v563_v19 = vrot.slane %v556_v16, %v1086_v25 }
 0x1d0   :  { %v499_v13 = vrot.slane %v467_v9, 1 }
 0x1d1   :  { %564 = vrot.lane.b32.xlu0 %v530_v7, %s964_s28  ;;  %v498_v15 = vsel %vm97_vm0, %v496_v11, %v497_v10 }
 0x1d2   :  { %v501_v17 = vsel %vm97_vm0, %v499_v13, %v500_v6 }
 0x1d3   :  { %504 = vrot.lane.b32.xlu1 %v497_v10, %s973_s4 }
 0x1d5   :  { %502 = vrot.lane.b32.xlu0 %v498_v15, %s973_s4 }
 0x1d7   :  { %506 = vrot.lane.b32.xlu1 %v501_v17, %s973_s4 }
 0x1d9   :  { %566 = vrot.lane.b32.xlu0 %v538_v18, %s964_s28 }
 0x1db   :  { %570 = vrot.lane.b32.xlu1 %v563_v19, %s964_s28 }
 0x23f   :  { %v569_v20 = vpop.permute.xlu0 %568 }
 0x241   :  { %v509_v21 = vpop.permute.xlu1 %508 }
 0x242   :  { %v580_v36 = vsel %vm576_vm6, %v475_v55, %v509_v21 }
 0x243   :  { %v565_v22 = vpop.permute.xlu0 %564 }
 0x245   :  { %v505_v23 = vpop.permute.xlu1 %504 }
 0x246   :  { %v578_v31 = vsel %vm576_vm6, %v450_v60, %v505_v23 }
 0x247   :  { %v503_v24 = vpop.permute.xlu0 %502 }
 0x248   :  { %v577_v26 = vsel %vm576_vm6, %v442_v8, %v503_v24 }
 0x249   :  { %v582_v27 = vsel %vm581_vm5, %v577_v26, %v565_v22  ;;  %v507_v28 = vpop.permute.xlu1 %506 }
 0x24a   :  { %v590_v29 = vcombine.high %v582_v27, %v582_v27  ;;  %v579_v30 = vsel %vm576_vm6, %v467_v9, %v507_v28 }
 0x24b   :  { %v584_v32 = vsel %vm581_vm5, %v579_v30, %v569_v20  ;;  %v567_v33 = vpop.permute.xlu0 %566 }
 0x24c   :  { %v583_v25 = vsel %vm581_vm5, %v578_v31, %v567_v33  ;;  %v591_v34 = vcombine.high %v584_v32, %v584_v32  ;;  %v592_v35 = vcombine.low %v582_v27, %v590_v29 }
 0x24d   :  { %v593_v37 = vcombine.low %v583_v25, %v584_v32  ;;  %v571_v38 = vpop.permute.xlu1 %570 }
 0x24e   :  { %v585_v39 = vsel %vm581_vm5, %v580_v36, %v571_v38 }
 0x24f   :  { %v594_v40 = vcombine.low %v591_v34, %v585_v39  ;;  %v598_v41 = vpack.c.bf16 %v593_v37, %v592_v35 }
 0x251   :  { %v599_v42 = vpack.c.bf16 %v594_v40, %v594_v40  ;;  %799 = vmatprep.mubr.msk.bf16.mxu1 %vm642_vm7, %v598_v41 }
 0x253   :  { %800 = vmatmul.mubr.msk.bf16.vlgmr.msra.gmra.mrb[0].mxu1 %vm642_vm7, %v599_v42 }
 0x326   :  { %v801_v44 = vpop.f32.mrb[0].mxu1 }
 0x327   :  { %v692_v45 = vadd.f32 %v801_v44, %v753_v43  ;;  %v683_v46 = vpop.f32.mrb[1].mxu1 }
 0x328   :  { %v684_v47 = vadd.f32 %v753_v43, %v683_v46  ;;  %v802_v48 = vpop.f32.mrb[2].mxu1 }
 0x329   :  { %v702_v49 = vcombine.high %v692_v45, %v692_v45  ;;  %v686_v50 = vpop.f32.mrb[3].mxu1 }
 0x32a   :  { %v700_v51 = vcombine.high %v684_v47, %v684_v47  ;;  %v687_v52 = vadd.f32 %v753_v43, %v686_v50 }
 0x32b   :  { %v769_v53 = vpack.c.bf16 %v702_v49, %v702_v49 }
 0x32c   :  { %v704_v54 = vcombine.low %v684_v47, %v700_v51  ;;  %v701_v55 = vcombine.high %v687_v52, %v687_v52  ;;  %v767_v56 = vpack.c.bf16 %v687_v52, %v687_v52 }
 0x32d   :  { %729 = vst.msk [vmem:[#allocation11 + $0xc] sm:$0x3] %vm726_vm8, %v769_v53 }
 0x32e   :  { %v766_v57 = vpack.c.bf16 %v704_v54, %v704_v54  ;;  %v705_v58 = vcombine.low %v701_v55, %v692_v45  ;;  %727 = vst.msk [vmem:[#allocation11 + $0x4] sm:$0x3] %vm726_vm8, %v767_v56 }
 0x330   :  { %725 = vst.msk [vmem:[#allocation11] sm:$0xf] %vm724_vm9, %v766_v57  ;;  %v768_v59 = vpack.c.bf16 %v705_v58, %v705_v58 }
 0x332   :  { %728 = vst.msk [vmem:[#allocation11 + $0x8] sm:$0xf] %vm724_vm9, %v768_v59 }
 0x333   :  { %944 = shalt.err (!%p941_p2)
}
 0x334   :  { %s945_s13 = scalar_lea.hbm %s1168_s5, 256 }
 0x335   :  { %p946_p3 = scmp.ne.s32.totalorder %s1168_s5, %s945_s13  ;;  %p949_p4 = scmp.lt.u32.totalorder %s945_s13, %s1168_s5 }
 0x337   :  { %p951_p5 = pnand %p949_p4, %p946_p3 }
 0x339   :  { %954 = shalt.err (!%p951_p5)
}
 0x33a   :  { %741 = dma.vmem_to_hbm [thread:$0]  %s736_s8, 256, %s1168_s5, [#allocation4], %s964_s28, %s964_s28, %s965_s29  }
 0x33b   :  { %961 = dma.done.wait [#allocation4], 256  }
 0x33c   :  { %962 = vsyncadd [#allocation4], 4294967040 }
 0x33d   :  { %745 = vsyncpa [#allocation3], 1 }
 0x33e   :  { %746 = vsyncpa [#allocation6], 1 }
 0x33f   :  { %747 = vsyncpa [#allocation9], 1 }
 0x340   :  { %748 = vsyncpa [#allocation4], 1 }

// kernel: eegformer_forward.6
= control target key start
LH: loop header
LB: loop body
LE: loop exit
PB: predicated region body
PF: predicated region fallthrough
CT: control target
= control target key end

     0   :  { %s5025_s0 = inlined_call_operand.hbm [shape: bf16[64,32], index: 0, kind: input, shape index: {}]   ;;  %s5026_s1 = inlined_call_operand.hbm [shape: bf16[32,32], index: 1, kind: input, shape index: {}]   ;;  %s5027_s2 = inlined_call_operand.hbm [shape: f32[1,32], index: 2, kind: input, shape index: {}]   ;;  %s5028_s3 = inlined_call_operand.hbm [shape: bf16[32,4], index: 3, kind: input, shape index: {}]   ;;  %s5029_s4 = inlined_call_operand.hbm [shape: bf16[4,32], index: 4, kind: input, shape index: {}]   ;;  %s5030_s5 = inlined_call_operand.hbm [shape: bf16[2,32,96], index: 5, kind: input, shape index: {}]   ;;  %s5031_s6 = inlined_call_operand.hbm [shape: f32[2,1,96], index: 6, kind: input, shape index: {}]   ;;  %s5032_s7 = inlined_call_operand.hbm [shape: bf16[2,32,32], index: 7, kind: input, shape index: {}]   ;;  %s5033_s8 = inlined_call_operand.hbm [shape: f32[2,1,32], index: 8, kind: input, shape index: {}]   ;;  %s5034_s9 = inlined_call_operand.hbm [shape: f32[2,1,32], index: 9, kind: input, shape index: {}]   ;;  %s5035_s10 = inlined_call_operand.hbm [shape: f32[2,1,32], index: 10, kind: input, shape index: {}]   ;;  %s5036_s11 = inlined_call_operand.hbm [shape: bf16[2,32,64], index: 11, kind: input, shape index: {}]   ;;  %s5037_s12 = inlined_call_operand.hbm [shape: f32[2,1,64], index: 12, kind: input, shape index: {}]   ;;  %s5038_s13 = inlined_call_operand.hbm [shape: bf16[2,64,32], index: 13, kind: input, shape index: {}]   ;;  %s5039_s14 = inlined_call_operand.hbm [shape: f32[2,1,32], index: 14, kind: input, shape index: {}]   ;;  %s5040_s15 = inlined_call_operand.hbm [shape: f32[2,1,32], index: 15, kind: input, shape index: {}]   ;;  %s5041_s16 = inlined_call_operand.hbm [shape: f32[2,1,32], index: 16, kind: input, shape index: {}]   ;;  %s5042_s17 = inlined_call_operand.hbm [shape: bf16[64,32], index: 17, kind: output, shape index: {}]  }
   0x1   :  { %5046 = sst [smem:[#allocation40_spill]] %s5025_s0 }
   0x2   :  { %5047 = sst [smem:[#allocation41_spill]] %s5026_s1 }
   0x3   :  { %5048 = sst [smem:[#allocation42_spill]] %s5042_s17 }
   0x4   :  { %22 = vsyncpa [#allocation3], 0 }
   0x5   :  { %23 = vsyncpa [#allocation6], 0 }
   0x6   :  { %24 = vsyncpa [#allocation9], 0 }
   0x7   :  { %25 = vsyncpa [#allocation12], 0 }
   0x8   :  { %26 = vsyncpa [#allocation15], 0 }
   0x9   :  { %27 = vsyncpa [#allocation18], 0 }
   0xa   :  { %28 = vsyncpa [#allocation21], 0 }
   0xb   :  { %29 = vsyncpa [#allocation24], 0 }
   0xc   :  { %30 = vsyncpa [#allocation27], 0 }
   0xd   :  { %31 = vsyncpa [#allocation4], 0  ;;  %s4036_s24 = smov [#allocation5]   ;;  %s4037_s26 = smov [#allocation8]  }
   0xe   :  { %s49_s25 = sshll.u32 %s4036_s24, 4  ;;  %s71_s27 = sshll.u32 %s4037_s26, 4  ;;  %s50_s25 = int_to_ptr.vmem [resolvable:$true] %s49_s25  ;;  %s4149_s27 = int_to_ptr.vmem [resolvable:$true] %s71_s27 }
   0xf   :  { %s5049_s0 = sld [smem:[#allocation41_spill]] }
  0x15   :  { %s3620_s30 = scalar_lea.hbm %s5049_s0, 256 }
  0x16   :  { %p3621_p0 = scmp.ne.s32.totalorder %s5049_s0, %s3620_s30  ;;  %p3624_p1 = scmp.lt.u32.totalorder %s3620_s30, %s5049_s0 }
  0x18   :  { %p3626_p2 = pnand %p3624_p1, %p3621_p0 }
  0x1a   :  { %3629 = shalt.err (!%p3626_p2)
}
  0x1b   :  { %s3630_s21 = scalar_lea.vmem %s50_s25, 256  ;;  %p3635_p4 = scmp.lt.s32.totalorder %s50_s25, %s50_s25 }
  0x1c   :  { %p3631_p3 = scmp.ne.s32.totalorder %s50_s25, %s3630_s21  ;;  %p3636_p5 = scmp.lt.s32.totalorder %s3630_s21, %s3630_s21 }
  0x1e   :  { %p3637_p6 = por %p3636_p5, %p3635_p4 }
  0x20   :  { %p3638_p7 = pnand %p3637_p6, %p3631_p3 }
  0x22   :  { %3641 = shalt.err (!%p3638_p7)
}
  0x23   :  { %s4038_s22 = smov 64   ;;  %s4039_s23 = smov 4  }
  0x24   :  { %55 = dma.hbm_to_vmem [thread:$0]  %s5049_s0, 256, %s50_s25, [#allocation6], %s4038_s22, %s4038_s22, %s4039_s23  }
  0x25   :  { %s3642_s30 = scalar_lea.hbm %s5028_s3, 256 }
  0x26   :  { %p3643_p8 = scmp.ne.s32.totalorder %s5028_s3, %s3642_s30  ;;  %p3646_p9 = scmp.lt.u32.totalorder %s3642_s30, %s5028_s3 }
  0x28   :  { %p3648_p10 = pnand %p3646_p9, %p3643_p8 }
  0x2a   :  { %3651 = shalt.err (!%p3648_p10)
}
  0x2b   :  { %s3652_s21 = scalar_lea.vmem %s4149_s27, 256  ;;  %p3657_p12 = scmp.lt.s32.totalorder %s4149_s27, %s4149_s27 }
  0x2c   :  { %p3653_p11 = scmp.ne.s32.totalorder %s4149_s27, %s3652_s21  ;;  %p3658_p13 = scmp.lt.s32.totalorder %s3652_s21, %s3652_s21 }
  0x2e   :  { %p3659_p0 = por %p3658_p13, %p3657_p12 }
  0x30   :  { %p3660_p1 = pnand %p3659_p0, %p3653_p11 }
  0x32   :  { %3663 = shalt.err (!%p3660_p1)
}
  0x33   :  { %77 = dma.hbm_to_vmem [thread:$0]  %s5028_s3, 256, %s4149_s27, [#allocation9], %s4038_s22, %s4038_s22, %s4039_s23  }
  0x34   :  { %s4040_s24 = smov [#allocation11]   ;;  %s4041_s28 = smov [#allocation14]  }
  0x35   :  { %s93_s26 = sshll.u32 %s4040_s24, 4  ;;  %s117_s29 = sshll.u32 %s4041_s28, 4  ;;  %s94_s26 = int_to_ptr.vmem [resolvable:$true] %s93_s26  ;;  %s4186_s29 = int_to_ptr.vmem [resolvable:$true] %s117_s29 }
  0x36   :  { %s3664_s19 = scalar_lea.hbm %s5030_s5, 512 }
  0x37   :  { %p3665_p2 = scmp.ne.s32.totalorder %s5030_s5, %s3664_s19  ;;  %p3668_p3 = scmp.lt.u32.totalorder %s3664_s19, %s5030_s5 }
  0x39   :  { %p3670_p4 = pnand %p3668_p3, %p3665_p2 }
  0x3b   :  { %3673 = shalt.err (!%p3670_p4)
}
  0x3c   :  { %s3674_s3 = scalar_lea.vmem %s94_s26, 512  ;;  %p3679_p6 = scmp.lt.s32.totalorder %s94_s26, %s94_s26 }
  0x3d   :  { %p3675_p5 = scmp.ne.s32.totalorder %s94_s26, %s3674_s3  ;;  %p3680_p7 = scmp.lt.s32.totalorder %s3674_s3, %s3674_s3 }
  0x3f   :  { %p3681_p8 = por %p3680_p7, %p3679_p6 }
  0x41   :  { %p3682_p9 = pnand %p3681_p8, %p3675_p5 }
  0x43   :  { %3685 = shalt.err (!%p3682_p9)
}
  0x44   :  { %99 = dma.hbm_to_vmem [thread:$0]  %s5030_s5, 512, %s94_s26, [#allocation12], %s4038_s22, %s4038_s22, %s4039_s23  }
  0x45   :  { %s3686_s17 = scalar_lea.hbm %s5032_s7, 512 }
  0x46   :  { %p3687_p10 = scmp.ne.s32.totalorder %s5032_s7, %s3686_s17  ;;  %p3690_p11 = scmp.lt.u32.totalorder %s3686_s17, %s5032_s7 }
  0x48   :  { %p3692_p12 = pnand %p3690_p11, %p3687_p10 }
  0x4a   :  { %3695 = shalt.err (!%p3692_p12)
}
  0x4b   :  { %s3696_s1 = scalar_lea.vmem %s4186_s29, 512  ;;  %p3701_p0 = scmp.lt.s32.totalorder %s4186_s29, %s4186_s29 }
  0x4c   :  { %p3697_p13 = scmp.ne.s32.totalorder %s4186_s29, %s3696_s1  ;;  %p3702_p1 = scmp.lt.s32.totalorder %s3696_s1, %s3696_s1 }
  0x4e   :  { %p3703_p2 = por %p3702_p1, %p3701_p0 }
  0x50   :  { %p3704_p3 = pnand %p3703_p2, %p3697_p13 }
  0x52   :  { %3707 = shalt.err (!%p3704_p3)
}
  0x53   :  { %123 = dma.hbm_to_vmem [thread:$0]  %s5032_s7, 512, %s4186_s29, [#allocation15], %s4038_s22, %s4038_s22, %s4039_s23  }
  0x54   :  { %s4042_s20 = smov [#allocation17]   ;;  %s4043_s3 = smov [#allocation20]  }
  0x55   :  { %s141_s21 = sshll.u32 %s4042_s20, 4  ;;  %s165_s27 = sshll.u32 %s4043_s3, 4  ;;  %s142_s21 = int_to_ptr.vmem [resolvable:$true] %s141_s21  ;;  %s4223_s27 = int_to_ptr.vmem [resolvable:$true] %s165_s27 }
  0x56   :  { %s3708_s24 = scalar_lea.hbm %s5034_s9, 32 }
  0x57   :  { %p3709_p4 = scmp.ne.s32.totalorder %s5034_s9, %s3708_s24  ;;  %p3712_p5 = scmp.lt.u32.totalorder %s3708_s24, %s5034_s9 }
  0x59   :  { %p3714_p6 = pnand %p3712_p5, %p3709_p4 }
  0x5b   :  { %3717 = shalt.err (!%p3714_p6)
}
  0x5c   :  { %s3718_s7 = scalar_lea.vmem %s142_s21, 32  ;;  %p3723_p8 = scmp.lt.s32.totalorder %s142_s21, %s142_s21 }
  0x5d   :  { %p3719_p7 = scmp.ne.s32.totalorder %s142_s21, %s3718_s7  ;;  %p3724_p9 = scmp.lt.s32.totalorder %s3718_s7, %s3718_s7 }
  0x5f   :  { %p3725_p10 = por %p3724_p9, %p3723_p8 }
  0x61   :  { %p3726_p11 = pnand %p3725_p10, %p3719_p7 }
  0x63   :  { %3729 = shalt.err (!%p3726_p11)
}
  0x64   :  { %s4044_s29 = smov 16   ;;  %s4045_s19 = smov 1  }
  0x65   :  { %147 = dma.hbm_to_vmem [thread:$0]  %s5034_s9, 32, %s142_s21, [#allocation18], %s4044_s29, %s4044_s29, %s4045_s19  }
  0x66   :  { %s3730_s3 = scalar_lea.hbm %s5036_s11, 512 }
  0x67   :  { %p3731_p12 = scmp.ne.s32.totalorder %s5036_s11, %s3730_s3  ;;  %p3734_p13 = scmp.lt.u32.totalorder %s3730_s3, %s5036_s11 }
  0x69   :  { %p3736_p0 = pnand %p3734_p13, %p3731_p12 }
  0x6b   :  { %3739 = shalt.err (!%p3736_p0)
}
  0x6c   :  { %s3740_s28 = scalar_lea.vmem %s4223_s27, 512  ;;  %p3745_p2 = scmp.lt.s32.totalorder %s4223_s27, %s4223_s27 }
  0x6d   :  { %p3741_p1 = scmp.ne.s32.totalorder %s4223_s27, %s3740_s28  ;;  %p3746_p3 = scmp.lt.s32.totalorder %s3740_s28, %s3740_s28 }
  0x6f   :  { %p3747_p4 = por %p3746_p3, %p3745_p2 }
  0x71   :  { %p3748_p5 = pnand %p3747_p4, %p3741_p1 }
  0x73   :  { %3751 = shalt.err (!%p3748_p5)
}
  0x74   :  { %171 = dma.hbm_to_vmem [thread:$0]  %s5036_s11, 512, %s4223_s27, [#allocation21], %s4038_s22, %s4038_s22, %s4039_s23  }
  0x75   :  { %s4046_s30 = smov [#allocation23]   ;;  %s4047_s7 = smov [#allocation26]  }
  0x76   :  { %s189_s18 = sshll.u32 %s4046_s30, 4  ;;  %s213_s1 = sshll.u32 %s4047_s7, 4  ;;  %s190_s18 = int_to_ptr.vmem [resolvable:$true] %s189_s18  ;;  %s4260_s1 = int_to_ptr.vmem [resolvable:$true] %s213_s1 }
  0x77   :  { %s3752_s20 = scalar_lea.hbm %s5038_s13, 1024 }
  0x78   :  { %p3753_p6 = scmp.ne.s32.totalorder %s5038_s13, %s3752_s20  ;;  %p3756_p7 = scmp.lt.u32.totalorder %s3752_s20, %s5038_s13 }
  0x7a   :  { %p3758_p8 = pnand %p3756_p7, %p3753_p6 }
  0x7c   :  { %3761 = shalt.err (!%p3758_p8)
}
  0x7d   :  { %s3762_s11 = scalar_lea.vmem %s190_s18, 1024  ;;  %p3767_p10 = scmp.lt.s32.totalorder %s190_s18, %s190_s18 }
  0x7e   :  { %p3763_p9 = scmp.ne.s32.totalorder %s190_s18, %s3762_s11  ;;  %p3768_p11 = scmp.lt.s32.totalorder %s3762_s11, %s3762_s11 }
  0x80   :  { %p3769_p12 = por %p3768_p11, %p3767_p10 }
  0x82   :  { %p3770_p13 = pnand %p3769_p12, %p3763_p9 }
  0x84   :  { %3773 = shalt.err (!%p3770_p13)
}
  0x85   :  { %195 = dma.hbm_to_vmem [thread:$0]  %s5038_s13, 1024, %s190_s18, [#allocation24], %s4038_s22, %s4038_s22, %s4039_s23  }
  0x86   :  { %s3774_s21 = scalar_lea.hbm %s5040_s15, 32 }
  0x87   :  { %p3775_p0 = scmp.ne.s32.totalorder %s5040_s15, %s3774_s21  ;;  %p3778_p1 = scmp.lt.u32.totalorder %s3774_s21, %s5040_s15 }
  0x89   :  { %p3780_p2 = pnand %p3778_p1, %p3775_p0 }
  0x8b   :  { %3783 = shalt.err (!%p3780_p2)
}
  0x8c   :  { %s3784_s20 = scalar_lea.vmem %s4260_s1, 32  ;;  %p3789_p4 = scmp.lt.s32.totalorder %s4260_s1, %s4260_s1 }
  0x8d   :  { %p3785_p3 = scmp.ne.s32.totalorder %s4260_s1, %s3784_s20  ;;  %p3790_p5 = scmp.lt.s32.totalorder %s3784_s20, %s3784_s20 }
  0x8f   :  { %p3791_p6 = por %p3790_p5, %p3789_p4 }
  0x91   :  { %p3792_p7 = pnand %p3791_p6, %p3785_p3 }
  0x93   :  { %3795 = shalt.err (!%p3792_p7)
}
  0x94   :  { %219 = dma.hbm_to_vmem [thread:$0]  %s5040_s15, 32, %s4260_s1, [#allocation27], %s4044_s29, %s4044_s29, %s4045_s19  }
  0x95   :  { %s4048_s3 = smov [#allocation2]   ;;  %s4049_s0 = smov [#allocation7]  }
  0x96   :  { %s37_s25 = sshll.u32 %s4048_s3, 4  ;;  %s62_s24 = sshll.u32 %s4049_s0, 4  ;;  %s38_s25 = int_to_ptr.vmem [resolvable:$true] %s37_s25  ;;  %s63_s24 = int_to_ptr.vmem [resolvable:$true] %s62_s24 }
  0x97   :  { %s5050_s17 = sld [smem:[#allocation40_spill]] }
  0x9d   :  { %s3796_s28 = scalar_lea.hbm %s5050_s17, 512 }
  0x9e   :  { %p3797_p8 = scmp.ne.s32.totalorder %s5050_s17, %s3796_s28  ;;  %p3800_p9 = scmp.lt.u32.totalorder %s3796_s28, %s5050_s17 }
  0xa0   :  { %p3802_p10 = pnand %p3800_p9, %p3797_p8 }
  0xa2   :  { %3805 = shalt.err (!%p3802_p10)
}
  0xa3   :  { %s3806_s15 = scalar_lea.vmem %s38_s25, 512  ;;  %p3811_p12 = scmp.lt.s32.totalorder %s38_s25, %s38_s25 }
  0xa4   :  { %p3807_p11 = scmp.ne.s32.totalorder %s38_s25, %s3806_s15  ;;  %p3812_p13 = scmp.lt.s32.totalorder %s3806_s15, %s3806_s15 }
  0xa6   :  { %p3813_p0 = por %p3812_p13, %p3811_p12 }
  0xa8   :  { %p3814_p1 = pnand %p3813_p0, %p3807_p11 }
  0xaa   :  { %3817 = shalt.err (!%p3814_p1)
}
  0xab   :  { %43 = dma.hbm_to_vmem [thread:$0]  %s5050_s17, 512, %s38_s25, [#allocation3], %s4038_s22, %s4038_s22, %s4039_s23  }
  0xac   :  { %s3818_s13 = scalar_lea.hbm %s5027_s2, 16 }
  0xad   :  { %p3819_p2 = scmp.ne.s32.totalorder %s5027_s2, %s3818_s13  ;;  %p3822_p3 = scmp.lt.u32.totalorder %s3818_s13, %s5027_s2 }
  0xaf   :  { %p3824_p4 = pnand %p3822_p3, %p3819_p2 }
  0xb1   :  { %3827 = shalt.err (!%p3824_p4)
}
  0xb2   :  { %s3828_s27 = scalar_lea.vmem %s63_s24, 16  ;;  %s3832_s28 = scalar_lea.vmem %s63_s24, 32 }
  0xb3   :  { %p3829_p5 = scmp.ne.s32.totalorder %s63_s24, %s3828_s27  ;;  %p3833_p6 = scmp.lt.s32.totalorder %s63_s24, %s63_s24 }
  0xb4   :  { %p3834_p7 = scmp.lt.s32.totalorder %s3832_s28, %s3828_s27 }
  0xb6   :  { %p3835_p8 = por %p3834_p7, %p3833_p6 }
  0xb8   :  { %p3836_p9 = pnand %p3835_p8, %p3829_p5 }
  0xba   :  { %3839 = shalt.err (!%p3836_p9)
}
  0xbb   :  { %65 = dma.hbm_to_vmem [thread:$0]  %s5027_s2, 16, %s63_s24, [#allocation6]  }
  0xbc   :  { %s4050_s9 = smov [#allocation10]   ;;  %s4051_s30 = smov [#allocation13]  }
  0xbd   :  { %s84_s21 = sshll.u32 %s4050_s9, 4  ;;  %s105_s7 = sshll.u32 %s4051_s30, 4  ;;  %s85_s21 = int_to_ptr.vmem [resolvable:$true] %s84_s21  ;;  %s4324_s7 = int_to_ptr.vmem [resolvable:$true] %s105_s7 }
  0xbe   :  { %s3840_s5 = scalar_lea.hbm %s5029_s4, 32 }
  0xbf   :  { %p3841_p10 = scmp.ne.s32.totalorder %s5029_s4, %s3840_s5  ;;  %p3844_p11 = scmp.lt.u32.totalorder %s3840_s5, %s5029_s4 }
  0xc1   :  { %p3846_p12 = pnand %p3844_p11, %p3841_p10 }
  0xc3   :  { %3849 = shalt.err (!%p3846_p12)
}
  0xc4   :  { %s3850_s2 = scalar_lea.vmem %s85_s21, 32  ;;  %p3855_p0 = scmp.lt.s32.totalorder %s85_s21, %s85_s21 }
  0xc5   :  { %p3851_p13 = scmp.ne.s32.totalorder %s85_s21, %s3850_s2  ;;  %p3856_p1 = scmp.lt.s32.totalorder %s3850_s2, %s3850_s2 }
  0xc7   :  { %p3857_p2 = por %p3856_p1, %p3855_p0 }
  0xc9   :  { %p3858_p3 = pnand %p3857_p2, %p3851_p13 }
  0xcb   :  { %3861 = shalt.err (!%p3858_p3)
}
  0xcc   :  { %87 = dma.hbm_to_vmem [thread:$0]  %s5029_s4, 32, %s85_s21, [#allocation9]  }
  0xcd   :  { %s3862_s27 = scalar_lea.hbm %s5031_s6, 32 }
  0xce   :  { %p3863_p4 = scmp.ne.s32.totalorder %s5031_s6, %s3862_s27  ;;  %p3866_p5 = scmp.lt.u32.totalorder %s3862_s27, %s5031_s6 }
  0xd0   :  { %p3868_p6 = pnand %p3866_p5, %p3863_p4 }
  0xd2   :  { %3871 = shalt.err (!%p3868_p6)
}
  0xd3   :  { %s3872_s30 = scalar_lea.vmem %s4324_s7, 32  ;;  %p3877_p8 = scmp.lt.s32.totalorder %s4324_s7, %s4324_s7 }
  0xd4   :  { %p3873_p7 = scmp.ne.s32.totalorder %s4324_s7, %s3872_s30  ;;  %p3878_p9 = scmp.lt.s32.totalorder %s3872_s30, %s3872_s30 }
  0xd6   :  { %p3879_p10 = por %p3878_p9, %p3877_p8 }
  0xd8   :  { %p3880_p11 = pnand %p3879_p10, %p3873_p7 }
  0xda   :  { %3883 = shalt.err (!%p3880_p11)
}
  0xdb   :  { %111 = dma.hbm_to_vmem [thread:$0]  %s5031_s6, 32, %s4324_s7, [#allocation12], %s4044_s29, %s4044_s29, %s4045_s19  }
  0xdc   :  { %s4052_s15 = smov [#allocation16]   ;;  %s4053_s5 = smov [#allocation19]  }
  0xdd   :  { %s129_s1 = sshll.u32 %s4052_s15, 4  ;;  %s153_s26 = sshll.u32 %s4053_s5, 4  ;;  %s130_s1 = int_to_ptr.vmem [resolvable:$true] %s129_s1  ;;  %s4358_s26 = int_to_ptr.vmem [resolvable:$true] %s153_s26 }
  0xde   :  { %s3884_s18 = scalar_lea.hbm %s5033_s8, 32 }
  0xdf   :  { %p3885_p12 = scmp.ne.s32.totalorder %s5033_s8, %s3884_s18  ;;  %p3888_p13 = scmp.lt.u32.totalorder %s3884_s18, %s5033_s8 }
  0xe1   :  { %p3890_p0 = pnand %p3888_p13, %p3885_p12 }
  0xe3   :  { %3893 = shalt.err (!%p3890_p0)
}
  0xe4   :  { %s3894_s6 = scalar_lea.vmem %s130_s1, 32  ;;  %p3899_p2 = scmp.lt.s32.totalorder %s130_s1, %s130_s1 }
  0xe5   :  { %p3895_p1 = scmp.ne.s32.totalorder %s130_s1, %s3894_s6  ;;  %p3900_p3 = scmp.lt.s32.totalorder %s3894_s6, %s3894_s6 }
  0xe7   :  { %p3901_p4 = por %p3900_p3, %p3899_p2 }
  0xe9   :  { %p3902_p5 = pnand %p3901_p4, %p3895_p1 }
  0xeb   :  { %3905 = shalt.err (!%p3902_p5)
}
  0xec   :  { %135 = dma.hbm_to_vmem [thread:$0]  %s5033_s8, 32, %s130_s1, [#allocation15], %s4044_s29, %s4044_s29, %s4045_s19  }
  0xed   :  { %s3906_s25 = scalar_lea.hbm %s5035_s10, 32 }
  0xee   :  { %p3907_p6 = scmp.ne.s32.totalorder %s5035_s10, %s3906_s25  ;;  %p3910_p7 = scmp.lt.u32.totalorder %s3906_s25, %s5035_s10 }
  0xf0   :  { %p3912_p8 = pnand %p3910_p7, %p3907_p6 }
  0xf2   :  { %3915 = shalt.err (!%p3912_p8)
}
  0xf3   :  { %s3916_s21 = scalar_lea.vmem %s4358_s26, 32  ;;  %p3921_p10 = scmp.lt.s32.totalorder %s4358_s26, %s4358_s26 }
  0xf4   :  { %p3917_p9 = scmp.ne.s32.totalorder %s4358_s26, %s3916_s21  ;;  %p3922_p11 = scmp.lt.s32.totalorder %s3916_s21, %s3916_s21 }
  0xf6   :  { %p3923_p12 = por %p3922_p11, %p3921_p10 }
  0xf8   :  { %p3924_p13 = pnand %p3923_p12, %p3917_p9 }
  0xfa   :  { %3927 = shalt.err (!%p3924_p13)
}
  0xfb   :  { %159 = dma.hbm_to_vmem [thread:$0]  %s5035_s10, 32, %s4358_s26, [#allocation18], %s4044_s29, %s4044_s29, %s4045_s19  }
  0xfc   :  { %s4054_s1 = smov [#allocation22]   ;;  %s4055_s20 = smov [#allocation25]  }
  0xfd   :  { %s177_s5 = sshll.u32 %s4054_s1, 4  ;;  %s201_s13 = sshll.u32 %s4055_s20, 4  ;;  %s178_s5 = int_to_ptr.vmem [resolvable:$true] %s177_s5  ;;  %s4395_s13 = int_to_ptr.vmem [resolvable:$true] %s201_s13 }
  0xfe   :  { %s3928_s24 = scalar_lea.hbm %s5037_s12, 32 }
  0xff   :  { %p3929_p0 = scmp.ne.s32.totalorder %s5037_s12, %s3928_s24  ;;  %p3932_p1 = scmp.lt.u32.totalorder %s3928_s24, %s5037_s12 }
 0x101   :  { %p3934_p2 = pnand %p3932_p1, %p3929_p0 }
 0x103   :  { %3937 = shalt.err (!%p3934_p2)
}
 0x104   :  { %s3938_s10 = scalar_lea.vmem %s178_s5, 32  ;;  %p3943_p4 = scmp.lt.s32.totalorder %s178_s5, %s178_s5 }
 0x105   :  { %p3939_p3 = scmp.ne.s32.totalorder %s178_s5, %s3938_s10  ;;  %p3944_p5 = scmp.lt.s32.totalorder %s3938_s10, %s3938_s10 }
 0x107   :  { %p3945_p6 = por %p3944_p5, %p3943_p4 }
 0x109   :  { %p3946_p7 = pnand %p3945_p6, %p3939_p3 }
 0x10b   :  { %3949 = shalt.err (!%p3946_p7)
}
 0x10c   :  { %183 = dma.hbm_to_vmem [thread:$0]  %s5037_s12, 32, %s178_s5, [#allocation21], %s4044_s29, %s4044_s29, %s4045_s19  }
 0x10d   :  { %s3950_s25 = scalar_lea.hbm %s5039_s14, 32 }
 0x10e   :  { %p3951_p8 = scmp.ne.s32.totalorder %s5039_s14, %s3950_s25  ;;  %p3954_p9 = scmp.lt.u32.totalorder %s3950_s25, %s5039_s14 }
 0x110   :  { %p3956_p10 = pnand %p3954_p9, %p3951_p8 }
 0x112   :  { %3959 = shalt.err (!%p3956_p10)
}
 0x113   :  { %s3960_s21 = scalar_lea.vmem %s4395_s13, 32  ;;  %p3965_p12 = scmp.lt.s32.totalorder %s4395_s13, %s4395_s13 }
 0x114   :  { %p3961_p11 = scmp.ne.s32.totalorder %s4395_s13, %s3960_s21  ;;  %p3966_p13 = scmp.lt.s32.totalorder %s3960_s21, %s3960_s21 }
 0x116   :  { %p3967_p0 = por %p3966_p13, %p3965_p12 }
 0x118   :  { %p3968_p1 = pnand %p3967_p0, %p3961_p11 }
 0x11a   :  { %3971 = shalt.err (!%p3968_p1)
}
 0x11b   :  { %207 = dma.hbm_to_vmem [thread:$0]  %s5039_s14, 32, %s4395_s13, [#allocation24], %s4044_s29, %s4044_s29, %s4045_s19  }
 0x11c   :  { %s4056_s15 = smov [#allocation28]   ;;  %s3972_s18 = scalar_lea.hbm %s5041_s16, 32 }
 0x11d   :  { %s225_s1 = sshll.u32 %s4056_s15, 4  ;;  %p3973_p2 = scmp.ne.s32.totalorder %s5041_s16, %s3972_s18  ;;  %s226_s1 = int_to_ptr.vmem [resolvable:$true] %s225_s1 }
 0x11e   :  { %p3976_p3 = scmp.lt.u32.totalorder %s3972_s18, %s5041_s16 }
 0x120   :  { %p3978_p4 = pnand %p3976_p3, %p3973_p2 }
 0x122   :  { %3981 = shalt.err (!%p3978_p4)
}
 0x123   :  { %s3982_s6 = scalar_lea.vmem %s226_s1, 32  ;;  %p3987_p6 = scmp.lt.s32.totalorder %s226_s1, %s226_s1 }
 0x124   :  { %p3983_p5 = scmp.ne.s32.totalorder %s226_s1, %s3982_s6  ;;  %p3988_p7 = scmp.lt.s32.totalorder %s3982_s6, %s3982_s6 }
 0x126   :  { %p3989_p8 = por %p3988_p7, %p3987_p6 }
 0x128   :  { %p3990_p9 = pnand %p3989_p8, %p3983_p5 }
 0x12a   :  { %3993 = shalt.err (!%p3990_p9)
}
 0x12b   :  { %231 = dma.hbm_to_vmem [thread:$0]  %s5041_s16, 32, %s226_s1, [#allocation27], %s4044_s29, %s4044_s29, %s4045_s19  }
 0x12c   :  { %4016 = dma.done.wait [#allocation3], 512  }
 0x12d   :  { %4017 = vsyncadd [#allocation3], 4294966784 }
 0x12e   :  { %4018 = dma.done.wait [#allocation6], 272  }
 0x12f   :  { %4019 = vsyncadd [#allocation6], 4294967024 }
 0x130   :  { %4020 = dma.done.wait [#allocation9], 288  }
 0x131   :  { %4021 = vsyncadd [#allocation9], 4294967008 }
 0x132   :  { %4022 = dma.done.wait [#allocation12], 544  }
 0x133   :  { %4023 = vsyncadd [#allocation12], 4294966752 }
 0x134   :  { %4024 = dma.done.wait [#allocation15], 544  }
 0x135   :  { %4025 = vsyncadd [#allocation15], 4294966752 }
 0x136   :  { %4026 = dma.done.wait [#allocation18], 64  }
 0x137   :  { %4027 = vsyncadd [#allocation18], 4294967232 }
 0x138   :  { %4028 = dma.done.wait [#allocation21], 544  }
 0x139   :  { %4029 = vsyncadd [#allocation21], 4294966752 }
 0x13a   :  { %4030 = dma.done.wait [#allocation24], 1056  }
 0x13b   :  { %4031 = vsyncadd [#allocation24], 4294966240 }
 0x13c   :  { %4032 = dma.done.wait [#allocation27], 64  }
 0x13d   :  { %4033 = vsyncadd [#allocation27], 4294967232  ;;  %v3429_v0 = vld [vmem:[#allocation5] sm:$0xff]   ;;  %v3430_v1 = vld [vmem:[#allocation5 + $0x8] sm:$0xff]   ;;  %vm328_vm0 = vcmask 261120   ;;  %s4057_s16 = smov 96  }
 0x13e   :  { %3208 = vmatprep.subr.bf16.mxu0 %v3429_v0  ;;  %3400 = vmatprep.subr.bf16.mxu1 %v3429_v0  ;;  %v3431_v2 = vld [vmem:[#allocation2] sm:$0xff]   ;;  %v3432_v3 = vld [vmem:[#allocation2 + $0x8] sm:$0xff]   ;;  %v3433_v4 = vld [vmem:[#allocation2 + $0x10] sm:$0xff]   ;;  %vm911_vm1 = vcmask 1041408   ;;  %vm758_vm2 = vcmask 31744   ;;  %vm1457_vm3 = vcmask 523264  }
 0x13f   :  { %3209 = vmatpush3.bf16.msra.mxu0 %v3429_v0  ;;  %3402 = vmatpush3.bf16.msra.mxu1 %v3429_v0  ;;  %v3434_v5 = vld [vmem:[#allocation2 + $0x18] sm:$0xff]   ;;  %v3435_v6 = vld [vmem:[#allocation11] sm:$0xff]   ;;  %v3436_v7 = vld [vmem:[#allocation11 + $0x8] sm:$0xff]   ;;  %vm2949_vm4 = vcmask 257024   ;;  %s4058_s29 = smov [#allocation29]  }
 0x140   :  { %3210 = vmatprep.subr.bf16.mxu0 %v3430_v1  ;;  %3212 = vmatprep.mubr.msk.bf16.mxu0 %vm328_vm0, %v3431_v2  ;;  %v2993_v10 = vld [vmem:[#allocation7] ss:$0 sm:$0xff]  ;;  %v3437_v29 = vld [vmem:[#allocation8] sm:$0xff]   ;;  %v3438_v30 = vld [vmem:[#allocation8 + $0x8] sm:$0xff]   ;;  %s2963_s19 = sshll.u32 %s4058_s29, 4  ;;  %s2964_s19 = int_to_ptr.vmem [resolvable:$true] %s2963_s19 }
 0x141   :  { %3401 = vmatprep.subr.bf16.mxu1 %v3430_v1  ;;  %3216 = vmatprep.mubr.msk.bf16.mxu1 %vm328_vm0, %v3433_v4  ;;  %v2994_v31 = vld [vmem:[#allocation13] ss:$0 sm:$0xff]  ;;  %s3994_s7 = scalar_lea.vmem %s2964_s19, 512  ;;  %p3999_p11 = scmp.lt.s32.totalorder %s2964_s19, %s2964_s19 }
 0x142   :  { %p3995_p10 = scmp.ne.s32.totalorder %s2964_s19, %s3994_s7  ;;  %p4000_p12 = scmp.lt.s32.totalorder %s3994_s7, %s3994_s7 }
 0x143   :  { %3211 = vmatpush3.bf16.msra.mxu0 %v3430_v1  ;;  %3403 = vmatpush3.bf16.msra.mxu1 %v3430_v1 }
 0x144   :  { %3220 = vmatprep.subr.bf16.mxu1 %v3435_v6  ;;  %3232 = vmatprep.subr.bf16.mxu0 %v3437_v29  ;;  %p4001_p13 = por %p4000_p12, %p3999_p11 }
 0x146   :  { %3213 = vmatmul.mubr.msk.bf16.vlgmr.msra.gmra.mrb[0].mxu0 %vm328_vm0, %v3432_v3  ;;  %3217 = vmatmul.mubr.msk.bf16.vlgmr.msra.gmra.mrb[0].mxu1 %vm328_vm0, %v3434_v5  ;;  %p4002_p0 = pnand %p4001_p13, %p3995_p10 }
 0x147   :  { %3221 = vmatpush3.bf16.msra.mxu1 %v3435_v6  ;;  %3233 = vmatpush3.bf16.msra.mxu0 %v3437_v29 }
 0x148   :  { %3222 = vmatprep.subr.bf16.mxu1 %v3436_v7  ;;  %3234 = vmatprep.subr.bf16.mxu0 %v3438_v30 }
 0x14b   :  { %3223 = vmatpush3.bf16.msra.mxu1 %v3436_v7  ;;  %3235 = vmatpush3.bf16.msra.mxu0 %v3438_v30 }
 0x219   :  { %v3214_v8 = vpop.f32.mrb[0].mxu0  ;;  %v3218_v9 = vpop.f32.mrb[0].mxu1 }
 0x21a   :  { %v375_v11 = vpop.f32.mrb[1].mxu0  ;;  %v391_v12 = vpop.f32.mrb[1].mxu1  ;;  %v4461_v22 = vadd.f32 %v3214_v8, %v2993_v10  ;;  %v4472_v26 = vadd.f32 %v3218_v9, %v2993_v10 }
 0x21b   :  { %v3215_v13 = vpop.f32.mrb[2].mxu0  ;;  %v4451_v14 = vadd.f32 %v2993_v10, %v391_v12  ;;  %v3219_v15 = vpop.f32.mrb[2].mxu1  ;;  %v4455_v19 = vadd.f32 %v2993_v10, %v375_v11 }
 0x21c   :  { %v4453_v16 = vadd.f32 %v3215_v13, %v2993_v10  ;;  %v378_v17 = vpop.f32.mrb[3].mxu0  ;;  %v394_v18 = vpop.f32.mrb[3].mxu1  ;;  %v4474_v27 = vadd.f32 %v3219_v15, %v2993_v10 }
 0x21d   :  { %v4457_v20 = vadd.f32 %v2993_v10, %v378_v17  ;;  %v4459_v21 = vadd.f32 %v2993_v10, %v394_v18  ;;  %v425_v18 = vld [vmem:[#allocation10] sm:$0x3] }
 0x21e   :  { %v455_v25 = vpack.c.bf16 %v4453_v16, %v4461_v22  ;;  %v457_v28 = vpack.c.bf16 %v4474_v27, %v4472_v26  ;;  %3404 = vmatprep.subr.msk.bf16.mxu1 %vm911_vm1, %v425_v18 }
 0x21f   :  { %v454_v23 = vpack.c.bf16 %v4457_v20, %v4455_v19  ;;  %v456_v24 = vpack.c.bf16 %v4459_v21, %v4451_v14 }
 0x221   :  { %3224 = vmatprep.mubr.msk.bf16.mxu1 %vm328_vm0, %v454_v23  ;;  %v4505_v23 = vsel %vm911_vm1, %v425_v18, 0 }
 0x222   :  { %3225 = vmatmul.mubr.msk.bf16.vlgmr.msra.gmra.mrb[4].mxu1 %vm328_vm0, %v455_v25 }
 0x223   :  { %3228 = vmatprep.mubr.msk.bf16.mxu1 %vm328_vm0, %v456_v24  ;;  %3253 = vmatpush3.bf16.msra.mxu1 %v4505_v23  ;;  %v3439_v24 = vld [vmem:[#allocation14] sm:$0xff]  }
 0x224   :  { %3270 = vmatprep.subr.bf16.mxu0 %v3439_v24 }
 0x22a   :  { %3229 = vmatmul.mubr.msk.bf16.gmra.mrb[8].mxu1 %vm328_vm0, %v457_v28 }
 0x2f5   :  { %v3226_v32 = vpop.f32.mrb[4].mxu1 }
 0x2f6   :  { %v531_v33 = vadd.f32 %v3226_v32, %v2994_v31  ;;  %v522_v34 = vpop.f32.mrb[5].mxu1 }
 0x2f7   :  { %v523_v35 = vadd.f32 %v2994_v31, %v522_v34  ;;  %v3227_v36 = vpop.f32.mrb[6].mxu1 }
 0x2f8   :  { %565 = vrot.lane.b32.xlu1 %v531_v33, %s4057_s16  ;;  %v525_v37 = vpop.f32.mrb[7].mxu1  ;;  %v534_v38 = vadd.f32 %v3227_v36, %v2994_v31 }
 0x2f9   :  { %561 = vrot.lane.b32.xlu0 %v523_v35, %s4057_s16  ;;  %v526_v39 = vadd.f32 %v2994_v31, %v525_v37 }
 0x2fc   :  { %567 = vrot.lane.b32.xlu1 %v534_v38, %s4057_s16 }
 0x2fd   :  { %v3230_v40 = vpop.f32.mrb[8].mxu1  ;;  %563 = vrot.lane.b32.xlu0 %v526_v39, %s4057_s16 }
 0x2fe   :  { %v538_v41 = vpop.f32.mrb[9].mxu1  ;;  %v547_v46 = vadd.f32 %v3230_v40, %v2994_v31 }
 0x2ff   :  { %v539_v42 = vadd.f32 %v2994_v31, %v538_v41  ;;  %v3231_v43 = vpop.f32.mrb[10].mxu1 }
 0x300   :  { %v541_v44 = vpop.f32.mrb[11].mxu1  ;;  %v550_v47 = vadd.f32 %v3231_v43, %v2994_v31 }
 0x301   :  { %v542_v45 = vadd.f32 %v2994_v31, %v541_v44  ;;  %569 = vrot.lane.b32.xlu0 %v539_v42, %s4057_s16 }
 0x303   :  { %571 = vrot.lane.b32.xlu1 %v542_v45, %s4057_s16 }
 0x305   :  { %573 = vrot.lane.b32.xlu0 %v547_v46, %s4057_s16 }
 0x307   :  { %575 = vrot.lane.b32.xlu1 %v550_v47, %s4057_s16 }
 0x309   :  { %1012 = vrot.lane.b32.xlu0 %v523_v35, %s4038_s22 }
 0x30b   :  { %1014 = vrot.lane.b32.xlu1 %v526_v39, %s4038_s22 }
 0x30d   :  { %1020 = vrot.lane.b32.xlu0 %v539_v42, %s4038_s22 }
 0x30f   :  { %1018 = vrot.lane.b32.xlu1 %v534_v38, %s4038_s22 }
 0x311   :  { %1016 = vrot.lane.b32.xlu0 %v531_v33, %s4038_s22 }
 0x313   :  { %1022 = vrot.lane.b32.xlu1 %v542_v45, %s4038_s22 }
 0x315   :  { %1024 = vrot.lane.b32.xlu0 %v547_v46, %s4038_s22 }
 0x317   :  { %1026 = vrot.lane.b32.xlu1 %v550_v47, %s4038_s22 }
 0x36a   :  { %v566_v48 = vpop.permute.xlu1 %565 }
 0x36b   :  { %v562_v49 = vpop.permute.xlu0 %561  ;;  %v587_v55 = vmul.f32 %v566_v48, %v531_v33  ;;  %v595_v9 = vmul.f32 %v566_v48, %v547_v46 }
 0x36c   :  { %v585_v53 = vmul.f32 %v562_v49, %v523_v35  ;;  %v593_v4 = vmul.f32 %v562_v49, %v539_v42 }
 0x36e   :  { %v568_v50 = vpop.permute.xlu1 %567 }
 0x36f   :  { %v588_v51 = vmul.f32 %v568_v50, %v534_v38  ;;  %v564_v52 = vpop.permute.xlu0 %563  ;;  %v596_v7 = vmul.f32 %v568_v50, %v550_v47 }
 0x370   :  { %v586_v54 = vmul.f32 %v564_v52, %v526_v39  ;;  %v594_v0 = vmul.f32 %v564_v52, %v542_v45 }
 0x371   :  { %v602_v57 = vpack.c.bf16 %v588_v51, %v587_v55  ;;  %v606_v11 = vpack.c.bf16 %v596_v7, %v595_v9 }
 0x372   :  { %v601_v56 = vpack.c.bf16 %v586_v54, %v585_v53  ;;  %v605_v6 = vpack.c.bf16 %v594_v0, %v593_v4 }
 0x373   :  { %v570_v58 = vpop.permute.xlu0 %569 }
 0x374   :  { %3236 = vmatprep.mubr.msk.bf16.mxu0 %vm328_vm0, %v601_v56  ;;  %v589_v60 = vmul.f32 %v570_v58, %v523_v35  ;;  %v597_v10 = vmul.f32 %v570_v58, %v539_v42 }
 0x375   :  { %v572_v59 = vpop.permute.xlu1 %571  ;;  %3237 = vmatmul.mubr.msk.bf16.vlgmr.msra.gmra.mrb[4].mxu0 %vm328_vm0, %v602_v57 }
 0x376   :  { %v590_v61 = vmul.f32 %v572_v59, %v526_v39  ;;  %v598_v8 = vmul.f32 %v572_v59, %v542_v45  ;;  %3271 = vmatpush3.bf16.msra.mxu0 %v3439_v24 }
 0x377   :  { %v574_v62 = vpop.permute.xlu0 %573 }
 0x378   :  { %v603_v63 = vpack.c.bf16 %v590_v61, %v589_v60  ;;  %v591_v2 = vmul.f32 %v574_v62, %v531_v33  ;;  %v607_v12 = vpack.c.bf16 %v598_v8, %v597_v10  ;;  %v599_v15 = vmul.f32 %v574_v62, %v547_v46 }
 0x379   :  { %v576_v1 = vpop.permute.xlu1 %575 }
 0x37a   :  { %v592_v3 = vmul.f32 %v576_v1, %v534_v38  ;;  %3240 = vmatprep.mubr.msk.bf16.mxu0 %vm328_vm0, %v603_v63  ;;  %v600_v13 = vmul.f32 %v576_v1, %v550_v47 }
 0x37c   :  { %v604_v5 = vpack.c.bf16 %v592_v3, %v591_v2  ;;  %v608_v17 = vpack.c.bf16 %v600_v13, %v599_v15 }
 0x37e   :  { %3241 = vmatmul.mubr.msk.bf16.gmra.mrb[8].mxu0 %vm328_vm0, %v604_v5 }
 0x37f   :  { %3244 = vmatprep.mubr.msk.bf16.mxu0 %vm328_vm0, %v605_v6 }
 0x386   :  { %3245 = vmatmul.mubr.msk.bf16.gmra.mrb[12].mxu0 %vm328_vm0, %v606_v11 }
 0x387   :  { %3248 = vmatprep.mubr.msk.bf16.mxu0 %vm328_vm0, %v607_v12 }
 0x38e   :  { %3249 = vmatmul.mubr.msk.bf16.gmra.mrb[16].mxu0 %vm328_vm0, %v608_v17 }
 0x448   :  { %v3238_v25 = vpop.f32.mrb[4].mxu0 }
 0x449   :  { %v679_v28 = vpop.f32.mrb[5].mxu0  ;;  %v744_v31 = vmul.f32 0.35355338, %v3238_v25 }
 0x44a   :  { %v3239_v29 = vpop.f32.mrb[6].mxu0  ;;  %v742_v32 = vmul.f32 0.35355338, %v679_v28 }
 0x44b   :  { %v682_v30 = vpop.f32.mrb[7].mxu0  ;;  %v745_v33 = vmul.f32 0.35355338, %v3239_v29  ;;  %v765_v40 = vsel %vm758_vm2, %v744_v31, -inf }
 0x44c   :  { %v743_v35 = vmul.f32 0.35355338, %v682_v30  ;;  %v759_v44 = vsel %vm758_vm2, %v742_v32, -inf }
 0x44d   :  { %v768_v48 = vsel %vm758_vm2, %v745_v33, -inf }
 0x44e   :  { %v762_v49 = vsel %vm758_vm2, %v743_v35, -inf }
 0x451   :  { %v3242_v34 = vpop.f32.mrb[8].mxu0 }
 0x452   :  { %v748_v36 = vmul.f32 0.35355338, %v3242_v34  ;;  %v695_v37 = vpop.f32.mrb[9].mxu0 }
 0x453   :  { %v746_v38 = vmul.f32 0.35355338, %v695_v37  ;;  %v3243_v39 = vpop.f32.mrb[10].mxu0 }
 0x454   :  { %v766_v41 = vsel %vm758_vm2, %v748_v36, -inf  ;;  %v749_v42 = vmul.f32 0.35355338, %v3243_v39  ;;  %v698_v43 = vpop.f32.mrb[11].mxu0 }
 0x455   :  { %v767_v45 = vmax.f32 %v765_v40, %v766_v41  ;;  %v760_v46 = vsel %vm758_vm2, %v746_v38, -inf  ;;  %v747_v47 = vmul.f32 0.35355338, %v698_v43 }
 0x456   :  { %v761_v50 = vmax.f32 %v759_v44, %v760_v46  ;;  %v769_v51 = vsel %vm758_vm2, %v749_v42, -inf }
 0x457   :  { %v785_v52 = vsub.f32 %v744_v31, %v767_v45  ;;  %v789_v53 = vsub.f32 %v748_v36, %v767_v45  ;;  %v770_v54 = vmax.f32 %v768_v48, %v769_v51  ;;  %v763_v55 = vsel %vm758_vm2, %v747_v47, -inf }
 0x458   :  { %v783_v56 = vsub.f32 %v742_v32, %v761_v50  ;;  %v787_v57 = vsub.f32 %v746_v38, %v761_v50  ;;  %v764_v58 = vmax.f32 %v762_v49, %v763_v55 }
 0x459   :  { %v803_v59 = vmul.f32 1.442695, %v785_v52  ;;  %v811_v60 = vmul.f32 1.442695, %v789_v53  ;;  %v786_v61 = vsub.f32 %v745_v33, %v770_v54  ;;  %v790_v62 = vsub.f32 %v749_v42, %v770_v54  ;;  %v3246_v63 = vpop.f32.mrb[12].mxu0 }
 0x45a   :  { %v799_v0 = vmul.f32 1.442695, %v783_v56  ;;  %v807_v1 = vmul.f32 1.442695, %v787_v57  ;;  %v784_v2 = vsub.f32 %v743_v35, %v764_v58  ;;  %v788_v3 = vsub.f32 %v747_v47, %v764_v58  ;;  %v711_v4 = vpop.f32.mrb[13].mxu0 }
 0x45b   :  { %3457 = vpow2.f32 %v803_v59  ;;  %v805_v5 = vmul.f32 1.442695, %v786_v61  ;;  %v813_v6 = vmul.f32 1.442695, %v790_v62  ;;  %v3247_v8 = vpop.f32.mrb[14].mxu0 }
 0x45c   :  { %3459 = vpow2.f32 %v811_v60  ;;  %v801_v7 = vmul.f32 1.442695, %v784_v2  ;;  %v809_v9 = vmul.f32 1.442695, %v788_v3  ;;  %v714_v10 = vpop.f32.mrb[15].mxu0 }
 0x45d   :  { %3461 = vpow2.f32 %v799_v0  ;;  %v752_v11 = vmul.f32 0.35355338, %v3246_v63  ;;  %v750_v12 = vmul.f32 0.35355338, %v711_v4  ;;  %v753_v13 = vmul.f32 0.35355338, %v3247_v8 }
 0x45e   :  { %3463 = vpow2.f32 %v807_v1  ;;  %v751_v35 = vmul.f32 0.35355338, %v714_v10 }
 0x45f   :  { %3465 = vpow2.f32 %v805_v5  ;;  %v777_v28 = vsel %vm758_vm2, %v752_v11, -inf  ;;  %v771_v29 = vsel %vm758_vm2, %v750_v12, -inf  ;;  %v780_v34 = vsel %vm758_vm2, %v753_v13, -inf }
 0x460   :  { %3467 = vpow2.f32 %v813_v6  ;;  %v774_v4 = vsel %vm758_vm2, %v751_v35, -inf }
 0x461   :  { %3469 = vpow2.f32 %v801_v7  ;;  %v3250_v15 = vpop.f32.mrb[16].mxu0 }
 0x462   :  { %3471 = vpow2.f32 %v809_v9  ;;  %v756_v17 = vmul.f32 0.35355338, %v3250_v15  ;;  %v727_v18 = vpop.f32.mrb[17].mxu0 }
 0x463   :  { %v754_v24 = vmul.f32 0.35355338, %v727_v18  ;;  %v3251_v25 = vpop.f32.mrb[18].mxu0 }
 0x464   :  { %v778_v30 = vsel %vm758_vm2, %v756_v17, -inf  ;;  %v757_v31 = vmul.f32 0.35355338, %v3251_v25  ;;  %v730_v32 = vpop.f32.mrb[19].mxu0 }
 0x465   :  { %v3458_v33 = vpop.eup %3457  ;;  %v779_v36 = vmax.f32 %v777_v28, %v778_v30  ;;  %v772_v37 = vsel %vm758_vm2, %v754_v24, -inf  ;;  %v755_v42 = vmul.f32 0.35355338, %v730_v32 }
 0x466   :  { %v3460_v38 = vpop.eup %3459  ;;  %v837_v39 = vsel %vm758_vm2, %v3458_v33, 0.0  ;;  %v773_v40 = vmax.f32 %v771_v29, %v772_v37  ;;  %v781_v41 = vsel %vm758_vm2, %v757_v31, -inf }
 0x467   :  { %v3462_v43 = vpop.eup %3461  ;;  %v838_v44 = vsel %vm758_vm2, %v3460_v38, 0.0  ;;  %v793_v45 = vsub.f32 %v752_v11, %v779_v36  ;;  %v797_v46 = vsub.f32 %v756_v17, %v779_v36  ;;  %v782_v47 = vmax.f32 %v780_v34, %v781_v41 }
 0x468   :  { %v3464_v48 = vpop.eup %3463  ;;  %v839_v49 = vadd.f32 %v838_v44, %v837_v39  ;;  %v831_v50 = vsel %vm758_vm2, %v3462_v43, 0.0  ;;  %v791_v51 = vsub.f32 %v750_v12, %v773_v40  ;;  %v795_v52 = vsub.f32 %v754_v24, %v773_v40 }
 0x469   :  { %v3466_v53 = vpop.eup %3465  ;;  %v832_v54 = vsel %vm758_vm2, %v3464_v48, 0.0  ;;  %v819_v55 = vmul.f32 1.442695, %v793_v45  ;;  %v827_v56 = vmul.f32 1.442695, %v797_v46  ;;  %v794_v57 = vsub.f32 %v753_v13, %v782_v47 }
 0x46a   :  { %v3468_v58 = vpop.eup %3467  ;;  %3473 = vrcp.f32 %v839_v49  ;;  %v833_v59 = vadd.f32 %v832_v54, %v831_v50  ;;  %v840_v60 = vsel %vm758_vm2, %v3466_v53, 0.0  ;;  %v815_v63 = vmul.f32 1.442695, %v791_v51 }
 0x46b   :  { %v3470_v61 = vpop.eup %3469  ;;  %v841_v62 = vsel %vm758_vm2, %v3468_v58, 0.0  ;;  %3475 = vpow2.f32 %v819_v55  ;;  %v798_v0 = vsub.f32 %v757_v31, %v782_v47  ;;  %v823_v6 = vmul.f32 1.442695, %v795_v52 }
 0x46c   :  { %v3472_v1 = vpop.eup %3471  ;;  %3477 = vrcp.f32 %v833_v59  ;;  %v842_v2 = vadd.f32 %v841_v62, %v840_v60  ;;  %v834_v3 = vsel %vm758_vm2, %v3470_v61, 0.0  ;;  %v775_v7 = vsel %vm758_vm2, %v755_v42, -inf }
 0x46d   :  { %v835_v5 = vsel %vm758_vm2, %v3472_v1, 0.0  ;;  %3479 = vpow2.f32 %v827_v56  ;;  %v821_v9 = vmul.f32 1.442695, %v794_v57  ;;  %v776_v10 = vmax.f32 %v774_v4, %v775_v7 }
 0x46e   :  { %3481 = vrcp.f32 %v842_v2  ;;  %v836_v8 = vadd.f32 %v835_v5, %v834_v3  ;;  %v829_v11 = vmul.f32 1.442695, %v798_v0 }
 0x46f   :  { %3483 = vpow2.f32 %v815_v63  ;;  %v792_v12 = vsub.f32 %v751_v35, %v776_v10  ;;  %v796_v13 = vsub.f32 %v755_v42, %v776_v10 }
 0x470   :  { %3485 = vrcp.f32 %v836_v8 }
 0x471   :  { %3487 = vpow2.f32 %v823_v6  ;;  %v817_v15 = vmul.f32 1.442695, %v792_v12  ;;  %v825_v17 = vmul.f32 1.442695, %v796_v13  ;;  %v3440_v13 = vld [vmem:[#allocation14 + $0x8] sm:$0xff]  }
 0x472   :  { %3489 = vpow2.f32 %v821_v9  ;;  %3272 = vmatprep.subr.bf16.mxu0 %v3440_v13 }
 0x473   :  { %3491 = vpow2.f32 %v829_v11  ;;  %3273 = vmatpush3.bf16.msra.mxu0 %v3440_v13 }
 0x474   :  { %v3474_v18 = vpop.eup %3473  ;;  %3493 = vpow2.f32 %v817_v15  ;;  %v1013_v15 = vpop.permute.xlu0 %1012 }
 0x475   :  { %v3476_v24 = vpop.eup %3475  ;;  %v860_v25 = vmul.f32 %v3474_v18, %v3458_v33  ;;  %3495 = vpow2.f32 %v825_v17  ;;  %v865_v28 = vmul.f32 %v3474_v18, %v3460_v38  ;;  %v1015_v17 = vpop.permute.xlu1 %1014 }
 0x476   :  { %v3478_v29 = vpop.eup %3477  ;;  %v849_v30 = vsel %vm758_vm2, %v3476_v24, 0.0 }
 0x477   :  { %v3480_v31 = vpop.eup %3479  ;;  %v856_v32 = vmul.f32 %v3478_v29, %v3462_v43  ;;  %v863_v34 = vmul.f32 %v3478_v29, %v3464_v48 }
 0x478   :  { %v3482_v36 = vpop.eup %3481  ;;  %v850_v35 = vsel %vm758_vm2, %v3480_v31, 0.0  ;;  %v1021_v18 = vpop.permute.xlu0 %1020 }
 0x479   :  { %v3484_v37 = vpop.eup %3483  ;;  %v862_v39 = vmul.f32 %v3482_v36, %v3466_v53  ;;  %v851_v40 = vadd.f32 %v850_v35, %v849_v30  ;;  %v866_v41 = vmul.f32 %v3482_v36, %v3468_v58 }
 0x47a   :  { %v3486_v42 = vpop.eup %3485  ;;  %v843_v44 = vsel %vm758_vm2, %v3484_v37, 0.0 }
 0x47b   :  { %v3488_v45 = vpop.eup %3487  ;;  %3497 = vrcp.f32 %v851_v40  ;;  %v858_v33 = vmul.f32 %v3486_v42, %v3470_v61  ;;  %v880_v38 = vpack.c.bf16 %v862_v39, %v860_v25  ;;  %v864_v46 = vmul.f32 %v3486_v42, %v3472_v1 }
 0x47c   :  { %v3490_v47 = vpop.eup %3489  ;;  %v844_v49 = vsel %vm758_vm2, %v3488_v45, 0.0  ;;  %v882_v43 = vpack.c.bf16 %v866_v41, %v865_v28  ;;  %v1017_v29 = vpop.permute.xlu0 %1016 }
 0x47d   :  { %v3492_v48 = vpop.eup %3491  ;;  %v845_v50 = vadd.f32 %v844_v49, %v843_v44  ;;  %v852_v51 = vsel %vm758_vm2, %v3490_v47, 0.0  ;;  %v879_v52 = vpack.c.bf16 %v858_v33, %v856_v32  ;;  %v881_v53 = vpack.c.bf16 %v864_v46, %v863_v34 }
 0x47e   :  { %v3494_v54 = vpop.eup %3493  ;;  %v853_v55 = vsel %vm758_vm2, %v3492_v48, 0.0 }
 0x47f   :  { %v3496_v56 = vpop.eup %3495  ;;  %3499 = vrcp.f32 %v845_v50  ;;  %v854_v57 = vadd.f32 %v853_v55, %v852_v51  ;;  %v846_v58 = vsel %vm758_vm2, %v3494_v54, 0.0  ;;  %3254 = vmatprep.mubr.msk.bf16.mxu1 %vm758_vm2, %v879_v52 }
 0x480   :  { %v847_v59 = vsel %vm758_vm2, %v3496_v56, 0.0  ;;  %3255 = vmatmul.mubr.msk.bf16.vlgmr.msra.gmra.mrb[12].mxu1 %vm758_vm2, %v880_v38  ;;  %v1025_v36 = vpop.permute.xlu0 %1024 }
 0x481   :  { %3501 = vrcp.f32 %v854_v57  ;;  %v848_v60 = vadd.f32 %v847_v59, %v846_v58  ;;  %3258 = vmatprep.mubr.msk.bf16.mxu1 %vm758_vm2, %v881_v53 }
 0x483   :  { %3503 = vrcp.f32 %v848_v60 }
 0x485   :  { %v3498_v61 = vpop.eup %3497 }
 0x486   :  { %v872_v62 = vmul.f32 %v3498_v61, %v3476_v24  ;;  %v877_v63 = vmul.f32 %v3498_v61, %v3480_v31  ;;  %v1019_v24 = vpop.permute.xlu1 %1018 }
 0x488   :  { %3259 = vmatmul.mubr.msk.bf16.gmra.mrb[16].mxu1 %vm758_vm2, %v882_v43 }
 0x489   :  { %v3500_v0 = vpop.eup %3499 }
 0x48a   :  { %v868_v1 = vmul.f32 %v3500_v0, %v3484_v37  ;;  %v875_v2 = vmul.f32 %v3500_v0, %v3488_v45  ;;  %v1023_v32 = vpop.permute.xlu1 %1022 }
 0x48b   :  { %v3502_v3 = vpop.eup %3501 }
 0x48c   :  { %v874_v4 = vmul.f32 %v3502_v3, %v3490_v47  ;;  %v878_v5 = vmul.f32 %v3502_v3, %v3492_v48 }
 0x48d   :  { %v3504_v6 = vpop.eup %3503 }
 0x48e   :  { %v870_v7 = vmul.f32 %v3504_v6, %v3494_v54  ;;  %v884_v8 = vpack.c.bf16 %v874_v4, %v872_v62  ;;  %v876_v9 = vmul.f32 %v3504_v6, %v3496_v56  ;;  %v886_v10 = vpack.c.bf16 %v878_v5, %v877_v63  ;;  %v1027_v42 = vpop.permute.xlu1 %1026 }
 0x490   :  { %v883_v11 = vpack.c.bf16 %v870_v7, %v868_v1  ;;  %v885_v12 = vpack.c.bf16 %v876_v9, %v875_v2 }
 0x492   :  { %3262 = vmatprep.mubr.msk.bf16.mxu1 %vm758_vm2, %v883_v11 }
 0x493   :  { %3263 = vmatmul.mubr.msk.bf16.gmra.mrb[20].mxu1 %vm758_vm2, %v884_v8 }
 0x494   :  { %3266 = vmatprep.mubr.msk.bf16.mxu1 %vm758_vm2, %v885_v12 }
 0x49b   :  { %3267 = vmatmul.mubr.msk.bf16.gmra.mrb[24].mxu1 %vm758_vm2, %v886_v10 }
 0x553   :  { %v3256_v25 = vpop.f32.mrb[12].mxu1 }
 0x554   :  { %v949_v28 = vpop.f32.mrb[13].mxu1  ;;  %v1038_v34 = vmul.f32 %v3256_v25, %v1017_v29 }
 0x555   :  { %v3257_v30 = vpop.f32.mrb[14].mxu1  ;;  %v1036_v35 = vmul.f32 %v1013_v15, %v949_v28 }
 0x556   :  { %v952_v31 = vpop.f32.mrb[15].mxu1  ;;  %v1039_v39 = vmul.f32 %v3257_v30, %v1019_v24  ;;  %v1058_v38 = vsel %vm328_vm0, %v1038_v34, 0.0 }
 0x557   :  { %v1037_v44 = vmul.f32 %v1015_v17, %v952_v31  ;;  %v1052_v43 = vsel %vm328_vm0, %v1036_v35, 0.0 }
 0x558   :  { %v1061_v52 = vsel %vm328_vm0, %v1039_v39, 0.0  ;;  %v3019_v39 = vld [vmem:[#allocation16] ss:$0 sm:$0xff] }
 0x559   :  { %v1055_v55 = vsel %vm328_vm0, %v1037_v44, 0.0 }
 0x55b   :  { %v3260_v37 = vpop.f32.mrb[16].mxu1 }
 0x55c   :  { %v1042_v40 = vmul.f32 %v3260_v37, %v1025_v36  ;;  %v965_v41 = vpop.f32.mrb[17].mxu1 }
 0x55d   :  { %v1040_v45 = vmul.f32 %v1021_v18, %v965_v41  ;;  %v3261_v33 = vpop.f32.mrb[18].mxu1 }
 0x55e   :  { %v1059_v46 = vsel %vm328_vm0, %v1042_v40, 0.0  ;;  %v1043_v47 = vmul.f32 %v3261_v33, %v1027_v42  ;;  %v968_v49 = vpop.f32.mrb[19].mxu1 }
 0x55f   :  { %v1060_v48 = vadd.f32 %v1059_v46, %v1058_v38  ;;  %v1053_v50 = vsel %vm328_vm0, %v1040_v45, 0.0  ;;  %v1041_v51 = vmul.f32 %v1023_v32, %v968_v49 }
 0x560   :  { %v1054_v53 = vadd.f32 %v1053_v50, %v1052_v43  ;;  %v1062_v54 = vsel %vm328_vm0, %v1043_v47, 0.0 }
 0x561   :  { %v1063_v56 = vadd.f32 %v1062_v54, %v1061_v52  ;;  %v1056_v57 = vsel %vm328_vm0, %v1041_v51, 0.0 }
 0x562   :  { %v1057_v58 = vadd.f32 %v1056_v57, %v1055_v55 }
 0x563   :  { %v1077_v59 = vpack.c.bf16 %v1063_v56, %v1060_v48 }
 0x564   :  { %v1076_v60 = vpack.c.bf16 %v1057_v58, %v1054_v53 }
 0x566   :  { %v3264_v61 = vpop.f32.mrb[20].mxu1  ;;  %3274 = vmatprep.mubr.msk.bf16.mxu0 %vm328_vm0, %v1076_v60 }
 0x567   :  { %v981_v62 = vpop.f32.mrb[21].mxu1  ;;  %3275 = vmatmul.mubr.msk.bf16.vlgmr.msra.gmra.mrb[20].mxu0 %vm328_vm0, %v1077_v59  ;;  %v1046_v1 = vmul.f32 %v3264_v61, %v1017_v29 }
 0x568   :  { %v3265_v63 = vpop.f32.mrb[22].mxu1  ;;  %v1044_v2 = vmul.f32 %v1013_v15, %v981_v62 }
 0x569   :  { %v984_v0 = vpop.f32.mrb[23].mxu1  ;;  %v1047_v4 = vmul.f32 %v3265_v63, %v1019_v24  ;;  %v1070_v10 = vsel %vm328_vm0, %v1046_v1, 0.0 }
 0x56a   :  { %v1045_v7 = vmul.f32 %v1015_v17, %v984_v0  ;;  %v1064_v25 = vsel %vm328_vm0, %v1044_v2, 0.0 }
 0x56b   :  { %v1073_v15 = vsel %vm328_vm0, %v1047_v4, 0.0 }
 0x56c   :  { %v1067_v17 = vsel %vm328_vm0, %v1045_v7, 0.0 }
 0x56e   :  { %v3268_v3 = vpop.f32.mrb[24].mxu1 }
 0x56f   :  { %v1050_v5 = vmul.f32 %v3268_v3, %v1025_v36  ;;  %v997_v6 = vpop.f32.mrb[25].mxu1 }
 0x570   :  { %v1048_v8 = vmul.f32 %v1021_v18, %v997_v6  ;;  %v3269_v9 = vpop.f32.mrb[26].mxu1 }
 0x571   :  { %v1071_v11 = vsel %vm328_vm0, %v1050_v5, 0.0  ;;  %v1051_v12 = vmul.f32 %v3269_v9, %v1027_v42  ;;  %v1000_v13 = vpop.f32.mrb[27].mxu1 }
 0x572   :  { %v1072_v28 = vadd.f32 %v1071_v11, %v1070_v10  ;;  %v1065_v30 = vsel %vm328_vm0, %v1048_v8, 0.0  ;;  %v1049_v29 = vmul.f32 %v1023_v32, %v1000_v13 }
 0x573   :  { %v1066_v24 = vadd.f32 %v1065_v30, %v1064_v25  ;;  %v1074_v31 = vsel %vm328_vm0, %v1051_v12, 0.0 }
 0x574   :  { %v1075_v18 = vadd.f32 %v1074_v31, %v1073_v15  ;;  %v1068_v34 = vsel %vm328_vm0, %v1049_v29, 0.0 }
 0x575   :  { %v1069_v36 = vadd.f32 %v1068_v34, %v1067_v17 }
 0x576   :  { %v1079_v35 = vpack.c.bf16 %v1075_v18, %v1072_v28 }
 0x577   :  { %v1078_v37 = vpack.c.bf16 %v1069_v36, %v1066_v24 }
 0x579   :  { %3278 = vmatprep.mubr.msk.bf16.mxu0 %vm328_vm0, %v1078_v37 }
 0x57a   :  { %3279 = vmatmul.mubr.msk.bf16.gmra.mrb[24].mxu0 %vm328_vm0, %v1079_v35 }
 0x63a   :  { %v3276_v40 = vpop.f32.mrb[20].mxu0 }
 0x63b   :  { %v1144_v32 = vpop.f32.mrb[21].mxu0  ;;  %v1153_v41 = vadd.f32 %v3276_v40, %v3019_v39 }
 0x63c   :  { %v1145_v42 = vadd.f32 %v3019_v39, %v1144_v32  ;;  %v3277_v44 = vpop.f32.mrb[22].mxu0 }
 0x63d   :  { %v1147_v45 = vpop.f32.mrb[23].mxu0  ;;  %v1156_v46 = vadd.f32 %v3277_v44, %v3019_v39  ;;  %v1177_v43 = vadd.f32 %v1153_v41, %v4461_v22 }
 0x63e   :  { %v1148_v33 = vadd.f32 %v3019_v39, %v1147_v45  ;;  %v1175_v38 = vadd.f32 %v1145_v42, %v4455_v19 }
 0x63f   :  { %v1189_v50 = vsel %vm328_vm0, %v1177_v43, 0.0  ;;  %v1178_v51 = vadd.f32 %v1156_v46, %v4453_v16 }
 0x640   :  { %v1183_v47 = vsel %vm328_vm0, %v1175_v38, 0.0  ;;  %v1176_v49 = vadd.f32 %v1148_v33, %v4457_v20 }
 0x641   :  { %1184 = vadd.xlane.f32.xlu0 %v1183_v47  ;;  %v1192_v52 = vsel %vm328_vm0, %v1178_v51, 0.0  ;;  %v3441_v47 = vld [vmem:[#allocation20] sm:$0xff]  }
 0x642   :  { %v1186_v48 = vsel %vm328_vm0, %v1176_v49, 0.0  ;;  %3282 = vmatprep.subr.bf16.mxu1 %v3441_v47 }
 0x643   :  { %1187 = vadd.xlane.f32.xlu1 %v1186_v48  ;;  %3283 = vmatpush3.bf16.msra.mxu1 %v3441_v47  ;;  %v3444_v48 = vld [vmem:[#allocation23 + $0x8] sm:$0xff]  }
 0x645   :  { %1190 = vadd.xlane.f32.xlu0 %v1189_v50 }
 0x649   :  { %1193 = vadd.xlane.f32.xlu0 %v1192_v52 }
 0x64d   :  { %v3280_v19 = vpop.f32.mrb[24].mxu0 }
 0x64e   :  { %v1160_v53 = vpop.f32.mrb[25].mxu0  ;;  %v1169_v54 = vadd.f32 %v3280_v19, %v3019_v39 }
 0x64f   :  { %v1161_v55 = vadd.f32 %v3019_v39, %v1160_v53  ;;  %v3281_v56 = vpop.f32.mrb[26].mxu0 }
 0x650   :  { %v1163_v20 = vpop.f32.mrb[27].mxu0  ;;  %v1172_v57 = vadd.f32 %v3281_v56, %v3019_v39  ;;  %v1181_v16 = vadd.f32 %v1169_v54, %v4472_v26 }
 0x651   :  { %v1164_v22 = vadd.f32 %v3019_v39, %v1163_v20  ;;  %v1179_v58 = vadd.f32 %v1161_v55, %v4451_v14 }
 0x652   :  { %v1182_v62 = vadd.f32 %v1172_v57, %v4474_v27  ;;  %v1201_v63 = vsel %vm328_vm0, %v1181_v16, 0.0 }
 0x653   :  { %v1195_v59 = vsel %vm328_vm0, %v1179_v58, 0.0  ;;  %v1180_v60 = vadd.f32 %v1164_v22, %v4459_v21 }
 0x654   :  { %1196 = vadd.xlane.f32.xlu1 %v1195_v59  ;;  %v1204_v0 = vsel %vm328_vm0, %v1182_v62, 0.0 }
 0x655   :  { %v1198_v61 = vsel %vm328_vm0, %v1180_v60, 0.0 }
 0x656   :  { %1199 = vadd.xlane.f32.xlu0 %v1198_v61 }
 0x658   :  { %1202 = vadd.xlane.f32.xlu1 %v1201_v63 }
 0x65a   :  { %1205 = vadd.xlane.f32.xlu0 %v1204_v0 }
 0x6ce   :  { %v1185_v1 = vpop.xlane.xlu0 %1184 }
 0x6cf   :  { %v1208_v14 = vmul.f32 0.03125, %v1185_v1 }
 0x6d0   :  { %v1188_v2 = vpop.xlane.xlu1 %1187 }
 0x6d1   :  { %v4584_v3 = vsub.f32 %v1175_v38, %v1208_v14  ;;  %v1209_v21 = vmul.f32 0.03125, %v1188_v2  ;;  %v3027_v14 = vld [vmem:[#allocation19] ss:$0 sm:$0xff] }
 0x6d2   :  { %v1191_v4 = vpop.xlane.xlu0 %1190 }
 0x6d3   :  { %v4586_v26 = vsub.f32 %v1176_v49, %v1209_v21  ;;  %v1210_v5 = vmul.f32 0.03125, %v1191_v4  ;;  %v1224_v27 = vmul.f32 %v4584_v3, %v4584_v3  ;;  %v3442_v49 = vld [vmem:[#allocation20 + $0x8] sm:$0xff]  }
 0x6d4   :  { %3284 = vmatprep.subr.bf16.mxu1 %v3442_v49 }
 0x6d5   :  { %v4590_v6 = vsub.f32 %v1177_v43, %v1210_v5  ;;  %v1232_v7 = vsel %vm328_vm0, %v1224_v27, 0.0  ;;  %v1225_v8 = vmul.f32 %v4586_v26, %v4586_v26  ;;  %3285 = vmatpush3.bf16.msra.mxu1 %v3442_v49  ;;  %v3443_v43 = vld [vmem:[#allocation23] sm:$0xff]  }
 0x6d6   :  { %1233 = vadd.xlane.f32.xlu1 %v1232_v7  ;;  %v1194_v9 = vpop.xlane.xlu0 %1193  ;;  %3294 = vmatprep.subr.bf16.mxu0 %v3443_v43 }
 0x6d7   :  { %v1211_v10 = vmul.f32 0.03125, %v1194_v9  ;;  %v1235_v11 = vsel %vm328_vm0, %v1225_v8, 0.0  ;;  %v1226_v12 = vmul.f32 %v4590_v6, %v4590_v6  ;;  %3295 = vmatpush3.bf16.msra.mxu0 %v3443_v43 }
 0x6d8   :  { %1236 = vadd.xlane.f32.xlu0 %v1235_v11  ;;  %3296 = vmatprep.subr.bf16.mxu0 %v3444_v48 }
 0x6d9   :  { %v4598_v13 = vsub.f32 %v1178_v51, %v1211_v10  ;;  %v1238_v25 = vsel %vm328_vm0, %v1226_v12, 0.0 }
 0x6da   :  { %1239 = vadd.xlane.f32.xlu1 %v1238_v25 }
 0x6db   :  { %v1227_v28 = vmul.f32 %v4598_v13, %v4598_v13  ;;  %3297 = vmatpush3.bf16.msra.mxu0 %v3444_v48 }
 0x6dd   :  { %v1241_v30 = vsel %vm328_vm0, %v1227_v28, 0.0 }
 0x6de   :  { %1242 = vadd.xlane.f32.xlu0 %v1241_v30 }
 0x6e1   :  { %v1197_v29 = vpop.xlane.xlu1 %1196 }
 0x6e2   :  { %v1212_v15 = vmul.f32 0.03125, %v1197_v29 }
 0x6e3   :  { %v1200_v24 = vpop.xlane.xlu0 %1199 }
 0x6e4   :  { %v4604_v31 = vsub.f32 %v1179_v58, %v1212_v15  ;;  %v1213_v17 = vmul.f32 0.03125, %v1200_v24 }
 0x6e5   :  { %v1203_v18 = vpop.xlane.xlu1 %1202 }
 0x6e6   :  { %v4606_v34 = vsub.f32 %v1180_v60, %v1213_v17  ;;  %v1214_v36 = vmul.f32 0.03125, %v1203_v18  ;;  %v1228_v35 = vmul.f32 %v4604_v31, %v4604_v31 }
 0x6e7   :  { %v1206_v37 = vpop.xlane.xlu0 %1205 }
 0x6e8   :  { %v4610_v39 = vsub.f32 %v1181_v16, %v1214_v36  ;;  %v1215_v40 = vmul.f32 0.03125, %v1206_v37  ;;  %v1244_v32 = vsel %vm328_vm0, %v1228_v35, 0.0  ;;  %v1229_v41 = vmul.f32 %v4606_v34, %v4606_v34  ;;  %v3026_v16 = vld [vmem:[#allocation17] ss:$0 sm:$0xff] }
 0x6e9   :  { %1245 = vadd.xlane.f32.xlu1 %v1244_v32 }
 0x6ea   :  { %v4615_v42 = vsub.f32 %v1182_v62, %v1215_v40  ;;  %v1247_v44 = vsel %vm328_vm0, %v1229_v41, 0.0  ;;  %v1230_v45 = vmul.f32 %v4610_v39, %v4610_v39 }
 0x6eb   :  { %1248 = vadd.xlane.f32.xlu0 %v1247_v44 }
 0x6ec   :  { %v1250_v33 = vsel %vm328_vm0, %v1230_v45, 0.0  ;;  %v1231_v38 = vmul.f32 %v4615_v42, %v4615_v42 }
 0x6ed   :  { %1251 = vadd.xlane.f32.xlu1 %v1250_v33 }
 0x6ee   :  { %v1253_v46 = vsel %vm328_vm0, %v1231_v38, 0.0 }
 0x6ef   :  { %1254 = vadd.xlane.f32.xlu0 %v1253_v46 }
 0x763   :  { %v1234_v50 = vpop.xlane.xlu1 %1233 }
 0x764   :  { %v1256_v51 = vmul.f32 0.03125, %v1234_v50  ;;  %v3446_v50 = vld [vmem:[#allocation23 + $0x18] sm:$0xff]  }
 0x765   :  { %v1237_v52 = vpop.xlane.xlu0 %1236 }
 0x766   :  { %v1264_v19 = vadd.f32 1e-05, %v1256_v51  ;;  %v1257_v53 = vmul.f32 0.03125, %v1237_v52  ;;  %v3617_v51 = vld [vmem:[#allocation8] sm:$0xff]   ;;  %v3028_v52 = vld [vmem:[#allocation22] ss:$0 sm:$0xff] }
 0x767   :  { %v1240_v54 = vpop.xlane.xlu1 %1239 }
 0x768   :  { %3505 = vrsqrt.f32 %v1264_v19  ;;  %v1265_v55 = vadd.f32 1e-05, %v1257_v53  ;;  %v1258_v56 = vmul.f32 0.03125, %v1240_v54 }
 0x76a   :  { %3507 = vrsqrt.f32 %v1265_v55  ;;  %v1266_v20 = vadd.f32 1e-05, %v1258_v56 }
 0x76b   :  { %v1243_v57 = vpop.xlane.xlu0 %1242 }
 0x76c   :  { %3509 = vrsqrt.f32 %v1266_v20  ;;  %v1259_v22 = vmul.f32 0.03125, %v1243_v57 }
 0x76e   :  { %v1267_v58 = vadd.f32 1e-05, %v1259_v22 }
 0x770   :  { %3511 = vrsqrt.f32 %v1267_v58 }
 0x772   :  { %v3506_v59 = vpop.eup %3505 }
 0x773   :  { %v1280_v60 = vmul.f32 %v3506_v59, %v4584_v3 }
 0x774   :  { %v3508_v61 = vpop.eup %3507 }
 0x775   :  { %v1281_v62 = vmul.f32 %v3508_v61, %v4586_v26  ;;  %v1294_v1 = vmul.f32 %v3026_v16, %v1280_v60 }
 0x776   :  { %v3510_v63 = vpop.eup %3509  ;;  %v1246_v0 = vpop.xlane.xlu1 %1245 }
 0x777   :  { %v1282_v2 = vmul.f32 %v3510_v63, %v4590_v6  ;;  %v1260_v21 = vmul.f32 0.03125, %v1246_v0  ;;  %v1295_v4 = vmul.f32 %v3026_v16, %v1281_v62  ;;  %v4629_v3 = vadd.f32 %v3027_v14, %v1294_v1  ;;  %v3618_v63 = vld [vmem:[#allocation8 + $0x8] sm:$0xff]  }
 0x778   :  { %v1249_v5 = vpop.xlane.xlu0 %1248 }
 0x779   :  { %v1268_v27 = vadd.f32 1e-05, %v1260_v21  ;;  %v1261_v7 = vmul.f32 0.03125, %v1249_v5  ;;  %v4627_v8 = vadd.f32 %v3027_v14, %v1295_v4  ;;  %v1296_v11 = vmul.f32 %v3026_v16, %v1282_v2 }
 0x77a   :  { %v3512_v9 = vpop.eup %3511  ;;  %v1252_v10 = vpop.xlane.xlu1 %1251 }
 0x77b   :  { %v1283_v26 = vmul.f32 %v3512_v9, %v4598_v13  ;;  %3513 = vrsqrt.f32 %v1268_v27  ;;  %v1269_v12 = vadd.f32 1e-05, %v1261_v7  ;;  %v1262_v25 = vmul.f32 0.03125, %v1252_v10 }
 0x77c   :  { %v1255_v28 = vpop.xlane.xlu0 %1254  ;;  %v1316_v6 = vpack.c.bf16 %v4627_v8, %v4629_v3  ;;  %v4635_v24 = vadd.f32 %v3027_v14, %v1296_v11 }
 0x77d   :  { %v1297_v30 = vmul.f32 %v3026_v16, %v1283_v26  ;;  %3515 = vrsqrt.f32 %v1269_v12  ;;  %v1263_v29 = vmul.f32 0.03125, %v1255_v28  ;;  %v1270_v15 = vadd.f32 1e-05, %v1262_v25  ;;  %v3035_v25 = vld [vmem:[#allocation25] ss:$0 sm:$0xff] }
 0x77e   :  { %3286 = vmatprep.mubr.msk.bf16.mxu1 %vm328_vm0, %v1316_v6 }
 0x77f   :  { %v4637_v17 = vadd.f32 %v3027_v14, %v1297_v30  ;;  %v1271_v18 = vadd.f32 1e-05, %v1263_v29  ;;  %3517 = vrsqrt.f32 %v1270_v15 }
 0x781   :  { %3519 = vrsqrt.f32 %v1271_v18  ;;  %v1317_v13 = vpack.c.bf16 %v4637_v17, %v4635_v24 }
 0x783   :  { %3287 = vmatmul.mubr.msk.bf16.vlgmr.msra.gmra.mrb[28].mxu1 %vm328_vm0, %v1317_v13 }
 0x785   :  { %v3514_v36 = vpop.eup %3513 }
 0x786   :  { %v1284_v35 = vmul.f32 %v3514_v36, %v4604_v31 }
 0x787   :  { %v3516_v37 = vpop.eup %3515 }
 0x788   :  { %v1285_v40 = vmul.f32 %v3516_v37, %v4606_v34  ;;  %v1298_v32 = vmul.f32 %v3026_v16, %v1284_v35 }
 0x789   :  { %v3518_v41 = vpop.eup %3517 }
 0x78a   :  { %v1299_v44 = vmul.f32 %v3026_v16, %v1285_v40  ;;  %v1286_v33 = vmul.f32 %v3518_v41, %v4610_v39  ;;  %v4646_v46 = vadd.f32 %v3027_v14, %v1298_v32 }
 0x78b   :  { %v3520_v45 = vpop.eup %3519 }
 0x78c   :  { %v1287_v38 = vmul.f32 %v3520_v45, %v4615_v42  ;;  %v4648_v47 = vadd.f32 %v3027_v14, %v1299_v44  ;;  %v1300_v49 = vmul.f32 %v3026_v16, %v1286_v33  ;;  %v3445_v42 = vld [vmem:[#allocation23 + $0x10] sm:$0xff]  }
 0x78d   :  { %3298 = vmatprep.subr.bf16.mxu0 %v3445_v42 }
 0x78e   :  { %v1318_v43 = vpack.c.bf16 %v4648_v47, %v4646_v46  ;;  %v1301_v31 = vmul.f32 %v3026_v16, %v1287_v38  ;;  %v4653_v34 = vadd.f32 %v3027_v14, %v1300_v49  ;;  %3299 = vmatpush3.bf16.msra.mxu0 %v3445_v42 }
 0x78f   :  { %3300 = vmatprep.subr.bf16.mxu0 %v3446_v50 }
 0x790   :  { %3290 = vmatprep.mubr.msk.bf16.mxu1 %vm328_vm0, %v1318_v43  ;;  %v4655_v48 = vadd.f32 %v3027_v14, %v1301_v31 }
 0x792   :  { %v1319_v39 = vpack.c.bf16 %v4655_v48, %v4653_v34  ;;  %3301 = vmatpush3.bf16.msra.mxu0 %v3446_v50 }
 0x793   :  { %3322 = vmatprep.subr.bf16.mxu0 %v3617_v51 }
 0x794   :  { %3291 = vmatmul.mubr.msk.bf16.gmra.mrb[32].mxu1 %vm328_vm0, %v1319_v39 }
 0x856   :  { %v3288_v19 = vpop.f32.mrb[28].mxu1 }
 0x857   :  { %v1393_v53 = vadd.f32 %v3288_v19, %v3028_v52  ;;  %v1384_v54 = vpop.f32.mrb[29].mxu1 }
 0x858   :  { %v1385_v55 = vadd.f32 %v3028_v52, %v1384_v54  ;;  %v3289_v56 = vpop.f32.mrb[30].mxu1 }
 0x859   :  { %v1396_v20 = vadd.f32 %v3289_v56, %v3028_v52  ;;  %v1387_v57 = vpop.f32.mrb[31].mxu1  ;;  %v1417_v58 = vmax.f32 %v1393_v53, 0.0 }
 0x85a   :  { %v1388_v22 = vadd.f32 %v3028_v52, %v1387_v57  ;;  %v1415_v60 = vmax.f32 %v1385_v55, 0.0 }
 0x85b   :  { %v1418_v59 = vmax.f32 %v1396_v20, 0.0 }
 0x85c   :  { %v1416_v16 = vmax.f32 %v1388_v22, 0.0 }
 0x85d   :  { %v1424_v61 = vpack.c.bf16 %v1418_v59, %v1417_v58 }
 0x85e   :  { %v1423_v62 = vpack.c.bf16 %v1416_v16, %v1415_v60 }
 0x860   :  { %3302 = vmatprep.mubr.msk.bf16.mxu0 %vm1457_vm3, %v1423_v62 }
 0x861   :  { %3303 = vmatmul.mubr.msk.bf16.vlgmr.msra.gmra.mrb[28].mxu0 %vm1457_vm3, %v1424_v61 }
 0x862   :  { %3323 = vmatpush3.bf16.msra.mxu0 %v3617_v51 }
 0x863   :  { %3324 = vmatprep.subr.bf16.mxu0 %v3618_v63 }
 0x866   :  { %3325 = vmatpush3.bf16.msra.mxu0 %v3618_v63 }
 0x867   :  { %v3292_v0 = vpop.f32.mrb[32].mxu1 }
 0x868   :  { %v1409_v1 = vadd.f32 %v3292_v0, %v3028_v52  ;;  %v1400_v14 = vpop.f32.mrb[33].mxu1 }
 0x869   :  { %v1401_v2 = vadd.f32 %v3028_v52, %v1400_v14  ;;  %v3293_v21 = vpop.f32.mrb[34].mxu1 }
 0x86a   :  { %v1412_v4 = vadd.f32 %v3293_v21, %v3028_v52  ;;  %v1403_v5 = vpop.f32.mrb[35].mxu1  ;;  %v1421_v7 = vmax.f32 %v1409_v1, 0.0 }
 0x86b   :  { %v1404_v27 = vadd.f32 %v3028_v52, %v1403_v5  ;;  %v1419_v10 = vmax.f32 %v1401_v2, 0.0 }
 0x86c   :  { %v1422_v9 = vmax.f32 %v1412_v4, 0.0 }
 0x86d   :  { %v1420_v11 = vmax.f32 %v1404_v27, 0.0 }
 0x86e   :  { %v1426_v26 = vpack.c.bf16 %v1422_v9, %v1421_v7 }
 0x86f   :  { %v1425_v12 = vpack.c.bf16 %v1420_v11, %v1419_v10 }
 0x871   :  { %3306 = vmatprep.mubr.msk.bf16.mxu0 %vm1457_vm3, %v1425_v12 }
 0x872   :  { %3307 = vmatmul.mubr.msk.bf16.gmra.mrb[32].mxu0 %vm1457_vm3, %v1426_v26 }
 0x934   :  { %v3304_v28 = vpop.f32.mrb[28].mxu0 }
 0x935   :  { %v1504_v6 = vpop.f32.mrb[29].mxu0  ;;  %v1513_v30 = vadd.f32 %v3304_v28, %v3035_v25 }
 0x936   :  { %v1505_v29 = vadd.f32 %v3035_v25, %v1504_v6  ;;  %v3305_v15 = vpop.f32.mrb[30].mxu0 }
 0x937   :  { %v1507_v18 = vpop.f32.mrb[31].mxu0  ;;  %v1516_v13 = vadd.f32 %v3305_v15, %v3035_v25  ;;  %v1537_v32 = vadd.f32 %v1513_v30, %v4635_v24 }
 0x938   :  { %v1508_v36 = vadd.f32 %v3035_v25, %v1507_v18  ;;  %v1535_v35 = vadd.f32 %v1505_v29, %v4629_v3 }
 0x939   :  { %v1538_v44 = vadd.f32 %v1516_v13, %v4637_v17  ;;  %v1549_v45 = vsel %vm328_vm0, %v1537_v32, 0.0 }
 0x93a   :  { %v1543_v37 = vsel %vm328_vm0, %v1535_v35, 0.0  ;;  %v1536_v40 = vadd.f32 %v1508_v36, %v4627_v8 }
 0x93b   :  { %1544 = vadd.xlane.f32.xlu1 %v1543_v37  ;;  %v1552_v33 = vsel %vm328_vm0, %v1538_v44, 0.0  ;;  %v3447_v37 = vld [vmem:[#allocation11 + $0x10] sm:$0xff]  }
 0x93c   :  { %v1546_v41 = vsel %vm328_vm0, %v1536_v40, 0.0  ;;  %3310 = vmatprep.subr.bf16.mxu1 %v3447_v37 }
 0x93d   :  { %1547 = vadd.xlane.f32.xlu0 %v1546_v41  ;;  %3311 = vmatpush3.bf16.msra.mxu1 %v3447_v37 }
 0x93f   :  { %1550 = vadd.xlane.f32.xlu1 %v1549_v45 }
 0x941   :  { %1553 = vadd.xlane.f32.xlu0 %v1552_v33 }
 0x945   :  { %v3308_v38 = vpop.f32.mrb[32].mxu0 }
 0x946   :  { %v1520_v3 = vpop.f32.mrb[33].mxu0  ;;  %v1529_v49 = vadd.f32 %v3308_v38, %v3035_v25 }
 0x947   :  { %v1521_v43 = vadd.f32 %v3035_v25, %v1520_v3  ;;  %v3309_v31 = vpop.f32.mrb[34].mxu0 }
 0x948   :  { %v1523_v8 = vpop.f32.mrb[35].mxu0  ;;  %v1532_v39 = vadd.f32 %v3309_v31, %v3035_v25  ;;  %v1541_v51 = vadd.f32 %v1529_v49, %v4653_v34 }
 0x949   :  { %v1524_v24 = vadd.f32 %v3035_v25, %v1523_v8  ;;  %v1539_v42 = vadd.f32 %v1521_v43, %v4646_v46 }
 0x94a   :  { %v1542_v19 = vadd.f32 %v1532_v39, %v4655_v48  ;;  %v1561_v53 = vsel %vm328_vm0, %v1541_v51, 0.0 }
 0x94b   :  { %v1555_v50 = vsel %vm328_vm0, %v1539_v42, 0.0  ;;  %v1540_v17 = vadd.f32 %v1524_v24, %v4648_v47 }
 0x94c   :  { %1556 = vadd.xlane.f32.xlu1 %v1555_v50  ;;  %v1564_v54 = vsel %vm328_vm0, %v1542_v19, 0.0 }
 0x94d   :  { %v1558_v52 = vsel %vm328_vm0, %v1540_v17, 0.0 }
 0x94e   :  { %1559 = vadd.xlane.f32.xlu0 %v1558_v52 }
 0x950   :  { %1562 = vadd.xlane.f32.xlu1 %v1561_v53 }
 0x952   :  { %1565 = vadd.xlane.f32.xlu0 %v1564_v54 }
 0x9c8   :  { %v1545_v55 = vpop.xlane.xlu1 %1544 }
 0x9c9   :  { %v1567_v46 = vmul.f32 0.03125, %v1545_v55 }
 0x9ca   :  { %v1548_v56 = vpop.xlane.xlu0 %1547 }
 0x9cb   :  { %v4680_v20 = vsub.f32 %v1535_v35, %v1567_v46  ;;  %v1568_v47 = vmul.f32 0.03125, %v1548_v56  ;;  %v3045_v56 = vld [vmem:[#allocation28] ss:$0 sm:$0xff] }
 0x9cc   :  { %v1551_v57 = vpop.xlane.xlu1 %1550 }
 0x9cd   :  { %v4682_v34 = vsub.f32 %v1536_v40, %v1568_v47  ;;  %v1569_v22 = vmul.f32 0.03125, %v1551_v57  ;;  %v1583_v48 = vmul.f32 %v4680_v20, %v4680_v20  ;;  %v3448_v40 = vld [vmem:[#allocation11 + $0x18] sm:$0xff]  }
 0x9ce   :  { %v1554_v58 = vpop.xlane.xlu0 %1553  ;;  %3312 = vmatprep.subr.bf16.mxu1 %v3448_v40 }
 0x9cf   :  { %v4686_v59 = vsub.f32 %v1537_v32, %v1569_v22  ;;  %v1570_v60 = vmul.f32 0.03125, %v1554_v58  ;;  %v1591_v16 = vsel %vm328_vm0, %v1583_v48, 0.0  ;;  %v1584_v61 = vmul.f32 %v4682_v34, %v4682_v34  ;;  %3313 = vmatpush3.bf16.msra.mxu1 %v3448_v40  ;;  %v3619_v32 = vld [vmem:[#allocation10] sm:$0x3] }
 0x9d0   :  { %1592 = vadd.xlane.f32.xlu1 %v1591_v16  ;;  %3405 = vmatprep.subr.msk.bf16.mxu1 %vm911_vm1, %v3619_v32 }
 0x9d1   :  { %v4691_v62 = vsub.f32 %v1538_v44, %v1570_v60  ;;  %v1594_v63 = vsel %vm328_vm0, %v1584_v61, 0.0  ;;  %v1585_v0 = vmul.f32 %v4686_v59, %v4686_v59 }
 0x9d2   :  { %1595 = vadd.xlane.f32.xlu0 %v1594_v63 }
 0x9d3   :  { %v1597_v1 = vsel %vm328_vm0, %v1585_v0, 0.0  ;;  %v1586_v14 = vmul.f32 %v4691_v62, %v4691_v62 }
 0x9d4   :  { %1598 = vadd.xlane.f32.xlu1 %v1597_v1 }
 0x9d5   :  { %v1600_v2 = vsel %vm328_vm0, %v1586_v14, 0.0 }
 0x9d6   :  { %1601 = vadd.xlane.f32.xlu0 %v1600_v2 }
 0x9d9   :  { %v1557_v21 = vpop.xlane.xlu1 %1556 }
 0x9da   :  { %v1571_v4 = vmul.f32 0.03125, %v1557_v21 }
 0x9db   :  { %v1560_v5 = vpop.xlane.xlu0 %1559 }
 0x9dc   :  { %v4700_v27 = vsub.f32 %v1539_v42, %v1571_v4  ;;  %v1572_v7 = vmul.f32 0.03125, %v1560_v5 }
 0x9dd   :  { %v1563_v9 = vpop.xlane.xlu1 %1562 }
 0x9de   :  { %v4702_v10 = vsub.f32 %v1540_v17, %v1572_v7  ;;  %v1573_v11 = vmul.f32 0.03125, %v1563_v9  ;;  %v1587_v26 = vmul.f32 %v4700_v27, %v4700_v27  ;;  %v3044_v17 = vld [vmem:[#allocation26] ss:$0 sm:$0xff] }
 0x9df   :  { %v1566_v12 = vpop.xlane.xlu0 %1565 }
 0x9e0   :  { %v4706_v25 = vsub.f32 %v1541_v51, %v1573_v11  ;;  %v1574_v28 = vmul.f32 0.03125, %v1566_v12  ;;  %v1603_v6 = vsel %vm328_vm0, %v1587_v26, 0.0  ;;  %v1588_v30 = vmul.f32 %v4702_v10, %v4702_v10 }
 0x9e1   :  { %1604 = vadd.xlane.f32.xlu1 %v1603_v6 }
 0x9e2   :  { %v4711_v29 = vsub.f32 %v1542_v19, %v1574_v28  ;;  %v1606_v15 = vsel %vm328_vm0, %v1588_v30, 0.0  ;;  %v1589_v18 = vmul.f32 %v4706_v25, %v4706_v25 }
 0x9e3   :  { %1607 = vadd.xlane.f32.xlu0 %v1606_v15 }
 0x9e4   :  { %v1609_v13 = vsel %vm328_vm0, %v1589_v18, 0.0  ;;  %v1590_v36 = vmul.f32 %v4711_v29, %v4711_v29 }
 0x9e5   :  { %1610 = vadd.xlane.f32.xlu1 %v1609_v13 }
 0x9e6   :  { %v1612_v35 = vsel %vm328_vm0, %v1590_v36, 0.0 }
 0x9e7   :  { %1613 = vadd.xlane.f32.xlu0 %v1612_v35 }
 0xa5d   :  { %v1593_v41 = vpop.xlane.xlu1 %1592 }
 0xa5e   :  { %v1615_v44 = vmul.f32 0.03125, %v1593_v41 }
 0xa5f   :  { %v1596_v45 = vpop.xlane.xlu0 %1595 }
 0xa60   :  { %v1623_v33 = vadd.f32 1e-05, %v1615_v44  ;;  %v1616_v38 = vmul.f32 0.03125, %v1596_v45 }
 0xa61   :  { %v1599_v3 = vpop.xlane.xlu1 %1598 }
 0xa62   :  { %3521 = vrsqrt.f32 %v1623_v33  ;;  %v1624_v49 = vadd.f32 1e-05, %v1616_v38  ;;  %v1617_v43 = vmul.f32 0.03125, %v1599_v3 }
 0xa63   :  { %v1602_v31 = vpop.xlane.xlu0 %1601 }
 0xa64   :  { %3523 = vrsqrt.f32 %v1624_v49  ;;  %v1625_v8 = vadd.f32 1e-05, %v1617_v43  ;;  %v1618_v39 = vmul.f32 0.03125, %v1602_v31 }
 0xa66   :  { %3525 = vrsqrt.f32 %v1625_v8  ;;  %v1626_v24 = vadd.f32 1e-05, %v1618_v39 }
 0xa68   :  { %3527 = vrsqrt.f32 %v1626_v24 }
 0xa6c   :  { %v3522_v42 = vpop.eup %3521 }
 0xa6d   :  { %v1639_v50 = vmul.f32 %v3522_v42, %v4680_v20 }
 0xa6e   :  { %v3524_v51 = vpop.eup %3523  ;;  %v1605_v52 = vpop.xlane.xlu1 %1604 }
 0xa6f   :  { %v1640_v19 = vmul.f32 %v3524_v51, %v4682_v34  ;;  %v1619_v53 = vmul.f32 0.03125, %v1605_v52  ;;  %v1653_v46 = vmul.f32 %v3044_v17, %v1639_v50 }
 0xa70   :  { %v3526_v54 = vpop.eup %3525  ;;  %v1608_v55 = vpop.xlane.xlu0 %1607 }
 0xa71   :  { %v1641_v47 = vmul.f32 %v3526_v54, %v4686_v59  ;;  %v1627_v57 = vadd.f32 1e-05, %v1619_v53  ;;  %v1620_v22 = vmul.f32 0.03125, %v1608_v55  ;;  %v1654_v48 = vmul.f32 %v3044_v17, %v1640_v19 }
 0xa72   :  { %v3528_v58 = vpop.eup %3527  ;;  %v1611_v60 = vpop.xlane.xlu1 %1610  ;;  %v4725_v34 = vadd.f32 %v3045_v56, %v1653_v46 }
 0xa73   :  { %v1655_v16 = vmul.f32 %v3044_v17, %v1641_v47  ;;  %v1642_v20 = vmul.f32 %v3528_v58, %v4691_v62  ;;  %3529 = vrsqrt.f32 %v1627_v57  ;;  %v1628_v61 = vadd.f32 1e-05, %v1620_v22 }
 0xa74   :  { %v1621_v63 = vmul.f32 0.03125, %v1611_v60  ;;  %v1614_v0 = vpop.xlane.xlu0 %1613  ;;  %v4727_v1 = vadd.f32 %v3045_v56, %v1654_v48 }
 0xa75   :  { %v1656_v14 = vmul.f32 %v3044_v17, %v1642_v20  ;;  %3531 = vrsqrt.f32 %v1628_v61  ;;  %v1622_v2 = vmul.f32 0.03125, %v1614_v0  ;;  %v4731_v4 = vadd.f32 %v3045_v56, %v1655_v16 }
 0xa76   :  { %v1629_v59 = vadd.f32 1e-05, %v1621_v63  ;;  %v1715_v21 = vpack.c.bf16 %v4727_v1, %v4725_v34 }
 0xa77   :  { %v4733_v5 = vadd.f32 %v3045_v56, %v1656_v14  ;;  %v1630_v62 = vadd.f32 1e-05, %v1622_v2 }
 0xa78   :  { %3533 = vrsqrt.f32 %v1629_v59  ;;  %3314 = vmatprep.mubr.msk.bf16.mxu1 %vm328_vm0, %v1715_v21 }
 0xa79   :  { %3535 = vrsqrt.f32 %v1630_v62  ;;  %v1716_v7 = vpack.c.bf16 %v4733_v5, %v4731_v4 }
 0xa7b   :  { %3315 = vmatmul.mubr.msk.bf16.vlgmr.msra.gmra.mrb[36].mxu1 %vm328_vm0, %v1716_v7 }
 0xa7c   :  { %3343 = vmatpush3.bf16.msra.mxu1 %v4505_v23 }
 0xa7d   :  { %v3530_v9 = vpop.eup %3529 }
 0xa7e   :  { %v1643_v11 = vmul.f32 %v3530_v9, %v4700_v27 }
 0xa7f   :  { %v3532_v26 = vpop.eup %3531 }
 0xa80   :  { %v1644_v12 = vmul.f32 %v3532_v26, %v4702_v10  ;;  %v1657_v28 = vmul.f32 %v3044_v17, %v1643_v11 }
 0xa82   :  { %v3534_v6 = vpop.eup %3533  ;;  %v1658_v30 = vmul.f32 %v3044_v17, %v1644_v12  ;;  %v4744_v36 = vadd.f32 %v3045_v56, %v1657_v28 }
 0xa83   :  { %v3536_v15 = vpop.eup %3535  ;;  %v1645_v18 = vmul.f32 %v3534_v6, %v4706_v25 }
 0xa84   :  { %v1646_v13 = vmul.f32 %v3536_v15, %v4711_v29  ;;  %v4746_v35 = vadd.f32 %v3045_v56, %v1658_v30  ;;  %v3046_v29 = vld [vmem:[#allocation13 + $0x1] ss:$0 sm:$0xff]  ;;  %v3449_v15 = vld [vmem:[#allocation14 + $0x10] sm:$0xff]  }
 0xa85   :  { %v1659_v37 = vmul.f32 %v3044_v17, %v1645_v18  ;;  %3360 = vmatprep.subr.bf16.mxu0 %v3449_v15 }
 0xa86   :  { %v1717_v23 = vpack.c.bf16 %v4746_v35, %v4744_v36  ;;  %v1660_v27 = vmul.f32 %v3044_v17, %v1646_v13 }
 0xa87   :  { %v4751_v10 = vadd.f32 %v3045_v56, %v1659_v37 }
 0xa88   :  { %3318 = vmatprep.mubr.msk.bf16.mxu1 %vm328_vm0, %v1717_v23  ;;  %v4753_v40 = vadd.f32 %v3045_v56, %v1660_v27 }
 0xa8a   :  { %v1718_v25 = vpack.c.bf16 %v4753_v40, %v4751_v10 }
 0xa8c   :  { %3319 = vmatmul.mubr.msk.bf16.gmra.mrb[40].mxu1 %vm328_vm0, %v1718_v25 }
 0xb4e   :  { %v3316_v32 = vpop.f32.mrb[36].mxu1 }
 0xb4f   :  { %v1783_v41 = vpop.f32.mrb[37].mxu1  ;;  %v1792_v3 = vadd.f32 %v3316_v32, %v3046_v29 }
 0xb50   :  { %v1784_v44 = vadd.f32 %v3046_v29, %v1783_v41  ;;  %v3317_v45 = vpop.f32.mrb[38].mxu1 }
 0xb51   :  { %v1786_v33 = vpop.f32.mrb[39].mxu1  ;;  %v1795_v49 = vadd.f32 %v3317_v45, %v3046_v29 }
 0xb52   :  { %v1787_v38 = vadd.f32 %v3046_v29, %v1786_v33  ;;  %1822 = vrot.lane.b32.xlu1 %v1784_v44, %s4057_s16 }
 0xb54   :  { %1824 = vrot.lane.b32.xlu0 %v1787_v38, %s4057_s16 }
 0xb56   :  { %1826 = vrot.lane.b32.xlu1 %v1792_v3, %s4057_s16 }
 0xb5a   :  { %1828 = vrot.lane.b32.xlu1 %v1795_v49, %s4057_s16 }
 0xb5f   :  { %v3320_v43 = vpop.f32.mrb[40].mxu1 }
 0xb60   :  { %v1799_v31 = vpop.f32.mrb[41].mxu1  ;;  %v1808_v50 = vadd.f32 %v3320_v43, %v3046_v29 }
 0xb61   :  { %v1800_v8 = vadd.f32 %v3046_v29, %v1799_v31  ;;  %v3321_v39 = vpop.f32.mrb[42].mxu1 }
 0xb62   :  { %v1802_v24 = vpop.f32.mrb[43].mxu1  ;;  %v1811_v17 = vadd.f32 %v3321_v39, %v3046_v29 }
 0xb63   :  { %v1803_v42 = vadd.f32 %v3046_v29, %v1802_v24  ;;  %1830 = vrot.lane.b32.xlu0 %v1800_v8, %s4057_s16 }
 0xb65   :  { %1832 = vrot.lane.b32.xlu1 %v1803_v42, %s4057_s16 }
 0xb67   :  { %1834 = vrot.lane.b32.xlu0 %v1808_v50, %s4057_s16 }
 0xb69   :  { %1836 = vrot.lane.b32.xlu1 %v1811_v17, %s4057_s16 }
 0xb6b   :  { %2256 = vrot.lane.b32.xlu0 %v1784_v44, %s4038_s22 }
 0xb6d   :  { %2258 = vrot.lane.b32.xlu1 %v1787_v38, %s4038_s22 }
 0xb6f   :  { %2264 = vrot.lane.b32.xlu0 %v1800_v8, %s4038_s22 }
 0xb71   :  { %2262 = vrot.lane.b32.xlu1 %v1795_v49, %s4038_s22 }
 0xb73   :  { %2260 = vrot.lane.b32.xlu0 %v1792_v3, %s4038_s22 }
 0xb75   :  { %2266 = vrot.lane.b32.xlu1 %v1803_v42, %s4038_s22 }
 0xb77   :  { %2268 = vrot.lane.b32.xlu0 %v1808_v50, %s4038_s22 }
 0xb79   :  { %2270 = vrot.lane.b32.xlu1 %v1811_v17, %s4038_s22 }
 0xbc4   :  { %v1823_v51 = vpop.permute.xlu1 %1822 }
 0xbc5   :  { %v1846_v19 = vmul.f32 %v1823_v51, %v1784_v44  ;;  %v1854_v2 = vmul.f32 %v1823_v51, %v1800_v8 }
 0xbc6   :  { %v1825_v52 = vpop.permute.xlu0 %1824 }
 0xbc7   :  { %v1847_v53 = vmul.f32 %v1825_v52, %v1787_v38  ;;  %v1855_v61 = vmul.f32 %v1825_v52, %v1803_v42 }
 0xbc8   :  { %v1827_v54 = vpop.permute.xlu1 %1826 }
 0xbc9   :  { %v1862_v55 = vpack.c.bf16 %v1847_v53, %v1846_v19  ;;  %v1848_v56 = vmul.f32 %v1827_v54, %v1792_v3  ;;  %v1866_v21 = vpack.c.bf16 %v1855_v61, %v1854_v2  ;;  %v1856_v9 = vmul.f32 %v1827_v54, %v1808_v50 }
 0xbcb   :  { %3326 = vmatprep.mubr.msk.bf16.mxu0 %vm328_vm0, %v1862_v55 }
 0xbcc   :  { %v1829_v46 = vpop.permute.xlu1 %1828 }
 0xbcd   :  { %v1849_v47 = vmul.f32 %v1829_v46, %v1795_v49  ;;  %v1857_v62 = vmul.f32 %v1829_v46, %v1811_v17 }
 0xbcf   :  { %v1863_v57 = vpack.c.bf16 %v1849_v47, %v1848_v56  ;;  %v1867_v26 = vpack.c.bf16 %v1857_v62, %v1856_v9 }
 0xbd1   :  { %3327 = vmatmul.mubr.msk.bf16.vlgmr.msra.gmra.mrb[36].mxu0 %vm328_vm0, %v1863_v57 }
 0xbd2   :  { %3361 = vmatpush3.bf16.msra.mxu0 %v3449_v15 }
 0xbd5   :  { %v1831_v22 = vpop.permute.xlu0 %1830 }
 0xbd6   :  { %v1850_v58 = vmul.f32 %v1831_v22, %v1784_v44  ;;  %v1858_v11 = vmul.f32 %v1831_v22, %v1800_v8 }
 0xbd7   :  { %v1833_v48 = vpop.permute.xlu1 %1832 }
 0xbd8   :  { %v1851_v60 = vmul.f32 %v1833_v48, %v1787_v38  ;;  %v1859_v7 = vmul.f32 %v1833_v48, %v1803_v42 }
 0xbd9   :  { %v1835_v16 = vpop.permute.xlu0 %1834 }
 0xbda   :  { %v1864_v20 = vpack.c.bf16 %v1851_v60, %v1850_v58  ;;  %v1852_v0 = vmul.f32 %v1835_v16, %v1792_v3  ;;  %v1868_v12 = vpack.c.bf16 %v1859_v7, %v1858_v11  ;;  %v1860_v6 = vmul.f32 %v1835_v16, %v1808_v50 }
 0xbdb   :  { %v1837_v63 = vpop.permute.xlu1 %1836 }
 0xbdc   :  { %v1853_v14 = vmul.f32 %v1837_v63, %v1795_v49  ;;  %3330 = vmatprep.mubr.msk.bf16.mxu0 %vm328_vm0, %v1864_v20  ;;  %v1861_v28 = vmul.f32 %v1837_v63, %v1811_v17 }
 0xbde   :  { %v1865_v59 = vpack.c.bf16 %v1853_v14, %v1852_v0  ;;  %v1869_v30 = vpack.c.bf16 %v1861_v28, %v1860_v6 }
 0xbe0   :  { %3331 = vmatmul.mubr.msk.bf16.gmra.mrb[40].mxu0 %vm328_vm0, %v1865_v59 }
 0xbe1   :  { %3334 = vmatprep.mubr.msk.bf16.mxu0 %vm328_vm0, %v1866_v21 }
 0xbe8   :  { %3335 = vmatmul.mubr.msk.bf16.gmra.mrb[44].mxu0 %vm328_vm0, %v1867_v26 }
 0xbe9   :  { %3338 = vmatprep.mubr.msk.bf16.mxu0 %vm328_vm0, %v1868_v12 }
 0xbf0   :  { %3339 = vmatmul.mubr.msk.bf16.gmra.mrb[48].mxu0 %vm328_vm0, %v1869_v30 }
 0xca4   :  { %v3328_v18 = vpop.f32.mrb[36].mxu0 }
 0xca5   :  { %v1928_v13 = vpop.f32.mrb[37].mxu0  ;;  %v1993_v27 = vmul.f32 0.35355338, %v3328_v18 }
 0xca6   :  { %v3329_v37 = vpop.f32.mrb[38].mxu0  ;;  %v1991_v25 = vmul.f32 0.35355338, %v1928_v13 }
 0xca7   :  { %v1931_v23 = vpop.f32.mrb[39].mxu0  ;;  %v1994_v29 = vmul.f32 0.35355338, %v3329_v37  ;;  %v2013_v3 = vsel %vm758_vm2, %v1993_v27, -inf }
 0xca8   :  { %v1992_v41 = vmul.f32 0.35355338, %v1931_v23  ;;  %v2007_v8 = vsel %vm758_vm2, %v1991_v25, -inf }
 0xca9   :  { %v2016_v50 = vsel %vm758_vm2, %v1994_v29, -inf }
 0xcaa   :  { %v2010_v17 = vsel %vm758_vm2, %v1992_v41, -inf }
 0xcb3   :  { %v3332_v32 = vpop.f32.mrb[40].mxu0 }
 0xcb4   :  { %v1997_v44 = vmul.f32 0.35355338, %v3332_v32  ;;  %v1944_v45 = vpop.f32.mrb[41].mxu0 }
 0xcb5   :  { %v1995_v33 = vmul.f32 0.35355338, %v1944_v45  ;;  %v3333_v38 = vpop.f32.mrb[42].mxu0 }
 0xcb6   :  { %v2014_v49 = vsel %vm758_vm2, %v1997_v44, -inf  ;;  %v1998_v43 = vmul.f32 0.35355338, %v3333_v38  ;;  %v1947_v31 = vpop.f32.mrb[43].mxu0 }
 0xcb7   :  { %v2015_v39 = vmax.f32 %v2013_v3, %v2014_v49  ;;  %v2008_v24 = vsel %vm758_vm2, %v1995_v33, -inf  ;;  %v1996_v42 = vmul.f32 0.35355338, %v1947_v31 }
 0xcb8   :  { %v2009_v51 = vmax.f32 %v2007_v8, %v2008_v24  ;;  %v2017_v52 = vsel %vm758_vm2, %v1998_v43, -inf }
 0xcb9   :  { %v2033_v19 = vsub.f32 %v1993_v27, %v2015_v39  ;;  %v2037_v53 = vsub.f32 %v1997_v44, %v2015_v39  ;;  %v2018_v54 = vmax.f32 %v2016_v50, %v2017_v52  ;;  %v2011_v55 = vsel %vm758_vm2, %v1996_v42, -inf }
 0xcba   :  { %v2031_v46 = vsub.f32 %v1991_v25, %v2009_v51  ;;  %v2035_v56 = vsub.f32 %v1995_v33, %v2009_v51  ;;  %v2012_v47 = vmax.f32 %v2010_v17, %v2011_v55 }
 0xcbb   :  { %v2051_v57 = vmul.f32 1.442695, %v2033_v19  ;;  %v2059_v22 = vmul.f32 1.442695, %v2037_v53  ;;  %v2034_v48 = vsub.f32 %v1994_v29, %v2018_v54  ;;  %v2038_v58 = vsub.f32 %v1998_v43, %v2018_v54  ;;  %v3336_v60 = vpop.f32.mrb[44].mxu0 }
 0xcbc   :  { %v2047_v16 = vmul.f32 1.442695, %v2031_v46  ;;  %v2055_v20 = vmul.f32 1.442695, %v2035_v56  ;;  %v2032_v61 = vsub.f32 %v1992_v41, %v2012_v47  ;;  %v2036_v63 = vsub.f32 %v1996_v42, %v2012_v47  ;;  %v1960_v0 = vpop.f32.mrb[45].mxu0 }
 0xcbd   :  { %3537 = vpow2.f32 %v2051_v57  ;;  %v2053_v14 = vmul.f32 1.442695, %v2034_v48  ;;  %v2061_v2 = vmul.f32 1.442695, %v2038_v58  ;;  %v3337_v21 = vpop.f32.mrb[46].mxu0 }
 0xcbe   :  { %3539 = vpow2.f32 %v2059_v22  ;;  %v2049_v59 = vmul.f32 1.442695, %v2032_v61  ;;  %v2057_v62 = vmul.f32 1.442695, %v2036_v63  ;;  %v1963_v7 = vpop.f32.mrb[47].mxu0 }
 0xcbf   :  { %3541 = vpow2.f32 %v2047_v16  ;;  %v2001_v9 = vmul.f32 0.35355338, %v3336_v60  ;;  %v1999_v11 = vmul.f32 0.35355338, %v1960_v0  ;;  %v2002_v26 = vmul.f32 0.35355338, %v3337_v21 }
 0xcc0   :  { %3543 = vpow2.f32 %v2055_v20  ;;  %v2000_v32 = vmul.f32 0.35355338, %v1963_v7 }
 0xcc1   :  { %3545 = vpow2.f32 %v2053_v14  ;;  %v2025_v18 = vsel %vm758_vm2, %v2001_v9, -inf  ;;  %v2019_v13 = vsel %vm758_vm2, %v1999_v11, -inf  ;;  %v2028_v29 = vsel %vm758_vm2, %v2002_v26, -inf }
 0xcc2   :  { %3547 = vpow2.f32 %v2061_v2  ;;  %v2022_v63 = vsel %vm758_vm2, %v2000_v32, -inf }
 0xcc3   :  { %3549 = vpow2.f32 %v2049_v59  ;;  %v3340_v12 = vpop.f32.mrb[48].mxu0 }
 0xcc4   :  { %3551 = vpow2.f32 %v2057_v62  ;;  %v2005_v28 = vmul.f32 0.35355338, %v3340_v12  ;;  %v1976_v6 = vpop.f32.mrb[49].mxu0 }
 0xcc5   :  { %v2003_v30 = vmul.f32 0.35355338, %v1976_v6  ;;  %v3341_v15 = vpop.f32.mrb[50].mxu0 }
 0xcc6   :  { %v2026_v37 = vsel %vm758_vm2, %v2005_v28, -inf  ;;  %v2006_v23 = vmul.f32 0.35355338, %v3341_v15  ;;  %v1979_v27 = vpop.f32.mrb[51].mxu0 }
 0xcc7   :  { %v3538_v25 = vpop.eup %3537  ;;  %v2027_v41 = vmax.f32 %v2025_v18, %v2026_v37  ;;  %v2020_v44 = vsel %vm758_vm2, %v2003_v30, -inf  ;;  %v2004_v49 = vmul.f32 0.35355338, %v1979_v27 }
 0xcc8   :  { %v3540_v45 = vpop.eup %3539  ;;  %v2085_v33 = vsel %vm758_vm2, %v3538_v25, 0.0  ;;  %v2021_v38 = vmax.f32 %v2019_v13, %v2020_v44  ;;  %v2029_v3 = vsel %vm758_vm2, %v2006_v23, -inf }
 0xcc9   :  { %v3542_v43 = vpop.eup %3541  ;;  %v2086_v31 = vsel %vm758_vm2, %v3540_v45, 0.0  ;;  %v2041_v8 = vsub.f32 %v2001_v9, %v2027_v41  ;;  %v2045_v39 = vsub.f32 %v2005_v28, %v2027_v41  ;;  %v2030_v24 = vmax.f32 %v2028_v29, %v2029_v3 }
 0xcca   :  { %v3544_v42 = vpop.eup %3543  ;;  %v2087_v50 = vadd.f32 %v2086_v31, %v2085_v33  ;;  %v2079_v17 = vsel %vm758_vm2, %v3542_v43, 0.0  ;;  %v2039_v51 = vsub.f32 %v1999_v11, %v2021_v38  ;;  %v2043_v52 = vsub.f32 %v2003_v30, %v2021_v38 }
 0xccb   :  { %v3546_v19 = vpop.eup %3545  ;;  %v2080_v53 = vsel %vm758_vm2, %v3544_v42, 0.0  ;;  %v2067_v54 = vmul.f32 1.442695, %v2041_v8  ;;  %v2075_v55 = vmul.f32 1.442695, %v2045_v39  ;;  %v2042_v46 = vsub.f32 %v2002_v26, %v2030_v24 }
 0xccc   :  { %v3548_v56 = vpop.eup %3547  ;;  %3553 = vrcp.f32 %v2087_v50  ;;  %v2081_v47 = vadd.f32 %v2080_v53, %v2079_v17  ;;  %v2088_v57 = vsel %vm758_vm2, %v3546_v19, 0.0  ;;  %v2063_v58 = vmul.f32 1.442695, %v2039_v51 }
 0xccd   :  { %v3550_v22 = vpop.eup %3549  ;;  %v2089_v48 = vsel %vm758_vm2, %v3548_v56, 0.0  ;;  %3555 = vpow2.f32 %v2067_v54  ;;  %v2046_v60 = vsub.f32 %v2006_v23, %v2030_v24  ;;  %v2071_v14 = vmul.f32 1.442695, %v2043_v52 }
 0xcce   :  { %v3552_v16 = vpop.eup %3551  ;;  %3557 = vrcp.f32 %v2081_v47  ;;  %v2090_v20 = vadd.f32 %v2089_v48, %v2088_v57  ;;  %v2082_v61 = vsel %vm758_vm2, %v3550_v22, 0.0  ;;  %v2023_v2 = vsel %vm758_vm2, %v2004_v49, -inf }
 0xccf   :  { %v2083_v0 = vsel %vm758_vm2, %v3552_v16, 0.0  ;;  %3559 = vpow2.f32 %v2075_v55  ;;  %v2069_v21 = vmul.f32 1.442695, %v2042_v46  ;;  %v2024_v62 = vmax.f32 %v2022_v63, %v2023_v2 }
 0xcd0   :  { %3561 = vrcp.f32 %v2090_v20  ;;  %v2084_v59 = vadd.f32 %v2083_v0, %v2082_v61  ;;  %v2077_v7 = vmul.f32 1.442695, %v2046_v60 }
 0xcd1   :  { %3563 = vpow2.f32 %v2063_v58  ;;  %v2040_v9 = vsub.f32 %v2000_v32, %v2024_v62  ;;  %v2044_v11 = vsub.f32 %v2004_v49, %v2024_v62 }
 0xcd2   :  { %3565 = vrcp.f32 %v2084_v59 }
 0xcd3   :  { %3567 = vpow2.f32 %v2071_v14  ;;  %v2065_v26 = vmul.f32 1.442695, %v2040_v9  ;;  %v2073_v12 = vmul.f32 1.442695, %v2044_v11  ;;  %v3450_v9 = vld [vmem:[#allocation14 + $0x18] sm:$0xff]   ;;  %v2257_v11 = vpop.permute.xlu0 %2256 }
 0xcd4   :  { %3569 = vpow2.f32 %v2069_v21  ;;  %3362 = vmatprep.subr.bf16.mxu0 %v3450_v9 }
 0xcd5   :  { %3571 = vpow2.f32 %v2077_v7  ;;  %3363 = vmatpush3.bf16.msra.mxu0 %v3450_v9 }
 0xcd6   :  { %v3554_v28 = vpop.eup %3553  ;;  %3573 = vpow2.f32 %v2065_v26  ;;  %v2259_v26 = vpop.permute.xlu1 %2258 }
 0xcd7   :  { %v3556_v6 = vpop.eup %3555  ;;  %v2108_v30 = vmul.f32 %v3554_v28, %v3538_v25  ;;  %3575 = vpow2.f32 %v2073_v12  ;;  %v2113_v15 = vmul.f32 %v3554_v28, %v3540_v45  ;;  %v2265_v12 = vpop.permute.xlu0 %2264 }
 0xcd8   :  { %v3558_v18 = vpop.eup %3557  ;;  %v2097_v13 = vsel %vm758_vm2, %v3556_v6, 0.0 }
 0xcd9   :  { %v3560_v37 = vpop.eup %3559  ;;  %v2104_v23 = vmul.f32 %v3558_v18, %v3542_v43  ;;  %v2111_v27 = vmul.f32 %v3558_v18, %v3544_v42 }
 0xcda   :  { %v3562_v29 = vpop.eup %3561  ;;  %v2098_v32 = vsel %vm758_vm2, %v3560_v37, 0.0  ;;  %v2263_v28 = vpop.permute.xlu1 %2262 }
 0xcdb   :  { %v3564_v41 = vpop.eup %3563  ;;  %v2110_v44 = vmul.f32 %v3562_v29, %v3546_v19  ;;  %v2099_v33 = vadd.f32 %v2098_v32, %v2097_v13  ;;  %v2114_v38 = vmul.f32 %v3562_v29, %v3548_v56 }
 0xcdc   :  { %v3566_v3 = vpop.eup %3565  ;;  %v2091_v49 = vsel %vm758_vm2, %v3564_v41, 0.0 }
 0xcdd   :  { %v3568_v31 = vpop.eup %3567  ;;  %3577 = vrcp.f32 %v2099_v33  ;;  %v2106_v25 = vmul.f32 %v3566_v3, %v3550_v22  ;;  %v2128_v45 = vpack.c.bf16 %v2110_v44, %v2108_v30  ;;  %v2112_v8 = vmul.f32 %v3566_v3, %v3552_v16 }
 0xcde   :  { %v3570_v39 = vpop.eup %3569  ;;  %v2092_v24 = vsel %vm758_vm2, %v3568_v31, 0.0  ;;  %v2130_v43 = vpack.c.bf16 %v2114_v38, %v2113_v15  ;;  %v2261_v15 = vpop.permute.xlu0 %2260 }
 0xcdf   :  { %v3572_v42 = vpop.eup %3571  ;;  %v2093_v50 = vadd.f32 %v2092_v24, %v2091_v49  ;;  %v2100_v17 = vsel %vm758_vm2, %v3570_v39, 0.0  ;;  %v2127_v51 = vpack.c.bf16 %v2106_v25, %v2104_v23  ;;  %v2129_v52 = vpack.c.bf16 %v2112_v8, %v2111_v27 }
 0xce0   :  { %v3574_v19 = vpop.eup %3573  ;;  %v2101_v53 = vsel %vm758_vm2, %v3572_v42, 0.0 }
 0xce1   :  { %v3576_v54 = vpop.eup %3575  ;;  %3579 = vrcp.f32 %v2093_v50  ;;  %v2102_v55 = vadd.f32 %v2101_v53, %v2100_v17  ;;  %v2094_v46 = vsel %vm758_vm2, %v3574_v19, 0.0  ;;  %3344 = vmatprep.mubr.msk.bf16.mxu1 %vm758_vm2, %v2127_v51 }
 0xce2   :  { %v2095_v56 = vsel %vm758_vm2, %v3576_v54, 0.0  ;;  %3345 = vmatmul.mubr.msk.bf16.vlgmr.msra.gmra.mrb[44].mxu1 %vm758_vm2, %v2128_v45  ;;  %v2269_v27 = vpop.permute.xlu0 %2268 }
 0xce3   :  { %3581 = vrcp.f32 %v2102_v55  ;;  %v2096_v47 = vadd.f32 %v2095_v56, %v2094_v46  ;;  %3348 = vmatprep.mubr.msk.bf16.mxu1 %vm758_vm2, %v2129_v52 }
 0xce5   :  { %3583 = vrcp.f32 %v2096_v47 }
 0xce7   :  { %v3578_v57 = vpop.eup %3577 }
 0xce8   :  { %v2120_v22 = vmul.f32 %v3578_v57, %v3556_v6  ;;  %v2125_v48 = vmul.f32 %v3578_v57, %v3560_v37  ;;  %v2267_v37 = vpop.permute.xlu1 %2266 }
 0xcea   :  { %3349 = vmatmul.mubr.msk.bf16.gmra.mrb[48].mxu1 %vm758_vm2, %v2130_v43 }
 0xceb   :  { %v3580_v58 = vpop.eup %3579 }
 0xcec   :  { %v2116_v60 = vmul.f32 %v3580_v58, %v3564_v41  ;;  %v2123_v16 = vmul.f32 %v3580_v58, %v3568_v31  ;;  %v2271_v38 = vpop.permute.xlu1 %2270 }
 0xced   :  { %v3582_v20 = vpop.eup %3581 }
 0xcee   :  { %v2122_v61 = vmul.f32 %v3582_v20, %v3570_v39  ;;  %v2126_v63 = vmul.f32 %v3582_v20, %v3572_v42 }
 0xcef   :  { %v3584_v0 = vpop.eup %3583 }
 0xcf0   :  { %v2118_v14 = vmul.f32 %v3584_v0, %v3574_v19  ;;  %v2132_v2 = vpack.c.bf16 %v2122_v61, %v2120_v22  ;;  %v2124_v59 = vmul.f32 %v3584_v0, %v3576_v54  ;;  %v2134_v21 = vpack.c.bf16 %v2126_v63, %v2125_v48 }
 0xcf2   :  { %v2131_v62 = vpack.c.bf16 %v2118_v14, %v2116_v60  ;;  %v2133_v7 = vpack.c.bf16 %v2124_v59, %v2123_v16 }
 0xcf4   :  { %3352 = vmatprep.mubr.msk.bf16.mxu1 %vm758_vm2, %v2131_v62 }
 0xcf5   :  { %3353 = vmatmul.mubr.msk.bf16.gmra.mrb[52].mxu1 %vm758_vm2, %v2132_v2 }
 0xcf6   :  { %3356 = vmatprep.mubr.msk.bf16.mxu1 %vm758_vm2, %v2133_v7 }
 0xcfd   :  { %3357 = vmatmul.mubr.msk.bf16.gmra.mrb[56].mxu1 %vm758_vm2, %v2134_v21 }
 0xdb5   :  { %v3346_v6 = vpop.f32.mrb[44].mxu1 }
 0xdb6   :  { %v2193_v30 = vpop.f32.mrb[45].mxu1  ;;  %v2282_v23 = vmul.f32 %v3346_v6, %v2261_v15 }
 0xdb7   :  { %v3347_v18 = vpop.f32.mrb[46].mxu1  ;;  %v2280_v29 = vmul.f32 %v2257_v11, %v2193_v30 }
 0xdb8   :  { %v2196_v13 = vpop.f32.mrb[47].mxu1  ;;  %v2283_v41 = vmul.f32 %v3347_v18, %v2263_v28  ;;  %v2302_v25 = vsel %vm328_vm0, %v2282_v23, 0.0 }
 0xdb9   :  { %v2281_v3 = vmul.f32 %v2259_v26, %v2196_v13  ;;  %v2296_v24 = vsel %vm328_vm0, %v2280_v29, 0.0 }
 0xdba   :  { %v2305_v17 = vsel %vm328_vm0, %v2283_v41, 0.0 }
 0xdbb   :  { %v2299_v19 = vsel %vm328_vm0, %v2281_v3, 0.0 }
 0xdbd   :  { %v3350_v32 = vpop.f32.mrb[48].mxu1 }
 0xdbe   :  { %v2286_v44 = vmul.f32 %v3350_v32, %v2269_v27  ;;  %v2209_v33 = vpop.f32.mrb[49].mxu1  ;;  %v3069_v32 = vld [vmem:[#allocation16 + $0x1] ss:$0 sm:$0xff] }
 0xdbf   :  { %v2284_v49 = vmul.f32 %v2265_v12, %v2209_v33  ;;  %v3351_v31 = vpop.f32.mrb[50].mxu1 }
 0xdc0   :  { %v2303_v45 = vsel %vm328_vm0, %v2286_v44, 0.0  ;;  %v2287_v8 = vmul.f32 %v3351_v31, %v2271_v38  ;;  %v2212_v39 = vpop.f32.mrb[51].mxu1 }
 0xdc1   :  { %v2304_v43 = vadd.f32 %v2303_v45, %v2302_v25  ;;  %v2297_v42 = vsel %vm328_vm0, %v2284_v49, 0.0  ;;  %v2285_v50 = vmul.f32 %v2267_v37, %v2212_v39 }
 0xdc2   :  { %v2298_v51 = vadd.f32 %v2297_v42, %v2296_v24  ;;  %v2306_v52 = vsel %vm328_vm0, %v2287_v8, 0.0 }
 0xdc3   :  { %v2307_v53 = vadd.f32 %v2306_v52, %v2305_v17  ;;  %v2300_v54 = vsel %vm328_vm0, %v2285_v50, 0.0 }
 0xdc4   :  { %v2301_v55 = vadd.f32 %v2300_v54, %v2299_v19 }
 0xdc5   :  { %v2321_v46 = vpack.c.bf16 %v2307_v53, %v2304_v43 }
 0xdc6   :  { %v2320_v56 = vpack.c.bf16 %v2301_v55, %v2298_v51 }
 0xdc8   :  { %v3354_v47 = vpop.f32.mrb[52].mxu1  ;;  %3364 = vmatprep.mubr.msk.bf16.mxu0 %vm328_vm0, %v2320_v56 }
 0xdc9   :  { %v2225_v57 = vpop.f32.mrb[53].mxu1  ;;  %3365 = vmatmul.mubr.msk.bf16.vlgmr.msra.gmra.mrb[52].mxu0 %vm328_vm0, %v2321_v46  ;;  %v2290_v58 = vmul.f32 %v3354_v47, %v2261_v15 }
 0xdca   :  { %v3355_v22 = vpop.f32.mrb[54].mxu1  ;;  %v2288_v60 = vmul.f32 %v2257_v11, %v2225_v57 }
 0xdcb   :  { %v2228_v48 = vpop.f32.mrb[55].mxu1  ;;  %v2291_v20 = vmul.f32 %v3355_v22, %v2263_v28  ;;  %v2314_v59 = vsel %vm328_vm0, %v2290_v58, 0.0 }
 0xdcc   :  { %v2289_v0 = vmul.f32 %v2259_v26, %v2228_v48  ;;  %v2308_v9 = vsel %vm328_vm0, %v2288_v60, 0.0 }
 0xdcd   :  { %v2317_v11 = vsel %vm328_vm0, %v2291_v20, 0.0 }
 0xdce   :  { %v2311_v26 = vsel %vm328_vm0, %v2289_v0, 0.0 }
 0xdd0   :  { %v3358_v16 = vpop.f32.mrb[56].mxu1 }
 0xdd1   :  { %v2294_v61 = vmul.f32 %v3358_v16, %v2269_v27  ;;  %v2241_v63 = vpop.f32.mrb[57].mxu1 }
 0xdd2   :  { %v2292_v14 = vmul.f32 %v2265_v12, %v2241_v63  ;;  %v3359_v2 = vpop.f32.mrb[58].mxu1 }
 0xdd3   :  { %v2315_v21 = vsel %vm328_vm0, %v2294_v61, 0.0  ;;  %v2295_v62 = vmul.f32 %v3359_v2, %v2271_v38  ;;  %v2244_v7 = vpop.f32.mrb[59].mxu1 }
 0xdd4   :  { %v2316_v6 = vadd.f32 %v2315_v21, %v2314_v59  ;;  %v2309_v30 = vsel %vm328_vm0, %v2292_v14, 0.0  ;;  %v2293_v15 = vmul.f32 %v2267_v37, %v2244_v7 }
 0xdd5   :  { %v2310_v28 = vadd.f32 %v2309_v30, %v2308_v9  ;;  %v2318_v18 = vsel %vm328_vm0, %v2295_v62, 0.0 }
 0xdd6   :  { %v2319_v12 = vadd.f32 %v2318_v18, %v2317_v11  ;;  %v2312_v13 = vsel %vm328_vm0, %v2293_v15, 0.0 }
 0xdd7   :  { %v2313_v23 = vadd.f32 %v2312_v13, %v2311_v26 }
 0xdd8   :  { %v2323_v27 = vpack.c.bf16 %v2319_v12, %v2316_v6 }
 0xdd9   :  { %v2322_v29 = vpack.c.bf16 %v2313_v23, %v2310_v28 }
 0xddb   :  { %3368 = vmatprep.mubr.msk.bf16.mxu0 %vm328_vm0, %v2322_v29 }
 0xddc   :  { %3369 = vmatmul.mubr.msk.bf16.gmra.mrb[56].mxu0 %vm328_vm0, %v2323_v27 }
 0xe9c   :  { %v3366_v41 = vpop.f32.mrb[52].mxu0 }
 0xe9d   :  { %v2388_v37 = vpop.f32.mrb[53].mxu0  ;;  %v2397_v44 = vadd.f32 %v3366_v41, %v3069_v32 }
 0xe9e   :  { %v2389_v33 = vadd.f32 %v3069_v32, %v2388_v37  ;;  %v3367_v38 = vpop.f32.mrb[54].mxu0 }
 0xe9f   :  { %v2391_v3 = vpop.f32.mrb[55].mxu0  ;;  %v2400_v25 = vadd.f32 %v3367_v38, %v3069_v32  ;;  %v2421_v39 = vadd.f32 %v2397_v44, %v4731_v4 }
 0xea0   :  { %v2392_v49 = vadd.f32 %v3069_v32, %v2391_v3  ;;  %v2419_v31 = vadd.f32 %v2389_v33, %v4725_v34 }
 0xea1   :  { %v2433_v43 = vsel %vm328_vm0, %v2421_v39, 0.0  ;;  %v2422_v42 = vadd.f32 %v2400_v25, %v4733_v5  ;;  %v3451_v25 = vld [vmem:[#allocation20 + $0x10] sm:$0xff]  }
 0xea2   :  { %v2427_v45 = vsel %vm328_vm0, %v2419_v31, 0.0  ;;  %v2420_v8 = vadd.f32 %v2392_v49, %v4727_v1  ;;  %3372 = vmatprep.subr.bf16.mxu1 %v3451_v25 }
 0xea3   :  { %2428 = vadd.xlane.f32.xlu0 %v2427_v45  ;;  %v2436_v50 = vsel %vm328_vm0, %v2422_v42, 0.0  ;;  %3373 = vmatpush3.bf16.msra.mxu1 %v3451_v25  ;;  %v3452_v45 = vld [vmem:[#allocation20 + $0x18] sm:$0xff]  }
 0xea4   :  { %v2430_v24 = vsel %vm328_vm0, %v2420_v8, 0.0  ;;  %3374 = vmatprep.subr.bf16.mxu1 %v3452_v45 }
 0xea5   :  { %2431 = vadd.xlane.f32.xlu1 %v2430_v24 }
 0xea7   :  { %2434 = vadd.xlane.f32.xlu0 %v2433_v43  ;;  %3375 = vmatpush3.bf16.msra.mxu1 %v3452_v45 }
 0xeab   :  { %2437 = vadd.xlane.f32.xlu0 %v2436_v50 }
 0xeaf   :  { %v3370_v34 = vpop.f32.mrb[56].mxu0 }
 0xeb0   :  { %v2404_v17 = vpop.f32.mrb[57].mxu0  ;;  %v2413_v51 = vadd.f32 %v3370_v34, %v3069_v32 }
 0xeb1   :  { %v2405_v52 = vadd.f32 %v3069_v32, %v2404_v17  ;;  %v3371_v19 = vpop.f32.mrb[58].mxu0 }
 0xeb2   :  { %v2407_v1 = vpop.f32.mrb[59].mxu0  ;;  %v2416_v53 = vadd.f32 %v3371_v19, %v3069_v32  ;;  %v2425_v5 = vadd.f32 %v2413_v51, %v4751_v10 }
 0xeb3   :  { %v2408_v4 = vadd.f32 %v3069_v32, %v2407_v1  ;;  %v2423_v54 = vadd.f32 %v2405_v52, %v4744_v36 }
 0xeb4   :  { %v2426_v47 = vadd.f32 %v2416_v53, %v4753_v40  ;;  %v2445_v57 = vsel %vm328_vm0, %v2425_v5, 0.0 }
 0xeb5   :  { %v2439_v55 = vsel %vm328_vm0, %v2423_v54, 0.0  ;;  %v2424_v46 = vadd.f32 %v2408_v4, %v4746_v35 }
 0xeb6   :  { %2440 = vadd.xlane.f32.xlu1 %v2439_v55  ;;  %v2448_v22 = vsel %vm328_vm0, %v2426_v47, 0.0 }
 0xeb7   :  { %v2442_v56 = vsel %vm328_vm0, %v2424_v46, 0.0 }
 0xeb8   :  { %2443 = vadd.xlane.f32.xlu0 %v2442_v56 }
 0xeba   :  { %2446 = vadd.xlane.f32.xlu1 %v2445_v57 }
 0xebc   :  { %2449 = vadd.xlane.f32.xlu0 %v2448_v22 }
 0xf30   :  { %v2429_v48 = vpop.xlane.xlu0 %2428 }
 0xf31   :  { %v2451_v36 = vmul.f32 0.03125, %v2429_v48  ;;  %v3077_v48 = vld [vmem:[#allocation19 + $0x1] ss:$0 sm:$0xff] }
 0xf32   :  { %v2432_v58 = vpop.xlane.xlu1 %2431 }
 0xf33   :  { %v4858_v60 = vsub.f32 %v2419_v31, %v2451_v36  ;;  %v2452_v35 = vmul.f32 0.03125, %v2432_v58 }
 0xf34   :  { %v2435_v16 = vpop.xlane.xlu0 %2434 }
 0xf35   :  { %v4860_v10 = vsub.f32 %v2420_v8, %v2452_v35  ;;  %v2453_v20 = vmul.f32 0.03125, %v2435_v16  ;;  %v2467_v40 = vmul.f32 %v4858_v60, %v4858_v60  ;;  %v3453_v8 = vld [vmem:[#allocation23 + $0x20] sm:$0xff]  }
 0xf36   :  { %3384 = vmatprep.subr.bf16.mxu0 %v3453_v8 }
 0xf37   :  { %v4864_v61 = vsub.f32 %v2421_v39, %v2453_v20  ;;  %v2475_v63 = vsel %vm328_vm0, %v2467_v40, 0.0  ;;  %v2468_v0 = vmul.f32 %v4860_v10, %v4860_v10  ;;  %v3454_v39 = vld [vmem:[#allocation23 + $0x28] sm:$0xff]   ;;  %3385 = vmatpush3.bf16.msra.mxu0 %v3453_v8 }
 0xf38   :  { %2476 = vadd.xlane.f32.xlu1 %v2475_v63  ;;  %v2438_v14 = vpop.xlane.xlu0 %2437  ;;  %3386 = vmatprep.subr.bf16.mxu0 %v3454_v39 }
 0xf39   :  { %v2454_v2 = vmul.f32 0.03125, %v2438_v14  ;;  %v2478_v59 = vsel %vm328_vm0, %v2468_v0, 0.0  ;;  %v2469_v21 = vmul.f32 %v4864_v61, %v4864_v61 }
 0xf3a   :  { %2479 = vadd.xlane.f32.xlu0 %v2478_v59 }
 0xf3b   :  { %v4872_v62 = vsub.f32 %v2422_v42, %v2454_v2  ;;  %v2481_v7 = vsel %vm328_vm0, %v2469_v21, 0.0  ;;  %3387 = vmatpush3.bf16.msra.mxu0 %v3454_v39  ;;  %v3456_v39 = vld [vmem:[#allocation23 + $0x38] sm:$0xff]  }
 0xf3c   :  { %2482 = vadd.xlane.f32.xlu1 %v2481_v7 }
 0xf3d   :  { %v2470_v9 = vmul.f32 %v4872_v62, %v4872_v62 }
 0xf3f   :  { %v2484_v6 = vsel %vm328_vm0, %v2470_v9, 0.0 }
 0xf40   :  { %2485 = vadd.xlane.f32.xlu0 %v2484_v6 }
 0xf43   :  { %v2441_v30 = vpop.xlane.xlu1 %2440 }
 0xf44   :  { %v2455_v15 = vmul.f32 0.03125, %v2441_v30 }
 0xf45   :  { %v2444_v11 = vpop.xlane.xlu0 %2443 }
 0xf46   :  { %v4878_v28 = vsub.f32 %v2423_v54, %v2455_v15  ;;  %v2456_v18 = vmul.f32 0.03125, %v2444_v11 }
 0xf47   :  { %v2447_v26 = vpop.xlane.xlu1 %2446 }
 0xf48   :  { %v4880_v12 = vsub.f32 %v2424_v46, %v2456_v18  ;;  %v2457_v13 = vmul.f32 0.03125, %v2447_v26  ;;  %v2471_v23 = vmul.f32 %v4878_v28, %v4878_v28  ;;  %v3076_v46 = vld [vmem:[#allocation17 + $0x1] ss:$0 sm:$0xff] }
 0xf49   :  { %v2450_v27 = vpop.xlane.xlu0 %2449 }
 0xf4a   :  { %v4884_v29 = vsub.f32 %v2425_v5, %v2457_v13  ;;  %v2458_v32 = vmul.f32 0.03125, %v2450_v27  ;;  %v2487_v41 = vsel %vm328_vm0, %v2471_v23, 0.0  ;;  %v2472_v37 = vmul.f32 %v4880_v12, %v4880_v12 }
 0xf4b   :  { %2488 = vadd.xlane.f32.xlu1 %v2487_v41 }
 0xf4c   :  { %v4889_v44 = vsub.f32 %v2426_v47, %v2458_v32  ;;  %v2490_v33 = vsel %vm328_vm0, %v2472_v37, 0.0  ;;  %v2473_v38 = vmul.f32 %v4884_v29, %v4884_v29 }
 0xf4d   :  { %2491 = vadd.xlane.f32.xlu0 %v2490_v33 }
 0xf4e   :  { %v2493_v3 = vsel %vm328_vm0, %v2473_v38, 0.0  ;;  %v2474_v49 = vmul.f32 %v4889_v44, %v4889_v44 }
 0xf4f   :  { %2494 = vadd.xlane.f32.xlu1 %v2493_v3 }
 0xf50   :  { %v2496_v31 = vsel %vm328_vm0, %v2474_v49, 0.0 }
 0xf51   :  { %2497 = vadd.xlane.f32.xlu0 %v2496_v31 }
 0xfc5   :  { %v2477_v24 = vpop.xlane.xlu1 %2476 }
 0xfc6   :  { %v2499_v43 = vmul.f32 0.03125, %v2477_v24  ;;  %v3078_v24 = vld [vmem:[#allocation22 + $0x1] ss:$0 sm:$0xff] }
 0xfc7   :  { %v2480_v42 = vpop.xlane.xlu0 %2479 }
 0xfc8   :  { %v2507_v50 = vadd.f32 1e-05, %v2499_v43  ;;  %v2500_v34 = vmul.f32 0.03125, %v2480_v42 }
 0xfc9   :  { %v2483_v17 = vpop.xlane.xlu1 %2482 }
 0xfca   :  { %3585 = vrsqrt.f32 %v2507_v50  ;;  %v2508_v51 = vadd.f32 1e-05, %v2500_v34  ;;  %v2501_v52 = vmul.f32 0.03125, %v2483_v17 }
 0xfcc   :  { %3587 = vrsqrt.f32 %v2508_v51  ;;  %v2509_v19 = vadd.f32 1e-05, %v2501_v52 }
 0xfcd   :  { %v2486_v1 = vpop.xlane.xlu0 %2485 }
 0xfce   :  { %3589 = vrsqrt.f32 %v2509_v19  ;;  %v2502_v53 = vmul.f32 0.03125, %v2486_v1 }
 0xfd0   :  { %v2510_v4 = vadd.f32 1e-05, %v2502_v53 }
 0xfd2   :  { %3591 = vrsqrt.f32 %v2510_v4 }
 0xfd4   :  { %v3586_v54 = vpop.eup %3585 }
 0xfd5   :  { %v2523_v55 = vmul.f32 %v3586_v54, %v4858_v60 }
 0xfd6   :  { %v3588_v5 = vpop.eup %3587 }
 0xfd7   :  { %v2524_v56 = vmul.f32 %v3588_v5, %v4860_v10  ;;  %v2537_v22 = vmul.f32 %v3076_v46, %v2523_v55 }
 0xfd8   :  { %v3590_v47 = vpop.eup %3589  ;;  %v2489_v57 = vpop.xlane.xlu1 %2488 }
 0xfd9   :  { %v2525_v36 = vmul.f32 %v3590_v47, %v4864_v61  ;;  %v2503_v58 = vmul.f32 0.03125, %v2489_v57  ;;  %v2538_v35 = vmul.f32 %v3076_v46, %v2524_v56  ;;  %v4903_v60 = vadd.f32 %v3077_v48, %v2537_v22 }
 0xfda   :  { %v2492_v16 = vpop.xlane.xlu0 %2491 }
 0xfdb   :  { %v2511_v20 = vadd.f32 1e-05, %v2503_v58  ;;  %v2504_v40 = vmul.f32 0.03125, %v2492_v16  ;;  %v4901_v63 = vadd.f32 %v3077_v48, %v2538_v35  ;;  %v2539_v2 = vmul.f32 %v3076_v46, %v2525_v36 }
 0xfdc   :  { %v3592_v0 = vpop.eup %3591  ;;  %v2495_v14 = vpop.xlane.xlu1 %2494 }
 0xfdd   :  { %v2526_v10 = vmul.f32 %v3592_v0, %v4872_v62  ;;  %3593 = vrsqrt.f32 %v2511_v20  ;;  %v2512_v59 = vadd.f32 1e-05, %v2504_v40  ;;  %v2505_v21 = vmul.f32 0.03125, %v2495_v14 }
 0xfde   :  { %v2498_v7 = vpop.xlane.xlu0 %2497  ;;  %v2559_v61 = vpack.c.bf16 %v4901_v63, %v4903_v60  ;;  %v4909_v15 = vadd.f32 %v3077_v48, %v2539_v2  ;;  %v3085_v2 = vld [vmem:[#allocation25 + $0x1] ss:$0 sm:$0xff] }
 0xfdf   :  { %v2540_v9 = vmul.f32 %v3076_v46, %v2526_v10  ;;  %3595 = vrsqrt.f32 %v2512_v59  ;;  %v2506_v6 = vmul.f32 0.03125, %v2498_v7  ;;  %v2513_v30 = vadd.f32 1e-05, %v2505_v21 }
 0xfe0   :  { %3376 = vmatprep.mubr.msk.bf16.mxu1 %vm328_vm0, %v2559_v61 }
 0xfe1   :  { %v4911_v11 = vadd.f32 %v3077_v48, %v2540_v9  ;;  %v2514_v18 = vadd.f32 1e-05, %v2506_v6  ;;  %3597 = vrsqrt.f32 %v2513_v30 }
 0xfe3   :  { %3599 = vrsqrt.f32 %v2514_v18  ;;  %v2560_v62 = vpack.c.bf16 %v4911_v11, %v4909_v15 }
 0xfe5   :  { %3377 = vmatmul.mubr.msk.bf16.vlgmr.msra.gmra.mrb[60].mxu1 %vm328_vm0, %v2560_v62 }
 0xfe7   :  { %v3594_v26 = vpop.eup %3593 }
 0xfe8   :  { %v2527_v13 = vmul.f32 %v3594_v26, %v4878_v28 }
 0xfe9   :  { %v3596_v23 = vpop.eup %3595 }
 0xfea   :  { %v2528_v27 = vmul.f32 %v3596_v23, %v4880_v12  ;;  %v2541_v32 = vmul.f32 %v3076_v46, %v2527_v13 }
 0xfeb   :  { %v3598_v41 = vpop.eup %3597 }
 0xfec   :  { %v2542_v37 = vmul.f32 %v3076_v46, %v2528_v27  ;;  %v2529_v38 = vmul.f32 %v3598_v41, %v4884_v29  ;;  %v4920_v49 = vadd.f32 %v3077_v48, %v2541_v32 }
 0xfed   :  { %v3600_v33 = vpop.eup %3599 }
 0xfee   :  { %v2530_v3 = vmul.f32 %v3600_v33, %v4889_v44  ;;  %v4922_v31 = vadd.f32 %v3077_v48, %v2542_v37  ;;  %v2543_v25 = vmul.f32 %v3076_v46, %v2529_v38  ;;  %v3455_v44 = vld [vmem:[#allocation23 + $0x30] sm:$0xff]  }
 0xfef   :  { %3388 = vmatprep.subr.bf16.mxu0 %v3455_v44 }
 0xff0   :  { %v2561_v45 = vpack.c.bf16 %v4922_v31, %v4920_v49  ;;  %v2544_v28 = vmul.f32 %v3076_v46, %v2530_v3  ;;  %v4927_v12 = vadd.f32 %v3077_v48, %v2543_v25  ;;  %3389 = vmatpush3.bf16.msra.mxu0 %v3455_v44 }
 0xff1   :  { %3390 = vmatprep.subr.bf16.mxu0 %v3456_v39 }
 0xff2   :  { %3380 = vmatprep.mubr.msk.bf16.mxu1 %vm328_vm0, %v2561_v45  ;;  %v4929_v8 = vadd.f32 %v3077_v48, %v2544_v28 }
 0xff4   :  { %v2562_v29 = vpack.c.bf16 %v4929_v8, %v4927_v12  ;;  %3391 = vmatpush3.bf16.msra.mxu0 %v3456_v39 }
 0xff6   :  { %3381 = vmatmul.mubr.msk.bf16.gmra.mrb[64].mxu1 %vm328_vm0, %v2562_v29 }
0x10b8   :  { %v3378_v43 = vpop.f32.mrb[60].mxu1 }
0x10b9   :  { %v2636_v42 = vadd.f32 %v3378_v43, %v3078_v24  ;;  %v2627_v50 = vpop.f32.mrb[61].mxu1 }
0x10ba   :  { %v2628_v34 = vadd.f32 %v3078_v24, %v2627_v50  ;;  %v3379_v17 = vpop.f32.mrb[62].mxu1 }
0x10bb   :  { %v2639_v51 = vadd.f32 %v3379_v17, %v3078_v24  ;;  %v2630_v52 = vpop.f32.mrb[63].mxu1  ;;  %v2660_v1 = vmax.f32 %v2636_v42, 0.0 }
0x10bc   :  { %v2631_v19 = vadd.f32 %v3078_v24, %v2630_v52  ;;  %v2658_v4 = vmax.f32 %v2628_v34, 0.0 }
0x10bd   :  { %v2661_v53 = vmax.f32 %v2639_v51, 0.0 }
0x10be   :  { %v2659_v54 = vmax.f32 %v2631_v19, 0.0 }
0x10bf   :  { %v2667_v55 = vpack.c.bf16 %v2661_v53, %v2660_v1 }
0x10c0   :  { %v2666_v46 = vpack.c.bf16 %v2659_v54, %v2658_v4 }
0x10c2   :  { %3392 = vmatprep.mubr.msk.bf16.mxu0 %vm1457_vm3, %v2666_v46 }
0x10c3   :  { %3393 = vmatmul.mubr.msk.bf16.vlgmr.msra.gmra.mrb[60].mxu0 %vm1457_vm3, %v2667_v55 }
0x10c9   :  { %v3382_v5 = vpop.f32.mrb[64].mxu1 }
0x10ca   :  { %v2652_v56 = vadd.f32 %v3382_v5, %v3078_v24  ;;  %v2643_v47 = vpop.f32.mrb[65].mxu1 }
0x10cb   :  { %v2644_v57 = vadd.f32 %v3078_v24, %v2643_v47  ;;  %v3383_v22 = vpop.f32.mrb[66].mxu1 }
0x10cc   :  { %v2655_v48 = vadd.f32 %v3383_v22, %v3078_v24  ;;  %v2646_v36 = vpop.f32.mrb[67].mxu1  ;;  %v2664_v35 = vmax.f32 %v2652_v56, 0.0 }
0x10cd   :  { %v2647_v58 = vadd.f32 %v3078_v24, %v2646_v36  ;;  %v2662_v20 = vmax.f32 %v2644_v57, 0.0 }
0x10ce   :  { %v2665_v16 = vmax.f32 %v2655_v48, 0.0 }
0x10cf   :  { %v2663_v40 = vmax.f32 %v2647_v58, 0.0 }
0x10d0   :  { %v2669_v0 = vpack.c.bf16 %v2665_v16, %v2664_v35 }
0x10d1   :  { %v2668_v14 = vpack.c.bf16 %v2663_v40, %v2662_v20 }
0x10d3   :  { %3396 = vmatprep.mubr.msk.bf16.mxu0 %vm1457_vm3, %v2668_v14 }
0x10d4   :  { %3397 = vmatmul.mubr.msk.bf16.gmra.mrb[64].mxu0 %vm1457_vm3, %v2669_v0 }
0x1196   :  { %v3394_v10 = vpop.f32.mrb[60].mxu0 }
0x1197   :  { %v2755_v59 = vadd.f32 %v3394_v10, %v3085_v2  ;;  %v2746_v21 = vpop.f32.mrb[61].mxu0 }
0x1198   :  { %v2747_v7 = vadd.f32 %v3085_v2, %v2746_v21  ;;  %v3395_v61 = vpop.f32.mrb[62].mxu0 }
0x1199   :  { %v2758_v9 = vadd.f32 %v3395_v61, %v3085_v2  ;;  %v2749_v6 = vpop.f32.mrb[63].mxu0  ;;  %v2779_v30 = vadd.f32 %v2755_v59, %v4909_v15 }
0x119a   :  { %v2750_v18 = vadd.f32 %v3085_v2, %v2749_v6  ;;  %v2777_v13 = vadd.f32 %v2747_v7, %v4903_v60 }
0x119b   :  { %v2791_v62 = vsel %vm328_vm0, %v2779_v30, 0.0  ;;  %v2780_v26 = vadd.f32 %v2758_v9, %v4911_v11 }
0x119c   :  { %2792 = vadd.xlane.f32.xlu1 %v2791_v62  ;;  %v2778_v27 = vadd.f32 %v2750_v18, %v4901_v63  ;;  %v2785_v32 = vsel %vm328_vm0, %v2777_v13, 0.0 }
0x119d   :  { %v2794_v23 = vsel %vm328_vm0, %v2780_v26, 0.0 }
0x119e   :  { %2795 = vadd.xlane.f32.xlu0 %v2794_v23  ;;  %v2788_v41 = vsel %vm328_vm0, %v2778_v27, 0.0 }
0x11a0   :  { %2786 = vadd.xlane.f32.xlu1 %v2785_v32 }
0x11a2   :  { %2789 = vadd.xlane.f32.xlu0 %v2788_v41 }
0x11a7   :  { %v3398_v15 = vpop.f32.mrb[64].mxu0 }
0x11a8   :  { %v2762_v37 = vpop.f32.mrb[65].mxu0  ;;  %v2771_v33 = vadd.f32 %v3398_v15, %v3085_v2 }
0x11a9   :  { %v2763_v38 = vadd.f32 %v3085_v2, %v2762_v37  ;;  %v3399_v3 = vpop.f32.mrb[66].mxu0 }
0x11aa   :  { %v2765_v11 = vpop.f32.mrb[67].mxu0  ;;  %v2774_v25 = vadd.f32 %v3399_v3, %v3085_v2  ;;  %v2783_v29 = vadd.f32 %v2771_v33, %v4927_v12 }
0x11ab   :  { %v2766_v60 = vadd.f32 %v3085_v2, %v2765_v11  ;;  %v2781_v45 = vadd.f32 %v2763_v38, %v4920_v49  ;;  %v3094_v11 = vld [vmem:[#allocation26 + $0x1] ss:$0 sm:$0xff] }
0x11ac   :  { %v2784_v39 = vadd.f32 %v2774_v25, %v4929_v8  ;;  %v2803_v24 = vsel %vm328_vm0, %v2783_v29, 0.0 }
0x11ad   :  { %v2797_v28 = vsel %vm328_vm0, %v2781_v45, 0.0  ;;  %v2782_v63 = vadd.f32 %v2766_v60, %v4922_v31 }
0x11ae   :  { %2798 = vadd.xlane.f32.xlu1 %v2797_v28  ;;  %v2806_v43 = vsel %vm328_vm0, %v2784_v39, 0.0 }
0x11af   :  { %v2800_v44 = vsel %vm328_vm0, %v2782_v63, 0.0 }
0x11b0   :  { %2801 = vadd.xlane.f32.xlu0 %v2800_v44 }
0x11b2   :  { %2804 = vadd.xlane.f32.xlu1 %v2803_v24 }
0x11b4   :  { %2807 = vadd.xlane.f32.xlu0 %v2806_v43 }
0x1229   :  { %v2793_v42 = vpop.xlane.xlu1 %2792 }
0x122a   :  { %v2811_v49 = vmul.f32 0.03125, %v2793_v42 }
0x122b   :  { %v2796_v50 = vpop.xlane.xlu0 %2795 }
0x122c   :  { %v4954_v34 = vsub.f32 %v2779_v30, %v2811_v49  ;;  %v2812_v31 = vmul.f32 0.03125, %v2796_v50 }
0x122d   :  { %v2787_v17 = vpop.xlane.xlu1 %2786 }
0x122e   :  { %v4956_v12 = vsub.f32 %v2780_v26, %v2812_v31  ;;  %v2809_v51 = vmul.f32 0.03125, %v2787_v17  ;;  %v2827_v8 = vmul.f32 %v4954_v34, %v4954_v34 }
0x122f   :  { %v2790_v52 = vpop.xlane.xlu0 %2789 }
0x1230   :  { %v4960_v19 = vsub.f32 %v2777_v13, %v2809_v51  ;;  %v2810_v1 = vmul.f32 0.03125, %v2790_v52  ;;  %v2839_v53 = vsel %vm328_vm0, %v2827_v8, 0.0  ;;  %v2828_v4 = vmul.f32 %v4956_v12, %v4956_v12 }
0x1231   :  { %2840 = vadd.xlane.f32.xlu1 %v2839_v53 }
0x1232   :  { %v4965_v54 = vsub.f32 %v2778_v27, %v2810_v1  ;;  %v2842_v55 = vsel %vm328_vm0, %v2828_v4, 0.0  ;;  %v2825_v46 = vmul.f32 %v4960_v19, %v4960_v19 }
0x1233   :  { %2843 = vadd.xlane.f32.xlu0 %v2842_v55 }
0x1234   :  { %v2833_v5 = vsel %vm328_vm0, %v2825_v46, 0.0  ;;  %v2826_v56 = vmul.f32 %v4965_v54, %v4965_v54 }
0x1235   :  { %2834 = vadd.xlane.f32.xlu1 %v2833_v5 }
0x1236   :  { %v2836_v47 = vsel %vm328_vm0, %v2826_v56, 0.0 }
0x1237   :  { %2837 = vadd.xlane.f32.xlu0 %v2836_v47 }
0x123b   :  { %v2799_v57 = vpop.xlane.xlu1 %2798 }
0x123c   :  { %v2813_v22 = vmul.f32 0.03125, %v2799_v57 }
0x123d   :  { %v2802_v48 = vpop.xlane.xlu0 %2801 }
0x123e   :  { %v4974_v36 = vsub.f32 %v2781_v45, %v2813_v22  ;;  %v2814_v58 = vmul.f32 0.03125, %v2802_v48  ;;  %v3095_v45 = vld [vmem:[#allocation28 + $0x1] ss:$0 sm:$0xff] }
0x123f   :  { %v2805_v35 = vpop.xlane.xlu1 %2804 }
0x1240   :  { %v4976_v16 = vsub.f32 %v2782_v63, %v2814_v58  ;;  %v2815_v20 = vmul.f32 0.03125, %v2805_v35  ;;  %v2829_v40 = vmul.f32 %v4974_v36, %v4974_v36 }
0x1241   :  { %v2808_v0 = vpop.xlane.xlu0 %2807 }
0x1242   :  { %v4980_v14 = vsub.f32 %v2783_v29, %v2815_v20  ;;  %v2816_v2 = vmul.f32 0.03125, %v2808_v0  ;;  %v2845_v10 = vsel %vm328_vm0, %v2829_v40, 0.0  ;;  %v2830_v59 = vmul.f32 %v4976_v16, %v4976_v16 }
0x1243   :  { %2846 = vadd.xlane.f32.xlu1 %v2845_v10 }
0x1244   :  { %v4985_v21 = vsub.f32 %v2784_v39, %v2816_v2  ;;  %v2848_v7 = vsel %vm328_vm0, %v2830_v59, 0.0  ;;  %v2831_v61 = vmul.f32 %v4980_v14, %v4980_v14 }
0x1245   :  { %2849 = vadd.xlane.f32.xlu0 %v2848_v7 }
0x1246   :  { %v2851_v9 = vsel %vm328_vm0, %v2831_v61, 0.0  ;;  %v2832_v6 = vmul.f32 %v4985_v21, %v4985_v21 }
0x1247   :  { %2852 = vadd.xlane.f32.xlu1 %v2851_v9 }
0x1248   :  { %v2854_v30 = vsel %vm328_vm0, %v2832_v6, 0.0 }
0x1249   :  { %2855 = vadd.xlane.f32.xlu0 %v2854_v30 }
0x12be   :  { %v2841_v18 = vpop.xlane.xlu1 %2840 }
0x12bf   :  { %v2859_v62 = vmul.f32 0.03125, %v2841_v18 }
0x12c0   :  { %v2844_v26 = vpop.xlane.xlu0 %2843 }
0x12c1   :  { %v2867_v13 = vadd.f32 1e-05, %v2859_v62  ;;  %v2860_v23 = vmul.f32 0.03125, %v2844_v26 }
0x12c2   :  { %v2835_v27 = vpop.xlane.xlu1 %2834 }
0x12c3   :  { %3601 = vrsqrt.f32 %v2867_v13  ;;  %v2868_v32 = vadd.f32 1e-05, %v2860_v23  ;;  %v2857_v41 = vmul.f32 0.03125, %v2835_v27 }
0x12c4   :  { %v2838_v15 = vpop.xlane.xlu0 %2837 }
0x12c5   :  { %3603 = vrsqrt.f32 %v2868_v32  ;;  %v2865_v37 = vadd.f32 1e-05, %v2857_v41  ;;  %v2858_v33 = vmul.f32 0.03125, %v2838_v15 }
0x12c7   :  { %3605 = vrsqrt.f32 %v2865_v37  ;;  %v2866_v38 = vadd.f32 1e-05, %v2858_v33 }
0x12c9   :  { %3607 = vrsqrt.f32 %v2866_v38 }
0x12cd   :  { %v3602_v3 = vpop.eup %3601 }
0x12ce   :  { %v2883_v25 = vmul.f32 %v3602_v3, %v4954_v34 }
0x12cf   :  { %v3604_v60 = vpop.eup %3603 }
0x12d0   :  { %v2897_v28 = vmul.f32 %v3094_v11, %v2883_v25  ;;  %v2884_v63 = vmul.f32 %v3604_v60, %v4956_v12  ;;  %v2847_v29 = vpop.xlane.xlu1 %2846 }
0x12d1   :  { %v3606_v44 = vpop.eup %3605  ;;  %v2861_v39 = vmul.f32 0.03125, %v2847_v29 }
0x12d2   :  { %v2911_v24 = vadd.f32 %v3095_v45, %v2897_v28  ;;  %v2898_v43 = vmul.f32 %v3094_v11, %v2884_v63  ;;  %v2881_v42 = vmul.f32 %v3606_v44, %v4960_v19  ;;  %v2850_v49 = vpop.xlane.xlu0 %2849 }
0x12d3   :  { %v3608_v50 = vpop.eup %3607  ;;  %v2869_v31 = vadd.f32 1e-05, %v2861_v39  ;;  %v2862_v17 = vmul.f32 0.03125, %v2850_v49 }
0x12d4   :  { %v3106_v51 = vpack.c.bf16 %v2911_v24, %v2911_v24  ;;  %v2912_v8 = vadd.f32 %v3095_v45, %v2898_v43  ;;  %v2895_v34 = vmul.f32 %v3094_v11, %v2881_v42  ;;  %v2882_v52 = vmul.f32 %v3608_v50, %v4965_v54  ;;  %v2853_v1 = vpop.xlane.xlu1 %2852 }
0x12d5   :  { %3609 = vrsqrt.f32 %v2869_v31  ;;  %v2870_v12 = vadd.f32 1e-05, %v2862_v17  ;;  %v2863_v53 = vmul.f32 0.03125, %v2853_v1 }
0x12d6   :  { %2952 = vst.msk [vmem:[#allocation29 + $0x8] sm:$0xf] %vm2949_vm4, %v3106_v51  ;;  %v3107_v4 = vpack.c.bf16 %v2912_v8, %v2912_v8  ;;  %v2909_v55 = vadd.f32 %v3095_v45, %v2895_v34  ;;  %v2896_v46 = vmul.f32 %v3094_v11, %v2882_v52  ;;  %v2856_v19 = vpop.xlane.xlu0 %2855 }
0x12d7   :  { %3611 = vrsqrt.f32 %v2870_v12  ;;  %v2871_v5 = vadd.f32 1e-05, %v2863_v53  ;;  %v2864_v56 = vmul.f32 0.03125, %v2856_v19 }
0x12d8   :  { %2953 = vst.msk [vmem:[#allocation29 + $0xc] sm:$0xf] %vm2949_vm4, %v3107_v4  ;;  %v3104_v47 = vpack.c.bf16 %v2909_v55, %v2909_v55  ;;  %v2910_v57 = vadd.f32 %v3095_v45, %v2896_v46 }
0x12d9   :  { %3613 = vrsqrt.f32 %v2871_v5  ;;  %v2872_v22 = vadd.f32 1e-05, %v2864_v56 }
0x12da   :  { %2950 = vst.msk [vmem:[#allocation29] sm:$0xf] %vm2949_vm4, %v3104_v47  ;;  %v3105_v54 = vpack.c.bf16 %v2910_v57, %v2910_v57 }
0x12db   :  { %3615 = vrsqrt.f32 %v2872_v22 }
0x12dc   :  { %2951 = vst.msk [vmem:[#allocation29 + $0x4] sm:$0xf] %vm2949_vm4, %v3105_v54 }
0x12df   :  { %v3610_v48 = vpop.eup %3609 }
0x12e0   :  { %v2885_v58 = vmul.f32 %v3610_v48, %v4974_v36 }
0x12e1   :  { %v3612_v35 = vpop.eup %3611 }
0x12e2   :  { %v2899_v20 = vmul.f32 %v3094_v11, %v2885_v58  ;;  %v2886_v40 = vmul.f32 %v3612_v35, %v4976_v16 }
0x12e3   :  { %v3614_v0 = vpop.eup %3613 }
0x12e4   :  { %v2913_v2 = vadd.f32 %v3095_v45, %v2899_v20  ;;  %v2900_v10 = vmul.f32 %v3094_v11, %v2886_v40  ;;  %v2887_v59 = vmul.f32 %v3614_v0, %v4980_v14 }
0x12e5   :  { %v3616_v7 = vpop.eup %3615 }
0x12e6   :  { %v3108_v61 = vpack.c.bf16 %v2913_v2, %v2913_v2  ;;  %v2914_v9 = vadd.f32 %v3095_v45, %v2900_v10  ;;  %v2901_v6 = vmul.f32 %v3094_v11, %v2887_v59  ;;  %v2888_v30 = vmul.f32 %v3616_v7, %v4985_v21 }
0x12e8   :  { %2954 = vst.msk [vmem:[#allocation29 + $0x10] sm:$0xf] %vm2949_vm4, %v3108_v61  ;;  %v3109_v18 = vpack.c.bf16 %v2914_v9, %v2914_v9  ;;  %v2915_v62 = vadd.f32 %v3095_v45, %v2901_v6  ;;  %v2902_v36 = vmul.f32 %v3094_v11, %v2888_v30 }
0x12ea   :  { %2955 = vst.msk [vmem:[#allocation29 + $0x14] sm:$0xf] %vm2949_vm4, %v3109_v18  ;;  %v3110_v16 = vpack.c.bf16 %v2915_v62, %v2915_v62  ;;  %v2916_v26 = vadd.f32 %v3095_v45, %v2902_v36 }
0x12ec   :  { %2956 = vst.msk [vmem:[#allocation29 + $0x18] sm:$0xf] %vm2949_vm4, %v3110_v16  ;;  %v3111_v14 = vpack.c.bf16 %v2916_v26, %v2916_v26 }
0x12ee   :  { %2957 = vst.msk [vmem:[#allocation29 + $0x1c] sm:$0xf] %vm2949_vm4, %v3111_v14 }
0x12ef   :  { %4005 = shalt.err (!%p4002_p0)
}
0x12f0   :  { %s5051_s11 = sld [smem:[#allocation42_spill]] }
0x12f6   :  { %s4006_s27 = scalar_lea.hbm %s5051_s11, 512 }
0x12f7   :  { %p4007_p1 = scmp.ne.s32.totalorder %s5051_s11, %s4006_s27  ;;  %p4010_p2 = scmp.lt.u32.totalorder %s4006_s27, %s5051_s11 }
0x12f9   :  { %p4012_p3 = pnand %p4010_p2, %p4007_p1 }
0x12fb   :  { %4015 = shalt.err (!%p4012_p3)
}
0x12fc   :  { %2969 = dma.vmem_to_hbm [thread:$0]  %s2964_s19, 512, %s5051_s11, [#allocation4], %s4038_s22, %s4038_s22, %s4039_s23  }
0x12fd   :  { %4034 = dma.done.wait [#allocation4], 512  }
0x12fe   :  { %4035 = vsyncadd [#allocation4], 4294966784 }
0x12ff   :  { %2973 = vsyncpa [#allocation3], 1 }
0x1300   :  { %2974 = vsyncpa [#allocation6], 1 }
0x1301   :  { %2975 = vsyncpa [#allocation9], 1 }
0x1302   :  { %2976 = vsyncpa [#allocation12], 1 }
0x1303   :  { %2977 = vsyncpa [#allocation15], 1 }
0x1304   :  { %2978 = vsyncpa [#allocation18], 1 }
0x1305   :  { %2979 = vsyncpa [#allocation21], 1 }
0x1306   :  { %2980 = vsyncpa [#allocation24], 1 }
0x1307   :  { %2981 = vsyncpa [#allocation27], 1 }
0x1308   :  { %2982 = vsyncpa [#allocation4], 1 }

// kernel: eegformer_forward.7
= control target key start
LH: loop header
LB: loop body
LE: loop exit
PB: predicated region body
PF: predicated region fallthrough
CT: control target
= control target key end

     0   :  { %s3226_s0 = inlined_call_operand.hbm [shape: bf16[16,128], index: 0, kind: input, shape index: {}]   ;;  %s3227_s1 = inlined_call_operand.hbm [shape: bf16[128,32], index: 1, kind: input, shape index: {}]   ;;  %s3228_s2 = inlined_call_operand.hbm [shape: f32[8,32], index: 2, kind: input, shape index: {}]   ;;  %s3229_s3 = inlined_call_operand.hbm [shape: bf16[32,4], index: 3, kind: input, shape index: {}]   ;;  %s3230_s4 = inlined_call_operand.hbm [shape: bf16[4,32], index: 4, kind: input, shape index: {}]   ;;  %s3231_s5 = inlined_call_operand.hbm [shape: bf16[2,32,96], index: 5, kind: input, shape index: {}]   ;;  %s3232_s6 = inlined_call_operand.hbm [shape: f32[2,1,96], index: 6, kind: input, shape index: {}]   ;;  %s3233_s7 = inlined_call_operand.hbm [shape: bf16[2,32,32], index: 7, kind: input, shape index: {}]   ;;  %s3234_s8 = inlined_call_operand.hbm [shape: f32[2,1,32], index: 8, kind: input, shape index: {}]   ;;  %s3235_s9 = inlined_call_operand.hbm [shape: f32[2,1,32], index: 9, kind: input, shape index: {}]   ;;  %s3236_s10 = inlined_call_operand.hbm [shape: f32[2,1,32], index: 10, kind: input, shape index: {}]   ;;  %s3237_s11 = inlined_call_operand.hbm [shape: bf16[2,32,64], index: 11, kind: input, shape index: {}]   ;;  %s3238_s12 = inlined_call_operand.hbm [shape: f32[2,1,64], index: 12, kind: input, shape index: {}]   ;;  %s3239_s13 = inlined_call_operand.hbm [shape: bf16[2,64,32], index: 13, kind: input, shape index: {}]   ;;  %s3240_s14 = inlined_call_operand.hbm [shape: f32[2,1,32], index: 14, kind: input, shape index: {}]   ;;  %s3241_s15 = inlined_call_operand.hbm [shape: f32[2,1,32], index: 15, kind: input, shape index: {}]   ;;  %s3242_s16 = inlined_call_operand.hbm [shape: f32[2,1,32], index: 16, kind: input, shape index: {}]   ;;  %s3243_s17 = inlined_call_operand.hbm [shape: bf16[32,32], index: 17, kind: input, shape index: {}]   ;;  %s3244_s18 = inlined_call_operand.hbm [shape: f32[1,32], index: 18, kind: input, shape index: {}]   ;;  %s3245_s19 = inlined_call_operand.hbm [shape: f32[1,32], index: 19, kind: input, shape index: {}]   ;;  %s3246_s20 = inlined_call_operand.<no memory space> [shape: f32[1,1], index: 20, kind: input, shape index: {}]   ;;  %s3247_s21 = inlined_call_operand.hbm [shape: f32[16,1], index: 21, kind: output, shape index: {}]  }
   0x1   :  { %3256 = sst [smem:[#allocation48_spill]] %s3226_s0  ;;  %v26_v0 = vstv %s3246_s20 }
   0x2   :  { %3257 = sst [smem:[#allocation49_spill]] %s3227_s1  ;;  %27 = vst [vmem:[#allocation2] sm:$0x1] %v26_v0 }
   0x3   :  { %3258 = sst [smem:[#allocation50_spill]] %s3228_s2 }
   0x4   :  { %3259 = sst [smem:[#allocation51_spill]] %s3229_s3 }
   0x5   :  { %3260 = sst [smem:[#allocation52_spill]] %s3230_s4 }
   0x6   :  { %3261 = sst [smem:[#allocation53_spill]] %s3231_s5 }
   0x7   :  { %3262 = sst [smem:[#allocation54_spill]] %s3245_s19 }
   0x8   :  { %3263 = sst [smem:[#allocation55_spill]] %s3247_s21 }
   0x9   :  { %28 = vsyncpa [#allocation4], 0 }
   0xa   :  { %29 = vsyncpa [#allocation7], 0 }
   0xb   :  { %30 = vsyncpa [#allocation10], 0 }
   0xc   :  { %31 = vsyncpa [#allocation13], 0 }
   0xd   :  { %32 = vsyncpa [#allocation16], 0 }
   0xe   :  { %33 = vsyncpa [#allocation19], 0 }
   0xf   :  { %34 = vsyncpa [#allocation22], 0 }
  0x10   :  { %35 = vsyncpa [#allocation25], 0 }
  0x11   :  { %36 = vsyncpa [#allocation28], 0 }
  0x12   :  { %37 = vsyncpa [#allocation31], 0 }
  0x13   :  { %38 = vsyncpa [#allocation34], 0 }
  0x14   :  { %39 = vsyncpa [#allocation5], 0  ;;  %s2570_s26 = smov [#allocation6]   ;;  %s2571_s3 = smov [#allocation9]  }
  0x15   :  { %s57_s27 = sshll.u32 %s2570_s26, 4  ;;  %s79_s28 = sshll.u32 %s2571_s3, 4  ;;  %s58_s27 = int_to_ptr.vmem [resolvable:$true] %s57_s27  ;;  %s2713_s28 = int_to_ptr.vmem [resolvable:$true] %s79_s28 }
  0x16   :  { %s3264_s0 = sld [smem:[#allocation49_spill]] }
  0x1c   :  { %s2084_s4 = scalar_lea.hbm %s3264_s0, 1024 }
  0x1d   :  { %p2085_p0 = scmp.ne.s32.totalorder %s3264_s0, %s2084_s4  ;;  %p2088_p1 = scmp.lt.u32.totalorder %s2084_s4, %s3264_s0 }
  0x1f   :  { %p2090_p2 = pnand %p2088_p1, %p2085_p0 }
  0x21   :  { %2093 = shalt.err (!%p2090_p2)
}
  0x22   :  { %s2094_s1 = scalar_lea.vmem %s58_s27, 1024  ;;  %p2099_p4 = scmp.lt.s32.totalorder %s58_s27, %s58_s27 }
  0x23   :  { %p2095_p3 = scmp.ne.s32.totalorder %s58_s27, %s2094_s1  ;;  %p2100_p5 = scmp.lt.s32.totalorder %s2094_s1, %s2094_s1 }
  0x25   :  { %p2101_p6 = por %p2100_p5, %p2099_p4 }
  0x27   :  { %p2102_p7 = pnand %p2101_p6, %p2095_p3 }
  0x29   :  { %2105 = shalt.err (!%p2102_p7)
}
  0x2a   :  { %s2572_s24 = smov 64   ;;  %s2573_s2 = smov 4  }
  0x2b   :  { %63 = dma.hbm_to_vmem [thread:$0]  %s3264_s0, 1024, %s58_s27, [#allocation7], %s2572_s24, %s2572_s24, %s2573_s2  }
  0x2c   :  { %s3265_s29 = sld [smem:[#allocation51_spill]] }
  0x32   :  { %s2106_s4 = scalar_lea.hbm %s3265_s29, 256 }
  0x33   :  { %p2107_p8 = scmp.ne.s32.totalorder %s3265_s29, %s2106_s4  ;;  %p2110_p9 = scmp.lt.u32.totalorder %s2106_s4, %s3265_s29 }
  0x35   :  { %p2112_p10 = pnand %p2110_p9, %p2107_p8 }
  0x37   :  { %2115 = shalt.err (!%p2112_p10)
}
  0x38   :  { %s2116_s1 = scalar_lea.vmem %s2713_s28, 256  ;;  %p2121_p12 = scmp.lt.s32.totalorder %s2713_s28, %s2713_s28 }
  0x39   :  { %p2117_p11 = scmp.ne.s32.totalorder %s2713_s28, %s2116_s1  ;;  %p2122_p13 = scmp.lt.s32.totalorder %s2116_s1, %s2116_s1 }
  0x3b   :  { %p2123_p0 = por %p2122_p13, %p2121_p12 }
  0x3d   :  { %p2124_p1 = pnand %p2123_p0, %p2117_p11 }
  0x3f   :  { %2127 = shalt.err (!%p2124_p1)
}
  0x40   :  { %85 = dma.hbm_to_vmem [thread:$0]  %s3265_s29, 256, %s2713_s28, [#allocation10], %s2572_s24, %s2572_s24, %s2573_s2  }
  0x41   :  { %s2574_s25 = smov [#allocation12]   ;;  %s2575_s3 = smov [#allocation15]  }
  0x42   :  { %s101_s26 = sshll.u32 %s2574_s25, 4  ;;  %s125_s20 = sshll.u32 %s2575_s3, 4  ;;  %s102_s26 = int_to_ptr.vmem [resolvable:$true] %s101_s26  ;;  %s2750_s20 = int_to_ptr.vmem [resolvable:$true] %s125_s20 }
  0x43   :  { %s3266_s5 = sld [smem:[#allocation53_spill]] }
  0x49   :  { %s2128_s22 = scalar_lea.hbm %s3266_s5, 512 }
  0x4a   :  { %p2129_p2 = scmp.ne.s32.totalorder %s3266_s5, %s2128_s22  ;;  %p2132_p3 = scmp.lt.u32.totalorder %s2128_s22, %s3266_s5 }
  0x4c   :  { %p2134_p4 = pnand %p2132_p3, %p2129_p2 }
  0x4e   :  { %2137 = shalt.err (!%p2134_p4)
}
  0x4f   :  { %s2138_s28 = scalar_lea.vmem %s102_s26, 512  ;;  %p2143_p6 = scmp.lt.s32.totalorder %s102_s26, %s102_s26 }
  0x50   :  { %p2139_p5 = scmp.ne.s32.totalorder %s102_s26, %s2138_s28  ;;  %p2144_p7 = scmp.lt.s32.totalorder %s2138_s28, %s2138_s28 }
  0x52   :  { %p2145_p8 = por %p2144_p7, %p2143_p6 }
  0x54   :  { %p2146_p9 = pnand %p2145_p8, %p2139_p5 }
  0x56   :  { %2149 = shalt.err (!%p2146_p9)
}
  0x57   :  { %107 = dma.hbm_to_vmem [thread:$0]  %s3266_s5, 512, %s102_s26, [#allocation13], %s2572_s24, %s2572_s24, %s2573_s2  }
  0x58   :  { %s2150_s19 = scalar_lea.hbm %s3233_s7, 512 }
  0x59   :  { %p2151_p10 = scmp.ne.s32.totalorder %s3233_s7, %s2150_s19  ;;  %p2154_p11 = scmp.lt.u32.totalorder %s2150_s19, %s3233_s7 }
  0x5b   :  { %p2156_p12 = pnand %p2154_p11, %p2151_p10 }
  0x5d   :  { %2159 = shalt.err (!%p2156_p12)
}
  0x5e   :  { %s2160_s22 = scalar_lea.vmem %s2750_s20, 512  ;;  %p2165_p0 = scmp.lt.s32.totalorder %s2750_s20, %s2750_s20 }
  0x5f   :  { %p2161_p13 = scmp.ne.s32.totalorder %s2750_s20, %s2160_s22  ;;  %p2166_p1 = scmp.lt.s32.totalorder %s2160_s22, %s2160_s22 }
  0x61   :  { %p2167_p2 = por %p2166_p1, %p2165_p0 }
  0x63   :  { %p2168_p3 = pnand %p2167_p2, %p2161_p13 }
  0x65   :  { %2171 = shalt.err (!%p2168_p3)
}
  0x66   :  { %131 = dma.hbm_to_vmem [thread:$0]  %s3233_s7, 512, %s2750_s20, [#allocation16], %s2572_s24, %s2572_s24, %s2573_s2  }
  0x67   :  { %s2576_s23 = smov [#allocation18]   ;;  %s2577_s28 = smov [#allocation21]  }
  0x68   :  { %s149_s1 = sshll.u32 %s2576_s23, 4  ;;  %s173_s29 = sshll.u32 %s2577_s28, 4  ;;  %s150_s1 = int_to_ptr.vmem [resolvable:$true] %s149_s1  ;;  %s2787_s29 = int_to_ptr.vmem [resolvable:$true] %s173_s29 }
  0x69   :  { %s2172_s25 = scalar_lea.hbm %s3235_s9, 32 }
  0x6a   :  { %p2173_p4 = scmp.ne.s32.totalorder %s3235_s9, %s2172_s25  ;;  %p2176_p5 = scmp.lt.u32.totalorder %s2172_s25, %s3235_s9 }
  0x6c   :  { %p2178_p6 = pnand %p2176_p5, %p2173_p4 }
  0x6e   :  { %2181 = shalt.err (!%p2178_p6)
}
  0x6f   :  { %s2182_s7 = scalar_lea.vmem %s150_s1, 32  ;;  %p2187_p8 = scmp.lt.s32.totalorder %s150_s1, %s150_s1 }
  0x70   :  { %p2183_p7 = scmp.ne.s32.totalorder %s150_s1, %s2182_s7  ;;  %p2188_p9 = scmp.lt.s32.totalorder %s2182_s7, %s2182_s7 }
  0x72   :  { %p2189_p10 = por %p2188_p9, %p2187_p8 }
  0x74   :  { %p2190_p11 = pnand %p2189_p10, %p2183_p7 }
  0x76   :  { %2193 = shalt.err (!%p2190_p11)
}
  0x77   :  { %s2578_s20 = smov 16   ;;  %s2579_s30 = smov 1  }
  0x78   :  { %155 = dma.hbm_to_vmem [thread:$0]  %s3235_s9, 32, %s150_s1, [#allocation19], %s2578_s20, %s2578_s20, %s2579_s30  }
  0x79   :  { %s2194_s28 = scalar_lea.hbm %s3237_s11, 512 }
  0x7a   :  { %p2195_p12 = scmp.ne.s32.totalorder %s3237_s11, %s2194_s28  ;;  %p2198_p13 = scmp.lt.u32.totalorder %s2194_s28, %s3237_s11 }
  0x7c   :  { %p2200_p0 = pnand %p2198_p13, %p2195_p12 }
  0x7e   :  { %2203 = shalt.err (!%p2200_p0)
}
  0x7f   :  { %s2204_s21 = scalar_lea.vmem %s2787_s29, 512  ;;  %p2209_p2 = scmp.lt.s32.totalorder %s2787_s29, %s2787_s29 }
  0x80   :  { %p2205_p1 = scmp.ne.s32.totalorder %s2787_s29, %s2204_s21  ;;  %p2210_p3 = scmp.lt.s32.totalorder %s2204_s21, %s2204_s21 }
  0x82   :  { %p2211_p4 = por %p2210_p3, %p2209_p2 }
  0x84   :  { %p2212_p5 = pnand %p2211_p4, %p2205_p1 }
  0x86   :  { %2215 = shalt.err (!%p2212_p5)
}
  0x87   :  { %179 = dma.hbm_to_vmem [thread:$0]  %s3237_s11, 512, %s2787_s29, [#allocation22], %s2572_s24, %s2572_s24, %s2573_s2  }
  0x88   :  { %s2580_s3 = smov [#allocation24]   ;;  %s2581_s7 = smov [#allocation27]  }
  0x89   :  { %s197_s4 = sshll.u32 %s2580_s3, 4  ;;  %s221_s22 = sshll.u32 %s2581_s7, 4  ;;  %s198_s4 = int_to_ptr.vmem [resolvable:$true] %s197_s4  ;;  %s2824_s22 = int_to_ptr.vmem [resolvable:$true] %s221_s22 }
  0x8a   :  { %s2216_s23 = scalar_lea.hbm %s3239_s13, 1024 }
  0x8b   :  { %p2217_p6 = scmp.ne.s32.totalorder %s3239_s13, %s2216_s23  ;;  %p2220_p7 = scmp.lt.u32.totalorder %s2216_s23, %s3239_s13 }
  0x8d   :  { %p2222_p8 = pnand %p2220_p7, %p2217_p6 }
  0x8f   :  { %2225 = shalt.err (!%p2222_p8)
}
  0x90   :  { %s2226_s11 = scalar_lea.vmem %s198_s4, 1024  ;;  %p2231_p10 = scmp.lt.s32.totalorder %s198_s4, %s198_s4 }
  0x91   :  { %p2227_p9 = scmp.ne.s32.totalorder %s198_s4, %s2226_s11  ;;  %p2232_p11 = scmp.lt.s32.totalorder %s2226_s11, %s2226_s11 }
  0x93   :  { %p2233_p12 = por %p2232_p11, %p2231_p10 }
  0x95   :  { %p2234_p13 = pnand %p2233_p12, %p2227_p9 }
  0x97   :  { %2237 = shalt.err (!%p2234_p13)
}
  0x98   :  { %203 = dma.hbm_to_vmem [thread:$0]  %s3239_s13, 1024, %s198_s4, [#allocation25], %s2572_s24, %s2572_s24, %s2573_s2  }
  0x99   :  { %s2238_s1 = scalar_lea.hbm %s3241_s15, 32 }
  0x9a   :  { %p2239_p0 = scmp.ne.s32.totalorder %s3241_s15, %s2238_s1  ;;  %p2242_p1 = scmp.lt.u32.totalorder %s2238_s1, %s3241_s15 }
  0x9c   :  { %p2244_p2 = pnand %p2242_p1, %p2239_p0 }
  0x9e   :  { %2247 = shalt.err (!%p2244_p2)
}
  0x9f   :  { %s2248_s23 = scalar_lea.vmem %s2824_s22, 32  ;;  %p2253_p4 = scmp.lt.s32.totalorder %s2824_s22, %s2824_s22 }
  0xa0   :  { %p2249_p3 = scmp.ne.s32.totalorder %s2824_s22, %s2248_s23  ;;  %p2254_p5 = scmp.lt.s32.totalorder %s2248_s23, %s2248_s23 }
  0xa2   :  { %p2255_p6 = por %p2254_p5, %p2253_p4 }
  0xa4   :  { %p2256_p7 = pnand %p2255_p6, %p2249_p3 }
  0xa6   :  { %2259 = shalt.err (!%p2256_p7)
}
  0xa7   :  { %227 = dma.hbm_to_vmem [thread:$0]  %s3241_s15, 32, %s2824_s22, [#allocation28], %s2578_s20, %s2578_s20, %s2579_s30  }
  0xa8   :  { %s2582_s28 = smov [#allocation30]   ;;  %s2583_s0 = smov [#allocation3]  }
  0xa9   :  { %s245_s27 = sshll.u32 %s2582_s28, 4  ;;  %s45_s25 = sshll.u32 %s2583_s0, 4  ;;  %s246_s27 = int_to_ptr.vmem [resolvable:$true] %s245_s27  ;;  %s2861_s25 = int_to_ptr.vmem [resolvable:$true] %s45_s25 }
  0xaa   :  { %s2260_s19 = scalar_lea.hbm %s3243_s17, 256 }
  0xab   :  { %p2261_p8 = scmp.ne.s32.totalorder %s3243_s17, %s2260_s19  ;;  %p2264_p9 = scmp.lt.u32.totalorder %s2260_s19, %s3243_s17 }
  0xad   :  { %p2266_p10 = pnand %p2264_p9, %p2261_p8 }
  0xaf   :  { %2269 = shalt.err (!%p2266_p10)
}
  0xb0   :  { %s2270_s15 = scalar_lea.vmem %s246_s27, 256  ;;  %p2275_p12 = scmp.lt.s32.totalorder %s246_s27, %s246_s27 }
  0xb1   :  { %p2271_p11 = scmp.ne.s32.totalorder %s246_s27, %s2270_s15  ;;  %p2276_p13 = scmp.lt.s32.totalorder %s2270_s15, %s2270_s15 }
  0xb3   :  { %p2277_p0 = por %p2276_p13, %p2275_p12 }
  0xb5   :  { %p2278_p1 = pnand %p2277_p0, %p2271_p11 }
  0xb7   :  { %2281 = shalt.err (!%p2278_p1)
}
  0xb8   :  { %251 = dma.hbm_to_vmem [thread:$0]  %s3243_s17, 256, %s246_s27, [#allocation31], %s2572_s24, %s2572_s24, %s2573_s2  }
  0xb9   :  { %s3267_s23 = sld [smem:[#allocation48_spill]] }
  0xbf   :  { %s2282_s13 = scalar_lea.hbm %s3267_s23, 128 }
  0xc0   :  { %p2283_p2 = scmp.ne.s32.totalorder %s3267_s23, %s2282_s13  ;;  %p2286_p3 = scmp.lt.u32.totalorder %s2282_s13, %s3267_s23 }
  0xc2   :  { %p2288_p4 = pnand %p2286_p3, %p2283_p2 }
  0xc4   :  { %2291 = shalt.err (!%p2288_p4)
}
  0xc5   :  { %s2292_s29 = scalar_lea.vmem %s2861_s25, 128  ;;  %p2297_p6 = scmp.lt.s32.totalorder %s2861_s25, %s2861_s25 }
  0xc6   :  { %p2293_p5 = scmp.ne.s32.totalorder %s2861_s25, %s2292_s29  ;;  %p2298_p7 = scmp.lt.s32.totalorder %s2292_s29, %s2292_s29 }
  0xc8   :  { %p2299_p8 = por %p2298_p7, %p2297_p6 }
  0xca   :  { %p2300_p9 = pnand %p2299_p8, %p2293_p5 }
  0xcc   :  { %2303 = shalt.err (!%p2300_p9)
}
  0xcd   :  { %51 = dma.hbm_to_vmem [thread:$0]  %s3267_s23, 128, %s2861_s25, [#allocation4], %s2572_s24, %s2572_s24, %s2573_s2  }
  0xce   :  { %s2584_s19 = smov [#allocation8]   ;;  %s2585_s9 = smov [#allocation11]  }
  0xcf   :  { %s70_s21 = sshll.u32 %s2584_s19, 4  ;;  %s92_s1 = sshll.u32 %s2585_s9, 4  ;;  %s71_s21 = int_to_ptr.vmem [resolvable:$true] %s70_s21  ;;  %s93_s1 = int_to_ptr.vmem [resolvable:$true] %s92_s1 }
  0xd0   :  { %s3268_s22 = sld [smem:[#allocation50_spill]] }
  0xd6   :  { %s2304_s7 = scalar_lea.hbm %s3268_s22, 128 }
  0xd7   :  { %p2305_p10 = scmp.ne.s32.totalorder %s3268_s22, %s2304_s7  ;;  %p2308_p11 = scmp.lt.u32.totalorder %s2304_s7, %s3268_s22 }
  0xd9   :  { %p2310_p12 = pnand %p2308_p11, %p2305_p10 }
  0xdb   :  { %2313 = shalt.err (!%p2310_p12)
}
  0xdc   :  { %s2314_s2 = scalar_lea.vmem %s71_s21, 128  ;;  %p2319_p0 = scmp.lt.s32.totalorder %s71_s21, %s71_s21 }
  0xdd   :  { %p2315_p13 = scmp.ne.s32.totalorder %s71_s21, %s2314_s2  ;;  %p2320_p1 = scmp.lt.s32.totalorder %s2314_s2, %s2314_s2 }
  0xdf   :  { %p2321_p2 = por %p2320_p1, %p2319_p0 }
  0xe1   :  { %p2322_p3 = pnand %p2321_p2, %p2315_p13 }
  0xe3   :  { %2325 = shalt.err (!%p2322_p3)
}
  0xe4   :  { %73 = dma.hbm_to_vmem [thread:$0]  %s3268_s22, 128, %s71_s21, [#allocation7]  }
  0xe5   :  { %s3269_s11 = sld [smem:[#allocation52_spill]] }
  0xeb   :  { %s2326_s29 = scalar_lea.hbm %s3269_s11, 32 }
  0xec   :  { %p2327_p4 = scmp.ne.s32.totalorder %s3269_s11, %s2326_s29  ;;  %p2330_p5 = scmp.lt.u32.totalorder %s2326_s29, %s3269_s11 }
  0xee   :  { %p2332_p6 = pnand %p2330_p5, %p2327_p4 }
  0xf0   :  { %2335 = shalt.err (!%p2332_p6)
}
  0xf1   :  { %s2336_s3 = scalar_lea.vmem %s93_s1, 32  ;;  %p2341_p8 = scmp.lt.s32.totalorder %s93_s1, %s93_s1 }
  0xf2   :  { %p2337_p7 = scmp.ne.s32.totalorder %s93_s1, %s2336_s3  ;;  %p2342_p9 = scmp.lt.s32.totalorder %s2336_s3, %s2336_s3 }
  0xf4   :  { %p2343_p10 = por %p2342_p9, %p2341_p8 }
  0xf6   :  { %p2344_p11 = pnand %p2343_p10, %p2337_p7 }
  0xf8   :  { %2347 = shalt.err (!%p2344_p11)
}
  0xf9   :  { %95 = dma.hbm_to_vmem [thread:$0]  %s3269_s11, 32, %s93_s1, [#allocation10]  }
  0xfa   :  { %s2586_s22 = smov [#allocation14]   ;;  %s2587_s26 = smov [#allocation17]  }
  0xfb   :  { %s113_s7 = sshll.u32 %s2586_s22, 4  ;;  %s137_s5 = sshll.u32 %s2587_s26, 4  ;;  %s114_s7 = int_to_ptr.vmem [resolvable:$true] %s113_s7  ;;  %s2922_s5 = int_to_ptr.vmem [resolvable:$true] %s137_s5 }
  0xfc   :  { %s2348_s2 = scalar_lea.hbm %s3232_s6, 32 }
  0xfd   :  { %p2349_p12 = scmp.ne.s32.totalorder %s3232_s6, %s2348_s2  ;;  %p2352_p13 = scmp.lt.u32.totalorder %s2348_s2, %s3232_s6 }
  0xff   :  { %p2354_p0 = pnand %p2352_p13, %p2349_p12 }
 0x101   :  { %2357 = shalt.err (!%p2354_p0)
}
 0x102   :  { %s2358_s1 = scalar_lea.vmem %s114_s7, 32  ;;  %p2363_p2 = scmp.lt.s32.totalorder %s114_s7, %s114_s7 }
 0x103   :  { %p2359_p1 = scmp.ne.s32.totalorder %s114_s7, %s2358_s1  ;;  %p2364_p3 = scmp.lt.s32.totalorder %s2358_s1, %s2358_s1 }
 0x105   :  { %p2365_p4 = por %p2364_p3, %p2363_p2 }
 0x107   :  { %p2366_p5 = pnand %p2365_p4, %p2359_p1 }
 0x109   :  { %2369 = shalt.err (!%p2366_p5)
}
 0x10a   :  { %119 = dma.hbm_to_vmem [thread:$0]  %s3232_s6, 32, %s114_s7, [#allocation13], %s2578_s20, %s2578_s20, %s2579_s30  }
 0x10b   :  { %s2370_s19 = scalar_lea.hbm %s3234_s8, 32 }
 0x10c   :  { %p2371_p6 = scmp.ne.s32.totalorder %s3234_s8, %s2370_s19  ;;  %p2374_p7 = scmp.lt.u32.totalorder %s2370_s19, %s3234_s8 }
 0x10e   :  { %p2376_p8 = pnand %p2374_p7, %p2371_p6 }
 0x110   :  { %2379 = shalt.err (!%p2376_p8)
}
 0x111   :  { %s2380_s22 = scalar_lea.vmem %s2922_s5, 32  ;;  %p2385_p10 = scmp.lt.s32.totalorder %s2922_s5, %s2922_s5 }
 0x112   :  { %p2381_p9 = scmp.ne.s32.totalorder %s2922_s5, %s2380_s22  ;;  %p2386_p11 = scmp.lt.s32.totalorder %s2380_s22, %s2380_s22 }
 0x114   :  { %p2387_p12 = por %p2386_p11, %p2385_p10 }
 0x116   :  { %p2388_p13 = pnand %p2387_p12, %p2381_p9 }
 0x118   :  { %2391 = shalt.err (!%p2388_p13)
}
 0x119   :  { %143 = dma.hbm_to_vmem [thread:$0]  %s3234_s8, 32, %s2922_s5, [#allocation16], %s2578_s20, %s2578_s20, %s2579_s30  }
 0x11a   :  { %s2588_s26 = smov [#allocation20]   ;;  %s2589_s4 = smov [#allocation23]  }
 0x11b   :  { %s161_s13 = sshll.u32 %s2588_s26, 4  ;;  %s185_s2 = sshll.u32 %s2589_s4, 4  ;;  %s162_s13 = int_to_ptr.vmem [resolvable:$true] %s161_s13  ;;  %s2959_s2 = int_to_ptr.vmem [resolvable:$true] %s185_s2 }
 0x11c   :  { %s2392_s28 = scalar_lea.hbm %s3236_s10, 32 }
 0x11d   :  { %p2393_p0 = scmp.ne.s32.totalorder %s3236_s10, %s2392_s28  ;;  %p2396_p1 = scmp.lt.u32.totalorder %s2392_s28, %s3236_s10 }
 0x11f   :  { %p2398_p2 = pnand %p2396_p1, %p2393_p0 }
 0x121   :  { %2401 = shalt.err (!%p2398_p2)
}
 0x122   :  { %s2402_s8 = scalar_lea.vmem %s162_s13, 32  ;;  %p2407_p4 = scmp.lt.s32.totalorder %s162_s13, %s162_s13 }
 0x123   :  { %p2403_p3 = scmp.ne.s32.totalorder %s162_s13, %s2402_s8  ;;  %p2408_p5 = scmp.lt.s32.totalorder %s2402_s8, %s2402_s8 }
 0x125   :  { %p2409_p6 = por %p2408_p5, %p2407_p4 }
 0x127   :  { %p2410_p7 = pnand %p2409_p6, %p2403_p3 }
 0x129   :  { %2413 = shalt.err (!%p2410_p7)
}
 0x12a   :  { %167 = dma.hbm_to_vmem [thread:$0]  %s3236_s10, 32, %s162_s13, [#allocation19], %s2578_s20, %s2578_s20, %s2579_s30  }
 0x12b   :  { %s2414_s9 = scalar_lea.hbm %s3238_s12, 32 }
 0x12c   :  { %p2415_p8 = scmp.ne.s32.totalorder %s3238_s12, %s2414_s9  ;;  %p2418_p9 = scmp.lt.u32.totalorder %s2414_s9, %s3238_s12 }
 0x12e   :  { %p2420_p10 = pnand %p2418_p9, %p2415_p8 }
 0x130   :  { %2423 = shalt.err (!%p2420_p10)
}
 0x131   :  { %s2424_s6 = scalar_lea.vmem %s2959_s2, 32  ;;  %p2429_p12 = scmp.lt.s32.totalorder %s2959_s2, %s2959_s2 }
 0x132   :  { %p2425_p11 = scmp.ne.s32.totalorder %s2959_s2, %s2424_s6  ;;  %p2430_p13 = scmp.lt.s32.totalorder %s2424_s6, %s2424_s6 }
 0x134   :  { %p2431_p0 = por %p2430_p13, %p2429_p12 }
 0x136   :  { %p2432_p1 = pnand %p2431_p0, %p2425_p11 }
 0x138   :  { %2435 = shalt.err (!%p2432_p1)
}
 0x139   :  { %191 = dma.hbm_to_vmem [thread:$0]  %s3238_s12, 32, %s2959_s2, [#allocation22], %s2578_s20, %s2578_s20, %s2579_s30  }
 0x13a   :  { %s2590_s26 = smov [#allocation26]   ;;  %s2591_s4 = smov [#allocation29]  }
 0x13b   :  { %s209_s13 = sshll.u32 %s2590_s26, 4  ;;  %s233_s25 = sshll.u32 %s2591_s4, 4  ;;  %s210_s13 = int_to_ptr.vmem [resolvable:$true] %s209_s13  ;;  %s2996_s25 = int_to_ptr.vmem [resolvable:$true] %s233_s25 }
 0x13c   :  { %s2436_s0 = scalar_lea.hbm %s3240_s14, 32 }
 0x13d   :  { %p2437_p2 = scmp.ne.s32.totalorder %s3240_s14, %s2436_s0  ;;  %p2440_p3 = scmp.lt.u32.totalorder %s2436_s0, %s3240_s14 }
 0x13f   :  { %p2442_p4 = pnand %p2440_p3, %p2437_p2 }
 0x141   :  { %2445 = shalt.err (!%p2442_p4)
}
 0x142   :  { %s2446_s12 = scalar_lea.vmem %s210_s13, 32  ;;  %p2451_p6 = scmp.lt.s32.totalorder %s210_s13, %s210_s13 }
 0x143   :  { %p2447_p5 = scmp.ne.s32.totalorder %s210_s13, %s2446_s12  ;;  %p2452_p7 = scmp.lt.s32.totalorder %s2446_s12, %s2446_s12 }
 0x145   :  { %p2453_p8 = por %p2452_p7, %p2451_p6 }
 0x147   :  { %p2454_p9 = pnand %p2453_p8, %p2447_p5 }
 0x149   :  { %2457 = shalt.err (!%p2454_p9)
}
 0x14a   :  { %215 = dma.hbm_to_vmem [thread:$0]  %s3240_s14, 32, %s210_s13, [#allocation25], %s2578_s20, %s2578_s20, %s2579_s30  }
 0x14b   :  { %s2458_s19 = scalar_lea.hbm %s3242_s16, 32 }
 0x14c   :  { %p2459_p10 = scmp.ne.s32.totalorder %s3242_s16, %s2458_s19  ;;  %p2462_p11 = scmp.lt.u32.totalorder %s2458_s19, %s3242_s16 }
 0x14e   :  { %p2464_p12 = pnand %p2462_p11, %p2459_p10 }
 0x150   :  { %2467 = shalt.err (!%p2464_p12)
}
 0x151   :  { %s2468_s22 = scalar_lea.vmem %s2996_s25, 32  ;;  %p2473_p0 = scmp.lt.s32.totalorder %s2996_s25, %s2996_s25 }
 0x152   :  { %p2469_p13 = scmp.ne.s32.totalorder %s2996_s25, %s2468_s22  ;;  %p2474_p1 = scmp.lt.s32.totalorder %s2468_s22, %s2468_s22 }
 0x154   :  { %p2475_p2 = por %p2474_p1, %p2473_p0 }
 0x156   :  { %p2476_p3 = pnand %p2475_p2, %p2469_p13 }
 0x158   :  { %2479 = shalt.err (!%p2476_p3)
}
 0x159   :  { %239 = dma.hbm_to_vmem [thread:$0]  %s3242_s16, 32, %s2996_s25, [#allocation28], %s2578_s20, %s2578_s20, %s2579_s30  }
 0x15a   :  { %s2592_s10 = smov [#allocation32]   ;;  %s2593_s26 = smov [#allocation33]  }
 0x15b   :  { %s258_s7 = sshll.u32 %s2592_s10, 4  ;;  %s268_s13 = sshll.u32 %s2593_s26, 4  ;;  %s259_s7 = int_to_ptr.vmem [resolvable:$true] %s258_s7  ;;  %s269_s13 = int_to_ptr.vmem [resolvable:$true] %s268_s13 }
 0x15c   :  { %s2480_s28 = scalar_lea.hbm %s3244_s18, 16 }
 0x15d   :  { %p2481_p4 = scmp.ne.s32.totalorder %s3244_s18, %s2480_s28  ;;  %p2484_p5 = scmp.lt.u32.totalorder %s2480_s28, %s3244_s18 }
 0x15f   :  { %p2486_p6 = pnand %p2484_p5, %p2481_p4 }
 0x161   :  { %2489 = shalt.err (!%p2486_p6)
}
 0x162   :  { %s2490_s16 = scalar_lea.vmem %s259_s7, 16  ;;  %s2494_s20 = scalar_lea.vmem %s259_s7, 32 }
 0x163   :  { %p2491_p7 = scmp.ne.s32.totalorder %s259_s7, %s2490_s16  ;;  %p2495_p8 = scmp.lt.s32.totalorder %s259_s7, %s259_s7 }
 0x164   :  { %p2496_p9 = scmp.lt.s32.totalorder %s2494_s20, %s2490_s16 }
 0x166   :  { %p2497_p10 = por %p2496_p9, %p2495_p8 }
 0x168   :  { %p2498_p11 = pnand %p2497_p10, %p2491_p7 }
 0x16a   :  { %2501 = shalt.err (!%p2498_p11)
}
 0x16b   :  { %261 = dma.hbm_to_vmem [thread:$0]  %s3244_s18, 16, %s259_s7, [#allocation31]  }
 0x16c   :  { %s3270_s2 = sld [smem:[#allocation54_spill]] }
 0x172   :  { %s2502_s5 = scalar_lea.hbm %s3270_s2, 16 }
 0x173   :  { %p2503_p12 = scmp.ne.s32.totalorder %s3270_s2, %s2502_s5  ;;  %p2506_p13 = scmp.lt.u32.totalorder %s2502_s5, %s3270_s2 }
 0x175   :  { %p2508_p0 = pnand %p2506_p13, %p2503_p12 }
 0x177   :  { %2511 = shalt.err (!%p2508_p0)
}
 0x178   :  { %s2512_s3 = scalar_lea.vmem %s269_s13, 16  ;;  %s2516_s21 = scalar_lea.vmem %s269_s13, 32 }
 0x179   :  { %p2513_p1 = scmp.ne.s32.totalorder %s269_s13, %s2512_s3  ;;  %p2517_p2 = scmp.lt.s32.totalorder %s269_s13, %s269_s13 }
 0x17a   :  { %p2518_p3 = scmp.lt.s32.totalorder %s2516_s21, %s2512_s3 }
 0x17c   :  { %p2519_p4 = por %p2518_p3, %p2517_p2 }
 0x17e   :  { %p2520_p5 = pnand %p2519_p4, %p2513_p1 }
 0x180   :  { %2523 = shalt.err (!%p2520_p5)
}
 0x181   :  { %271 = dma.hbm_to_vmem [thread:$0]  %s3270_s2, 16, %s269_s13, [#allocation34]  }
 0x182   :  { %2546 = dma.done.wait [#allocation4], 128  }
 0x183   :  { %2547 = vsyncadd [#allocation4], 4294967168 }
 0x184   :  { %2548 = dma.done.wait [#allocation7], 1152  }
 0x185   :  { %2549 = vsyncadd [#allocation7], 4294966144 }
 0x186   :  { %2550 = dma.done.wait [#allocation10], 288  }
 0x187   :  { %2551 = vsyncadd [#allocation10], 4294967008 }
 0x188   :  { %2552 = dma.done.wait [#allocation13], 544  }
 0x189   :  { %2553 = vsyncadd [#allocation13], 4294966752 }
 0x18a   :  { %2554 = dma.done.wait [#allocation16], 544  }
 0x18b   :  { %2555 = vsyncadd [#allocation16], 4294966752 }
 0x18c   :  { %2556 = dma.done.wait [#allocation19], 64  }
 0x18d   :  { %2557 = vsyncadd [#allocation19], 4294967232 }
 0x18e   :  { %2558 = dma.done.wait [#allocation22], 544  }
 0x18f   :  { %2559 = vsyncadd [#allocation22], 4294966752 }
 0x190   :  { %2560 = dma.done.wait [#allocation25], 1056  }
 0x191   :  { %2561 = vsyncadd [#allocation25], 4294966240 }
 0x192   :  { %2562 = dma.done.wait [#allocation28], 64  }
 0x193   :  { %2563 = vsyncadd [#allocation28], 4294967232 }
 0x194   :  { %2564 = dma.done.wait [#allocation31], 272  }
 0x195   :  { %2565 = vsyncadd [#allocation31], 4294967024 }
 0x196   :  { %2566 = dma.done.wait [#allocation34], 16  }
 0x197   :  { %2567 = vsyncadd [#allocation34], 4294967280  ;;  %v2594_v1 = vmov 0.0   ;;  %vm2595_vm0 = vmmov 0   ;;  %v2011_v2 = vld [vmem:[#allocation6] sm:$0xff]   ;;  %v2012_v3 = vld [vmem:[#allocation6 + $0x8] sm:$0xff]  }
 0x198   :  { %1851 = vmatprep.subr.bf16.mxu0 %v2594_v1  ;;  %1867 = vmatprep.mubr.msk.bf16.mxu0 %vm2595_vm0, %v2594_v1  ;;  %v2013_v4 = vld [vmem:[#allocation6 + $0x10] sm:$0xff]   ;;  %v2014_v5 = vld [vmem:[#allocation6 + $0x18] sm:$0xff]   ;;  %v2015_v6 = vld [vmem:[#allocation6 + $0x20] sm:$0xff]   ;;  %vm503_vm1 = vcmask 261120   ;;  %s2596_s22 = smov 96   ;;  %vm672_vm2 = vcmask 1041408  }
 0x199   :  { %1871 = vmatprep.subr.bf16.mxu1 %v2594_v1  ;;  %1875 = vmatprep.mubr.msk.bf16.mxu1 %vm2595_vm0, %v2594_v1  ;;  %v2016_v7 = vld [vmem:[#allocation6 + $0x28] sm:$0xff]   ;;  %v2017_v8 = vld [vmem:[#allocation6 + $0x30] sm:$0xff]   ;;  %v2018_v9 = vld [vmem:[#allocation6 + $0x38] sm:$0xff]   ;;  %vm633_vm3 = vcmask 31744   ;;  %vm945_vm4 = vcmask 523264   ;;  %vm1698_vm5 = vcmask 7168  }
 0x19a   :  { %1852 = vmatpush3.bf16.msra.mxu0 %v2011_v2  ;;  %v2019_v10 = vld [vmem:[#allocation3] sm:$0xff]   ;;  %v2021_v12 = vld [vmem:[#allocation12 + $0x8] sm:$0xff]   ;;  %v3085_v22 = vld [vmem:[#allocation9 + $0x8] sm:$0xff]  }
 0x19b   :  { %1853 = vmatprep.subr.bf16.mxu0 %v2594_v1  ;;  %v2020_v11 = vld [vmem:[#allocation12] sm:$0xff]   ;;  %v3081_v21 = vld [vmem:[#allocation9] sm:$0xff]   ;;  %v3095_v38 = vld [vmem:[#allocation11] sm:$0x3] }
 0x19c   :  { %1872 = vmatpush3.bf16.msra.mxu1 %v2020_v11  ;;  %v448_v14 = vld [vmem:[#allocation8] sm:$0xff]  ;;  %v1737_v23 = vld [vmem:[#allocation14] ss:$0 sm:$0xff]  ;;  %v3101_v39 = vsel %vm672_vm2, %v3095_v38, 0 }
 0x19d   :  { %1873 = vmatprep.subr.bf16.mxu1 %v2594_v1 }
 0x19e   :  { %1854 = vmatpush3.bf16.msra.mxu0 %v2012_v3 }
 0x19f   :  { %1855 = vmatprep.subr.bf16.mxu0 %v2594_v1 }
 0x1a0   :  { %1874 = vmatpush3.bf16.msra.mxu1 %v2021_v12 }
 0x1a1   :  { %1879 = vmatprep.subr.bf16.mxu1 %v3081_v21 }
 0x1a2   :  { %1856 = vmatpush3.bf16.msra.mxu0 %v2013_v4 }
 0x1a3   :  { %1857 = vmatprep.subr.bf16.mxu0 %v2594_v1 }
 0x1a6   :  { %1858 = vmatpush3.bf16.msra.mxu0 %v2014_v5 }
 0x1a7   :  { %1859 = vmatprep.subr.bf16.mxu0 %v2594_v1 }
 0x1aa   :  { %1860 = vmatpush3.bf16.msra.mxu0 %v2015_v6 }
 0x1ab   :  { %1861 = vmatprep.subr.bf16.mxu0 %v2594_v1 }
 0x1ae   :  { %1862 = vmatpush3.bf16.msra.mxu0 %v2016_v7 }
 0x1af   :  { %1863 = vmatprep.subr.bf16.mxu0 %v2594_v1 }
 0x1b2   :  { %1864 = vmatpush3.bf16.msra.mxu0 %v2017_v8 }
 0x1b3   :  { %1865 = vmatprep.subr.bf16.mxu0 %v2594_v1 }
 0x1b6   :  { %1866 = vmatpush3.bf16.msra.mxu0 %v2018_v9 }
 0x1b7   :  { %1901 = vmatprep.subr.bf16.mxu0 %v2594_v1 }
 0x1b9   :  { %1868 = vmatmul.mubr.bf16.vlgmr.msra.gmra.mrb[0].mxu0 %v2019_v10 }
 0x1ba   :  { %1905 = vmatprep.mubr.msk.bf16.mxu0 %vm2595_vm0, %v2594_v1 }
 0x28c   :  { %v441_v13 = vpop.f32.mrb[0].mxu0 }
 0x28d   :  { %v1869_v15 = vpop.f32.mrb[1].mxu0  ;;  %v3074_v17 = vadd.f32 %v448_v14, %v441_v13 }
 0x28e   :  { %v444_v16 = vpop.f32.mrb[2].mxu0 }
 0x28f   :  { %v3076_v18 = vadd.f32 %v448_v14, %v444_v16  ;;  %v1870_v19 = vpop.f32.mrb[3].mxu0 }
 0x290   :  { %v2024_v19 = vld [vmem:[#allocation15] sm:$0xff]  }
 0x291   :  { %v484_v20 = vpack.c.bf16 %v3076_v18, %v3074_v17 }
 0x293   :  { %1876 = vmatmul.mubr.msk.bf16.vlgmr.msra.gmra.mrb[0].mxu1 %vm503_vm1, %v484_v20  ;;  %v2025_v20 = vld [vmem:[#allocation15 + $0x8] sm:$0xff]  }
 0x294   :  { %1880 = vmatpush3.bf16.msra.mxu1 %v3081_v21 }
 0x295   :  { %1881 = vmatprep.subr.bf16.mxu1 %v3085_v22 }
 0x298   :  { %1882 = vmatpush3.bf16.msra.mxu1 %v3085_v22 }
 0x299   :  { %1979 = vmatprep.subr.msk.bf16.mxu1 %vm672_vm2, %v3095_v38 }
 0x366   :  { %v541_v24 = vpop.f32.mrb[0].mxu1 }
 0x367   :  { %v542_v25 = vadd.f32 %v1737_v23, %v541_v24  ;;  %v1877_v26 = vpop.f32.mrb[1].mxu1 }
 0x368   :  { %v544_v27 = vpop.f32.mrb[2].mxu1 }
 0x369   :  { %725 = vrot.lane.b32.xlu1 %v542_v25, %s2572_s24  ;;  %550 = vrot.lane.b32.xlu0 %v542_v25, %s2596_s22  ;;  %v1878_v28 = vpop.f32.mrb[3].mxu1  ;;  %v545_v29 = vadd.f32 %v1737_v23, %v544_v27 }
 0x36d   :  { %727 = vrot.lane.b32.xlu1 %v545_v29, %s2572_s24  ;;  %552 = vrot.lane.b32.xlu0 %v545_v29, %s2596_s22 }
 0x3db   :  { %v551_v30 = vpop.permute.xlu0 %550  ;;  %v726_v23 = vpop.permute.xlu1 %725 }
 0x3dc   :  { %v556_v32 = vmul.f32 %v551_v30, %v542_v25  ;;  %v558_v33 = vmul.f32 %v551_v30, %v545_v29 }
 0x3df   :  { %v553_v31 = vpop.permute.xlu0 %552  ;;  %v728_v27 = vpop.permute.xlu1 %727 }
 0x3e0   :  { %v557_v34 = vmul.f32 %v553_v31, %v542_v25  ;;  %v559_v35 = vmul.f32 %v553_v31, %v545_v29 }
 0x3e2   :  { %v560_v36 = vpack.c.bf16 %v557_v34, %v556_v32  ;;  %v561_v37 = vpack.c.bf16 %v559_v35, %v558_v33 }
 0x3e4   :  { %1883 = vmatprep.mubr.msk.bf16.mxu1 %vm503_vm1, %v560_v36 }
 0x3e5   :  { %1884 = vmatmul.mubr.msk.bf16.vlgmr.msra.gmra.mrb[4].mxu1 %vm503_vm1, %v561_v37 }
 0x3e6   :  { %1888 = vmatpush3.bf16.msra.mxu1 %v3101_v39 }
 0x3e7   :  { %1893 = vmatprep.subr.bf16.mxu1 %v2594_v1 }
 0x4b8   :  { %v1885_v40 = vpop.f32.mrb[4].mxu1 }
 0x4b9   :  { %v631_v41 = vmul.f32 0.35355338, %v1885_v40  ;;  %v614_v42 = vpop.f32.mrb[5].mxu1 }
 0x4ba   :  { %v629_v43 = vmul.f32 0.35355338, %v614_v42  ;;  %v1886_v44 = vpop.f32.mrb[6].mxu1  ;;  %v1747_v42 = vld [vmem:[#allocation17] ss:$0 sm:$0xff] }
 0x4bb   :  { %v632_v45 = vmul.f32 0.35355338, %v1886_v44  ;;  %v617_v46 = vpop.f32.mrb[7].mxu1  ;;  %v637_v48 = vsel %vm633_vm3, %v631_v41, -inf }
 0x4bc   :  { %v630_v47 = vmul.f32 0.35355338, %v617_v46  ;;  %v634_v50 = vsel %vm633_vm3, %v629_v43, -inf }
 0x4bd   :  { %v638_v49 = vsel %vm633_vm3, %v632_v45, -inf }
 0x4be   :  { %v639_v51 = vmax.f32 %v637_v48, %v638_v49  ;;  %v635_v52 = vsel %vm633_vm3, %v630_v47, -inf }
 0x4bf   :  { %v636_v53 = vmax.f32 %v634_v50, %v635_v52 }
 0x4c0   :  { %v642_v54 = vsub.f32 %v631_v41, %v639_v51  ;;  %v643_v55 = vsub.f32 %v632_v45, %v639_v51 }
 0x4c1   :  { %v640_v56 = vsub.f32 %v629_v43, %v636_v53  ;;  %v641_v57 = vsub.f32 %v630_v47, %v636_v53 }
 0x4c2   :  { %v648_v58 = vmul.f32 1.442695, %v642_v54  ;;  %v650_v59 = vmul.f32 1.442695, %v643_v55 }
 0x4c3   :  { %v644_v60 = vmul.f32 1.442695, %v640_v56  ;;  %v646_v61 = vmul.f32 1.442695, %v641_v57 }
 0x4c4   :  { %2044 = vpow2.f32 %v648_v58 }
 0x4c5   :  { %2046 = vpow2.f32 %v650_v59 }
 0x4c6   :  { %2048 = vpow2.f32 %v644_v60 }
 0x4c7   :  { %2050 = vpow2.f32 %v646_v61 }
 0x4ce   :  { %v2045_v62 = vpop.eup %2044 }
 0x4cf   :  { %v2047_v63 = vpop.eup %2046  ;;  %v655_v0 = vsel %vm633_vm3, %v2045_v62, 0.0 }
 0x4d0   :  { %v2049_v2 = vpop.eup %2048  ;;  %v656_v3 = vsel %vm633_vm3, %v2047_v63, 0.0 }
 0x4d1   :  { %v2051_v4 = vpop.eup %2050  ;;  %v657_v5 = vadd.f32 %v656_v3, %v655_v0  ;;  %v652_v6 = vsel %vm633_vm3, %v2049_v2, 0.0  ;;  %v2029_v0 = vld [vmem:[#allocation24 + $0x8] sm:$0xff]  }
 0x4d2   :  { %v653_v7 = vsel %vm633_vm3, %v2051_v4, 0.0 }
 0x4d3   :  { %2052 = vrcp.f32 %v657_v5  ;;  %v654_v8 = vadd.f32 %v653_v7, %v652_v6 }
 0x4d5   :  { %2054 = vrcp.f32 %v654_v8 }
 0x4dd   :  { %v2053_v9 = vpop.eup %2052 }
 0x4de   :  { %v662_v10 = vmul.f32 %v2053_v9, %v2045_v62  ;;  %v663_v11 = vmul.f32 %v2053_v9, %v2047_v63  ;;  %v2026_v62 = vld [vmem:[#allocation21] sm:$0xff]  }
 0x4df   :  { %v2055_v12 = vpop.eup %2054  ;;  %1902 = vmatpush3.bf16.msra.mxu0 %v2026_v62  ;;  %v2028_v63 = vld [vmem:[#allocation24] sm:$0xff]  }
 0x4e0   :  { %v659_v13 = vmul.f32 %v2055_v12, %v2049_v2  ;;  %v660_v14 = vmul.f32 %v2055_v12, %v2051_v4  ;;  %v665_v15 = vpack.c.bf16 %v663_v11, %v662_v10  ;;  %1903 = vmatprep.subr.bf16.mxu0 %v2594_v1  ;;  %v1751_v10 = vld [vmem:[#allocation18] ss:$0 sm:$0xff] }
 0x4e2   :  { %v664_v16 = vpack.c.bf16 %v660_v14, %v659_v13  ;;  %v1752_v14 = vld [vmem:[#allocation20] ss:$0 sm:$0xff] }
 0x4e4   :  { %1889 = vmatprep.mubr.msk.bf16.mxu1 %vm633_vm3, %v664_v16 }
 0x4e5   :  { %1890 = vmatmul.mubr.msk.bf16.vlgmr.msra.gmra.mrb[8].mxu1 %vm633_vm3, %v665_v15 }
 0x4e6   :  { %1897 = vmatprep.mubr.msk.bf16.mxu1 %vm2595_vm0, %v2594_v1  ;;  %1894 = vmatpush3.bf16.msra.mxu1 %v2024_v19 }
 0x4e7   :  { %1895 = vmatprep.subr.bf16.mxu1 %v2594_v1 }
 0x4ea   :  { %1896 = vmatpush3.bf16.msra.mxu1 %v2025_v20 }
 0x4eb   :  { %1909 = vmatprep.subr.bf16.mxu1 %v2594_v1 }
 0x5b8   :  { %v1891_v24 = vpop.f32.mrb[8].mxu1 }
 0x5b9   :  { %v733_v25 = vmul.f32 %v1891_v24, %v726_v23  ;;  %v710_v26 = vpop.f32.mrb[9].mxu1  ;;  %v2031_v24 = vld [vmem:[#allocation24 + $0x18] sm:$0xff]  }
 0x5ba   :  { %v731_v28 = vmul.f32 %v726_v23, %v710_v26  ;;  %v1892_v29 = vpop.f32.mrb[10].mxu1  ;;  %v2030_v23 = vld [vmem:[#allocation24 + $0x10] sm:$0xff]  }
 0x5bb   :  { %v734_v30 = vmul.f32 %v1892_v29, %v728_v27  ;;  %v713_v31 = vpop.f32.mrb[11].mxu1  ;;  %v738_v33 = vsel %vm503_vm1, %v733_v25, 0.0  ;;  %v1753_v25 = vld [vmem:[#allocation23] ss:$0 sm:$0xff] }
 0x5bc   :  { %v732_v32 = vmul.f32 %v728_v27, %v713_v31  ;;  %v735_v35 = vsel %vm503_vm1, %v731_v28, 0.0 }
 0x5bd   :  { %v739_v34 = vsel %vm503_vm1, %v734_v30, 0.0 }
 0x5be   :  { %v740_v36 = vadd.f32 %v739_v34, %v738_v33  ;;  %v736_v37 = vsel %vm503_vm1, %v732_v32, 0.0 }
 0x5bf   :  { %v737_v40 = vadd.f32 %v736_v37, %v735_v35  ;;  %v1757_v35 = vld [vmem:[#allocation26] ss:$0 sm:$0xff] }
 0x5c1   :  { %v741_v41 = vpack.c.bf16 %v740_v36, %v737_v40 }
 0x5c3   :  { %1898 = vmatmul.mubr.msk.bf16.vlgmr.msra.gmra.mrb[12].mxu1 %vm503_vm1, %v741_v41 }
 0x5c4   :  { %1917 = vmatprep.mubr.msk.bf16.mxu1 %vm2595_vm0, %v2594_v1  ;;  %1910 = vmatpush3.bf16.msra.mxu1 %v2028_v63  ;;  %v1763_v63 = vld [vmem:[#allocation27] ss:$0 sm:$0xff] }
 0x5c5   :  { %1911 = vmatprep.subr.bf16.mxu1 %v2594_v1 }
 0x5c8   :  { %1912 = vmatpush3.bf16.msra.mxu1 %v2029_v0 }
 0x5c9   :  { %1913 = vmatprep.subr.bf16.mxu1 %v2594_v1 }
 0x5cc   :  { %1914 = vmatpush3.bf16.msra.mxu1 %v2030_v23 }
 0x5cd   :  { %1915 = vmatprep.subr.bf16.mxu1 %v2594_v1 }
 0x5d0   :  { %1916 = vmatpush3.bf16.msra.mxu1 %v2031_v24 }
 0x5d1   :  { %1980 = vmatprep.subr.msk.bf16.mxu1 %vm672_vm2, %v3095_v38 }
 0x696   :  { %v797_v43 = vpop.f32.mrb[12].mxu1 }
 0x697   :  { %v798_v44 = vadd.f32 %v1747_v42, %v797_v43  ;;  %v1899_v45 = vpop.f32.mrb[13].mxu1 }
 0x698   :  { %v800_v46 = vpop.f32.mrb[14].mxu1 }
 0x699   :  { %v801_v47 = vadd.f32 %v1747_v42, %v800_v46  ;;  %v1900_v48 = vpop.f32.mrb[15].mxu1  ;;  %v804_v49 = vadd.f32 %v798_v44, %v3074_v17 }
 0x69b   :  { %v806_v50 = vsel %vm503_vm1, %v804_v49, 0.0  ;;  %v805_v51 = vadd.f32 %v801_v47, %v3076_v18  ;;  %v2027_v18 = vld [vmem:[#allocation21 + $0x8] sm:$0xff]  }
 0x69c   :  { %807 = vadd.xlane.f32.xlu0 %v806_v50  ;;  %1904 = vmatpush3.bf16.msra.mxu0 %v2027_v18 }
 0x69d   :  { %v809_v52 = vsel %vm503_vm1, %v805_v51, 0.0  ;;  %1921 = vmatprep.subr.bf16.mxu0 %v2594_v1 }
 0x69e   :  { %810 = vadd.xlane.f32.xlu1 %v809_v52 }
 0x729   :  { %v808_v53 = vpop.xlane.xlu0 %807 }
 0x72a   :  { %v813_v54 = vmul.f32 0.03125, %v808_v53 }
 0x72b   :  { %v811_v55 = vpop.xlane.xlu1 %810 }
 0x72c   :  { %v815_v56 = vsub.f32 %v804_v49, %v813_v54  ;;  %v814_v57 = vmul.f32 0.03125, %v811_v55 }
 0x72e   :  { %v816_v58 = vsub.f32 %v805_v51, %v814_v57  ;;  %v817_v59 = vmul.f32 %v815_v56, %v815_v56  ;;  %v2033_v57 = vld [vmem:[#allocation12 + $0x18] sm:$0xff]  }
 0x730   :  { %v819_v60 = vsel %vm503_vm1, %v817_v59, 0.0  ;;  %v818_v61 = vmul.f32 %v816_v58, %v816_v58 }
 0x731   :  { %820 = vadd.xlane.f32.xlu0 %v819_v60 }
 0x732   :  { %v822_v17 = vsel %vm503_vm1, %v818_v61, 0.0 }
 0x735   :  { %823 = vadd.xlane.f32.xlu0 %v822_v17 }
 0x7be   :  { %v821_v2 = vpop.xlane.xlu0 %820 }
 0x7bf   :  { %v825_v3 = vmul.f32 0.03125, %v821_v2 }
 0x7c1   :  { %v827_v4 = vadd.f32 1e-05, %v825_v3 }
 0x7c2   :  { %v824_v5 = vpop.xlane.xlu0 %823 }
 0x7c3   :  { %2056 = vrsqrt.f32 %v827_v4  ;;  %v826_v6 = vmul.f32 0.03125, %v824_v5  ;;  %v1764_v5 = vld [vmem:[#allocation29] ss:$0 sm:$0xff] }
 0x7c5   :  { %v828_v7 = vadd.f32 1e-05, %v826_v6 }
 0x7c7   :  { %2058 = vrsqrt.f32 %v828_v7 }
 0x7cd   :  { %v2057_v8 = vpop.eup %2056 }
 0x7ce   :  { %v831_v9 = vmul.f32 %v2057_v8, %v815_v56  ;;  %v2032_v56 = vld [vmem:[#allocation12 + $0x10] sm:$0xff]  }
 0x7d0   :  { %v839_v12 = vmul.f32 %v1751_v10, %v831_v9 }
 0x7d1   :  { %v2059_v11 = vpop.eup %2058 }
 0x7d2   :  { %v832_v13 = vmul.f32 %v2059_v11, %v816_v58  ;;  %v847_v16 = vadd.f32 %v1752_v14, %v839_v12 }
 0x7d4   :  { %v840_v15 = vmul.f32 %v1751_v10, %v832_v13  ;;  %v1765_v10 = vld [vmem:[#allocation14 + $0x1] ss:$0 sm:$0xff] }
 0x7d6   :  { %v848_v19 = vadd.f32 %v1752_v14, %v840_v15 }
 0x7d8   :  { %v849_v20 = vpack.c.bf16 %v848_v19, %v847_v16 }
 0x7da   :  { %1906 = vmatmul.mubr.msk.bf16.vlgmr.msra.gmra.mrb[4].mxu0 %vm503_vm1, %v849_v20 }
 0x7db   :  { %1925 = vmatprep.mubr.msk.bf16.mxu0 %vm2595_vm0, %v2594_v1  ;;  %1922 = vmatpush3.bf16.msra.mxu0 %v2032_v56 }
 0x7dc   :  { %1923 = vmatprep.subr.bf16.mxu0 %v2594_v1 }
 0x7df   :  { %1924 = vmatpush3.bf16.msra.mxu0 %v2033_v57 }
 0x7e0   :  { %1929 = vmatprep.subr.bf16.mxu0 %v3081_v21 }
 0x8ad   :  { %v905_v26 = vpop.f32.mrb[4].mxu0 }
 0x8ae   :  { %v906_v27 = vadd.f32 %v1753_v25, %v905_v26  ;;  %v1907_v28 = vpop.f32.mrb[5].mxu0 }
 0x8af   :  { %v908_v29 = vpop.f32.mrb[6].mxu0 }
 0x8b0   :  { %v909_v30 = vadd.f32 %v1753_v25, %v908_v29  ;;  %v1908_v31 = vpop.f32.mrb[7].mxu0  ;;  %v912_v32 = vmax.f32 %v906_v27, 0.0 }
 0x8b2   :  { %v913_v33 = vmax.f32 %v909_v30, 0.0 }
 0x8b4   :  { %v914_v34 = vpack.c.bf16 %v913_v33, %v912_v32 }
 0x8b6   :  { %1918 = vmatmul.mubr.msk.bf16.vlgmr.msra.gmra.mrb[16].mxu1 %vm945_vm4, %v914_v34 }
 0x8b7   :  { %1938 = vmatpush3.bf16.msra.mxu1 %v3101_v39 }
 0x8b8   :  { %1951 = vmatprep.subr.bf16.mxu1 %v2594_v1 }
 0x989   :  { %v983_v36 = vpop.f32.mrb[16].mxu1 }
 0x98a   :  { %v984_v38 = vadd.f32 %v1757_v35, %v983_v36  ;;  %v1919_v37 = vpop.f32.mrb[17].mxu1 }
 0x98b   :  { %v986_v40 = vpop.f32.mrb[18].mxu1 }
 0x98c   :  { %v987_v41 = vadd.f32 %v1757_v35, %v986_v40  ;;  %v1920_v42 = vpop.f32.mrb[19].mxu1  ;;  %v990_v43 = vadd.f32 %v984_v38, %v847_v16 }
 0x98e   :  { %v992_v44 = vsel %vm503_vm1, %v990_v43, 0.0  ;;  %v991_v45 = vadd.f32 %v987_v41, %v848_v19 }
 0x98f   :  { %993 = vadd.xlane.f32.xlu1 %v992_v44 }
 0x990   :  { %v995_v46 = vsel %vm503_vm1, %v991_v45, 0.0 }
 0x991   :  { %996 = vadd.xlane.f32.xlu0 %v995_v46 }
 0xa1c   :  { %v994_v47 = vpop.xlane.xlu1 %993 }
 0xa1d   :  { %v998_v48 = vmul.f32 0.03125, %v994_v47 }
 0xa1e   :  { %v997_v39 = vpop.xlane.xlu0 %996 }
 0xa1f   :  { %v1000_v49 = vsub.f32 %v990_v43, %v998_v48  ;;  %v999_v50 = vmul.f32 0.03125, %v997_v39 }
 0xa21   :  { %v1001_v51 = vsub.f32 %v991_v45, %v999_v50  ;;  %v1002_v52 = vmul.f32 %v1000_v49, %v1000_v49 }
 0xa23   :  { %v1004_v53 = vsel %vm503_vm1, %v1002_v52, 0.0  ;;  %v1003_v54 = vmul.f32 %v1001_v51, %v1001_v51 }
 0xa24   :  { %1005 = vadd.xlane.f32.xlu1 %v1004_v53 }
 0xa25   :  { %v1007_v55 = vsel %vm503_vm1, %v1003_v54, 0.0 }
 0xa26   :  { %1008 = vadd.xlane.f32.xlu0 %v1007_v55 }
 0xab1   :  { %v1006_v58 = vpop.xlane.xlu1 %1005 }
 0xab2   :  { %v1010_v59 = vmul.f32 0.03125, %v1006_v58 }
 0xab3   :  { %v1009_v60 = vpop.xlane.xlu0 %1008 }
 0xab4   :  { %v1012_v61 = vadd.f32 1e-05, %v1010_v59  ;;  %v1011_v17 = vmul.f32 0.03125, %v1009_v60 }
 0xab6   :  { %2060 = vrsqrt.f32 %v1012_v61  ;;  %v1013_v62 = vadd.f32 1e-05, %v1011_v17 }
 0xab8   :  { %2062 = vrsqrt.f32 %v1013_v62 }
 0xac0   :  { %v2061_v18 = vpop.eup %2060 }
 0xac1   :  { %v1016_v0 = vmul.f32 %v2061_v18, %v1000_v49 }
 0xac2   :  { %v2063_v2 = vpop.eup %2062 }
 0xac3   :  { %v1024_v3 = vmul.f32 %v1763_v63, %v1016_v0  ;;  %v1017_v4 = vmul.f32 %v2063_v2, %v1001_v51  ;;  %v2034_v2 = vld [vmem:[#allocation15 + $0x10] sm:$0xff]  }
 0xac5   :  { %v1025_v6 = vmul.f32 %v1763_v63, %v1017_v4  ;;  %v3151_v7 = vadd.f32 %v1764_v5, %v1024_v3  ;;  %v2035_v3 = vld [vmem:[#allocation15 + $0x18] sm:$0xff]  }
 0xac7   :  { %v3153_v8 = vadd.f32 %v1764_v5, %v1025_v6 }
 0xac9   :  { %v1074_v9 = vpack.c.bf16 %v3153_v8, %v3151_v7 }
 0xacb   :  { %1926 = vmatmul.mubr.msk.bf16.vlgmr.msra.gmra.mrb[8].mxu0 %vm503_vm1, %v1074_v9 }
 0xacc   :  { %1930 = vmatpush3.bf16.msra.mxu0 %v3081_v21 }
 0xacd   :  { %1931 = vmatprep.subr.bf16.mxu0 %v3085_v22 }
 0xad0   :  { %1932 = vmatpush3.bf16.msra.mxu0 %v3085_v22 }
 0xad1   :  { %1943 = vmatprep.subr.bf16.mxu0 %v2594_v1 }
 0xb9e   :  { %v1130_v11 = vpop.f32.mrb[8].mxu0 }
 0xb9f   :  { %v1131_v12 = vadd.f32 %v1765_v10, %v1130_v11  ;;  %v1927_v13 = vpop.f32.mrb[9].mxu0 }
 0xba0   :  { %v1133_v14 = vpop.f32.mrb[10].mxu0 }
 0xba1   :  { %v1134_v15 = vadd.f32 %v1765_v10, %v1133_v14  ;;  %1139 = vrot.lane.b32.xlu1 %v1131_v12, %s2596_s22  ;;  %v1928_v16 = vpop.f32.mrb[11].mxu0 }
 0xba3   :  { %1141 = vrot.lane.b32.xlu0 %v1134_v15, %s2596_s22 }
 0xba5   :  { %1297 = vrot.lane.b32.xlu1 %v1131_v12, %s2572_s24 }
 0xba9   :  { %1299 = vrot.lane.b32.xlu1 %v1134_v15, %s2572_s24  ;;  %s2597_s24 = smov [#allocation35]  }
 0xbaa   :  { %s1706_s14 = sshll.u32 %s2597_s24, 4  ;;  %s1707_s14 = int_to_ptr.vmem [resolvable:$true] %s1706_s14 }
 0xbab   :  { %s2524_s6 = scalar_lea.vmem %s1707_s14, 256  ;;  %p2529_p7 = scmp.lt.s32.totalorder %s1707_s14, %s1707_s14 }
 0xbac   :  { %p2525_p6 = scmp.ne.s32.totalorder %s1707_s14, %s2524_s6  ;;  %p2530_p8 = scmp.lt.s32.totalorder %s2524_s6, %s2524_s6 }
 0xbae   :  { %p2531_p9 = por %p2530_p8, %p2529_p7 }
 0xbb0   :  { %p2532_p10 = pnand %p2531_p9, %p2525_p6 }
 0xc13   :  { %v1140_v21 = vpop.permute.xlu1 %1139 }
 0xc14   :  { %v1145_v22 = vmul.f32 %v1140_v21, %v1131_v12  ;;  %v1147_v20 = vmul.f32 %v1140_v21, %v1134_v15 }
 0xc15   :  { %v1142_v19 = vpop.permute.xlu0 %1141 }
 0xc16   :  { %v1146_v23 = vmul.f32 %v1142_v19, %v1131_v12  ;;  %v1148_v24 = vmul.f32 %v1142_v19, %v1134_v15 }
 0xc17   :  { %v1298_v4 = vpop.permute.xlu1 %1297 }
 0xc18   :  { %v1149_v25 = vpack.c.bf16 %v1146_v23, %v1145_v22  ;;  %v1150_v26 = vpack.c.bf16 %v1148_v24, %v1147_v20 }
 0xc1a   :  { %1933 = vmatprep.mubr.msk.bf16.mxu0 %vm503_vm1, %v1149_v25  ;;  %v1773_v25 = vld [vmem:[#allocation17 + $0x1] ss:$0 sm:$0xff] }
 0xc1b   :  { %1934 = vmatmul.mubr.msk.bf16.vlgmr.msra.gmra.mrb[12].mxu0 %vm503_vm1, %v1150_v26  ;;  %v1300_v10 = vpop.permute.xlu1 %1299 }
 0xc1c   :  { %1947 = vmatprep.mubr.msk.bf16.mxu0 %vm2595_vm0, %v2594_v1  ;;  %1944 = vmatpush3.bf16.msra.mxu0 %v2034_v2  ;;  %v1779_v2 = vld [vmem:[#allocation23 + $0x1] ss:$0 sm:$0xff] }
 0xc1d   :  { %1945 = vmatprep.subr.bf16.mxu0 %v2594_v1 }
 0xc20   :  { %1946 = vmatpush3.bf16.msra.mxu0 %v2035_v3 }
 0xc21   :  { %1959 = vmatprep.subr.bf16.mxu0 %v2594_v1 }
 0xcee   :  { %v1935_v27 = vpop.f32.mrb[12].mxu0 }
 0xcef   :  { %v1208_v28 = vmul.f32 0.35355338, %v1935_v27  ;;  %v1191_v29 = vpop.f32.mrb[13].mxu0 }
 0xcf0   :  { %v1206_v30 = vmul.f32 0.35355338, %v1191_v29  ;;  %v1936_v31 = vpop.f32.mrb[14].mxu0 }
 0xcf1   :  { %v1209_v32 = vmul.f32 0.35355338, %v1936_v31  ;;  %v1194_v33 = vpop.f32.mrb[15].mxu0  ;;  %v1213_v35 = vsel %vm633_vm3, %v1208_v28, -inf }
 0xcf2   :  { %v1207_v34 = vmul.f32 0.35355338, %v1194_v33  ;;  %v1210_v38 = vsel %vm633_vm3, %v1206_v30, -inf }
 0xcf3   :  { %v1214_v36 = vsel %vm633_vm3, %v1209_v32, -inf }
 0xcf4   :  { %v1215_v37 = vmax.f32 %v1213_v35, %v1214_v36  ;;  %v1211_v40 = vsel %vm633_vm3, %v1207_v34, -inf }
 0xcf5   :  { %v1212_v41 = vmax.f32 %v1210_v38, %v1211_v40 }
 0xcf6   :  { %v1218_v42 = vsub.f32 %v1208_v28, %v1215_v37  ;;  %v1219_v43 = vsub.f32 %v1209_v32, %v1215_v37 }
 0xcf7   :  { %v1216_v44 = vsub.f32 %v1206_v30, %v1212_v41  ;;  %v1217_v45 = vsub.f32 %v1207_v34, %v1212_v41 }
 0xcf8   :  { %v1224_v46 = vmul.f32 1.442695, %v1218_v42  ;;  %v1226_v47 = vmul.f32 1.442695, %v1219_v43 }
 0xcf9   :  { %v1220_v48 = vmul.f32 1.442695, %v1216_v44  ;;  %v1222_v39 = vmul.f32 1.442695, %v1217_v45 }
 0xcfa   :  { %2064 = vpow2.f32 %v1224_v46  ;;  %v2036_v46 = vld [vmem:[#allocation21 + $0x10] sm:$0xff]  }
 0xcfb   :  { %2066 = vpow2.f32 %v1226_v47  ;;  %v2038_v47 = vld [vmem:[#allocation24 + $0x20] sm:$0xff]  }
 0xcfc   :  { %2068 = vpow2.f32 %v1220_v48  ;;  %v2039_v48 = vld [vmem:[#allocation24 + $0x28] sm:$0xff]  }
 0xcfd   :  { %2070 = vpow2.f32 %v1222_v39 }
 0xd04   :  { %v2065_v49 = vpop.eup %2064 }
 0xd05   :  { %v2067_v50 = vpop.eup %2066  ;;  %v1231_v51 = vsel %vm633_vm3, %v2065_v49, 0.0 }
 0xd06   :  { %v2069_v52 = vpop.eup %2068  ;;  %v1232_v53 = vsel %vm633_vm3, %v2067_v50, 0.0 }
 0xd07   :  { %v2071_v54 = vpop.eup %2070  ;;  %v1233_v55 = vadd.f32 %v1232_v53, %v1231_v51  ;;  %v1228_v56 = vsel %vm633_vm3, %v2069_v52, 0.0 }
 0xd08   :  { %v1229_v57 = vsel %vm633_vm3, %v2071_v54, 0.0 }
 0xd09   :  { %2072 = vrcp.f32 %v1233_v55  ;;  %v1230_v58 = vadd.f32 %v1229_v57, %v1228_v56  ;;  %v1777_v56 = vld [vmem:[#allocation18 + $0x1] ss:$0 sm:$0xff] }
 0xd0b   :  { %2074 = vrcp.f32 %v1230_v58 }
 0xd13   :  { %v2073_v59 = vpop.eup %2072 }
 0xd14   :  { %v1238_v60 = vmul.f32 %v2073_v59, %v2065_v49  ;;  %v1239_v61 = vmul.f32 %v2073_v59, %v2067_v50 }
 0xd15   :  { %v2075_v17 = vpop.eup %2074 }
 0xd16   :  { %v1235_v62 = vmul.f32 %v2075_v17, %v2069_v52  ;;  %v1236_v18 = vmul.f32 %v2075_v17, %v2071_v54  ;;  %v1241_v63 = vpack.c.bf16 %v1239_v61, %v1238_v60  ;;  %v1778_v60 = vld [vmem:[#allocation20 + $0x1] ss:$0 sm:$0xff] }
 0xd18   :  { %v1240_v0 = vpack.c.bf16 %v1236_v18, %v1235_v62 }
 0xd1a   :  { %1939 = vmatprep.mubr.msk.bf16.mxu1 %vm633_vm3, %v1240_v0  ;;  %v2041_v0 = vld [vmem:[#allocation24 + $0x38] sm:$0xff]  }
 0xd1b   :  { %1940 = vmatmul.mubr.msk.bf16.vlgmr.msra.gmra.mrb[20].mxu1 %vm633_vm3, %v1241_v63  ;;  %v2040_v63 = vld [vmem:[#allocation24 + $0x30] sm:$0xff]  }
 0xd1c   :  { %1955 = vmatprep.mubr.msk.bf16.mxu1 %vm2595_vm0, %v2594_v1  ;;  %1952 = vmatpush3.bf16.msra.mxu1 %v2036_v46  ;;  %v1789_v46 = vld [vmem:[#allocation27 + $0x1] ss:$0 sm:$0xff] }
 0xd1d   :  { %1953 = vmatprep.subr.bf16.mxu1 %v2594_v1 }
 0xdee   :  { %v1941_v5 = vpop.f32.mrb[20].mxu1 }
 0xdef   :  { %v1305_v6 = vmul.f32 %v1941_v5, %v1298_v4  ;;  %v1282_v9 = vpop.f32.mrb[21].mxu1 }
 0xdf0   :  { %v1303_v11 = vmul.f32 %v1298_v4, %v1282_v9  ;;  %v1942_v12 = vpop.f32.mrb[22].mxu1 }
 0xdf1   :  { %v1306_v13 = vmul.f32 %v1942_v12, %v1300_v10  ;;  %v1285_v14 = vpop.f32.mrb[23].mxu1  ;;  %v1310_v16 = vsel %vm503_vm1, %v1305_v6, 0.0 }
 0xdf2   :  { %v1304_v15 = vmul.f32 %v1300_v10, %v1285_v14  ;;  %v1307_v19 = vsel %vm503_vm1, %v1303_v11, 0.0  ;;  %v1783_v14 = vld [vmem:[#allocation26 + $0x1] ss:$0 sm:$0xff] }
 0xdf3   :  { %v1311_v21 = vsel %vm503_vm1, %v1306_v13, 0.0 }
 0xdf4   :  { %v1312_v22 = vadd.f32 %v1311_v21, %v1310_v16  ;;  %v1308_v20 = vsel %vm503_vm1, %v1304_v15, 0.0 }
 0xdf5   :  { %v1309_v23 = vadd.f32 %v1308_v20, %v1307_v19 }
 0xdf7   :  { %v1313_v24 = vpack.c.bf16 %v1312_v22, %v1309_v23 }
 0xdf9   :  { %1948 = vmatmul.mubr.msk.bf16.vlgmr.msra.gmra.mrb[16].mxu0 %vm503_vm1, %v1313_v24 }
 0xdfa   :  { %1967 = vmatprep.mubr.msk.bf16.mxu0 %vm2595_vm0, %v2594_v1  ;;  %1960 = vmatpush3.bf16.msra.mxu0 %v2038_v47 }
 0xdfb   :  { %1961 = vmatprep.subr.bf16.mxu0 %v2594_v1 }
 0xdfe   :  { %1962 = vmatpush3.bf16.msra.mxu0 %v2039_v48 }
 0xdff   :  { %1963 = vmatprep.subr.bf16.mxu0 %v2594_v1 }
 0xe02   :  { %1964 = vmatpush3.bf16.msra.mxu0 %v2040_v63 }
 0xe03   :  { %1965 = vmatprep.subr.bf16.mxu0 %v2594_v1 }
 0xe06   :  { %1966 = vmatpush3.bf16.msra.mxu0 %v2041_v0 }
 0xecc   :  { %v1369_v26 = vpop.f32.mrb[16].mxu0 }
 0xecd   :  { %v1370_v27 = vadd.f32 %v1773_v25, %v1369_v26  ;;  %v1949_v28 = vpop.f32.mrb[17].mxu0 }
 0xece   :  { %v1372_v29 = vpop.f32.mrb[18].mxu0 }
 0xecf   :  { %v1373_v30 = vadd.f32 %v1773_v25, %v1372_v29  ;;  %v1950_v31 = vpop.f32.mrb[19].mxu0  ;;  %v1376_v32 = vadd.f32 %v1370_v27, %v3151_v7 }
 0xed1   :  { %v1378_v33 = vsel %vm503_vm1, %v1376_v32, 0.0  ;;  %v1377_v34 = vadd.f32 %v1373_v30, %v3153_v8  ;;  %v2037_v8 = vld [vmem:[#allocation21 + $0x18] sm:$0xff]  }
 0xed2   :  { %1379 = vadd.xlane.f32.xlu0 %v1378_v33  ;;  %1954 = vmatpush3.bf16.msra.mxu1 %v2037_v8 }
 0xed3   :  { %v1381_v35 = vsel %vm503_vm1, %v1377_v34, 0.0  ;;  %1971 = vmatprep.subr.bf16.mxu1 %v2594_v1 }
 0xed4   :  { %1382 = vadd.xlane.f32.xlu1 %v1381_v35 }
 0xf5f   :  { %v1380_v36 = vpop.xlane.xlu0 %1379 }
 0xf60   :  { %v1384_v38 = vmul.f32 0.03125, %v1380_v36 }
 0xf61   :  { %v1383_v37 = vpop.xlane.xlu1 %1382 }
 0xf62   :  { %v1386_v40 = vsub.f32 %v1376_v32, %v1384_v38  ;;  %v1385_v41 = vmul.f32 0.03125, %v1383_v37  ;;  %v2042_v38 = vld [vmem:[#allocation30] sm:$0xff]   ;;  %v2043_v37 = vld [vmem:[#allocation30 + $0x8] sm:$0xff]  }
 0xf64   :  { %v1387_v42 = vsub.f32 %v1377_v34, %v1385_v41  ;;  %v1388_v43 = vmul.f32 %v1386_v40, %v1386_v40 }
 0xf66   :  { %v1390_v44 = vsel %vm503_vm1, %v1388_v43, 0.0  ;;  %v1389_v45 = vmul.f32 %v1387_v42, %v1387_v42 }
 0xf67   :  { %1391 = vadd.xlane.f32.xlu0 %v1390_v44 }
 0xf68   :  { %v1393_v7 = vsel %vm503_vm1, %v1389_v45, 0.0 }
 0xf6b   :  { %1394 = vadd.xlane.f32.xlu0 %v1393_v7 }
 0xff4   :  { %v1392_v39 = vpop.xlane.xlu0 %1391 }
 0xff5   :  { %v1396_v49 = vmul.f32 0.03125, %v1392_v39 }
 0xff7   :  { %v1398_v50 = vadd.f32 1e-05, %v1396_v49  ;;  %v1790_v49 = vld [vmem:[#allocation29 + $0x1] ss:$0 sm:$0xff] }
 0xff8   :  { %v1395_v51 = vpop.xlane.xlu0 %1394 }
 0xff9   :  { %2076 = vrsqrt.f32 %v1398_v50  ;;  %v1397_v52 = vmul.f32 0.03125, %v1395_v51 }
 0xffb   :  { %v1399_v53 = vadd.f32 1e-05, %v1397_v52 }
 0xffd   :  { %2078 = vrsqrt.f32 %v1399_v53  ;;  %v1791_v53 = vld [vmem:[#allocation32] ss:$0 sm:$0xff] }
0x1003   :  { %v2077_v54 = vpop.eup %2076 }
0x1004   :  { %v1402_v55 = vmul.f32 %v2077_v54, %v1386_v40 }
0x1006   :  { %v1410_v58 = vmul.f32 %v1777_v56, %v1402_v55 }
0x1007   :  { %v2079_v57 = vpop.eup %2078 }
0x1008   :  { %v1403_v59 = vmul.f32 %v2079_v57, %v1387_v42  ;;  %v1418_v17 = vadd.f32 %v1778_v60, %v1410_v58  ;;  %v1795_v58 = vld [vmem:[#allocation33] ss:$0 sm:$0xff] }
0x100a   :  { %v1411_v61 = vmul.f32 %v1777_v56, %v1403_v59 }
0x100c   :  { %v1419_v62 = vadd.f32 %v1778_v60, %v1411_v61 }
0x100e   :  { %v1420_v18 = vpack.c.bf16 %v1419_v62, %v1418_v17 }
0x1010   :  { %1956 = vmatmul.mubr.msk.bf16.vlgmr.msra.gmra.mrb[24].mxu1 %vm503_vm1, %v1420_v18 }
0x1011   :  { %1975 = vmatprep.mubr.msk.bf16.mxu1 %vm2595_vm0, %v2594_v1  ;;  %1972 = vmatpush3.bf16.msra.mxu1 %v2042_v38 }
0x1012   :  { %1973 = vmatprep.subr.bf16.mxu1 %v2594_v1 }
0x1015   :  { %1974 = vmatpush3.bf16.msra.mxu1 %v2043_v37 }
0x10e3   :  { %v1476_v3 = vpop.f32.mrb[24].mxu1 }
0x10e4   :  { %v1477_v4 = vadd.f32 %v1779_v2, %v1476_v3  ;;  %v1957_v5 = vpop.f32.mrb[25].mxu1 }
0x10e5   :  { %v1479_v6 = vpop.f32.mrb[26].mxu1 }
0x10e6   :  { %v1480_v9 = vadd.f32 %v1779_v2, %v1479_v6  ;;  %v1958_v10 = vpop.f32.mrb[27].mxu1  ;;  %v1483_v11 = vmax.f32 %v1477_v4, 0.0  ;;  %v1796_v2 = vld [vmem:[#allocation2] ss:$0 sm:$0xff] }
0x10e8   :  { %v1484_v12 = vmax.f32 %v1480_v9, 0.0 }
0x10ea   :  { %v1485_v13 = vpack.c.bf16 %v1484_v12, %v1483_v11 }
0x10ec   :  { %1968 = vmatmul.mubr.msk.bf16.vlgmr.msra.gmra.mrb[20].mxu0 %vm945_vm4, %v1485_v13 }
0x11bf   :  { %v1553_v15 = vpop.f32.mrb[20].mxu0 }
0x11c0   :  { %v1554_v16 = vadd.f32 %v1783_v14, %v1553_v15  ;;  %v1969_v21 = vpop.f32.mrb[21].mxu0 }
0x11c1   :  { %v1556_v19 = vpop.f32.mrb[22].mxu0 }
0x11c2   :  { %v1557_v22 = vadd.f32 %v1783_v14, %v1556_v19  ;;  %v1970_v20 = vpop.f32.mrb[23].mxu0  ;;  %v1560_v23 = vadd.f32 %v1554_v16, %v1418_v17 }
0x11c4   :  { %v1562_v24 = vsel %vm503_vm1, %v1560_v23, 0.0  ;;  %v1561_v25 = vadd.f32 %v1557_v22, %v1419_v62 }
0x11c5   :  { %1563 = vadd.xlane.f32.xlu1 %v1562_v24 }
0x11c6   :  { %v1565_v26 = vsel %vm503_vm1, %v1561_v25, 0.0 }
0x11c7   :  { %1566 = vadd.xlane.f32.xlu0 %v1565_v26 }
0x1252   :  { %v1564_v27 = vpop.xlane.xlu1 %1563 }
0x1253   :  { %v1568_v28 = vmul.f32 0.03125, %v1564_v27 }
0x1254   :  { %v1567_v29 = vpop.xlane.xlu0 %1566 }
0x1255   :  { %v1570_v30 = vsub.f32 %v1560_v23, %v1568_v28  ;;  %v1569_v31 = vmul.f32 0.03125, %v1567_v29 }
0x1257   :  { %v1571_v32 = vsub.f32 %v1561_v25, %v1569_v31  ;;  %v1572_v33 = vmul.f32 %v1570_v30, %v1570_v30 }
0x1259   :  { %v1574_v34 = vsel %vm503_vm1, %v1572_v33, 0.0  ;;  %v1573_v35 = vmul.f32 %v1571_v32, %v1571_v32 }
0x125a   :  { %1575 = vadd.xlane.f32.xlu1 %v1574_v34 }
0x125b   :  { %v1577_v36 = vsel %vm503_vm1, %v1573_v35, 0.0 }
0x125c   :  { %1578 = vadd.xlane.f32.xlu0 %v1577_v36 }
0x12e7   :  { %v1576_v40 = vpop.xlane.xlu1 %1575 }
0x12e8   :  { %v1580_v41 = vmul.f32 0.03125, %v1576_v40 }
0x12e9   :  { %v1579_v42 = vpop.xlane.xlu0 %1578 }
0x12ea   :  { %v1582_v43 = vadd.f32 1e-05, %v1580_v41  ;;  %v1581_v44 = vmul.f32 0.03125, %v1579_v42 }
0x12ec   :  { %2080 = vrsqrt.f32 %v1582_v43  ;;  %v1583_v45 = vadd.f32 1e-05, %v1581_v44 }
0x12ee   :  { %2082 = vrsqrt.f32 %v1583_v45 }
0x12f6   :  { %v2081_v7 = vpop.eup %2080 }
0x12f7   :  { %v1586_v8 = vmul.f32 %v2081_v7, %v1570_v30 }
0x12f8   :  { %v2083_v47 = vpop.eup %2082 }
0x12f9   :  { %v1594_v48 = vmul.f32 %v1789_v46, %v1586_v8  ;;  %v1587_v39 = vmul.f32 %v2083_v47, %v1571_v32 }
0x12fb   :  { %v1595_v50 = vmul.f32 %v1789_v46, %v1587_v39  ;;  %v1602_v51 = vadd.f32 %v1790_v49, %v1594_v48 }
0x12fd   :  { %v1603_v1 = vadd.f32 %v1790_v49, %v1595_v50 }
0x12ff   :  { %v1604_v52 = vpack.c.bf16 %v1603_v1, %v1602_v51 }
0x1301   :  { %1976 = vmatmul.mubr.msk.bf16.vlgmr.msra.gmra.mrb[28].mxu1 %vm503_vm1, %v1604_v52 }
0x13d4   :  { %v1665_v54 = vpop.f32.mrb[28].mxu1 }
0x13d5   :  { %v1666_v55 = vadd.f32 %v1791_v53, %v1665_v54  ;;  %v1977_v56 = vpop.f32.mrb[29].mxu1 }
0x13d6   :  { %v1668_v57 = vpop.f32.mrb[30].mxu1 }
0x13d7   :  { %v1672_v59 = vmax.f32 %v1666_v55, 0.0  ;;  %v1669_v60 = vadd.f32 %v1791_v53, %v1668_v57  ;;  %v1978_v61 = vpop.f32.mrb[31].mxu1 }
0x13d9   :  { %v1673_v17 = vmax.f32 %v1669_v60, 0.0  ;;  %v1681_v62 = vmul.f32 %v1795_v58, %v1672_v59 }
0x13db   :  { %v1683_v18 = vsel %vm503_vm1, %v1681_v62, 0.0  ;;  %v1682_v63 = vmul.f32 %v1795_v58, %v1673_v17 }
0x13dc   :  { %1684 = vadd.xlane.f32.xlu1 %v1683_v18 }
0x13dd   :  { %v1686_v0 = vsel %vm503_vm1, %v1682_v63, 0.0 }
0x13de   :  { %1687 = vadd.xlane.f32.xlu0 %v1686_v0 }
0x1469   :  { %v1685_v3 = vpop.xlane.xlu1 %1684 }
0x146a   :  { %v1696_v4 = vadd.f32 %v1796_v2, %v1685_v3 }
0x146b   :  { %v1688_v5 = vpop.xlane.xlu0 %1687 }
0x146c   :  { %1699 = vst.msk [vmem:[#allocation35] sm:$0xff] %vm1698_vm5, %v1696_v4  ;;  %v1697_v6 = vadd.f32 %v1796_v2, %v1688_v5 }
0x146e   :  { %1700 = vst.msk [vmem:[#allocation35 + $0x8] sm:$0xff] %vm1698_vm5, %v1697_v6 }
0x146f   :  { %2535 = shalt.err (!%p2532_p10)
}
0x1470   :  { %s3271_s26 = sld [smem:[#allocation55_spill]] }
0x1476   :  { %s2536_s13 = scalar_lea.hbm %s3271_s26, 256 }
0x1477   :  { %p2537_p11 = scmp.ne.s32.totalorder %s3271_s26, %s2536_s13  ;;  %p2540_p12 = scmp.lt.u32.totalorder %s2536_s13, %s3271_s26 }
0x1479   :  { %p2542_p13 = pnand %p2540_p12, %p2537_p11 }
0x147b   :  { %2545 = shalt.err (!%p2542_p13)
}
0x147c   :  { %s2598_s1 = smov 128   ;;  %s2599_s11 = smov 8  }
0x147d   :  { %1712 = dma.vmem_to_hbm [thread:$0]  %s1707_s14, 256, %s3271_s26, [#allocation5], %s2598_s1, %s2598_s1, %s2599_s11  }
0x147e   :  { %2568 = dma.done.wait [#allocation5], 256  }
0x147f   :  { %2569 = vsyncadd [#allocation5], 4294967040 }
0x1480   :  { %1716 = vsyncpa [#allocation4], 1 }
0x1481   :  { %1717 = vsyncpa [#allocation7], 1 }
0x1482   :  { %1718 = vsyncpa [#allocation10], 1 }
0x1483   :  { %1719 = vsyncpa [#allocation13], 1 }
0x1484   :  { %1720 = vsyncpa [#allocation16], 1 }
0x1485   :  { %1721 = vsyncpa [#allocation19], 1 }
0x1486   :  { %1722 = vsyncpa [#allocation22], 1 }
0x1487   :  { %1723 = vsyncpa [#allocation25], 1 }
0x1488   :  { %1724 = vsyncpa [#allocation28], 1 }
0x1489   :  { %1725 = vsyncpa [#allocation31], 1 }
0x148a   :  { %1726 = vsyncpa [#allocation34], 1 }
0x148b   :  { %1727 = vsyncpa [#allocation5], 1 }

// kernel: eegformer_forward.5
= control target key start
LH: loop header
LB: loop body
LE: loop exit
PB: predicated region body
PF: predicated region fallthrough
CT: control target
= control target key end

     0   :  { %s5012_s0 = inlined_call_operand.hbm [shape: bf16[64,12], index: 0, kind: input, shape index: {}]   ;;  %s5013_s1 = inlined_call_operand.hbm [shape: bf16[12,32], index: 1, kind: input, shape index: {}]   ;;  %s5014_s2 = inlined_call_operand.hbm [shape: f32[1,32], index: 2, kind: input, shape index: {}]   ;;  %s5015_s3 = inlined_call_operand.hbm [shape: bf16[32,4], index: 3, kind: input, shape index: {}]   ;;  %s5016_s4 = inlined_call_operand.hbm [shape: bf16[4,32], index: 4, kind: input, shape index: {}]   ;;  %s5017_s5 = inlined_call_operand.hbm [shape: bf16[2,32,96], index: 5, kind: input, shape index: {}]   ;;  %s5018_s6 = inlined_call_operand.hbm [shape: f32[2,1,96], index: 6, kind: input, shape index: {}]   ;;  %s5019_s7 = inlined_call_operand.hbm [shape: bf16[2,32,32], index: 7, kind: input, shape index: {}]   ;;  %s5020_s8 = inlined_call_operand.hbm [shape: f32[2,1,32], index: 8, kind: input, shape index: {}]   ;;  %s5021_s9 = inlined_call_operand.hbm [shape: f32[2,1,32], index: 9, kind: input, shape index: {}]   ;;  %s5022_s10 = inlined_call_operand.hbm [shape: f32[2,1,32], index: 10, kind: input, shape index: {}]   ;;  %s5023_s11 = inlined_call_operand.hbm [shape: bf16[2,32,64], index: 11, kind: input, shape index: {}]   ;;  %s5024_s12 = inlined_call_operand.hbm [shape: f32[2,1,64], index: 12, kind: input, shape index: {}]   ;;  %s5025_s13 = inlined_call_operand.hbm [shape: bf16[2,64,32], index: 13, kind: input, shape index: {}]   ;;  %s5026_s14 = inlined_call_operand.hbm [shape: f32[2,1,32], index: 14, kind: input, shape index: {}]   ;;  %s5027_s15 = inlined_call_operand.hbm [shape: f32[2,1,32], index: 15, kind: input, shape index: {}]   ;;  %s5028_s16 = inlined_call_operand.hbm [shape: f32[2,1,32], index: 16, kind: input, shape index: {}]   ;;  %s5029_s17 = inlined_call_operand.hbm [shape: bf16[64,32], index: 17, kind: output, shape index: {}]  }
   0x1   :  { %5033 = sst [smem:[#allocation40_spill]] %s5012_s0 }
   0x2   :  { %5034 = sst [smem:[#allocation41_spill]] %s5013_s1 }
   0x3   :  { %5035 = sst [smem:[#allocation42_spill]] %s5029_s17 }
   0x4   :  { %22 = vsyncpa [#allocation3], 0 }
   0x5   :  { %23 = vsyncpa [#allocation6], 0 }
   0x6   :  { %24 = vsyncpa [#allocation9], 0 }
   0x7   :  { %25 = vsyncpa [#allocation12], 0 }
   0x8   :  { %26 = vsyncpa [#allocation15], 0 }
   0x9   :  { %27 = vsyncpa [#allocation18], 0 }
   0xa   :  { %28 = vsyncpa [#allocation21], 0 }
   0xb   :  { %29 = vsyncpa [#allocation24], 0 }
   0xc   :  { %30 = vsyncpa [#allocation27], 0 }
   0xd   :  { %31 = vsyncpa [#allocation4], 0  ;;  %s4027_s24 = smov [#allocation5]   ;;  %s4028_s26 = smov [#allocation8]  }
   0xe   :  { %s49_s25 = sshll.u32 %s4027_s24, 4  ;;  %s71_s27 = sshll.u32 %s4028_s26, 4  ;;  %s50_s25 = int_to_ptr.vmem [resolvable:$true] %s49_s25  ;;  %s4140_s27 = int_to_ptr.vmem [resolvable:$true] %s71_s27 }
   0xf   :  { %s5036_s0 = sld [smem:[#allocation41_spill]] }
  0x15   :  { %s3611_s30 = scalar_lea.hbm %s5036_s0, 128 }
  0x16   :  { %p3612_p0 = scmp.ne.s32.totalorder %s5036_s0, %s3611_s30  ;;  %p3615_p1 = scmp.lt.u32.totalorder %s3611_s30, %s5036_s0 }
  0x18   :  { %p3617_p2 = pnand %p3615_p1, %p3612_p0 }
  0x1a   :  { %3620 = shalt.err (!%p3617_p2)
}
  0x1b   :  { %s3621_s21 = scalar_lea.vmem %s50_s25, 128  ;;  %p3626_p4 = scmp.lt.s32.totalorder %s50_s25, %s50_s25 }
  0x1c   :  { %p3622_p3 = scmp.ne.s32.totalorder %s50_s25, %s3621_s21  ;;  %p3627_p5 = scmp.lt.s32.totalorder %s3621_s21, %s3621_s21 }
  0x1e   :  { %p3628_p6 = por %p3627_p5, %p3626_p4 }
  0x20   :  { %p3629_p7 = pnand %p3628_p6, %p3622_p3 }
  0x22   :  { %3632 = shalt.err (!%p3629_p7)
}
  0x23   :  { %s4029_s22 = smov 64   ;;  %s4030_s23 = smov 4  }
  0x24   :  { %55 = dma.hbm_to_vmem [thread:$0]  %s5036_s0, 128, %s50_s25, [#allocation6], %s4029_s22, %s4029_s22, %s4030_s23  }
  0x25   :  { %s3633_s30 = scalar_lea.hbm %s5015_s3, 256 }
  0x26   :  { %p3634_p8 = scmp.ne.s32.totalorder %s5015_s3, %s3633_s30  ;;  %p3637_p9 = scmp.lt.u32.totalorder %s3633_s30, %s5015_s3 }
  0x28   :  { %p3639_p10 = pnand %p3637_p9, %p3634_p8 }
  0x2a   :  { %3642 = shalt.err (!%p3639_p10)
}
  0x2b   :  { %s3643_s21 = scalar_lea.vmem %s4140_s27, 256  ;;  %p3648_p12 = scmp.lt.s32.totalorder %s4140_s27, %s4140_s27 }
  0x2c   :  { %p3644_p11 = scmp.ne.s32.totalorder %s4140_s27, %s3643_s21  ;;  %p3649_p13 = scmp.lt.s32.totalorder %s3643_s21, %s3643_s21 }
  0x2e   :  { %p3650_p0 = por %p3649_p13, %p3648_p12 }
  0x30   :  { %p3651_p1 = pnand %p3650_p0, %p3644_p11 }
  0x32   :  { %3654 = shalt.err (!%p3651_p1)
}
  0x33   :  { %77 = dma.hbm_to_vmem [thread:$0]  %s5015_s3, 256, %s4140_s27, [#allocation9], %s4029_s22, %s4029_s22, %s4030_s23  }
  0x34   :  { %s4031_s24 = smov [#allocation11]   ;;  %s4032_s28 = smov [#allocation14]  }
  0x35   :  { %s93_s26 = sshll.u32 %s4031_s24, 4  ;;  %s117_s29 = sshll.u32 %s4032_s28, 4  ;;  %s94_s26 = int_to_ptr.vmem [resolvable:$true] %s93_s26  ;;  %s4177_s29 = int_to_ptr.vmem [resolvable:$true] %s117_s29 }
  0x36   :  { %s3655_s19 = scalar_lea.hbm %s5017_s5, 512 }
  0x37   :  { %p3656_p2 = scmp.ne.s32.totalorder %s5017_s5, %s3655_s19  ;;  %p3659_p3 = scmp.lt.u32.totalorder %s3655_s19, %s5017_s5 }
  0x39   :  { %p3661_p4 = pnand %p3659_p3, %p3656_p2 }
  0x3b   :  { %3664 = shalt.err (!%p3661_p4)
}
  0x3c   :  { %s3665_s3 = scalar_lea.vmem %s94_s26, 512  ;;  %p3670_p6 = scmp.lt.s32.totalorder %s94_s26, %s94_s26 }
  0x3d   :  { %p3666_p5 = scmp.ne.s32.totalorder %s94_s26, %s3665_s3  ;;  %p3671_p7 = scmp.lt.s32.totalorder %s3665_s3, %s3665_s3 }
  0x3f   :  { %p3672_p8 = por %p3671_p7, %p3670_p6 }
  0x41   :  { %p3673_p9 = pnand %p3672_p8, %p3666_p5 }
  0x43   :  { %3676 = shalt.err (!%p3673_p9)
}
  0x44   :  { %99 = dma.hbm_to_vmem [thread:$0]  %s5017_s5, 512, %s94_s26, [#allocation12], %s4029_s22, %s4029_s22, %s4030_s23  }
  0x45   :  { %s3677_s17 = scalar_lea.hbm %s5019_s7, 512 }
  0x46   :  { %p3678_p10 = scmp.ne.s32.totalorder %s5019_s7, %s3677_s17  ;;  %p3681_p11 = scmp.lt.u32.totalorder %s3677_s17, %s5019_s7 }
  0x48   :  { %p3683_p12 = pnand %p3681_p11, %p3678_p10 }
  0x4a   :  { %3686 = shalt.err (!%p3683_p12)
}
  0x4b   :  { %s3687_s1 = scalar_lea.vmem %s4177_s29, 512  ;;  %p3692_p0 = scmp.lt.s32.totalorder %s4177_s29, %s4177_s29 }
  0x4c   :  { %p3688_p13 = scmp.ne.s32.totalorder %s4177_s29, %s3687_s1  ;;  %p3693_p1 = scmp.lt.s32.totalorder %s3687_s1, %s3687_s1 }
  0x4e   :  { %p3694_p2 = por %p3693_p1, %p3692_p0 }
  0x50   :  { %p3695_p3 = pnand %p3694_p2, %p3688_p13 }
  0x52   :  { %3698 = shalt.err (!%p3695_p3)
}
  0x53   :  { %123 = dma.hbm_to_vmem [thread:$0]  %s5019_s7, 512, %s4177_s29, [#allocation15], %s4029_s22, %s4029_s22, %s4030_s23  }
  0x54   :  { %s4033_s20 = smov [#allocation17]   ;;  %s4034_s3 = smov [#allocation20]  }
  0x55   :  { %s141_s21 = sshll.u32 %s4033_s20, 4  ;;  %s165_s27 = sshll.u32 %s4034_s3, 4  ;;  %s142_s21 = int_to_ptr.vmem [resolvable:$true] %s141_s21  ;;  %s4214_s27 = int_to_ptr.vmem [resolvable:$true] %s165_s27 }
  0x56   :  { %s3699_s24 = scalar_lea.hbm %s5021_s9, 32 }
  0x57   :  { %p3700_p4 = scmp.ne.s32.totalorder %s5021_s9, %s3699_s24  ;;  %p3703_p5 = scmp.lt.u32.totalorder %s3699_s24, %s5021_s9 }
  0x59   :  { %p3705_p6 = pnand %p3703_p5, %p3700_p4 }
  0x5b   :  { %3708 = shalt.err (!%p3705_p6)
}
  0x5c   :  { %s3709_s7 = scalar_lea.vmem %s142_s21, 32  ;;  %p3714_p8 = scmp.lt.s32.totalorder %s142_s21, %s142_s21 }
  0x5d   :  { %p3710_p7 = scmp.ne.s32.totalorder %s142_s21, %s3709_s7  ;;  %p3715_p9 = scmp.lt.s32.totalorder %s3709_s7, %s3709_s7 }
  0x5f   :  { %p3716_p10 = por %p3715_p9, %p3714_p8 }
  0x61   :  { %p3717_p11 = pnand %p3716_p10, %p3710_p7 }
  0x63   :  { %3720 = shalt.err (!%p3717_p11)
}
  0x64   :  { %s4035_s29 = smov 16   ;;  %s4036_s19 = smov 1  }
  0x65   :  { %147 = dma.hbm_to_vmem [thread:$0]  %s5021_s9, 32, %s142_s21, [#allocation18], %s4035_s29, %s4035_s29, %s4036_s19  }
  0x66   :  { %s3721_s3 = scalar_lea.hbm %s5023_s11, 512 }
  0x67   :  { %p3722_p12 = scmp.ne.s32.totalorder %s5023_s11, %s3721_s3  ;;  %p3725_p13 = scmp.lt.u32.totalorder %s3721_s3, %s5023_s11 }
  0x69   :  { %p3727_p0 = pnand %p3725_p13, %p3722_p12 }
  0x6b   :  { %3730 = shalt.err (!%p3727_p0)
}
  0x6c   :  { %s3731_s28 = scalar_lea.vmem %s4214_s27, 512  ;;  %p3736_p2 = scmp.lt.s32.totalorder %s4214_s27, %s4214_s27 }
  0x6d   :  { %p3732_p1 = scmp.ne.s32.totalorder %s4214_s27, %s3731_s28  ;;  %p3737_p3 = scmp.lt.s32.totalorder %s3731_s28, %s3731_s28 }
  0x6f   :  { %p3738_p4 = por %p3737_p3, %p3736_p2 }
  0x71   :  { %p3739_p5 = pnand %p3738_p4, %p3732_p1 }
  0x73   :  { %3742 = shalt.err (!%p3739_p5)
}
  0x74   :  { %171 = dma.hbm_to_vmem [thread:$0]  %s5023_s11, 512, %s4214_s27, [#allocation21], %s4029_s22, %s4029_s22, %s4030_s23  }
  0x75   :  { %s4037_s30 = smov [#allocation23]   ;;  %s4038_s7 = smov [#allocation26]  }
  0x76   :  { %s189_s18 = sshll.u32 %s4037_s30, 4  ;;  %s213_s1 = sshll.u32 %s4038_s7, 4  ;;  %s190_s18 = int_to_ptr.vmem [resolvable:$true] %s189_s18  ;;  %s4251_s1 = int_to_ptr.vmem [resolvable:$true] %s213_s1 }
  0x77   :  { %s3743_s20 = scalar_lea.hbm %s5025_s13, 1024 }
  0x78   :  { %p3744_p6 = scmp.ne.s32.totalorder %s5025_s13, %s3743_s20  ;;  %p3747_p7 = scmp.lt.u32.totalorder %s3743_s20, %s5025_s13 }
  0x7a   :  { %p3749_p8 = pnand %p3747_p7, %p3744_p6 }
  0x7c   :  { %3752 = shalt.err (!%p3749_p8)
}
  0x7d   :  { %s3753_s11 = scalar_lea.vmem %s190_s18, 1024  ;;  %p3758_p10 = scmp.lt.s32.totalorder %s190_s18, %s190_s18 }
  0x7e   :  { %p3754_p9 = scmp.ne.s32.totalorder %s190_s18, %s3753_s11  ;;  %p3759_p11 = scmp.lt.s32.totalorder %s3753_s11, %s3753_s11 }
  0x80   :  { %p3760_p12 = por %p3759_p11, %p3758_p10 }
  0x82   :  { %p3761_p13 = pnand %p3760_p12, %p3754_p9 }
  0x84   :  { %3764 = shalt.err (!%p3761_p13)
}
  0x85   :  { %195 = dma.hbm_to_vmem [thread:$0]  %s5025_s13, 1024, %s190_s18, [#allocation24], %s4029_s22, %s4029_s22, %s4030_s23  }
  0x86   :  { %s3765_s21 = scalar_lea.hbm %s5027_s15, 32 }
  0x87   :  { %p3766_p0 = scmp.ne.s32.totalorder %s5027_s15, %s3765_s21  ;;  %p3769_p1 = scmp.lt.u32.totalorder %s3765_s21, %s5027_s15 }
  0x89   :  { %p3771_p2 = pnand %p3769_p1, %p3766_p0 }
  0x8b   :  { %3774 = shalt.err (!%p3771_p2)
}
  0x8c   :  { %s3775_s20 = scalar_lea.vmem %s4251_s1, 32  ;;  %p3780_p4 = scmp.lt.s32.totalorder %s4251_s1, %s4251_s1 }
  0x8d   :  { %p3776_p3 = scmp.ne.s32.totalorder %s4251_s1, %s3775_s20  ;;  %p3781_p5 = scmp.lt.s32.totalorder %s3775_s20, %s3775_s20 }
  0x8f   :  { %p3782_p6 = por %p3781_p5, %p3780_p4 }
  0x91   :  { %p3783_p7 = pnand %p3782_p6, %p3776_p3 }
  0x93   :  { %3786 = shalt.err (!%p3783_p7)
}
  0x94   :  { %219 = dma.hbm_to_vmem [thread:$0]  %s5027_s15, 32, %s4251_s1, [#allocation27], %s4035_s29, %s4035_s29, %s4036_s19  }
  0x95   :  { %s4039_s3 = smov [#allocation2]   ;;  %s4040_s0 = smov [#allocation7]  }
  0x96   :  { %s37_s25 = sshll.u32 %s4039_s3, 4  ;;  %s62_s24 = sshll.u32 %s4040_s0, 4  ;;  %s38_s25 = int_to_ptr.vmem [resolvable:$true] %s37_s25  ;;  %s63_s24 = int_to_ptr.vmem [resolvable:$true] %s62_s24 }
  0x97   :  { %s5037_s17 = sld [smem:[#allocation40_spill]] }
  0x9d   :  { %s3787_s28 = scalar_lea.hbm %s5037_s17, 512 }
  0x9e   :  { %p3788_p8 = scmp.ne.s32.totalorder %s5037_s17, %s3787_s28  ;;  %p3791_p9 = scmp.lt.u32.totalorder %s3787_s28, %s5037_s17 }
  0xa0   :  { %p3793_p10 = pnand %p3791_p9, %p3788_p8 }
  0xa2   :  { %3796 = shalt.err (!%p3793_p10)
}
  0xa3   :  { %s3797_s15 = scalar_lea.vmem %s38_s25, 512  ;;  %p3802_p12 = scmp.lt.s32.totalorder %s38_s25, %s38_s25 }
  0xa4   :  { %p3798_p11 = scmp.ne.s32.totalorder %s38_s25, %s3797_s15  ;;  %p3803_p13 = scmp.lt.s32.totalorder %s3797_s15, %s3797_s15 }
  0xa6   :  { %p3804_p0 = por %p3803_p13, %p3802_p12 }
  0xa8   :  { %p3805_p1 = pnand %p3804_p0, %p3798_p11 }
  0xaa   :  { %3808 = shalt.err (!%p3805_p1)
}
  0xab   :  { %43 = dma.hbm_to_vmem [thread:$0]  %s5037_s17, 512, %s38_s25, [#allocation3], %s4029_s22, %s4029_s22, %s4030_s23  }
  0xac   :  { %s3809_s13 = scalar_lea.hbm %s5014_s2, 16 }
  0xad   :  { %p3810_p2 = scmp.ne.s32.totalorder %s5014_s2, %s3809_s13  ;;  %p3813_p3 = scmp.lt.u32.totalorder %s3809_s13, %s5014_s2 }
  0xaf   :  { %p3815_p4 = pnand %p3813_p3, %p3810_p2 }
  0xb1   :  { %3818 = shalt.err (!%p3815_p4)
}
  0xb2   :  { %s3819_s27 = scalar_lea.vmem %s63_s24, 16  ;;  %s3823_s28 = scalar_lea.vmem %s63_s24, 32 }
  0xb3   :  { %p3820_p5 = scmp.ne.s32.totalorder %s63_s24, %s3819_s27  ;;  %p3824_p6 = scmp.lt.s32.totalorder %s63_s24, %s63_s24 }
  0xb4   :  { %p3825_p7 = scmp.lt.s32.totalorder %s3823_s28, %s3819_s27 }
  0xb6   :  { %p3826_p8 = por %p3825_p7, %p3824_p6 }
  0xb8   :  { %p3827_p9 = pnand %p3826_p8, %p3820_p5 }
  0xba   :  { %3830 = shalt.err (!%p3827_p9)
}
  0xbb   :  { %65 = dma.hbm_to_vmem [thread:$0]  %s5014_s2, 16, %s63_s24, [#allocation6]  }
  0xbc   :  { %s4041_s9 = smov [#allocation10]   ;;  %s4042_s30 = smov [#allocation13]  }
  0xbd   :  { %s84_s21 = sshll.u32 %s4041_s9, 4  ;;  %s105_s7 = sshll.u32 %s4042_s30, 4  ;;  %s85_s21 = int_to_ptr.vmem [resolvable:$true] %s84_s21  ;;  %s4315_s7 = int_to_ptr.vmem [resolvable:$true] %s105_s7 }
  0xbe   :  { %s3831_s5 = scalar_lea.hbm %s5016_s4, 32 }
  0xbf   :  { %p3832_p10 = scmp.ne.s32.totalorder %s5016_s4, %s3831_s5  ;;  %p3835_p11 = scmp.lt.u32.totalorder %s3831_s5, %s5016_s4 }
  0xc1   :  { %p3837_p12 = pnand %p3835_p11, %p3832_p10 }
  0xc3   :  { %3840 = shalt.err (!%p3837_p12)
}
  0xc4   :  { %s3841_s2 = scalar_lea.vmem %s85_s21, 32  ;;  %p3846_p0 = scmp.lt.s32.totalorder %s85_s21, %s85_s21 }
  0xc5   :  { %p3842_p13 = scmp.ne.s32.totalorder %s85_s21, %s3841_s2  ;;  %p3847_p1 = scmp.lt.s32.totalorder %s3841_s2, %s3841_s2 }
  0xc7   :  { %p3848_p2 = por %p3847_p1, %p3846_p0 }
  0xc9   :  { %p3849_p3 = pnand %p3848_p2, %p3842_p13 }
  0xcb   :  { %3852 = shalt.err (!%p3849_p3)
}
  0xcc   :  { %87 = dma.hbm_to_vmem [thread:$0]  %s5016_s4, 32, %s85_s21, [#allocation9]  }
  0xcd   :  { %s3853_s27 = scalar_lea.hbm %s5018_s6, 32 }
  0xce   :  { %p3854_p4 = scmp.ne.s32.totalorder %s5018_s6, %s3853_s27  ;;  %p3857_p5 = scmp.lt.u32.totalorder %s3853_s27, %s5018_s6 }
  0xd0   :  { %p3859_p6 = pnand %p3857_p5, %p3854_p4 }
  0xd2   :  { %3862 = shalt.err (!%p3859_p6)
}
  0xd3   :  { %s3863_s30 = scalar_lea.vmem %s4315_s7, 32  ;;  %p3868_p8 = scmp.lt.s32.totalorder %s4315_s7, %s4315_s7 }
  0xd4   :  { %p3864_p7 = scmp.ne.s32.totalorder %s4315_s7, %s3863_s30  ;;  %p3869_p9 = scmp.lt.s32.totalorder %s3863_s30, %s3863_s30 }
  0xd6   :  { %p3870_p10 = por %p3869_p9, %p3868_p8 }
  0xd8   :  { %p3871_p11 = pnand %p3870_p10, %p3864_p7 }
  0xda   :  { %3874 = shalt.err (!%p3871_p11)
}
  0xdb   :  { %111 = dma.hbm_to_vmem [thread:$0]  %s5018_s6, 32, %s4315_s7, [#allocation12], %s4035_s29, %s4035_s29, %s4036_s19  }
  0xdc   :  { %s4043_s15 = smov [#allocation16]   ;;  %s4044_s5 = smov [#allocation19]  }
  0xdd   :  { %s129_s1 = sshll.u32 %s4043_s15, 4  ;;  %s153_s26 = sshll.u32 %s4044_s5, 4  ;;  %s130_s1 = int_to_ptr.vmem [resolvable:$true] %s129_s1  ;;  %s4349_s26 = int_to_ptr.vmem [resolvable:$true] %s153_s26 }
  0xde   :  { %s3875_s18 = scalar_lea.hbm %s5020_s8, 32 }
  0xdf   :  { %p3876_p12 = scmp.ne.s32.totalorder %s5020_s8, %s3875_s18  ;;  %p3879_p13 = scmp.lt.u32.totalorder %s3875_s18, %s5020_s8 }
  0xe1   :  { %p3881_p0 = pnand %p3879_p13, %p3876_p12 }
  0xe3   :  { %3884 = shalt.err (!%p3881_p0)
}
  0xe4   :  { %s3885_s6 = scalar_lea.vmem %s130_s1, 32  ;;  %p3890_p2 = scmp.lt.s32.totalorder %s130_s1, %s130_s1 }
  0xe5   :  { %p3886_p1 = scmp.ne.s32.totalorder %s130_s1, %s3885_s6  ;;  %p3891_p3 = scmp.lt.s32.totalorder %s3885_s6, %s3885_s6 }
  0xe7   :  { %p3892_p4 = por %p3891_p3, %p3890_p2 }
  0xe9   :  { %p3893_p5 = pnand %p3892_p4, %p3886_p1 }
  0xeb   :  { %3896 = shalt.err (!%p3893_p5)
}
  0xec   :  { %135 = dma.hbm_to_vmem [thread:$0]  %s5020_s8, 32, %s130_s1, [#allocation15], %s4035_s29, %s4035_s29, %s4036_s19  }
  0xed   :  { %s3897_s25 = scalar_lea.hbm %s5022_s10, 32 }
  0xee   :  { %p3898_p6 = scmp.ne.s32.totalorder %s5022_s10, %s3897_s25  ;;  %p3901_p7 = scmp.lt.u32.totalorder %s3897_s25, %s5022_s10 }
  0xf0   :  { %p3903_p8 = pnand %p3901_p7, %p3898_p6 }
  0xf2   :  { %3906 = shalt.err (!%p3903_p8)
}
  0xf3   :  { %s3907_s21 = scalar_lea.vmem %s4349_s26, 32  ;;  %p3912_p10 = scmp.lt.s32.totalorder %s4349_s26, %s4349_s26 }
  0xf4   :  { %p3908_p9 = scmp.ne.s32.totalorder %s4349_s26, %s3907_s21  ;;  %p3913_p11 = scmp.lt.s32.totalorder %s3907_s21, %s3907_s21 }
  0xf6   :  { %p3914_p12 = por %p3913_p11, %p3912_p10 }
  0xf8   :  { %p3915_p13 = pnand %p3914_p12, %p3908_p9 }
  0xfa   :  { %3918 = shalt.err (!%p3915_p13)
}
  0xfb   :  { %159 = dma.hbm_to_vmem [thread:$0]  %s5022_s10, 32, %s4349_s26, [#allocation18], %s4035_s29, %s4035_s29, %s4036_s19  }
  0xfc   :  { %s4045_s1 = smov [#allocation22]   ;;  %s4046_s20 = smov [#allocation25]  }
  0xfd   :  { %s177_s5 = sshll.u32 %s4045_s1, 4  ;;  %s201_s13 = sshll.u32 %s4046_s20, 4  ;;  %s178_s5 = int_to_ptr.vmem [resolvable:$true] %s177_s5  ;;  %s4386_s13 = int_to_ptr.vmem [resolvable:$true] %s201_s13 }
  0xfe   :  { %s3919_s24 = scalar_lea.hbm %s5024_s12, 32 }
  0xff   :  { %p3920_p0 = scmp.ne.s32.totalorder %s5024_s12, %s3919_s24  ;;  %p3923_p1 = scmp.lt.u32.totalorder %s3919_s24, %s5024_s12 }
 0x101   :  { %p3925_p2 = pnand %p3923_p1, %p3920_p0 }
 0x103   :  { %3928 = shalt.err (!%p3925_p2)
}
 0x104   :  { %s3929_s10 = scalar_lea.vmem %s178_s5, 32  ;;  %p3934_p4 = scmp.lt.s32.totalorder %s178_s5, %s178_s5 }
 0x105   :  { %p3930_p3 = scmp.ne.s32.totalorder %s178_s5, %s3929_s10  ;;  %p3935_p5 = scmp.lt.s32.totalorder %s3929_s10, %s3929_s10 }
 0x107   :  { %p3936_p6 = por %p3935_p5, %p3934_p4 }
 0x109   :  { %p3937_p7 = pnand %p3936_p6, %p3930_p3 }
 0x10b   :  { %3940 = shalt.err (!%p3937_p7)
}
 0x10c   :  { %183 = dma.hbm_to_vmem [thread:$0]  %s5024_s12, 32, %s178_s5, [#allocation21], %s4035_s29, %s4035_s29, %s4036_s19  }
 0x10d   :  { %s3941_s25 = scalar_lea.hbm %s5026_s14, 32 }
 0x10e   :  { %p3942_p8 = scmp.ne.s32.totalorder %s5026_s14, %s3941_s25  ;;  %p3945_p9 = scmp.lt.u32.totalorder %s3941_s25, %s5026_s14 }
 0x110   :  { %p3947_p10 = pnand %p3945_p9, %p3942_p8 }
 0x112   :  { %3950 = shalt.err (!%p3947_p10)
}
 0x113   :  { %s3951_s21 = scalar_lea.vmem %s4386_s13, 32  ;;  %p3956_p12 = scmp.lt.s32.totalorder %s4386_s13, %s4386_s13 }
 0x114   :  { %p3952_p11 = scmp.ne.s32.totalorder %s4386_s13, %s3951_s21  ;;  %p3957_p13 = scmp.lt.s32.totalorder %s3951_s21, %s3951_s21 }
 0x116   :  { %p3958_p0 = por %p3957_p13, %p3956_p12 }
 0x118   :  { %p3959_p1 = pnand %p3958_p0, %p3952_p11 }
 0x11a   :  { %3962 = shalt.err (!%p3959_p1)
}
 0x11b   :  { %207 = dma.hbm_to_vmem [thread:$0]  %s5026_s14, 32, %s4386_s13, [#allocation24], %s4035_s29, %s4035_s29, %s4036_s19  }
 0x11c   :  { %s4047_s15 = smov [#allocation28]   ;;  %s3963_s18 = scalar_lea.hbm %s5028_s16, 32 }
 0x11d   :  { %s225_s1 = sshll.u32 %s4047_s15, 4  ;;  %p3964_p2 = scmp.ne.s32.totalorder %s5028_s16, %s3963_s18  ;;  %s226_s1 = int_to_ptr.vmem [resolvable:$true] %s225_s1 }
 0x11e   :  { %p3967_p3 = scmp.lt.u32.totalorder %s3963_s18, %s5028_s16 }
 0x120   :  { %p3969_p4 = pnand %p3967_p3, %p3964_p2 }
 0x122   :  { %3972 = shalt.err (!%p3969_p4)
}
 0x123   :  { %s3973_s6 = scalar_lea.vmem %s226_s1, 32  ;;  %p3978_p6 = scmp.lt.s32.totalorder %s226_s1, %s226_s1 }
 0x124   :  { %p3974_p5 = scmp.ne.s32.totalorder %s226_s1, %s3973_s6  ;;  %p3979_p7 = scmp.lt.s32.totalorder %s3973_s6, %s3973_s6 }
 0x126   :  { %p3980_p8 = por %p3979_p7, %p3978_p6 }
 0x128   :  { %p3981_p9 = pnand %p3980_p8, %p3974_p5 }
 0x12a   :  { %3984 = shalt.err (!%p3981_p9)
}
 0x12b   :  { %231 = dma.hbm_to_vmem [thread:$0]  %s5028_s16, 32, %s226_s1, [#allocation27], %s4035_s29, %s4035_s29, %s4036_s19  }
 0x12c   :  { %4007 = dma.done.wait [#allocation3], 512  }
 0x12d   :  { %4008 = vsyncadd [#allocation3], 4294966784 }
 0x12e   :  { %4009 = dma.done.wait [#allocation6], 144  }
 0x12f   :  { %4010 = vsyncadd [#allocation6], 4294967152 }
 0x130   :  { %4011 = dma.done.wait [#allocation9], 288  }
 0x131   :  { %4012 = vsyncadd [#allocation9], 4294967008 }
 0x132   :  { %4013 = dma.done.wait [#allocation12], 544  }
 0x133   :  { %4014 = vsyncadd [#allocation12], 4294966752 }
 0x134   :  { %4015 = dma.done.wait [#allocation15], 544  }
 0x135   :  { %4016 = vsyncadd [#allocation15], 4294966752 }
 0x136   :  { %4017 = dma.done.wait [#allocation18], 64  }
 0x137   :  { %4018 = vsyncadd [#allocation18], 4294967232 }
 0x138   :  { %4019 = dma.done.wait [#allocation21], 544  }
 0x139   :  { %4020 = vsyncadd [#allocation21], 4294966752 }
 0x13a   :  { %4021 = dma.done.wait [#allocation24], 1056  }
 0x13b   :  { %4022 = vsyncadd [#allocation24], 4294966240 }
 0x13c   :  { %4023 = dma.done.wait [#allocation27], 64  }
 0x13d   :  { %4024 = vsyncadd [#allocation27], 4294967232  ;;  %vm332_vm0 = vcmask 1045504   ;;  %vm319_vm1 = vcmask 97280   ;;  %v3421_v0 = vld [vmem:[#allocation5] sm:$0x3f]  }
 0x13e   :  { %v3422_v1 = vld [vmem:[#allocation2] sm:$0xff]   ;;  %3394 = vmatprep.subr.msk.bf16.mxu0 %vm332_vm0, %v3421_v0  ;;  %v334_v2 = vsel %vm332_vm0, %v3421_v0, 0  ;;  %v3423_v3 = vld [vmem:[#allocation2 + $0x8] sm:$0xff]   ;;  %3395 = vmatprep.subr.msk.bf16.mxu1 %vm332_vm0, %v3421_v0  ;;  %v3424_v4 = vld [vmem:[#allocation2 + $0x10] sm:$0xff]   ;;  %vm471_vm2 = vcmask 261120   ;;  %s4048_s16 = smov 96  }
 0x13f   :  { %3203 = vmatpush3.bf16.msra.mxu0 %v334_v2  ;;  %3204 = vmatprep.mubr.msk.bf16.mxu0 %vm319_vm1, %v3422_v1  ;;  %v3425_v5 = vld [vmem:[#allocation2 + $0x18] sm:$0xff]   ;;  %v3427_v7 = vld [vmem:[#allocation11 + $0x8] sm:$0xff]   ;;  %vm907_vm3 = vcmask 1041408   ;;  %vm754_vm4 = vcmask 31744   ;;  %vm1453_vm5 = vcmask 523264   ;;  %vm2945_vm6 = vcmask 257024  }
 0x140   :  { %3393 = vmatpush3.bf16.msra.mxu1 %v334_v2  ;;  %3208 = vmatprep.mubr.msk.bf16.mxu1 %vm319_vm1, %v3424_v4  ;;  %v3426_v6 = vld [vmem:[#allocation11] sm:$0xff]   ;;  %v2988_v9 = vld [vmem:[#allocation7] ss:$0 sm:$0xff]  ;;  %v3428_v29 = vld [vmem:[#allocation8] sm:$0xff]   ;;  %s4049_s29 = smov [#allocation29]  }
 0x141   :  { %3212 = vmatprep.subr.bf16.mxu1 %v3426_v6  ;;  %3224 = vmatprep.subr.bf16.mxu0 %v3428_v29  ;;  %v3429_v30 = vld [vmem:[#allocation8 + $0x8] sm:$0xff]   ;;  %v2989_v31 = vld [vmem:[#allocation13] ss:$0 sm:$0xff]  ;;  %s2959_s19 = sshll.u32 %s4049_s29, 4  ;;  %s2960_s19 = int_to_ptr.vmem [resolvable:$true] %s2959_s19 }
 0x142   :  { %3205 = vmatmul.mubr.msk.bf16.vlgmr.msra.gmra.mrb[0].mxu0 %vm319_vm1, %v3423_v3  ;;  %s3985_s7 = scalar_lea.vmem %s2960_s19, 512  ;;  %p3990_p11 = scmp.lt.s32.totalorder %s2960_s19, %s2960_s19 }
 0x143   :  { %3209 = vmatmul.mubr.msk.bf16.vlgmr.msra.gmra.mrb[0].mxu1 %vm319_vm1, %v3425_v5  ;;  %3225 = vmatpush3.bf16.msra.mxu0 %v3428_v29  ;;  %p3986_p10 = scmp.ne.s32.totalorder %s2960_s19, %s3985_s7  ;;  %p3991_p12 = scmp.lt.s32.totalorder %s3985_s7, %s3985_s7 }
 0x144   :  { %3213 = vmatpush3.bf16.msra.mxu1 %v3426_v6  ;;  %3226 = vmatprep.subr.bf16.mxu0 %v3429_v30 }
 0x145   :  { %3214 = vmatprep.subr.bf16.mxu1 %v3427_v7  ;;  %p3992_p13 = por %p3991_p12, %p3990_p11 }
 0x147   :  { %3227 = vmatpush3.bf16.msra.mxu0 %v3429_v30  ;;  %p3993_p0 = pnand %p3992_p13, %p3986_p10 }
 0x148   :  { %3215 = vmatpush3.bf16.msra.mxu1 %v3427_v7 }
 0x215   :  { %v3206_v8 = vpop.f32.mrb[0].mxu0 }
 0x216   :  { %v370_v10 = vpop.f32.mrb[1].mxu0  ;;  %v3210_v11 = vpop.f32.mrb[0].mxu1  ;;  %v4446_v21 = vadd.f32 %v3206_v8, %v2988_v9 }
 0x217   :  { %v3207_v12 = vpop.f32.mrb[2].mxu0  ;;  %v386_v13 = vpop.f32.mrb[1].mxu1  ;;  %v4442_v18 = vadd.f32 %v2988_v9, %v370_v10  ;;  %v4459_v26 = vadd.f32 %v3210_v11, %v2988_v9 }
 0x218   :  { %v4438_v14 = vadd.f32 %v3207_v12, %v2988_v9  ;;  %v373_v15 = vpop.f32.mrb[3].mxu0  ;;  %v4440_v16 = vadd.f32 %v2988_v9, %v386_v13  ;;  %v3211_v17 = vpop.f32.mrb[2].mxu1 }
 0x219   :  { %v4444_v19 = vadd.f32 %v2988_v9, %v373_v15  ;;  %v389_v20 = vpop.f32.mrb[3].mxu1  ;;  %v4461_v27 = vadd.f32 %v3211_v17, %v2988_v9 }
 0x21a   :  { %v4448_v22 = vadd.f32 %v2988_v9, %v389_v20  ;;  %v450_v24 = vpack.c.bf16 %v4438_v14, %v4446_v21  ;;  %v420_v20 = vld [vmem:[#allocation10] sm:$0x3] }
 0x21b   :  { %v449_v23 = vpack.c.bf16 %v4444_v19, %v4442_v18  ;;  %v452_v28 = vpack.c.bf16 %v4461_v27, %v4459_v26  ;;  %3396 = vmatprep.subr.msk.bf16.mxu1 %vm907_vm3, %v420_v20 }
 0x21c   :  { %v451_v25 = vpack.c.bf16 %v4448_v22, %v4440_v16 }
 0x21d   :  { %3216 = vmatprep.mubr.msk.bf16.mxu1 %vm471_vm2, %v449_v23  ;;  %v4492_v23 = vsel %vm907_vm3, %v420_v20, 0 }
 0x21e   :  { %3217 = vmatmul.mubr.msk.bf16.vlgmr.msra.gmra.mrb[4].mxu1 %vm471_vm2, %v450_v24  ;;  %v3430_v24 = vld [vmem:[#allocation14] sm:$0xff]  }
 0x21f   :  { %3220 = vmatprep.mubr.msk.bf16.mxu1 %vm471_vm2, %v451_v25  ;;  %3245 = vmatpush3.bf16.msra.mxu1 %v4492_v23 }
 0x220   :  { %3262 = vmatprep.subr.bf16.mxu0 %v3430_v24 }
 0x226   :  { %3221 = vmatmul.mubr.msk.bf16.gmra.mrb[8].mxu1 %vm471_vm2, %v452_v28 }
 0x2f1   :  { %v3218_v32 = vpop.f32.mrb[4].mxu1 }
 0x2f2   :  { %v527_v33 = vadd.f32 %v3218_v32, %v2989_v31  ;;  %v518_v34 = vpop.f32.mrb[5].mxu1 }
 0x2f3   :  { %v519_v35 = vadd.f32 %v2989_v31, %v518_v34  ;;  %v3219_v36 = vpop.f32.mrb[6].mxu1 }
 0x2f4   :  { %561 = vrot.lane.b32.xlu1 %v527_v33, %s4048_s16  ;;  %v521_v37 = vpop.f32.mrb[7].mxu1  ;;  %v530_v38 = vadd.f32 %v3219_v36, %v2989_v31 }
 0x2f5   :  { %557 = vrot.lane.b32.xlu0 %v519_v35, %s4048_s16  ;;  %v522_v39 = vadd.f32 %v2989_v31, %v521_v37 }
 0x2f8   :  { %563 = vrot.lane.b32.xlu1 %v530_v38, %s4048_s16 }
 0x2f9   :  { %v3222_v40 = vpop.f32.mrb[8].mxu1  ;;  %559 = vrot.lane.b32.xlu0 %v522_v39, %s4048_s16 }
 0x2fa   :  { %v534_v41 = vpop.f32.mrb[9].mxu1  ;;  %v543_v46 = vadd.f32 %v3222_v40, %v2989_v31 }
 0x2fb   :  { %v535_v42 = vadd.f32 %v2989_v31, %v534_v41  ;;  %v3223_v43 = vpop.f32.mrb[10].mxu1 }
 0x2fc   :  { %v537_v44 = vpop.f32.mrb[11].mxu1  ;;  %v546_v47 = vadd.f32 %v3223_v43, %v2989_v31 }
 0x2fd   :  { %v538_v45 = vadd.f32 %v2989_v31, %v537_v44  ;;  %565 = vrot.lane.b32.xlu0 %v535_v42, %s4048_s16 }
 0x2ff   :  { %567 = vrot.lane.b32.xlu1 %v538_v45, %s4048_s16 }
 0x301   :  { %569 = vrot.lane.b32.xlu0 %v543_v46, %s4048_s16 }
 0x303   :  { %571 = vrot.lane.b32.xlu1 %v546_v47, %s4048_s16 }
 0x305   :  { %1008 = vrot.lane.b32.xlu0 %v519_v35, %s4029_s22 }
 0x307   :  { %1010 = vrot.lane.b32.xlu1 %v522_v39, %s4029_s22 }
 0x309   :  { %1016 = vrot.lane.b32.xlu0 %v535_v42, %s4029_s22 }
 0x30b   :  { %1014 = vrot.lane.b32.xlu1 %v530_v38, %s4029_s22 }
 0x30d   :  { %1012 = vrot.lane.b32.xlu0 %v527_v33, %s4029_s22 }
 0x30f   :  { %1018 = vrot.lane.b32.xlu1 %v538_v45, %s4029_s22 }
 0x311   :  { %1020 = vrot.lane.b32.xlu0 %v543_v46, %s4029_s22 }
 0x313   :  { %1022 = vrot.lane.b32.xlu1 %v546_v47, %s4029_s22 }
 0x366   :  { %v562_v48 = vpop.permute.xlu1 %561 }
 0x367   :  { %v558_v49 = vpop.permute.xlu0 %557  ;;  %v583_v55 = vmul.f32 %v562_v48, %v527_v33  ;;  %v591_v9 = vmul.f32 %v562_v48, %v543_v46 }
 0x368   :  { %v581_v53 = vmul.f32 %v558_v49, %v519_v35  ;;  %v589_v4 = vmul.f32 %v558_v49, %v535_v42 }
 0x36a   :  { %v564_v50 = vpop.permute.xlu1 %563 }
 0x36b   :  { %v584_v51 = vmul.f32 %v564_v50, %v530_v38  ;;  %v560_v52 = vpop.permute.xlu0 %559  ;;  %v592_v7 = vmul.f32 %v564_v50, %v546_v47 }
 0x36c   :  { %v582_v54 = vmul.f32 %v560_v52, %v522_v39  ;;  %v590_v0 = vmul.f32 %v560_v52, %v538_v45 }
 0x36d   :  { %v598_v57 = vpack.c.bf16 %v584_v51, %v583_v55  ;;  %v602_v11 = vpack.c.bf16 %v592_v7, %v591_v9 }
 0x36e   :  { %v597_v56 = vpack.c.bf16 %v582_v54, %v581_v53  ;;  %v601_v6 = vpack.c.bf16 %v590_v0, %v589_v4 }
 0x36f   :  { %v566_v58 = vpop.permute.xlu0 %565 }
 0x370   :  { %3228 = vmatprep.mubr.msk.bf16.mxu0 %vm471_vm2, %v597_v56  ;;  %v585_v60 = vmul.f32 %v566_v58, %v519_v35  ;;  %v593_v10 = vmul.f32 %v566_v58, %v535_v42 }
 0x371   :  { %v568_v59 = vpop.permute.xlu1 %567  ;;  %3229 = vmatmul.mubr.msk.bf16.vlgmr.msra.gmra.mrb[4].mxu0 %vm471_vm2, %v598_v57 }
 0x372   :  { %v586_v61 = vmul.f32 %v568_v59, %v522_v39  ;;  %v594_v8 = vmul.f32 %v568_v59, %v538_v45  ;;  %3263 = vmatpush3.bf16.msra.mxu0 %v3430_v24 }
 0x373   :  { %v570_v62 = vpop.permute.xlu0 %569 }
 0x374   :  { %v599_v63 = vpack.c.bf16 %v586_v61, %v585_v60  ;;  %v587_v2 = vmul.f32 %v570_v62, %v527_v33  ;;  %v603_v12 = vpack.c.bf16 %v594_v8, %v593_v10  ;;  %v595_v15 = vmul.f32 %v570_v62, %v543_v46 }
 0x375   :  { %v572_v1 = vpop.permute.xlu1 %571 }
 0x376   :  { %v588_v3 = vmul.f32 %v572_v1, %v530_v38  ;;  %3232 = vmatprep.mubr.msk.bf16.mxu0 %vm471_vm2, %v599_v63  ;;  %v596_v13 = vmul.f32 %v572_v1, %v546_v47 }
 0x378   :  { %v600_v5 = vpack.c.bf16 %v588_v3, %v587_v2  ;;  %v604_v17 = vpack.c.bf16 %v596_v13, %v595_v15 }
 0x37a   :  { %3233 = vmatmul.mubr.msk.bf16.gmra.mrb[8].mxu0 %vm471_vm2, %v600_v5 }
 0x37b   :  { %3236 = vmatprep.mubr.msk.bf16.mxu0 %vm471_vm2, %v601_v6 }
 0x382   :  { %3237 = vmatmul.mubr.msk.bf16.gmra.mrb[12].mxu0 %vm471_vm2, %v602_v11 }
 0x383   :  { %3240 = vmatprep.mubr.msk.bf16.mxu0 %vm471_vm2, %v603_v12 }
 0x38a   :  { %3241 = vmatmul.mubr.msk.bf16.gmra.mrb[16].mxu0 %vm471_vm2, %v604_v17 }
 0x444   :  { %v3230_v25 = vpop.f32.mrb[4].mxu0 }
 0x445   :  { %v675_v28 = vpop.f32.mrb[5].mxu0  ;;  %v740_v31 = vmul.f32 0.35355338, %v3230_v25 }
 0x446   :  { %v3231_v29 = vpop.f32.mrb[6].mxu0  ;;  %v738_v32 = vmul.f32 0.35355338, %v675_v28 }
 0x447   :  { %v678_v30 = vpop.f32.mrb[7].mxu0  ;;  %v741_v33 = vmul.f32 0.35355338, %v3231_v29  ;;  %v761_v40 = vsel %vm754_vm4, %v740_v31, -inf }
 0x448   :  { %v739_v35 = vmul.f32 0.35355338, %v678_v30  ;;  %v755_v44 = vsel %vm754_vm4, %v738_v32, -inf }
 0x449   :  { %v764_v48 = vsel %vm754_vm4, %v741_v33, -inf }
 0x44a   :  { %v758_v49 = vsel %vm754_vm4, %v739_v35, -inf }
 0x44d   :  { %v3234_v34 = vpop.f32.mrb[8].mxu0 }
 0x44e   :  { %v744_v36 = vmul.f32 0.35355338, %v3234_v34  ;;  %v691_v37 = vpop.f32.mrb[9].mxu0 }
 0x44f   :  { %v742_v38 = vmul.f32 0.35355338, %v691_v37  ;;  %v3235_v39 = vpop.f32.mrb[10].mxu0 }
 0x450   :  { %v762_v41 = vsel %vm754_vm4, %v744_v36, -inf  ;;  %v745_v42 = vmul.f32 0.35355338, %v3235_v39  ;;  %v694_v43 = vpop.f32.mrb[11].mxu0 }
 0x451   :  { %v763_v45 = vmax.f32 %v761_v40, %v762_v41  ;;  %v756_v46 = vsel %vm754_vm4, %v742_v38, -inf  ;;  %v743_v47 = vmul.f32 0.35355338, %v694_v43 }
 0x452   :  { %v757_v50 = vmax.f32 %v755_v44, %v756_v46  ;;  %v765_v51 = vsel %vm754_vm4, %v745_v42, -inf }
 0x453   :  { %v781_v52 = vsub.f32 %v740_v31, %v763_v45  ;;  %v785_v53 = vsub.f32 %v744_v36, %v763_v45  ;;  %v766_v54 = vmax.f32 %v764_v48, %v765_v51  ;;  %v759_v55 = vsel %vm754_vm4, %v743_v47, -inf }
 0x454   :  { %v779_v56 = vsub.f32 %v738_v32, %v757_v50  ;;  %v783_v57 = vsub.f32 %v742_v38, %v757_v50  ;;  %v760_v58 = vmax.f32 %v758_v49, %v759_v55 }
 0x455   :  { %v799_v59 = vmul.f32 1.442695, %v781_v52  ;;  %v807_v60 = vmul.f32 1.442695, %v785_v53  ;;  %v782_v61 = vsub.f32 %v741_v33, %v766_v54  ;;  %v786_v62 = vsub.f32 %v745_v42, %v766_v54  ;;  %v3238_v63 = vpop.f32.mrb[12].mxu0 }
 0x456   :  { %v795_v0 = vmul.f32 1.442695, %v779_v56  ;;  %v803_v1 = vmul.f32 1.442695, %v783_v57  ;;  %v780_v2 = vsub.f32 %v739_v35, %v760_v58  ;;  %v784_v3 = vsub.f32 %v743_v47, %v760_v58  ;;  %v707_v4 = vpop.f32.mrb[13].mxu0 }
 0x457   :  { %3448 = vpow2.f32 %v799_v59  ;;  %v801_v5 = vmul.f32 1.442695, %v782_v61  ;;  %v809_v6 = vmul.f32 1.442695, %v786_v62  ;;  %v3239_v8 = vpop.f32.mrb[14].mxu0 }
 0x458   :  { %3450 = vpow2.f32 %v807_v60  ;;  %v797_v7 = vmul.f32 1.442695, %v780_v2  ;;  %v805_v9 = vmul.f32 1.442695, %v784_v3  ;;  %v710_v10 = vpop.f32.mrb[15].mxu0 }
 0x459   :  { %3452 = vpow2.f32 %v795_v0  ;;  %v748_v11 = vmul.f32 0.35355338, %v3238_v63  ;;  %v746_v12 = vmul.f32 0.35355338, %v707_v4  ;;  %v749_v13 = vmul.f32 0.35355338, %v3239_v8 }
 0x45a   :  { %3454 = vpow2.f32 %v803_v1  ;;  %v747_v35 = vmul.f32 0.35355338, %v710_v10 }
 0x45b   :  { %3456 = vpow2.f32 %v801_v5  ;;  %v773_v28 = vsel %vm754_vm4, %v748_v11, -inf  ;;  %v767_v29 = vsel %vm754_vm4, %v746_v12, -inf  ;;  %v776_v34 = vsel %vm754_vm4, %v749_v13, -inf }
 0x45c   :  { %3458 = vpow2.f32 %v809_v6  ;;  %v770_v4 = vsel %vm754_vm4, %v747_v35, -inf }
 0x45d   :  { %3460 = vpow2.f32 %v797_v7  ;;  %v3242_v15 = vpop.f32.mrb[16].mxu0 }
 0x45e   :  { %3462 = vpow2.f32 %v805_v9  ;;  %v752_v17 = vmul.f32 0.35355338, %v3242_v15  ;;  %v723_v20 = vpop.f32.mrb[17].mxu0 }
 0x45f   :  { %v750_v24 = vmul.f32 0.35355338, %v723_v20  ;;  %v3243_v25 = vpop.f32.mrb[18].mxu0 }
 0x460   :  { %v774_v30 = vsel %vm754_vm4, %v752_v17, -inf  ;;  %v753_v31 = vmul.f32 0.35355338, %v3243_v25  ;;  %v726_v32 = vpop.f32.mrb[19].mxu0 }
 0x461   :  { %v3449_v33 = vpop.eup %3448  ;;  %v775_v36 = vmax.f32 %v773_v28, %v774_v30  ;;  %v768_v37 = vsel %vm754_vm4, %v750_v24, -inf  ;;  %v751_v42 = vmul.f32 0.35355338, %v726_v32 }
 0x462   :  { %v3451_v38 = vpop.eup %3450  ;;  %v833_v39 = vsel %vm754_vm4, %v3449_v33, 0.0  ;;  %v769_v40 = vmax.f32 %v767_v29, %v768_v37  ;;  %v777_v41 = vsel %vm754_vm4, %v753_v31, -inf }
 0x463   :  { %v3453_v43 = vpop.eup %3452  ;;  %v834_v44 = vsel %vm754_vm4, %v3451_v38, 0.0  ;;  %v789_v45 = vsub.f32 %v748_v11, %v775_v36  ;;  %v793_v46 = vsub.f32 %v752_v17, %v775_v36  ;;  %v778_v47 = vmax.f32 %v776_v34, %v777_v41 }
 0x464   :  { %v3455_v48 = vpop.eup %3454  ;;  %v835_v49 = vadd.f32 %v834_v44, %v833_v39  ;;  %v827_v50 = vsel %vm754_vm4, %v3453_v43, 0.0  ;;  %v787_v51 = vsub.f32 %v746_v12, %v769_v40  ;;  %v791_v52 = vsub.f32 %v750_v24, %v769_v40 }
 0x465   :  { %v3457_v53 = vpop.eup %3456  ;;  %v828_v54 = vsel %vm754_vm4, %v3455_v48, 0.0  ;;  %v815_v55 = vmul.f32 1.442695, %v789_v45  ;;  %v823_v56 = vmul.f32 1.442695, %v793_v46  ;;  %v790_v57 = vsub.f32 %v749_v13, %v778_v47 }
 0x466   :  { %v3459_v58 = vpop.eup %3458  ;;  %3464 = vrcp.f32 %v835_v49  ;;  %v829_v59 = vadd.f32 %v828_v54, %v827_v50  ;;  %v836_v60 = vsel %vm754_vm4, %v3457_v53, 0.0  ;;  %v811_v63 = vmul.f32 1.442695, %v787_v51 }
 0x467   :  { %v3461_v61 = vpop.eup %3460  ;;  %v837_v62 = vsel %vm754_vm4, %v3459_v58, 0.0  ;;  %3466 = vpow2.f32 %v815_v55  ;;  %v794_v0 = vsub.f32 %v753_v31, %v778_v47  ;;  %v819_v6 = vmul.f32 1.442695, %v791_v52 }
 0x468   :  { %v3463_v1 = vpop.eup %3462  ;;  %3468 = vrcp.f32 %v829_v59  ;;  %v838_v2 = vadd.f32 %v837_v62, %v836_v60  ;;  %v830_v3 = vsel %vm754_vm4, %v3461_v61, 0.0  ;;  %v771_v7 = vsel %vm754_vm4, %v751_v42, -inf }
 0x469   :  { %v831_v5 = vsel %vm754_vm4, %v3463_v1, 0.0  ;;  %3470 = vpow2.f32 %v823_v56  ;;  %v817_v9 = vmul.f32 1.442695, %v790_v57  ;;  %v772_v10 = vmax.f32 %v770_v4, %v771_v7 }
 0x46a   :  { %3472 = vrcp.f32 %v838_v2  ;;  %v832_v8 = vadd.f32 %v831_v5, %v830_v3  ;;  %v825_v11 = vmul.f32 1.442695, %v794_v0 }
 0x46b   :  { %3474 = vpow2.f32 %v811_v63  ;;  %v788_v12 = vsub.f32 %v747_v35, %v772_v10  ;;  %v792_v13 = vsub.f32 %v751_v42, %v772_v10 }
 0x46c   :  { %3476 = vrcp.f32 %v832_v8 }
 0x46d   :  { %3478 = vpow2.f32 %v819_v6  ;;  %v813_v15 = vmul.f32 1.442695, %v788_v12  ;;  %v821_v17 = vmul.f32 1.442695, %v792_v13  ;;  %v3431_v13 = vld [vmem:[#allocation14 + $0x8] sm:$0xff]  }
 0x46e   :  { %3480 = vpow2.f32 %v817_v9  ;;  %3264 = vmatprep.subr.bf16.mxu0 %v3431_v13 }
 0x46f   :  { %3482 = vpow2.f32 %v825_v11  ;;  %3265 = vmatpush3.bf16.msra.mxu0 %v3431_v13 }
 0x470   :  { %v3465_v20 = vpop.eup %3464  ;;  %3484 = vpow2.f32 %v813_v15  ;;  %v1009_v15 = vpop.permute.xlu0 %1008 }
 0x471   :  { %v3467_v24 = vpop.eup %3466  ;;  %v856_v25 = vmul.f32 %v3465_v20, %v3449_v33  ;;  %3486 = vpow2.f32 %v821_v17  ;;  %v861_v28 = vmul.f32 %v3465_v20, %v3451_v38  ;;  %v1011_v17 = vpop.permute.xlu1 %1010 }
 0x472   :  { %v3469_v29 = vpop.eup %3468  ;;  %v845_v30 = vsel %vm754_vm4, %v3467_v24, 0.0 }
 0x473   :  { %v3471_v31 = vpop.eup %3470  ;;  %v852_v32 = vmul.f32 %v3469_v29, %v3453_v43  ;;  %v859_v34 = vmul.f32 %v3469_v29, %v3455_v48 }
 0x474   :  { %v3473_v36 = vpop.eup %3472  ;;  %v846_v35 = vsel %vm754_vm4, %v3471_v31, 0.0  ;;  %v1017_v20 = vpop.permute.xlu0 %1016 }
 0x475   :  { %v3475_v37 = vpop.eup %3474  ;;  %v858_v39 = vmul.f32 %v3473_v36, %v3457_v53  ;;  %v847_v40 = vadd.f32 %v846_v35, %v845_v30  ;;  %v862_v41 = vmul.f32 %v3473_v36, %v3459_v58 }
 0x476   :  { %v3477_v42 = vpop.eup %3476  ;;  %v839_v44 = vsel %vm754_vm4, %v3475_v37, 0.0 }
 0x477   :  { %v3479_v45 = vpop.eup %3478  ;;  %3488 = vrcp.f32 %v847_v40  ;;  %v854_v33 = vmul.f32 %v3477_v42, %v3461_v61  ;;  %v876_v38 = vpack.c.bf16 %v858_v39, %v856_v25  ;;  %v860_v46 = vmul.f32 %v3477_v42, %v3463_v1 }
 0x478   :  { %v3481_v47 = vpop.eup %3480  ;;  %v840_v49 = vsel %vm754_vm4, %v3479_v45, 0.0  ;;  %v878_v43 = vpack.c.bf16 %v862_v41, %v861_v28  ;;  %v1013_v29 = vpop.permute.xlu0 %1012 }
 0x479   :  { %v3483_v48 = vpop.eup %3482  ;;  %v841_v50 = vadd.f32 %v840_v49, %v839_v44  ;;  %v848_v51 = vsel %vm754_vm4, %v3481_v47, 0.0  ;;  %v875_v52 = vpack.c.bf16 %v854_v33, %v852_v32  ;;  %v877_v53 = vpack.c.bf16 %v860_v46, %v859_v34 }
 0x47a   :  { %v3485_v54 = vpop.eup %3484  ;;  %v849_v55 = vsel %vm754_vm4, %v3483_v48, 0.0 }
 0x47b   :  { %v3487_v56 = vpop.eup %3486  ;;  %3490 = vrcp.f32 %v841_v50  ;;  %v850_v57 = vadd.f32 %v849_v55, %v848_v51  ;;  %v842_v58 = vsel %vm754_vm4, %v3485_v54, 0.0  ;;  %3246 = vmatprep.mubr.msk.bf16.mxu1 %vm754_vm4, %v875_v52 }
 0x47c   :  { %v843_v59 = vsel %vm754_vm4, %v3487_v56, 0.0  ;;  %3247 = vmatmul.mubr.msk.bf16.vlgmr.msra.gmra.mrb[12].mxu1 %vm754_vm4, %v876_v38  ;;  %v1021_v36 = vpop.permute.xlu0 %1020 }
 0x47d   :  { %3492 = vrcp.f32 %v850_v57  ;;  %v844_v60 = vadd.f32 %v843_v59, %v842_v58  ;;  %3250 = vmatprep.mubr.msk.bf16.mxu1 %vm754_vm4, %v877_v53 }
 0x47f   :  { %3494 = vrcp.f32 %v844_v60 }
 0x481   :  { %v3489_v61 = vpop.eup %3488 }
 0x482   :  { %v868_v62 = vmul.f32 %v3489_v61, %v3467_v24  ;;  %v873_v63 = vmul.f32 %v3489_v61, %v3471_v31  ;;  %v1015_v24 = vpop.permute.xlu1 %1014 }
 0x484   :  { %3251 = vmatmul.mubr.msk.bf16.gmra.mrb[16].mxu1 %vm754_vm4, %v878_v43 }
 0x485   :  { %v3491_v0 = vpop.eup %3490 }
 0x486   :  { %v864_v1 = vmul.f32 %v3491_v0, %v3475_v37  ;;  %v871_v2 = vmul.f32 %v3491_v0, %v3479_v45  ;;  %v1019_v32 = vpop.permute.xlu1 %1018 }
 0x487   :  { %v3493_v3 = vpop.eup %3492 }
 0x488   :  { %v870_v4 = vmul.f32 %v3493_v3, %v3481_v47  ;;  %v874_v5 = vmul.f32 %v3493_v3, %v3483_v48 }
 0x489   :  { %v3495_v6 = vpop.eup %3494 }
 0x48a   :  { %v866_v7 = vmul.f32 %v3495_v6, %v3485_v54  ;;  %v880_v8 = vpack.c.bf16 %v870_v4, %v868_v62  ;;  %v872_v9 = vmul.f32 %v3495_v6, %v3487_v56  ;;  %v882_v10 = vpack.c.bf16 %v874_v5, %v873_v63  ;;  %v1023_v42 = vpop.permute.xlu1 %1022 }
 0x48c   :  { %v879_v11 = vpack.c.bf16 %v866_v7, %v864_v1  ;;  %v881_v12 = vpack.c.bf16 %v872_v9, %v871_v2 }
 0x48e   :  { %3254 = vmatprep.mubr.msk.bf16.mxu1 %vm754_vm4, %v879_v11 }
 0x48f   :  { %3255 = vmatmul.mubr.msk.bf16.gmra.mrb[20].mxu1 %vm754_vm4, %v880_v8 }
 0x490   :  { %3258 = vmatprep.mubr.msk.bf16.mxu1 %vm754_vm4, %v881_v12 }
 0x497   :  { %3259 = vmatmul.mubr.msk.bf16.gmra.mrb[24].mxu1 %vm754_vm4, %v882_v10 }
 0x54f   :  { %v3248_v25 = vpop.f32.mrb[12].mxu1 }
 0x550   :  { %v945_v28 = vpop.f32.mrb[13].mxu1  ;;  %v1034_v34 = vmul.f32 %v3248_v25, %v1013_v29 }
 0x551   :  { %v3249_v30 = vpop.f32.mrb[14].mxu1  ;;  %v1032_v35 = vmul.f32 %v1009_v15, %v945_v28 }
 0x552   :  { %v948_v31 = vpop.f32.mrb[15].mxu1  ;;  %v1035_v39 = vmul.f32 %v3249_v30, %v1015_v24  ;;  %v1054_v38 = vsel %vm471_vm2, %v1034_v34, 0.0 }
 0x553   :  { %v1033_v44 = vmul.f32 %v1011_v17, %v948_v31  ;;  %v1048_v43 = vsel %vm471_vm2, %v1032_v35, 0.0 }
 0x554   :  { %v1057_v52 = vsel %vm471_vm2, %v1035_v39, 0.0  ;;  %v3014_v39 = vld [vmem:[#allocation16] ss:$0 sm:$0xff] }
 0x555   :  { %v1051_v55 = vsel %vm471_vm2, %v1033_v44, 0.0 }
 0x557   :  { %v3252_v37 = vpop.f32.mrb[16].mxu1 }
 0x558   :  { %v1038_v40 = vmul.f32 %v3252_v37, %v1021_v36  ;;  %v961_v41 = vpop.f32.mrb[17].mxu1 }
 0x559   :  { %v1036_v45 = vmul.f32 %v1017_v20, %v961_v41  ;;  %v3253_v33 = vpop.f32.mrb[18].mxu1 }
 0x55a   :  { %v1055_v46 = vsel %vm471_vm2, %v1038_v40, 0.0  ;;  %v1039_v47 = vmul.f32 %v3253_v33, %v1023_v42  ;;  %v964_v49 = vpop.f32.mrb[19].mxu1 }
 0x55b   :  { %v1056_v48 = vadd.f32 %v1055_v46, %v1054_v38  ;;  %v1049_v50 = vsel %vm471_vm2, %v1036_v45, 0.0  ;;  %v1037_v51 = vmul.f32 %v1019_v32, %v964_v49 }
 0x55c   :  { %v1050_v53 = vadd.f32 %v1049_v50, %v1048_v43  ;;  %v1058_v54 = vsel %vm471_vm2, %v1039_v47, 0.0 }
 0x55d   :  { %v1059_v56 = vadd.f32 %v1058_v54, %v1057_v52  ;;  %v1052_v57 = vsel %vm471_vm2, %v1037_v51, 0.0 }
 0x55e   :  { %v1053_v58 = vadd.f32 %v1052_v57, %v1051_v55 }
 0x55f   :  { %v1073_v59 = vpack.c.bf16 %v1059_v56, %v1056_v48 }
 0x560   :  { %v1072_v60 = vpack.c.bf16 %v1053_v58, %v1050_v53 }
 0x562   :  { %v3256_v61 = vpop.f32.mrb[20].mxu1  ;;  %3266 = vmatprep.mubr.msk.bf16.mxu0 %vm471_vm2, %v1072_v60 }
 0x563   :  { %v977_v62 = vpop.f32.mrb[21].mxu1  ;;  %3267 = vmatmul.mubr.msk.bf16.vlgmr.msra.gmra.mrb[20].mxu0 %vm471_vm2, %v1073_v59  ;;  %v1042_v1 = vmul.f32 %v3256_v61, %v1013_v29 }
 0x564   :  { %v3257_v63 = vpop.f32.mrb[22].mxu1  ;;  %v1040_v2 = vmul.f32 %v1009_v15, %v977_v62 }
 0x565   :  { %v980_v0 = vpop.f32.mrb[23].mxu1  ;;  %v1043_v4 = vmul.f32 %v3257_v63, %v1015_v24  ;;  %v1066_v10 = vsel %vm471_vm2, %v1042_v1, 0.0 }
 0x566   :  { %v1041_v7 = vmul.f32 %v1011_v17, %v980_v0  ;;  %v1060_v25 = vsel %vm471_vm2, %v1040_v2, 0.0 }
 0x567   :  { %v1069_v15 = vsel %vm471_vm2, %v1043_v4, 0.0 }
 0x568   :  { %v1063_v17 = vsel %vm471_vm2, %v1041_v7, 0.0 }
 0x56a   :  { %v3260_v3 = vpop.f32.mrb[24].mxu1 }
 0x56b   :  { %v1046_v5 = vmul.f32 %v3260_v3, %v1021_v36  ;;  %v993_v6 = vpop.f32.mrb[25].mxu1 }
 0x56c   :  { %v1044_v8 = vmul.f32 %v1017_v20, %v993_v6  ;;  %v3261_v9 = vpop.f32.mrb[26].mxu1 }
 0x56d   :  { %v1067_v11 = vsel %vm471_vm2, %v1046_v5, 0.0  ;;  %v1047_v12 = vmul.f32 %v3261_v9, %v1023_v42  ;;  %v996_v13 = vpop.f32.mrb[27].mxu1 }
 0x56e   :  { %v1068_v28 = vadd.f32 %v1067_v11, %v1066_v10  ;;  %v1061_v30 = vsel %vm471_vm2, %v1044_v8, 0.0  ;;  %v1045_v29 = vmul.f32 %v1019_v32, %v996_v13 }
 0x56f   :  { %v1062_v24 = vadd.f32 %v1061_v30, %v1060_v25  ;;  %v1070_v31 = vsel %vm471_vm2, %v1047_v12, 0.0 }
 0x570   :  { %v1071_v20 = vadd.f32 %v1070_v31, %v1069_v15  ;;  %v1064_v34 = vsel %vm471_vm2, %v1045_v29, 0.0 }
 0x571   :  { %v1065_v36 = vadd.f32 %v1064_v34, %v1063_v17 }
 0x572   :  { %v1075_v35 = vpack.c.bf16 %v1071_v20, %v1068_v28 }
 0x573   :  { %v1074_v37 = vpack.c.bf16 %v1065_v36, %v1062_v24 }
 0x575   :  { %3270 = vmatprep.mubr.msk.bf16.mxu0 %vm471_vm2, %v1074_v37 }
 0x576   :  { %3271 = vmatmul.mubr.msk.bf16.gmra.mrb[24].mxu0 %vm471_vm2, %v1075_v35 }
 0x636   :  { %v3268_v40 = vpop.f32.mrb[20].mxu0 }
 0x637   :  { %v1140_v32 = vpop.f32.mrb[21].mxu0  ;;  %v1149_v41 = vadd.f32 %v3268_v40, %v3014_v39 }
 0x638   :  { %v1141_v42 = vadd.f32 %v3014_v39, %v1140_v32  ;;  %v3269_v44 = vpop.f32.mrb[22].mxu0 }
 0x639   :  { %v1143_v45 = vpop.f32.mrb[23].mxu0  ;;  %v1152_v46 = vadd.f32 %v3269_v44, %v3014_v39  ;;  %v1173_v43 = vadd.f32 %v1149_v41, %v4446_v21 }
 0x63a   :  { %v1144_v33 = vadd.f32 %v3014_v39, %v1143_v45  ;;  %v1171_v38 = vadd.f32 %v1141_v42, %v4442_v18 }
 0x63b   :  { %v1185_v50 = vsel %vm471_vm2, %v1173_v43, 0.0  ;;  %v1174_v51 = vadd.f32 %v1152_v46, %v4438_v14 }
 0x63c   :  { %v1179_v47 = vsel %vm471_vm2, %v1171_v38, 0.0  ;;  %v1172_v49 = vadd.f32 %v1144_v33, %v4444_v19 }
 0x63d   :  { %1180 = vadd.xlane.f32.xlu0 %v1179_v47  ;;  %v1188_v52 = vsel %vm471_vm2, %v1174_v51, 0.0  ;;  %v3432_v47 = vld [vmem:[#allocation20] sm:$0xff]  }
 0x63e   :  { %v1182_v48 = vsel %vm471_vm2, %v1172_v49, 0.0  ;;  %3274 = vmatprep.subr.bf16.mxu1 %v3432_v47 }
 0x63f   :  { %1183 = vadd.xlane.f32.xlu1 %v1182_v48  ;;  %3275 = vmatpush3.bf16.msra.mxu1 %v3432_v47  ;;  %v3435_v48 = vld [vmem:[#allocation23 + $0x8] sm:$0xff]  }
 0x641   :  { %1186 = vadd.xlane.f32.xlu0 %v1185_v50 }
 0x645   :  { %1189 = vadd.xlane.f32.xlu0 %v1188_v52 }
 0x649   :  { %v3272_v18 = vpop.f32.mrb[24].mxu0 }
 0x64a   :  { %v1156_v53 = vpop.f32.mrb[25].mxu0  ;;  %v1165_v54 = vadd.f32 %v3272_v18, %v3014_v39 }
 0x64b   :  { %v1157_v55 = vadd.f32 %v3014_v39, %v1156_v53  ;;  %v3273_v56 = vpop.f32.mrb[26].mxu0 }
 0x64c   :  { %v1159_v19 = vpop.f32.mrb[27].mxu0  ;;  %v1168_v57 = vadd.f32 %v3273_v56, %v3014_v39  ;;  %v1177_v14 = vadd.f32 %v1165_v54, %v4459_v26 }
 0x64d   :  { %v1160_v21 = vadd.f32 %v3014_v39, %v1159_v19  ;;  %v1175_v58 = vadd.f32 %v1157_v55, %v4440_v16 }
 0x64e   :  { %v1178_v62 = vadd.f32 %v1168_v57, %v4461_v27  ;;  %v1197_v63 = vsel %vm471_vm2, %v1177_v14, 0.0 }
 0x64f   :  { %v1191_v59 = vsel %vm471_vm2, %v1175_v58, 0.0  ;;  %v1176_v60 = vadd.f32 %v1160_v21, %v4448_v22 }
 0x650   :  { %1192 = vadd.xlane.f32.xlu1 %v1191_v59  ;;  %v1200_v0 = vsel %vm471_vm2, %v1178_v62, 0.0 }
 0x651   :  { %v1194_v61 = vsel %vm471_vm2, %v1176_v60, 0.0 }
 0x652   :  { %1195 = vadd.xlane.f32.xlu0 %v1194_v61 }
 0x654   :  { %1198 = vadd.xlane.f32.xlu1 %v1197_v63 }
 0x656   :  { %1201 = vadd.xlane.f32.xlu0 %v1200_v0 }
 0x6ca   :  { %v1181_v1 = vpop.xlane.xlu0 %1180 }
 0x6cb   :  { %v1204_v16 = vmul.f32 0.03125, %v1181_v1 }
 0x6cc   :  { %v1184_v2 = vpop.xlane.xlu1 %1183 }
 0x6cd   :  { %v4571_v3 = vsub.f32 %v1171_v38, %v1204_v16  ;;  %v1205_v22 = vmul.f32 0.03125, %v1184_v2  ;;  %v3022_v16 = vld [vmem:[#allocation19] ss:$0 sm:$0xff] }
 0x6ce   :  { %v1187_v4 = vpop.xlane.xlu0 %1186 }
 0x6cf   :  { %v4573_v26 = vsub.f32 %v1172_v49, %v1205_v22  ;;  %v1206_v5 = vmul.f32 0.03125, %v1187_v4  ;;  %v1220_v27 = vmul.f32 %v4571_v3, %v4571_v3  ;;  %v3433_v49 = vld [vmem:[#allocation20 + $0x8] sm:$0xff]  }
 0x6d0   :  { %3276 = vmatprep.subr.bf16.mxu1 %v3433_v49 }
 0x6d1   :  { %v4577_v6 = vsub.f32 %v1173_v43, %v1206_v5  ;;  %v1228_v7 = vsel %vm471_vm2, %v1220_v27, 0.0  ;;  %v1221_v8 = vmul.f32 %v4573_v26, %v4573_v26  ;;  %3277 = vmatpush3.bf16.msra.mxu1 %v3433_v49  ;;  %v3434_v43 = vld [vmem:[#allocation23] sm:$0xff]  }
 0x6d2   :  { %1229 = vadd.xlane.f32.xlu1 %v1228_v7  ;;  %v1190_v9 = vpop.xlane.xlu0 %1189  ;;  %3286 = vmatprep.subr.bf16.mxu0 %v3434_v43 }
 0x6d3   :  { %v1207_v10 = vmul.f32 0.03125, %v1190_v9  ;;  %v1231_v11 = vsel %vm471_vm2, %v1221_v8, 0.0  ;;  %v1222_v12 = vmul.f32 %v4577_v6, %v4577_v6  ;;  %3287 = vmatpush3.bf16.msra.mxu0 %v3434_v43 }
 0x6d4   :  { %1232 = vadd.xlane.f32.xlu0 %v1231_v11  ;;  %3288 = vmatprep.subr.bf16.mxu0 %v3435_v48 }
 0x6d5   :  { %v4585_v13 = vsub.f32 %v1174_v51, %v1207_v10  ;;  %v1234_v25 = vsel %vm471_vm2, %v1222_v12, 0.0 }
 0x6d6   :  { %1235 = vadd.xlane.f32.xlu1 %v1234_v25 }
 0x6d7   :  { %v1223_v28 = vmul.f32 %v4585_v13, %v4585_v13  ;;  %3289 = vmatpush3.bf16.msra.mxu0 %v3435_v48 }
 0x6d9   :  { %v1237_v30 = vsel %vm471_vm2, %v1223_v28, 0.0 }
 0x6da   :  { %1238 = vadd.xlane.f32.xlu0 %v1237_v30 }
 0x6dd   :  { %v1193_v29 = vpop.xlane.xlu1 %1192 }
 0x6de   :  { %v1208_v15 = vmul.f32 0.03125, %v1193_v29 }
 0x6df   :  { %v1196_v24 = vpop.xlane.xlu0 %1195 }
 0x6e0   :  { %v4591_v31 = vsub.f32 %v1175_v58, %v1208_v15  ;;  %v1209_v17 = vmul.f32 0.03125, %v1196_v24 }
 0x6e1   :  { %v1199_v20 = vpop.xlane.xlu1 %1198 }
 0x6e2   :  { %v4593_v34 = vsub.f32 %v1176_v60, %v1209_v17  ;;  %v1210_v36 = vmul.f32 0.03125, %v1199_v20  ;;  %v1224_v35 = vmul.f32 %v4591_v31, %v4591_v31 }
 0x6e3   :  { %v1202_v37 = vpop.xlane.xlu0 %1201 }
 0x6e4   :  { %v4597_v39 = vsub.f32 %v1177_v14, %v1210_v36  ;;  %v1211_v40 = vmul.f32 0.03125, %v1202_v37  ;;  %v1240_v32 = vsel %vm471_vm2, %v1224_v35, 0.0  ;;  %v1225_v41 = vmul.f32 %v4593_v34, %v4593_v34  ;;  %v3021_v14 = vld [vmem:[#allocation17] ss:$0 sm:$0xff] }
 0x6e5   :  { %1241 = vadd.xlane.f32.xlu1 %v1240_v32 }
 0x6e6   :  { %v4602_v42 = vsub.f32 %v1178_v62, %v1211_v40  ;;  %v1243_v44 = vsel %vm471_vm2, %v1225_v41, 0.0  ;;  %v1226_v45 = vmul.f32 %v4597_v39, %v4597_v39 }
 0x6e7   :  { %1244 = vadd.xlane.f32.xlu0 %v1243_v44 }
 0x6e8   :  { %v1246_v33 = vsel %vm471_vm2, %v1226_v45, 0.0  ;;  %v1227_v38 = vmul.f32 %v4602_v42, %v4602_v42 }
 0x6e9   :  { %1247 = vadd.xlane.f32.xlu1 %v1246_v33 }
 0x6ea   :  { %v1249_v46 = vsel %vm471_vm2, %v1227_v38, 0.0 }
 0x6eb   :  { %1250 = vadd.xlane.f32.xlu0 %v1249_v46 }
 0x75f   :  { %v1230_v50 = vpop.xlane.xlu1 %1229 }
 0x760   :  { %v1252_v51 = vmul.f32 0.03125, %v1230_v50  ;;  %v3437_v50 = vld [vmem:[#allocation23 + $0x18] sm:$0xff]  }
 0x761   :  { %v1233_v52 = vpop.xlane.xlu0 %1232 }
 0x762   :  { %v1260_v18 = vadd.f32 1e-05, %v1252_v51  ;;  %v1253_v53 = vmul.f32 0.03125, %v1233_v52  ;;  %v3608_v51 = vld [vmem:[#allocation8] sm:$0xff]   ;;  %v3023_v52 = vld [vmem:[#allocation22] ss:$0 sm:$0xff] }
 0x763   :  { %v1236_v54 = vpop.xlane.xlu1 %1235 }
 0x764   :  { %3496 = vrsqrt.f32 %v1260_v18  ;;  %v1261_v55 = vadd.f32 1e-05, %v1253_v53  ;;  %v1254_v56 = vmul.f32 0.03125, %v1236_v54 }
 0x766   :  { %3498 = vrsqrt.f32 %v1261_v55  ;;  %v1262_v19 = vadd.f32 1e-05, %v1254_v56 }
 0x767   :  { %v1239_v57 = vpop.xlane.xlu0 %1238 }
 0x768   :  { %3500 = vrsqrt.f32 %v1262_v19  ;;  %v1255_v21 = vmul.f32 0.03125, %v1239_v57 }
 0x76a   :  { %v1263_v58 = vadd.f32 1e-05, %v1255_v21 }
 0x76c   :  { %3502 = vrsqrt.f32 %v1263_v58 }
 0x76e   :  { %v3497_v59 = vpop.eup %3496 }
 0x76f   :  { %v1276_v60 = vmul.f32 %v3497_v59, %v4571_v3 }
 0x770   :  { %v3499_v61 = vpop.eup %3498 }
 0x771   :  { %v1277_v62 = vmul.f32 %v3499_v61, %v4573_v26  ;;  %v1290_v1 = vmul.f32 %v3021_v14, %v1276_v60 }
 0x772   :  { %v3501_v63 = vpop.eup %3500  ;;  %v1242_v0 = vpop.xlane.xlu1 %1241 }
 0x773   :  { %v1278_v2 = vmul.f32 %v3501_v63, %v4577_v6  ;;  %v1256_v22 = vmul.f32 0.03125, %v1242_v0  ;;  %v1291_v4 = vmul.f32 %v3021_v14, %v1277_v62  ;;  %v4616_v3 = vadd.f32 %v3022_v16, %v1290_v1  ;;  %v3609_v63 = vld [vmem:[#allocation8 + $0x8] sm:$0xff]  }
 0x774   :  { %v1245_v5 = vpop.xlane.xlu0 %1244 }
 0x775   :  { %v1264_v27 = vadd.f32 1e-05, %v1256_v22  ;;  %v1257_v7 = vmul.f32 0.03125, %v1245_v5  ;;  %v4614_v8 = vadd.f32 %v3022_v16, %v1291_v4  ;;  %v1292_v11 = vmul.f32 %v3021_v14, %v1278_v2 }
 0x776   :  { %v3503_v9 = vpop.eup %3502  ;;  %v1248_v10 = vpop.xlane.xlu1 %1247 }
 0x777   :  { %v1279_v26 = vmul.f32 %v3503_v9, %v4585_v13  ;;  %3504 = vrsqrt.f32 %v1264_v27  ;;  %v1265_v12 = vadd.f32 1e-05, %v1257_v7  ;;  %v1258_v25 = vmul.f32 0.03125, %v1248_v10 }
 0x778   :  { %v1251_v28 = vpop.xlane.xlu0 %1250  ;;  %v1312_v6 = vpack.c.bf16 %v4614_v8, %v4616_v3  ;;  %v4622_v24 = vadd.f32 %v3022_v16, %v1292_v11 }
 0x779   :  { %v1293_v30 = vmul.f32 %v3021_v14, %v1279_v26  ;;  %3506 = vrsqrt.f32 %v1265_v12  ;;  %v1259_v29 = vmul.f32 0.03125, %v1251_v28  ;;  %v1266_v15 = vadd.f32 1e-05, %v1258_v25  ;;  %v3030_v25 = vld [vmem:[#allocation25] ss:$0 sm:$0xff] }
 0x77a   :  { %3278 = vmatprep.mubr.msk.bf16.mxu1 %vm471_vm2, %v1312_v6 }
 0x77b   :  { %v4624_v17 = vadd.f32 %v3022_v16, %v1293_v30  ;;  %v1267_v20 = vadd.f32 1e-05, %v1259_v29  ;;  %3508 = vrsqrt.f32 %v1266_v15 }
 0x77d   :  { %3510 = vrsqrt.f32 %v1267_v20  ;;  %v1313_v13 = vpack.c.bf16 %v4624_v17, %v4622_v24 }
 0x77f   :  { %3279 = vmatmul.mubr.msk.bf16.vlgmr.msra.gmra.mrb[28].mxu1 %vm471_vm2, %v1313_v13 }
 0x781   :  { %v3505_v36 = vpop.eup %3504 }
 0x782   :  { %v1280_v35 = vmul.f32 %v3505_v36, %v4591_v31 }
 0x783   :  { %v3507_v37 = vpop.eup %3506 }
 0x784   :  { %v1281_v40 = vmul.f32 %v3507_v37, %v4593_v34  ;;  %v1294_v32 = vmul.f32 %v3021_v14, %v1280_v35 }
 0x785   :  { %v3509_v41 = vpop.eup %3508 }
 0x786   :  { %v1295_v44 = vmul.f32 %v3021_v14, %v1281_v40  ;;  %v1282_v33 = vmul.f32 %v3509_v41, %v4597_v39  ;;  %v4633_v46 = vadd.f32 %v3022_v16, %v1294_v32 }
 0x787   :  { %v3511_v45 = vpop.eup %3510 }
 0x788   :  { %v1283_v38 = vmul.f32 %v3511_v45, %v4602_v42  ;;  %v4635_v47 = vadd.f32 %v3022_v16, %v1295_v44  ;;  %v1296_v49 = vmul.f32 %v3021_v14, %v1282_v33  ;;  %v3436_v42 = vld [vmem:[#allocation23 + $0x10] sm:$0xff]  }
 0x789   :  { %3290 = vmatprep.subr.bf16.mxu0 %v3436_v42 }
 0x78a   :  { %v1314_v43 = vpack.c.bf16 %v4635_v47, %v4633_v46  ;;  %v1297_v31 = vmul.f32 %v3021_v14, %v1283_v38  ;;  %v4640_v34 = vadd.f32 %v3022_v16, %v1296_v49  ;;  %3291 = vmatpush3.bf16.msra.mxu0 %v3436_v42 }
 0x78b   :  { %3292 = vmatprep.subr.bf16.mxu0 %v3437_v50 }
 0x78c   :  { %3282 = vmatprep.mubr.msk.bf16.mxu1 %vm471_vm2, %v1314_v43  ;;  %v4642_v48 = vadd.f32 %v3022_v16, %v1297_v31 }
 0x78e   :  { %v1315_v39 = vpack.c.bf16 %v4642_v48, %v4640_v34  ;;  %3293 = vmatpush3.bf16.msra.mxu0 %v3437_v50 }
 0x78f   :  { %3314 = vmatprep.subr.bf16.mxu0 %v3608_v51 }
 0x790   :  { %3283 = vmatmul.mubr.msk.bf16.gmra.mrb[32].mxu1 %vm471_vm2, %v1315_v39 }
 0x852   :  { %v3280_v18 = vpop.f32.mrb[28].mxu1 }
 0x853   :  { %v1389_v53 = vadd.f32 %v3280_v18, %v3023_v52  ;;  %v1380_v54 = vpop.f32.mrb[29].mxu1 }
 0x854   :  { %v1381_v55 = vadd.f32 %v3023_v52, %v1380_v54  ;;  %v3281_v56 = vpop.f32.mrb[30].mxu1 }
 0x855   :  { %v1392_v19 = vadd.f32 %v3281_v56, %v3023_v52  ;;  %v1383_v57 = vpop.f32.mrb[31].mxu1  ;;  %v1413_v58 = vmax.f32 %v1389_v53, 0.0 }
 0x856   :  { %v1384_v21 = vadd.f32 %v3023_v52, %v1383_v57  ;;  %v1411_v60 = vmax.f32 %v1381_v55, 0.0 }
 0x857   :  { %v1414_v59 = vmax.f32 %v1392_v19, 0.0 }
 0x858   :  { %v1412_v14 = vmax.f32 %v1384_v21, 0.0 }
 0x859   :  { %v1420_v61 = vpack.c.bf16 %v1414_v59, %v1413_v58 }
 0x85a   :  { %v1419_v62 = vpack.c.bf16 %v1412_v14, %v1411_v60 }
 0x85c   :  { %3294 = vmatprep.mubr.msk.bf16.mxu0 %vm1453_vm5, %v1419_v62 }
 0x85d   :  { %3295 = vmatmul.mubr.msk.bf16.vlgmr.msra.gmra.mrb[28].mxu0 %vm1453_vm5, %v1420_v61 }
 0x85e   :  { %3315 = vmatpush3.bf16.msra.mxu0 %v3608_v51 }
 0x85f   :  { %3316 = vmatprep.subr.bf16.mxu0 %v3609_v63 }
 0x862   :  { %3317 = vmatpush3.bf16.msra.mxu0 %v3609_v63 }
 0x863   :  { %v3284_v0 = vpop.f32.mrb[32].mxu1 }
 0x864   :  { %v1405_v1 = vadd.f32 %v3284_v0, %v3023_v52  ;;  %v1396_v16 = vpop.f32.mrb[33].mxu1 }
 0x865   :  { %v1397_v2 = vadd.f32 %v3023_v52, %v1396_v16  ;;  %v3285_v22 = vpop.f32.mrb[34].mxu1 }
 0x866   :  { %v1408_v4 = vadd.f32 %v3285_v22, %v3023_v52  ;;  %v1399_v5 = vpop.f32.mrb[35].mxu1  ;;  %v1417_v7 = vmax.f32 %v1405_v1, 0.0 }
 0x867   :  { %v1400_v27 = vadd.f32 %v3023_v52, %v1399_v5  ;;  %v1415_v10 = vmax.f32 %v1397_v2, 0.0 }
 0x868   :  { %v1418_v9 = vmax.f32 %v1408_v4, 0.0 }
 0x869   :  { %v1416_v11 = vmax.f32 %v1400_v27, 0.0 }
 0x86a   :  { %v1422_v26 = vpack.c.bf16 %v1418_v9, %v1417_v7 }
 0x86b   :  { %v1421_v12 = vpack.c.bf16 %v1416_v11, %v1415_v10 }
 0x86d   :  { %3298 = vmatprep.mubr.msk.bf16.mxu0 %vm1453_vm5, %v1421_v12 }
 0x86e   :  { %3299 = vmatmul.mubr.msk.bf16.gmra.mrb[32].mxu0 %vm1453_vm5, %v1422_v26 }
 0x930   :  { %v3296_v28 = vpop.f32.mrb[28].mxu0 }
 0x931   :  { %v1500_v6 = vpop.f32.mrb[29].mxu0  ;;  %v1509_v30 = vadd.f32 %v3296_v28, %v3030_v25 }
 0x932   :  { %v1501_v29 = vadd.f32 %v3030_v25, %v1500_v6  ;;  %v3297_v15 = vpop.f32.mrb[30].mxu0 }
 0x933   :  { %v1503_v20 = vpop.f32.mrb[31].mxu0  ;;  %v1512_v13 = vadd.f32 %v3297_v15, %v3030_v25  ;;  %v1533_v32 = vadd.f32 %v1509_v30, %v4622_v24 }
 0x934   :  { %v1504_v36 = vadd.f32 %v3030_v25, %v1503_v20  ;;  %v1531_v35 = vadd.f32 %v1501_v29, %v4616_v3 }
 0x935   :  { %v1534_v44 = vadd.f32 %v1512_v13, %v4624_v17  ;;  %v1545_v45 = vsel %vm471_vm2, %v1533_v32, 0.0 }
 0x936   :  { %v1539_v37 = vsel %vm471_vm2, %v1531_v35, 0.0  ;;  %v1532_v40 = vadd.f32 %v1504_v36, %v4614_v8 }
 0x937   :  { %1540 = vadd.xlane.f32.xlu1 %v1539_v37  ;;  %v1548_v33 = vsel %vm471_vm2, %v1534_v44, 0.0  ;;  %v3438_v37 = vld [vmem:[#allocation11 + $0x10] sm:$0xff]  }
 0x938   :  { %v1542_v41 = vsel %vm471_vm2, %v1532_v40, 0.0  ;;  %3302 = vmatprep.subr.bf16.mxu1 %v3438_v37 }
 0x939   :  { %1543 = vadd.xlane.f32.xlu0 %v1542_v41  ;;  %3303 = vmatpush3.bf16.msra.mxu1 %v3438_v37 }
 0x93b   :  { %1546 = vadd.xlane.f32.xlu1 %v1545_v45 }
 0x93d   :  { %1549 = vadd.xlane.f32.xlu0 %v1548_v33 }
 0x941   :  { %v3300_v38 = vpop.f32.mrb[32].mxu0 }
 0x942   :  { %v1516_v3 = vpop.f32.mrb[33].mxu0  ;;  %v1525_v49 = vadd.f32 %v3300_v38, %v3030_v25 }
 0x943   :  { %v1517_v43 = vadd.f32 %v3030_v25, %v1516_v3  ;;  %v3301_v31 = vpop.f32.mrb[34].mxu0 }
 0x944   :  { %v1519_v8 = vpop.f32.mrb[35].mxu0  ;;  %v1528_v39 = vadd.f32 %v3301_v31, %v3030_v25  ;;  %v1537_v51 = vadd.f32 %v1525_v49, %v4640_v34 }
 0x945   :  { %v1520_v24 = vadd.f32 %v3030_v25, %v1519_v8  ;;  %v1535_v42 = vadd.f32 %v1517_v43, %v4633_v46 }
 0x946   :  { %v1538_v18 = vadd.f32 %v1528_v39, %v4642_v48  ;;  %v1557_v53 = vsel %vm471_vm2, %v1537_v51, 0.0 }
 0x947   :  { %v1551_v50 = vsel %vm471_vm2, %v1535_v42, 0.0  ;;  %v1536_v17 = vadd.f32 %v1520_v24, %v4635_v47 }
 0x948   :  { %1552 = vadd.xlane.f32.xlu1 %v1551_v50  ;;  %v1560_v54 = vsel %vm471_vm2, %v1538_v18, 0.0 }
 0x949   :  { %v1554_v52 = vsel %vm471_vm2, %v1536_v17, 0.0 }
 0x94a   :  { %1555 = vadd.xlane.f32.xlu0 %v1554_v52 }
 0x94c   :  { %1558 = vadd.xlane.f32.xlu1 %v1557_v53 }
 0x94e   :  { %1561 = vadd.xlane.f32.xlu0 %v1560_v54 }
 0x9c4   :  { %v1541_v55 = vpop.xlane.xlu1 %1540 }
 0x9c5   :  { %v1563_v46 = vmul.f32 0.03125, %v1541_v55 }
 0x9c6   :  { %v1544_v56 = vpop.xlane.xlu0 %1543 }
 0x9c7   :  { %v4667_v19 = vsub.f32 %v1531_v35, %v1563_v46  ;;  %v1564_v47 = vmul.f32 0.03125, %v1544_v56  ;;  %v3040_v56 = vld [vmem:[#allocation28] ss:$0 sm:$0xff] }
 0x9c8   :  { %v1547_v57 = vpop.xlane.xlu1 %1546 }
 0x9c9   :  { %v4669_v34 = vsub.f32 %v1532_v40, %v1564_v47  ;;  %v1565_v21 = vmul.f32 0.03125, %v1547_v57  ;;  %v1579_v48 = vmul.f32 %v4667_v19, %v4667_v19  ;;  %v3439_v40 = vld [vmem:[#allocation11 + $0x18] sm:$0xff]  }
 0x9ca   :  { %v1550_v58 = vpop.xlane.xlu0 %1549  ;;  %3304 = vmatprep.subr.bf16.mxu1 %v3439_v40 }
 0x9cb   :  { %v4673_v59 = vsub.f32 %v1533_v32, %v1565_v21  ;;  %v1566_v60 = vmul.f32 0.03125, %v1550_v58  ;;  %v1587_v14 = vsel %vm471_vm2, %v1579_v48, 0.0  ;;  %v1580_v61 = vmul.f32 %v4669_v34, %v4669_v34  ;;  %3305 = vmatpush3.bf16.msra.mxu1 %v3439_v40  ;;  %v3610_v32 = vld [vmem:[#allocation10] sm:$0x3] }
 0x9cc   :  { %1588 = vadd.xlane.f32.xlu1 %v1587_v14  ;;  %3397 = vmatprep.subr.msk.bf16.mxu1 %vm907_vm3, %v3610_v32 }
 0x9cd   :  { %v4678_v62 = vsub.f32 %v1534_v44, %v1566_v60  ;;  %v1590_v63 = vsel %vm471_vm2, %v1580_v61, 0.0  ;;  %v1581_v0 = vmul.f32 %v4673_v59, %v4673_v59 }
 0x9ce   :  { %1591 = vadd.xlane.f32.xlu0 %v1590_v63 }
 0x9cf   :  { %v1593_v1 = vsel %vm471_vm2, %v1581_v0, 0.0  ;;  %v1582_v16 = vmul.f32 %v4678_v62, %v4678_v62 }
 0x9d0   :  { %1594 = vadd.xlane.f32.xlu1 %v1593_v1 }
 0x9d1   :  { %v1596_v2 = vsel %vm471_vm2, %v1582_v16, 0.0 }
 0x9d2   :  { %1597 = vadd.xlane.f32.xlu0 %v1596_v2 }
 0x9d5   :  { %v1553_v22 = vpop.xlane.xlu1 %1552 }
 0x9d6   :  { %v1567_v4 = vmul.f32 0.03125, %v1553_v22 }
 0x9d7   :  { %v1556_v5 = vpop.xlane.xlu0 %1555 }
 0x9d8   :  { %v4687_v27 = vsub.f32 %v1535_v42, %v1567_v4  ;;  %v1568_v7 = vmul.f32 0.03125, %v1556_v5 }
 0x9d9   :  { %v1559_v9 = vpop.xlane.xlu1 %1558 }
 0x9da   :  { %v4689_v10 = vsub.f32 %v1536_v17, %v1568_v7  ;;  %v1569_v11 = vmul.f32 0.03125, %v1559_v9  ;;  %v1583_v26 = vmul.f32 %v4687_v27, %v4687_v27  ;;  %v3039_v17 = vld [vmem:[#allocation26] ss:$0 sm:$0xff] }
 0x9db   :  { %v1562_v12 = vpop.xlane.xlu0 %1561 }
 0x9dc   :  { %v4693_v25 = vsub.f32 %v1537_v51, %v1569_v11  ;;  %v1570_v28 = vmul.f32 0.03125, %v1562_v12  ;;  %v1599_v6 = vsel %vm471_vm2, %v1583_v26, 0.0  ;;  %v1584_v30 = vmul.f32 %v4689_v10, %v4689_v10 }
 0x9dd   :  { %1600 = vadd.xlane.f32.xlu1 %v1599_v6 }
 0x9de   :  { %v4698_v29 = vsub.f32 %v1538_v18, %v1570_v28  ;;  %v1602_v15 = vsel %vm471_vm2, %v1584_v30, 0.0  ;;  %v1585_v20 = vmul.f32 %v4693_v25, %v4693_v25 }
 0x9df   :  { %1603 = vadd.xlane.f32.xlu0 %v1602_v15 }
 0x9e0   :  { %v1605_v13 = vsel %vm471_vm2, %v1585_v20, 0.0  ;;  %v1586_v36 = vmul.f32 %v4698_v29, %v4698_v29 }
 0x9e1   :  { %1606 = vadd.xlane.f32.xlu1 %v1605_v13 }
 0x9e2   :  { %v1608_v35 = vsel %vm471_vm2, %v1586_v36, 0.0 }
 0x9e3   :  { %1609 = vadd.xlane.f32.xlu0 %v1608_v35 }
 0xa59   :  { %v1589_v41 = vpop.xlane.xlu1 %1588 }
 0xa5a   :  { %v1611_v44 = vmul.f32 0.03125, %v1589_v41 }
 0xa5b   :  { %v1592_v45 = vpop.xlane.xlu0 %1591 }
 0xa5c   :  { %v1619_v33 = vadd.f32 1e-05, %v1611_v44  ;;  %v1612_v38 = vmul.f32 0.03125, %v1592_v45 }
 0xa5d   :  { %v1595_v3 = vpop.xlane.xlu1 %1594 }
 0xa5e   :  { %3512 = vrsqrt.f32 %v1619_v33  ;;  %v1620_v49 = vadd.f32 1e-05, %v1612_v38  ;;  %v1613_v43 = vmul.f32 0.03125, %v1595_v3 }
 0xa5f   :  { %v1598_v31 = vpop.xlane.xlu0 %1597 }
 0xa60   :  { %3514 = vrsqrt.f32 %v1620_v49  ;;  %v1621_v8 = vadd.f32 1e-05, %v1613_v43  ;;  %v1614_v39 = vmul.f32 0.03125, %v1598_v31 }
 0xa62   :  { %3516 = vrsqrt.f32 %v1621_v8  ;;  %v1622_v24 = vadd.f32 1e-05, %v1614_v39 }
 0xa64   :  { %3518 = vrsqrt.f32 %v1622_v24 }
 0xa68   :  { %v3513_v42 = vpop.eup %3512 }
 0xa69   :  { %v1635_v50 = vmul.f32 %v3513_v42, %v4667_v19 }
 0xa6a   :  { %v3515_v51 = vpop.eup %3514  ;;  %v1601_v52 = vpop.xlane.xlu1 %1600 }
 0xa6b   :  { %v1636_v18 = vmul.f32 %v3515_v51, %v4669_v34  ;;  %v1615_v53 = vmul.f32 0.03125, %v1601_v52  ;;  %v1649_v46 = vmul.f32 %v3039_v17, %v1635_v50 }
 0xa6c   :  { %v3517_v54 = vpop.eup %3516  ;;  %v1604_v55 = vpop.xlane.xlu0 %1603 }
 0xa6d   :  { %v1637_v47 = vmul.f32 %v3517_v54, %v4673_v59  ;;  %v1623_v57 = vadd.f32 1e-05, %v1615_v53  ;;  %v1616_v21 = vmul.f32 0.03125, %v1604_v55  ;;  %v1650_v48 = vmul.f32 %v3039_v17, %v1636_v18 }
 0xa6e   :  { %v3519_v58 = vpop.eup %3518  ;;  %v1607_v60 = vpop.xlane.xlu1 %1606  ;;  %v4712_v34 = vadd.f32 %v3040_v56, %v1649_v46 }
 0xa6f   :  { %v1651_v14 = vmul.f32 %v3039_v17, %v1637_v47  ;;  %v1638_v19 = vmul.f32 %v3519_v58, %v4678_v62  ;;  %3520 = vrsqrt.f32 %v1623_v57  ;;  %v1624_v61 = vadd.f32 1e-05, %v1616_v21 }
 0xa70   :  { %v1617_v63 = vmul.f32 0.03125, %v1607_v60  ;;  %v1610_v0 = vpop.xlane.xlu0 %1609  ;;  %v4714_v1 = vadd.f32 %v3040_v56, %v1650_v48 }
 0xa71   :  { %v1652_v16 = vmul.f32 %v3039_v17, %v1638_v19  ;;  %3522 = vrsqrt.f32 %v1624_v61  ;;  %v1618_v2 = vmul.f32 0.03125, %v1610_v0  ;;  %v4718_v4 = vadd.f32 %v3040_v56, %v1651_v14 }
 0xa72   :  { %v1625_v59 = vadd.f32 1e-05, %v1617_v63  ;;  %v1711_v22 = vpack.c.bf16 %v4714_v1, %v4712_v34 }
 0xa73   :  { %v4720_v5 = vadd.f32 %v3040_v56, %v1652_v16  ;;  %v1626_v62 = vadd.f32 1e-05, %v1618_v2 }
 0xa74   :  { %3524 = vrsqrt.f32 %v1625_v59  ;;  %3306 = vmatprep.mubr.msk.bf16.mxu1 %vm471_vm2, %v1711_v22 }
 0xa75   :  { %3526 = vrsqrt.f32 %v1626_v62  ;;  %v1712_v7 = vpack.c.bf16 %v4720_v5, %v4718_v4 }
 0xa77   :  { %3307 = vmatmul.mubr.msk.bf16.vlgmr.msra.gmra.mrb[36].mxu1 %vm471_vm2, %v1712_v7 }
 0xa78   :  { %3335 = vmatpush3.bf16.msra.mxu1 %v4492_v23 }
 0xa79   :  { %v3521_v9 = vpop.eup %3520 }
 0xa7a   :  { %v1639_v11 = vmul.f32 %v3521_v9, %v4687_v27 }
 0xa7b   :  { %v3523_v26 = vpop.eup %3522 }
 0xa7c   :  { %v1640_v12 = vmul.f32 %v3523_v26, %v4689_v10  ;;  %v1653_v28 = vmul.f32 %v3039_v17, %v1639_v11 }
 0xa7e   :  { %v3525_v6 = vpop.eup %3524  ;;  %v1654_v30 = vmul.f32 %v3039_v17, %v1640_v12  ;;  %v4731_v36 = vadd.f32 %v3040_v56, %v1653_v28 }
 0xa7f   :  { %v3527_v15 = vpop.eup %3526  ;;  %v1641_v20 = vmul.f32 %v3525_v6, %v4693_v25 }
 0xa80   :  { %v1642_v13 = vmul.f32 %v3527_v15, %v4698_v29  ;;  %v4733_v35 = vadd.f32 %v3040_v56, %v1654_v30  ;;  %v3041_v29 = vld [vmem:[#allocation13 + $0x1] ss:$0 sm:$0xff]  ;;  %v3440_v15 = vld [vmem:[#allocation14 + $0x10] sm:$0xff]  }
 0xa81   :  { %v1655_v37 = vmul.f32 %v3039_v17, %v1641_v20  ;;  %3352 = vmatprep.subr.bf16.mxu0 %v3440_v15 }
 0xa82   :  { %v1713_v23 = vpack.c.bf16 %v4733_v35, %v4731_v36  ;;  %v1656_v27 = vmul.f32 %v3039_v17, %v1642_v13 }
 0xa83   :  { %v4738_v10 = vadd.f32 %v3040_v56, %v1655_v37 }
 0xa84   :  { %3310 = vmatprep.mubr.msk.bf16.mxu1 %vm471_vm2, %v1713_v23  ;;  %v4740_v40 = vadd.f32 %v3040_v56, %v1656_v27 }
 0xa86   :  { %v1714_v25 = vpack.c.bf16 %v4740_v40, %v4738_v10 }
 0xa88   :  { %3311 = vmatmul.mubr.msk.bf16.gmra.mrb[40].mxu1 %vm471_vm2, %v1714_v25 }
 0xb4a   :  { %v3308_v32 = vpop.f32.mrb[36].mxu1 }
 0xb4b   :  { %v1779_v41 = vpop.f32.mrb[37].mxu1  ;;  %v1788_v3 = vadd.f32 %v3308_v32, %v3041_v29 }
 0xb4c   :  { %v1780_v44 = vadd.f32 %v3041_v29, %v1779_v41  ;;  %v3309_v45 = vpop.f32.mrb[38].mxu1 }
 0xb4d   :  { %v1782_v33 = vpop.f32.mrb[39].mxu1  ;;  %v1791_v49 = vadd.f32 %v3309_v45, %v3041_v29 }
 0xb4e   :  { %v1783_v38 = vadd.f32 %v3041_v29, %v1782_v33  ;;  %1818 = vrot.lane.b32.xlu1 %v1780_v44, %s4048_s16 }
 0xb50   :  { %1820 = vrot.lane.b32.xlu0 %v1783_v38, %s4048_s16 }
 0xb52   :  { %1822 = vrot.lane.b32.xlu1 %v1788_v3, %s4048_s16 }
 0xb56   :  { %1824 = vrot.lane.b32.xlu1 %v1791_v49, %s4048_s16 }
 0xb5b   :  { %v3312_v43 = vpop.f32.mrb[40].mxu1 }
 0xb5c   :  { %v1795_v31 = vpop.f32.mrb[41].mxu1  ;;  %v1804_v50 = vadd.f32 %v3312_v43, %v3041_v29 }
 0xb5d   :  { %v1796_v8 = vadd.f32 %v3041_v29, %v1795_v31  ;;  %v3313_v39 = vpop.f32.mrb[42].mxu1 }
 0xb5e   :  { %v1798_v24 = vpop.f32.mrb[43].mxu1  ;;  %v1807_v17 = vadd.f32 %v3313_v39, %v3041_v29 }
 0xb5f   :  { %v1799_v42 = vadd.f32 %v3041_v29, %v1798_v24  ;;  %1826 = vrot.lane.b32.xlu0 %v1796_v8, %s4048_s16 }
 0xb61   :  { %1828 = vrot.lane.b32.xlu1 %v1799_v42, %s4048_s16 }
 0xb63   :  { %1830 = vrot.lane.b32.xlu0 %v1804_v50, %s4048_s16 }
 0xb65   :  { %1832 = vrot.lane.b32.xlu1 %v1807_v17, %s4048_s16 }
 0xb67   :  { %2252 = vrot.lane.b32.xlu0 %v1780_v44, %s4029_s22 }
 0xb69   :  { %2254 = vrot.lane.b32.xlu1 %v1783_v38, %s4029_s22 }
 0xb6b   :  { %2260 = vrot.lane.b32.xlu0 %v1796_v8, %s4029_s22 }
 0xb6d   :  { %2258 = vrot.lane.b32.xlu1 %v1791_v49, %s4029_s22 }
 0xb6f   :  { %2256 = vrot.lane.b32.xlu0 %v1788_v3, %s4029_s22 }
 0xb71   :  { %2262 = vrot.lane.b32.xlu1 %v1799_v42, %s4029_s22 }
 0xb73   :  { %2264 = vrot.lane.b32.xlu0 %v1804_v50, %s4029_s22 }
 0xb75   :  { %2266 = vrot.lane.b32.xlu1 %v1807_v17, %s4029_s22 }
 0xbc0   :  { %v1819_v51 = vpop.permute.xlu1 %1818 }
 0xbc1   :  { %v1842_v18 = vmul.f32 %v1819_v51, %v1780_v44  ;;  %v1850_v2 = vmul.f32 %v1819_v51, %v1796_v8 }
 0xbc2   :  { %v1821_v52 = vpop.permute.xlu0 %1820 }
 0xbc3   :  { %v1843_v53 = vmul.f32 %v1821_v52, %v1783_v38  ;;  %v1851_v61 = vmul.f32 %v1821_v52, %v1799_v42 }
 0xbc4   :  { %v1823_v54 = vpop.permute.xlu1 %1822 }
 0xbc5   :  { %v1858_v55 = vpack.c.bf16 %v1843_v53, %v1842_v18  ;;  %v1844_v56 = vmul.f32 %v1823_v54, %v1788_v3  ;;  %v1862_v22 = vpack.c.bf16 %v1851_v61, %v1850_v2  ;;  %v1852_v9 = vmul.f32 %v1823_v54, %v1804_v50 }
 0xbc7   :  { %3318 = vmatprep.mubr.msk.bf16.mxu0 %vm471_vm2, %v1858_v55 }
 0xbc8   :  { %v1825_v46 = vpop.permute.xlu1 %1824 }
 0xbc9   :  { %v1845_v47 = vmul.f32 %v1825_v46, %v1791_v49  ;;  %v1853_v62 = vmul.f32 %v1825_v46, %v1807_v17 }
 0xbcb   :  { %v1859_v57 = vpack.c.bf16 %v1845_v47, %v1844_v56  ;;  %v1863_v26 = vpack.c.bf16 %v1853_v62, %v1852_v9 }
 0xbcd   :  { %3319 = vmatmul.mubr.msk.bf16.vlgmr.msra.gmra.mrb[36].mxu0 %vm471_vm2, %v1859_v57 }
 0xbce   :  { %3353 = vmatpush3.bf16.msra.mxu0 %v3440_v15 }
 0xbd1   :  { %v1827_v21 = vpop.permute.xlu0 %1826 }
 0xbd2   :  { %v1846_v58 = vmul.f32 %v1827_v21, %v1780_v44  ;;  %v1854_v11 = vmul.f32 %v1827_v21, %v1796_v8 }
 0xbd3   :  { %v1829_v48 = vpop.permute.xlu1 %1828 }
 0xbd4   :  { %v1847_v60 = vmul.f32 %v1829_v48, %v1783_v38  ;;  %v1855_v7 = vmul.f32 %v1829_v48, %v1799_v42 }
 0xbd5   :  { %v1831_v14 = vpop.permute.xlu0 %1830 }
 0xbd6   :  { %v1860_v19 = vpack.c.bf16 %v1847_v60, %v1846_v58  ;;  %v1848_v0 = vmul.f32 %v1831_v14, %v1788_v3  ;;  %v1864_v12 = vpack.c.bf16 %v1855_v7, %v1854_v11  ;;  %v1856_v6 = vmul.f32 %v1831_v14, %v1804_v50 }
 0xbd7   :  { %v1833_v63 = vpop.permute.xlu1 %1832 }
 0xbd8   :  { %v1849_v16 = vmul.f32 %v1833_v63, %v1791_v49  ;;  %3322 = vmatprep.mubr.msk.bf16.mxu0 %vm471_vm2, %v1860_v19  ;;  %v1857_v28 = vmul.f32 %v1833_v63, %v1807_v17 }
 0xbda   :  { %v1861_v59 = vpack.c.bf16 %v1849_v16, %v1848_v0  ;;  %v1865_v30 = vpack.c.bf16 %v1857_v28, %v1856_v6 }
 0xbdc   :  { %3323 = vmatmul.mubr.msk.bf16.gmra.mrb[40].mxu0 %vm471_vm2, %v1861_v59 }
 0xbdd   :  { %3326 = vmatprep.mubr.msk.bf16.mxu0 %vm471_vm2, %v1862_v22 }
 0xbe4   :  { %3327 = vmatmul.mubr.msk.bf16.gmra.mrb[44].mxu0 %vm471_vm2, %v1863_v26 }
 0xbe5   :  { %3330 = vmatprep.mubr.msk.bf16.mxu0 %vm471_vm2, %v1864_v12 }
 0xbec   :  { %3331 = vmatmul.mubr.msk.bf16.gmra.mrb[48].mxu0 %vm471_vm2, %v1865_v30 }
 0xca0   :  { %v3320_v20 = vpop.f32.mrb[36].mxu0 }
 0xca1   :  { %v1924_v13 = vpop.f32.mrb[37].mxu0  ;;  %v1989_v27 = vmul.f32 0.35355338, %v3320_v20 }
 0xca2   :  { %v3321_v37 = vpop.f32.mrb[38].mxu0  ;;  %v1987_v25 = vmul.f32 0.35355338, %v1924_v13 }
 0xca3   :  { %v1927_v23 = vpop.f32.mrb[39].mxu0  ;;  %v1990_v29 = vmul.f32 0.35355338, %v3321_v37  ;;  %v2009_v3 = vsel %vm754_vm4, %v1989_v27, -inf }
 0xca4   :  { %v1988_v41 = vmul.f32 0.35355338, %v1927_v23  ;;  %v2003_v8 = vsel %vm754_vm4, %v1987_v25, -inf }
 0xca5   :  { %v2012_v50 = vsel %vm754_vm4, %v1990_v29, -inf }
 0xca6   :  { %v2006_v17 = vsel %vm754_vm4, %v1988_v41, -inf }
 0xcaf   :  { %v3324_v32 = vpop.f32.mrb[40].mxu0 }
 0xcb0   :  { %v1993_v44 = vmul.f32 0.35355338, %v3324_v32  ;;  %v1940_v45 = vpop.f32.mrb[41].mxu0 }
 0xcb1   :  { %v1991_v33 = vmul.f32 0.35355338, %v1940_v45  ;;  %v3325_v38 = vpop.f32.mrb[42].mxu0 }
 0xcb2   :  { %v2010_v49 = vsel %vm754_vm4, %v1993_v44, -inf  ;;  %v1994_v43 = vmul.f32 0.35355338, %v3325_v38  ;;  %v1943_v31 = vpop.f32.mrb[43].mxu0 }
 0xcb3   :  { %v2011_v39 = vmax.f32 %v2009_v3, %v2010_v49  ;;  %v2004_v24 = vsel %vm754_vm4, %v1991_v33, -inf  ;;  %v1992_v42 = vmul.f32 0.35355338, %v1943_v31 }
 0xcb4   :  { %v2005_v51 = vmax.f32 %v2003_v8, %v2004_v24  ;;  %v2013_v52 = vsel %vm754_vm4, %v1994_v43, -inf }
 0xcb5   :  { %v2029_v18 = vsub.f32 %v1989_v27, %v2011_v39  ;;  %v2033_v53 = vsub.f32 %v1993_v44, %v2011_v39  ;;  %v2014_v54 = vmax.f32 %v2012_v50, %v2013_v52  ;;  %v2007_v55 = vsel %vm754_vm4, %v1992_v42, -inf }
 0xcb6   :  { %v2027_v46 = vsub.f32 %v1987_v25, %v2005_v51  ;;  %v2031_v56 = vsub.f32 %v1991_v33, %v2005_v51  ;;  %v2008_v47 = vmax.f32 %v2006_v17, %v2007_v55 }
 0xcb7   :  { %v2047_v57 = vmul.f32 1.442695, %v2029_v18  ;;  %v2055_v21 = vmul.f32 1.442695, %v2033_v53  ;;  %v2030_v48 = vsub.f32 %v1990_v29, %v2014_v54  ;;  %v2034_v58 = vsub.f32 %v1994_v43, %v2014_v54  ;;  %v3328_v60 = vpop.f32.mrb[44].mxu0 }
 0xcb8   :  { %v2043_v14 = vmul.f32 1.442695, %v2027_v46  ;;  %v2051_v19 = vmul.f32 1.442695, %v2031_v56  ;;  %v2028_v61 = vsub.f32 %v1988_v41, %v2008_v47  ;;  %v2032_v63 = vsub.f32 %v1992_v42, %v2008_v47  ;;  %v1956_v0 = vpop.f32.mrb[45].mxu0 }
 0xcb9   :  { %3528 = vpow2.f32 %v2047_v57  ;;  %v2049_v16 = vmul.f32 1.442695, %v2030_v48  ;;  %v2057_v2 = vmul.f32 1.442695, %v2034_v58  ;;  %v3329_v22 = vpop.f32.mrb[46].mxu0 }
 0xcba   :  { %3530 = vpow2.f32 %v2055_v21  ;;  %v2045_v59 = vmul.f32 1.442695, %v2028_v61  ;;  %v2053_v62 = vmul.f32 1.442695, %v2032_v63  ;;  %v1959_v7 = vpop.f32.mrb[47].mxu0 }
 0xcbb   :  { %3532 = vpow2.f32 %v2043_v14  ;;  %v1997_v9 = vmul.f32 0.35355338, %v3328_v60  ;;  %v1995_v11 = vmul.f32 0.35355338, %v1956_v0  ;;  %v1998_v26 = vmul.f32 0.35355338, %v3329_v22 }
 0xcbc   :  { %3534 = vpow2.f32 %v2051_v19  ;;  %v1996_v32 = vmul.f32 0.35355338, %v1959_v7 }
 0xcbd   :  { %3536 = vpow2.f32 %v2049_v16  ;;  %v2021_v20 = vsel %vm754_vm4, %v1997_v9, -inf  ;;  %v2015_v13 = vsel %vm754_vm4, %v1995_v11, -inf  ;;  %v2024_v29 = vsel %vm754_vm4, %v1998_v26, -inf }
 0xcbe   :  { %3538 = vpow2.f32 %v2057_v2  ;;  %v2018_v63 = vsel %vm754_vm4, %v1996_v32, -inf }
 0xcbf   :  { %3540 = vpow2.f32 %v2045_v59  ;;  %v3332_v12 = vpop.f32.mrb[48].mxu0 }
 0xcc0   :  { %3542 = vpow2.f32 %v2053_v62  ;;  %v2001_v28 = vmul.f32 0.35355338, %v3332_v12  ;;  %v1972_v6 = vpop.f32.mrb[49].mxu0 }
 0xcc1   :  { %v1999_v30 = vmul.f32 0.35355338, %v1972_v6  ;;  %v3333_v15 = vpop.f32.mrb[50].mxu0 }
 0xcc2   :  { %v2022_v37 = vsel %vm754_vm4, %v2001_v28, -inf  ;;  %v2002_v23 = vmul.f32 0.35355338, %v3333_v15  ;;  %v1975_v27 = vpop.f32.mrb[51].mxu0 }
 0xcc3   :  { %v3529_v25 = vpop.eup %3528  ;;  %v2023_v41 = vmax.f32 %v2021_v20, %v2022_v37  ;;  %v2016_v44 = vsel %vm754_vm4, %v1999_v30, -inf  ;;  %v2000_v49 = vmul.f32 0.35355338, %v1975_v27 }
 0xcc4   :  { %v3531_v45 = vpop.eup %3530  ;;  %v2081_v33 = vsel %vm754_vm4, %v3529_v25, 0.0  ;;  %v2017_v38 = vmax.f32 %v2015_v13, %v2016_v44  ;;  %v2025_v3 = vsel %vm754_vm4, %v2002_v23, -inf }
 0xcc5   :  { %v3533_v43 = vpop.eup %3532  ;;  %v2082_v31 = vsel %vm754_vm4, %v3531_v45, 0.0  ;;  %v2037_v8 = vsub.f32 %v1997_v9, %v2023_v41  ;;  %v2041_v39 = vsub.f32 %v2001_v28, %v2023_v41  ;;  %v2026_v24 = vmax.f32 %v2024_v29, %v2025_v3 }
 0xcc6   :  { %v3535_v42 = vpop.eup %3534  ;;  %v2083_v50 = vadd.f32 %v2082_v31, %v2081_v33  ;;  %v2075_v17 = vsel %vm754_vm4, %v3533_v43, 0.0  ;;  %v2035_v51 = vsub.f32 %v1995_v11, %v2017_v38  ;;  %v2039_v52 = vsub.f32 %v1999_v30, %v2017_v38 }
 0xcc7   :  { %v3537_v18 = vpop.eup %3536  ;;  %v2076_v53 = vsel %vm754_vm4, %v3535_v42, 0.0  ;;  %v2063_v54 = vmul.f32 1.442695, %v2037_v8  ;;  %v2071_v55 = vmul.f32 1.442695, %v2041_v39  ;;  %v2038_v46 = vsub.f32 %v1998_v26, %v2026_v24 }
 0xcc8   :  { %v3539_v56 = vpop.eup %3538  ;;  %3544 = vrcp.f32 %v2083_v50  ;;  %v2077_v47 = vadd.f32 %v2076_v53, %v2075_v17  ;;  %v2084_v57 = vsel %vm754_vm4, %v3537_v18, 0.0  ;;  %v2059_v58 = vmul.f32 1.442695, %v2035_v51 }
 0xcc9   :  { %v3541_v21 = vpop.eup %3540  ;;  %v2085_v48 = vsel %vm754_vm4, %v3539_v56, 0.0  ;;  %3546 = vpow2.f32 %v2063_v54  ;;  %v2042_v60 = vsub.f32 %v2002_v23, %v2026_v24  ;;  %v2067_v16 = vmul.f32 1.442695, %v2039_v52 }
 0xcca   :  { %v3543_v14 = vpop.eup %3542  ;;  %3548 = vrcp.f32 %v2077_v47  ;;  %v2086_v19 = vadd.f32 %v2085_v48, %v2084_v57  ;;  %v2078_v61 = vsel %vm754_vm4, %v3541_v21, 0.0  ;;  %v2019_v2 = vsel %vm754_vm4, %v2000_v49, -inf }
 0xccb   :  { %v2079_v0 = vsel %vm754_vm4, %v3543_v14, 0.0  ;;  %3550 = vpow2.f32 %v2071_v55  ;;  %v2065_v22 = vmul.f32 1.442695, %v2038_v46  ;;  %v2020_v62 = vmax.f32 %v2018_v63, %v2019_v2 }
 0xccc   :  { %3552 = vrcp.f32 %v2086_v19  ;;  %v2080_v59 = vadd.f32 %v2079_v0, %v2078_v61  ;;  %v2073_v7 = vmul.f32 1.442695, %v2042_v60 }
 0xccd   :  { %3554 = vpow2.f32 %v2059_v58  ;;  %v2036_v9 = vsub.f32 %v1996_v32, %v2020_v62  ;;  %v2040_v11 = vsub.f32 %v2000_v49, %v2020_v62 }
 0xcce   :  { %3556 = vrcp.f32 %v2080_v59 }
 0xccf   :  { %3558 = vpow2.f32 %v2067_v16  ;;  %v2061_v26 = vmul.f32 1.442695, %v2036_v9  ;;  %v2069_v12 = vmul.f32 1.442695, %v2040_v11  ;;  %v3441_v9 = vld [vmem:[#allocation14 + $0x18] sm:$0xff]   ;;  %v2253_v11 = vpop.permute.xlu0 %2252 }
 0xcd0   :  { %3560 = vpow2.f32 %v2065_v22  ;;  %3354 = vmatprep.subr.bf16.mxu0 %v3441_v9 }
 0xcd1   :  { %3562 = vpow2.f32 %v2073_v7  ;;  %3355 = vmatpush3.bf16.msra.mxu0 %v3441_v9 }
 0xcd2   :  { %v3545_v28 = vpop.eup %3544  ;;  %3564 = vpow2.f32 %v2061_v26  ;;  %v2255_v26 = vpop.permute.xlu1 %2254 }
 0xcd3   :  { %v3547_v6 = vpop.eup %3546  ;;  %v2104_v30 = vmul.f32 %v3545_v28, %v3529_v25  ;;  %3566 = vpow2.f32 %v2069_v12  ;;  %v2109_v15 = vmul.f32 %v3545_v28, %v3531_v45  ;;  %v2261_v12 = vpop.permute.xlu0 %2260 }
 0xcd4   :  { %v3549_v20 = vpop.eup %3548  ;;  %v2093_v13 = vsel %vm754_vm4, %v3547_v6, 0.0 }
 0xcd5   :  { %v3551_v37 = vpop.eup %3550  ;;  %v2100_v23 = vmul.f32 %v3549_v20, %v3533_v43  ;;  %v2107_v27 = vmul.f32 %v3549_v20, %v3535_v42 }
 0xcd6   :  { %v3553_v29 = vpop.eup %3552  ;;  %v2094_v32 = vsel %vm754_vm4, %v3551_v37, 0.0  ;;  %v2259_v28 = vpop.permute.xlu1 %2258 }
 0xcd7   :  { %v3555_v41 = vpop.eup %3554  ;;  %v2106_v44 = vmul.f32 %v3553_v29, %v3537_v18  ;;  %v2095_v33 = vadd.f32 %v2094_v32, %v2093_v13  ;;  %v2110_v38 = vmul.f32 %v3553_v29, %v3539_v56 }
 0xcd8   :  { %v3557_v3 = vpop.eup %3556  ;;  %v2087_v49 = vsel %vm754_vm4, %v3555_v41, 0.0 }
 0xcd9   :  { %v3559_v31 = vpop.eup %3558  ;;  %3568 = vrcp.f32 %v2095_v33  ;;  %v2102_v25 = vmul.f32 %v3557_v3, %v3541_v21  ;;  %v2124_v45 = vpack.c.bf16 %v2106_v44, %v2104_v30  ;;  %v2108_v8 = vmul.f32 %v3557_v3, %v3543_v14 }
 0xcda   :  { %v3561_v39 = vpop.eup %3560  ;;  %v2088_v24 = vsel %vm754_vm4, %v3559_v31, 0.0  ;;  %v2126_v43 = vpack.c.bf16 %v2110_v38, %v2109_v15  ;;  %v2257_v15 = vpop.permute.xlu0 %2256 }
 0xcdb   :  { %v3563_v42 = vpop.eup %3562  ;;  %v2089_v50 = vadd.f32 %v2088_v24, %v2087_v49  ;;  %v2096_v17 = vsel %vm754_vm4, %v3561_v39, 0.0  ;;  %v2123_v51 = vpack.c.bf16 %v2102_v25, %v2100_v23  ;;  %v2125_v52 = vpack.c.bf16 %v2108_v8, %v2107_v27 }
 0xcdc   :  { %v3565_v18 = vpop.eup %3564  ;;  %v2097_v53 = vsel %vm754_vm4, %v3563_v42, 0.0 }
 0xcdd   :  { %v3567_v54 = vpop.eup %3566  ;;  %3570 = vrcp.f32 %v2089_v50  ;;  %v2098_v55 = vadd.f32 %v2097_v53, %v2096_v17  ;;  %v2090_v46 = vsel %vm754_vm4, %v3565_v18, 0.0  ;;  %3336 = vmatprep.mubr.msk.bf16.mxu1 %vm754_vm4, %v2123_v51 }
 0xcde   :  { %v2091_v56 = vsel %vm754_vm4, %v3567_v54, 0.0  ;;  %3337 = vmatmul.mubr.msk.bf16.vlgmr.msra.gmra.mrb[44].mxu1 %vm754_vm4, %v2124_v45  ;;  %v2265_v27 = vpop.permute.xlu0 %2264 }
 0xcdf   :  { %3572 = vrcp.f32 %v2098_v55  ;;  %v2092_v47 = vadd.f32 %v2091_v56, %v2090_v46  ;;  %3340 = vmatprep.mubr.msk.bf16.mxu1 %vm754_vm4, %v2125_v52 }
 0xce1   :  { %3574 = vrcp.f32 %v2092_v47 }
 0xce3   :  { %v3569_v57 = vpop.eup %3568 }
 0xce4   :  { %v2116_v21 = vmul.f32 %v3569_v57, %v3547_v6  ;;  %v2121_v48 = vmul.f32 %v3569_v57, %v3551_v37  ;;  %v2263_v37 = vpop.permute.xlu1 %2262 }
 0xce6   :  { %3341 = vmatmul.mubr.msk.bf16.gmra.mrb[48].mxu1 %vm754_vm4, %v2126_v43 }
 0xce7   :  { %v3571_v58 = vpop.eup %3570 }
 0xce8   :  { %v2112_v60 = vmul.f32 %v3571_v58, %v3555_v41  ;;  %v2119_v14 = vmul.f32 %v3571_v58, %v3559_v31  ;;  %v2267_v38 = vpop.permute.xlu1 %2266 }
 0xce9   :  { %v3573_v19 = vpop.eup %3572 }
 0xcea   :  { %v2118_v61 = vmul.f32 %v3573_v19, %v3561_v39  ;;  %v2122_v63 = vmul.f32 %v3573_v19, %v3563_v42 }
 0xceb   :  { %v3575_v0 = vpop.eup %3574 }
 0xcec   :  { %v2114_v16 = vmul.f32 %v3575_v0, %v3565_v18  ;;  %v2128_v2 = vpack.c.bf16 %v2118_v61, %v2116_v21  ;;  %v2120_v59 = vmul.f32 %v3575_v0, %v3567_v54  ;;  %v2130_v22 = vpack.c.bf16 %v2122_v63, %v2121_v48 }
 0xcee   :  { %v2127_v62 = vpack.c.bf16 %v2114_v16, %v2112_v60  ;;  %v2129_v7 = vpack.c.bf16 %v2120_v59, %v2119_v14 }
 0xcf0   :  { %3344 = vmatprep.mubr.msk.bf16.mxu1 %vm754_vm4, %v2127_v62 }
 0xcf1   :  { %3345 = vmatmul.mubr.msk.bf16.gmra.mrb[52].mxu1 %vm754_vm4, %v2128_v2 }
 0xcf2   :  { %3348 = vmatprep.mubr.msk.bf16.mxu1 %vm754_vm4, %v2129_v7 }
 0xcf9   :  { %3349 = vmatmul.mubr.msk.bf16.gmra.mrb[56].mxu1 %vm754_vm4, %v2130_v22 }
 0xdb1   :  { %v3338_v6 = vpop.f32.mrb[44].mxu1 }
 0xdb2   :  { %v2189_v30 = vpop.f32.mrb[45].mxu1  ;;  %v2278_v23 = vmul.f32 %v3338_v6, %v2257_v15 }
 0xdb3   :  { %v3339_v20 = vpop.f32.mrb[46].mxu1  ;;  %v2276_v29 = vmul.f32 %v2253_v11, %v2189_v30 }
 0xdb4   :  { %v2192_v13 = vpop.f32.mrb[47].mxu1  ;;  %v2279_v41 = vmul.f32 %v3339_v20, %v2259_v28  ;;  %v2298_v25 = vsel %vm471_vm2, %v2278_v23, 0.0 }
 0xdb5   :  { %v2277_v3 = vmul.f32 %v2255_v26, %v2192_v13  ;;  %v2292_v24 = vsel %vm471_vm2, %v2276_v29, 0.0 }
 0xdb6   :  { %v2301_v17 = vsel %vm471_vm2, %v2279_v41, 0.0 }
 0xdb7   :  { %v2295_v18 = vsel %vm471_vm2, %v2277_v3, 0.0 }
 0xdb9   :  { %v3342_v32 = vpop.f32.mrb[48].mxu1 }
 0xdba   :  { %v2282_v44 = vmul.f32 %v3342_v32, %v2265_v27  ;;  %v2205_v33 = vpop.f32.mrb[49].mxu1  ;;  %v3064_v32 = vld [vmem:[#allocation16 + $0x1] ss:$0 sm:$0xff] }
 0xdbb   :  { %v2280_v49 = vmul.f32 %v2261_v12, %v2205_v33  ;;  %v3343_v31 = vpop.f32.mrb[50].mxu1 }
 0xdbc   :  { %v2299_v45 = vsel %vm471_vm2, %v2282_v44, 0.0  ;;  %v2283_v8 = vmul.f32 %v3343_v31, %v2267_v38  ;;  %v2208_v39 = vpop.f32.mrb[51].mxu1 }
 0xdbd   :  { %v2300_v43 = vadd.f32 %v2299_v45, %v2298_v25  ;;  %v2293_v42 = vsel %vm471_vm2, %v2280_v49, 0.0  ;;  %v2281_v50 = vmul.f32 %v2263_v37, %v2208_v39 }
 0xdbe   :  { %v2294_v51 = vadd.f32 %v2293_v42, %v2292_v24  ;;  %v2302_v52 = vsel %vm471_vm2, %v2283_v8, 0.0 }
 0xdbf   :  { %v2303_v53 = vadd.f32 %v2302_v52, %v2301_v17  ;;  %v2296_v54 = vsel %vm471_vm2, %v2281_v50, 0.0 }
 0xdc0   :  { %v2297_v55 = vadd.f32 %v2296_v54, %v2295_v18 }
 0xdc1   :  { %v2317_v46 = vpack.c.bf16 %v2303_v53, %v2300_v43 }
 0xdc2   :  { %v2316_v56 = vpack.c.bf16 %v2297_v55, %v2294_v51 }
 0xdc4   :  { %v3346_v47 = vpop.f32.mrb[52].mxu1  ;;  %3356 = vmatprep.mubr.msk.bf16.mxu0 %vm471_vm2, %v2316_v56 }
 0xdc5   :  { %v2221_v57 = vpop.f32.mrb[53].mxu1  ;;  %3357 = vmatmul.mubr.msk.bf16.vlgmr.msra.gmra.mrb[52].mxu0 %vm471_vm2, %v2317_v46  ;;  %v2286_v58 = vmul.f32 %v3346_v47, %v2257_v15 }
 0xdc6   :  { %v3347_v21 = vpop.f32.mrb[54].mxu1  ;;  %v2284_v60 = vmul.f32 %v2253_v11, %v2221_v57 }
 0xdc7   :  { %v2224_v48 = vpop.f32.mrb[55].mxu1  ;;  %v2287_v19 = vmul.f32 %v3347_v21, %v2259_v28  ;;  %v2310_v59 = vsel %vm471_vm2, %v2286_v58, 0.0 }
 0xdc8   :  { %v2285_v0 = vmul.f32 %v2255_v26, %v2224_v48  ;;  %v2304_v9 = vsel %vm471_vm2, %v2284_v60, 0.0 }
 0xdc9   :  { %v2313_v11 = vsel %vm471_vm2, %v2287_v19, 0.0 }
 0xdca   :  { %v2307_v26 = vsel %vm471_vm2, %v2285_v0, 0.0 }
 0xdcc   :  { %v3350_v14 = vpop.f32.mrb[56].mxu1 }
 0xdcd   :  { %v2290_v61 = vmul.f32 %v3350_v14, %v2265_v27  ;;  %v2237_v63 = vpop.f32.mrb[57].mxu1 }
 0xdce   :  { %v2288_v16 = vmul.f32 %v2261_v12, %v2237_v63  ;;  %v3351_v2 = vpop.f32.mrb[58].mxu1 }
 0xdcf   :  { %v2311_v22 = vsel %vm471_vm2, %v2290_v61, 0.0  ;;  %v2291_v62 = vmul.f32 %v3351_v2, %v2267_v38  ;;  %v2240_v7 = vpop.f32.mrb[59].mxu1 }
 0xdd0   :  { %v2312_v6 = vadd.f32 %v2311_v22, %v2310_v59  ;;  %v2305_v30 = vsel %vm471_vm2, %v2288_v16, 0.0  ;;  %v2289_v15 = vmul.f32 %v2263_v37, %v2240_v7 }
 0xdd1   :  { %v2306_v28 = vadd.f32 %v2305_v30, %v2304_v9  ;;  %v2314_v20 = vsel %vm471_vm2, %v2291_v62, 0.0 }
 0xdd2   :  { %v2315_v12 = vadd.f32 %v2314_v20, %v2313_v11  ;;  %v2308_v13 = vsel %vm471_vm2, %v2289_v15, 0.0 }
 0xdd3   :  { %v2309_v23 = vadd.f32 %v2308_v13, %v2307_v26 }
 0xdd4   :  { %v2319_v27 = vpack.c.bf16 %v2315_v12, %v2312_v6 }
 0xdd5   :  { %v2318_v29 = vpack.c.bf16 %v2309_v23, %v2306_v28 }
 0xdd7   :  { %3360 = vmatprep.mubr.msk.bf16.mxu0 %vm471_vm2, %v2318_v29 }
 0xdd8   :  { %3361 = vmatmul.mubr.msk.bf16.gmra.mrb[56].mxu0 %vm471_vm2, %v2319_v27 }
 0xe98   :  { %v3358_v41 = vpop.f32.mrb[52].mxu0 }
 0xe99   :  { %v2384_v37 = vpop.f32.mrb[53].mxu0  ;;  %v2393_v44 = vadd.f32 %v3358_v41, %v3064_v32 }
 0xe9a   :  { %v2385_v33 = vadd.f32 %v3064_v32, %v2384_v37  ;;  %v3359_v38 = vpop.f32.mrb[54].mxu0 }
 0xe9b   :  { %v2387_v3 = vpop.f32.mrb[55].mxu0  ;;  %v2396_v25 = vadd.f32 %v3359_v38, %v3064_v32  ;;  %v2417_v39 = vadd.f32 %v2393_v44, %v4718_v4 }
 0xe9c   :  { %v2388_v49 = vadd.f32 %v3064_v32, %v2387_v3  ;;  %v2415_v31 = vadd.f32 %v2385_v33, %v4712_v34 }
 0xe9d   :  { %v2429_v43 = vsel %vm471_vm2, %v2417_v39, 0.0  ;;  %v2418_v42 = vadd.f32 %v2396_v25, %v4720_v5  ;;  %v3442_v25 = vld [vmem:[#allocation20 + $0x10] sm:$0xff]  }
 0xe9e   :  { %v2423_v45 = vsel %vm471_vm2, %v2415_v31, 0.0  ;;  %v2416_v8 = vadd.f32 %v2388_v49, %v4714_v1  ;;  %3364 = vmatprep.subr.bf16.mxu1 %v3442_v25 }
 0xe9f   :  { %2424 = vadd.xlane.f32.xlu0 %v2423_v45  ;;  %v2432_v50 = vsel %vm471_vm2, %v2418_v42, 0.0  ;;  %3365 = vmatpush3.bf16.msra.mxu1 %v3442_v25  ;;  %v3443_v45 = vld [vmem:[#allocation20 + $0x18] sm:$0xff]  }
 0xea0   :  { %v2426_v24 = vsel %vm471_vm2, %v2416_v8, 0.0  ;;  %3366 = vmatprep.subr.bf16.mxu1 %v3443_v45 }
 0xea1   :  { %2427 = vadd.xlane.f32.xlu1 %v2426_v24 }
 0xea3   :  { %2430 = vadd.xlane.f32.xlu0 %v2429_v43  ;;  %3367 = vmatpush3.bf16.msra.mxu1 %v3443_v45 }
 0xea7   :  { %2433 = vadd.xlane.f32.xlu0 %v2432_v50 }
 0xeab   :  { %v3362_v34 = vpop.f32.mrb[56].mxu0 }
 0xeac   :  { %v2400_v17 = vpop.f32.mrb[57].mxu0  ;;  %v2409_v51 = vadd.f32 %v3362_v34, %v3064_v32 }
 0xead   :  { %v2401_v52 = vadd.f32 %v3064_v32, %v2400_v17  ;;  %v3363_v18 = vpop.f32.mrb[58].mxu0 }
 0xeae   :  { %v2403_v1 = vpop.f32.mrb[59].mxu0  ;;  %v2412_v53 = vadd.f32 %v3363_v18, %v3064_v32  ;;  %v2421_v5 = vadd.f32 %v2409_v51, %v4738_v10 }
 0xeaf   :  { %v2404_v4 = vadd.f32 %v3064_v32, %v2403_v1  ;;  %v2419_v54 = vadd.f32 %v2401_v52, %v4731_v36 }
 0xeb0   :  { %v2422_v47 = vadd.f32 %v2412_v53, %v4740_v40  ;;  %v2441_v57 = vsel %vm471_vm2, %v2421_v5, 0.0 }
 0xeb1   :  { %v2435_v55 = vsel %vm471_vm2, %v2419_v54, 0.0  ;;  %v2420_v46 = vadd.f32 %v2404_v4, %v4733_v35 }
 0xeb2   :  { %2436 = vadd.xlane.f32.xlu1 %v2435_v55  ;;  %v2444_v21 = vsel %vm471_vm2, %v2422_v47, 0.0 }
 0xeb3   :  { %v2438_v56 = vsel %vm471_vm2, %v2420_v46, 0.0 }
 0xeb4   :  { %2439 = vadd.xlane.f32.xlu0 %v2438_v56 }
 0xeb6   :  { %2442 = vadd.xlane.f32.xlu1 %v2441_v57 }
 0xeb8   :  { %2445 = vadd.xlane.f32.xlu0 %v2444_v21 }
 0xf2c   :  { %v2425_v48 = vpop.xlane.xlu0 %2424 }
 0xf2d   :  { %v2447_v36 = vmul.f32 0.03125, %v2425_v48  ;;  %v3072_v48 = vld [vmem:[#allocation19 + $0x1] ss:$0 sm:$0xff] }
 0xf2e   :  { %v2428_v58 = vpop.xlane.xlu1 %2427 }
 0xf2f   :  { %v4845_v60 = vsub.f32 %v2415_v31, %v2447_v36  ;;  %v2448_v35 = vmul.f32 0.03125, %v2428_v58 }
 0xf30   :  { %v2431_v14 = vpop.xlane.xlu0 %2430 }
 0xf31   :  { %v4847_v10 = vsub.f32 %v2416_v8, %v2448_v35  ;;  %v2449_v19 = vmul.f32 0.03125, %v2431_v14  ;;  %v2463_v40 = vmul.f32 %v4845_v60, %v4845_v60  ;;  %v3444_v8 = vld [vmem:[#allocation23 + $0x20] sm:$0xff]  }
 0xf32   :  { %3376 = vmatprep.subr.bf16.mxu0 %v3444_v8 }
 0xf33   :  { %v4851_v61 = vsub.f32 %v2417_v39, %v2449_v19  ;;  %v2471_v63 = vsel %vm471_vm2, %v2463_v40, 0.0  ;;  %v2464_v0 = vmul.f32 %v4847_v10, %v4847_v10  ;;  %v3445_v39 = vld [vmem:[#allocation23 + $0x28] sm:$0xff]   ;;  %3377 = vmatpush3.bf16.msra.mxu0 %v3444_v8 }
 0xf34   :  { %2472 = vadd.xlane.f32.xlu1 %v2471_v63  ;;  %v2434_v16 = vpop.xlane.xlu0 %2433  ;;  %3378 = vmatprep.subr.bf16.mxu0 %v3445_v39 }
 0xf35   :  { %v2450_v2 = vmul.f32 0.03125, %v2434_v16  ;;  %v2474_v59 = vsel %vm471_vm2, %v2464_v0, 0.0  ;;  %v2465_v22 = vmul.f32 %v4851_v61, %v4851_v61 }
 0xf36   :  { %2475 = vadd.xlane.f32.xlu0 %v2474_v59 }
 0xf37   :  { %v4859_v62 = vsub.f32 %v2418_v42, %v2450_v2  ;;  %v2477_v7 = vsel %vm471_vm2, %v2465_v22, 0.0  ;;  %3379 = vmatpush3.bf16.msra.mxu0 %v3445_v39  ;;  %v3447_v39 = vld [vmem:[#allocation23 + $0x38] sm:$0xff]  }
 0xf38   :  { %2478 = vadd.xlane.f32.xlu1 %v2477_v7 }
 0xf39   :  { %v2466_v9 = vmul.f32 %v4859_v62, %v4859_v62 }
 0xf3b   :  { %v2480_v6 = vsel %vm471_vm2, %v2466_v9, 0.0 }
 0xf3c   :  { %2481 = vadd.xlane.f32.xlu0 %v2480_v6 }
 0xf3f   :  { %v2437_v30 = vpop.xlane.xlu1 %2436 }
 0xf40   :  { %v2451_v15 = vmul.f32 0.03125, %v2437_v30 }
 0xf41   :  { %v2440_v11 = vpop.xlane.xlu0 %2439 }
 0xf42   :  { %v4865_v28 = vsub.f32 %v2419_v54, %v2451_v15  ;;  %v2452_v20 = vmul.f32 0.03125, %v2440_v11 }
 0xf43   :  { %v2443_v26 = vpop.xlane.xlu1 %2442 }
 0xf44   :  { %v4867_v12 = vsub.f32 %v2420_v46, %v2452_v20  ;;  %v2453_v13 = vmul.f32 0.03125, %v2443_v26  ;;  %v2467_v23 = vmul.f32 %v4865_v28, %v4865_v28  ;;  %v3071_v46 = vld [vmem:[#allocation17 + $0x1] ss:$0 sm:$0xff] }
 0xf45   :  { %v2446_v27 = vpop.xlane.xlu0 %2445 }
 0xf46   :  { %v4871_v29 = vsub.f32 %v2421_v5, %v2453_v13  ;;  %v2454_v32 = vmul.f32 0.03125, %v2446_v27  ;;  %v2483_v41 = vsel %vm471_vm2, %v2467_v23, 0.0  ;;  %v2468_v37 = vmul.f32 %v4867_v12, %v4867_v12 }
 0xf47   :  { %2484 = vadd.xlane.f32.xlu1 %v2483_v41 }
 0xf48   :  { %v4876_v44 = vsub.f32 %v2422_v47, %v2454_v32  ;;  %v2486_v33 = vsel %vm471_vm2, %v2468_v37, 0.0  ;;  %v2469_v38 = vmul.f32 %v4871_v29, %v4871_v29 }
 0xf49   :  { %2487 = vadd.xlane.f32.xlu0 %v2486_v33 }
 0xf4a   :  { %v2489_v3 = vsel %vm471_vm2, %v2469_v38, 0.0  ;;  %v2470_v49 = vmul.f32 %v4876_v44, %v4876_v44 }
 0xf4b   :  { %2490 = vadd.xlane.f32.xlu1 %v2489_v3 }
 0xf4c   :  { %v2492_v31 = vsel %vm471_vm2, %v2470_v49, 0.0 }
 0xf4d   :  { %2493 = vadd.xlane.f32.xlu0 %v2492_v31 }
 0xfc1   :  { %v2473_v24 = vpop.xlane.xlu1 %2472 }
 0xfc2   :  { %v2495_v43 = vmul.f32 0.03125, %v2473_v24  ;;  %v3073_v24 = vld [vmem:[#allocation22 + $0x1] ss:$0 sm:$0xff] }
 0xfc3   :  { %v2476_v42 = vpop.xlane.xlu0 %2475 }
 0xfc4   :  { %v2503_v50 = vadd.f32 1e-05, %v2495_v43  ;;  %v2496_v34 = vmul.f32 0.03125, %v2476_v42 }
 0xfc5   :  { %v2479_v17 = vpop.xlane.xlu1 %2478 }
 0xfc6   :  { %3576 = vrsqrt.f32 %v2503_v50  ;;  %v2504_v51 = vadd.f32 1e-05, %v2496_v34  ;;  %v2497_v52 = vmul.f32 0.03125, %v2479_v17 }
 0xfc8   :  { %3578 = vrsqrt.f32 %v2504_v51  ;;  %v2505_v18 = vadd.f32 1e-05, %v2497_v52 }
 0xfc9   :  { %v2482_v1 = vpop.xlane.xlu0 %2481 }
 0xfca   :  { %3580 = vrsqrt.f32 %v2505_v18  ;;  %v2498_v53 = vmul.f32 0.03125, %v2482_v1 }
 0xfcc   :  { %v2506_v4 = vadd.f32 1e-05, %v2498_v53 }
 0xfce   :  { %3582 = vrsqrt.f32 %v2506_v4 }
 0xfd0   :  { %v3577_v54 = vpop.eup %3576 }
 0xfd1   :  { %v2519_v55 = vmul.f32 %v3577_v54, %v4845_v60 }
 0xfd2   :  { %v3579_v5 = vpop.eup %3578 }
 0xfd3   :  { %v2520_v56 = vmul.f32 %v3579_v5, %v4847_v10  ;;  %v2533_v21 = vmul.f32 %v3071_v46, %v2519_v55 }
 0xfd4   :  { %v3581_v47 = vpop.eup %3580  ;;  %v2485_v57 = vpop.xlane.xlu1 %2484 }
 0xfd5   :  { %v2521_v36 = vmul.f32 %v3581_v47, %v4851_v61  ;;  %v2499_v58 = vmul.f32 0.03125, %v2485_v57  ;;  %v2534_v35 = vmul.f32 %v3071_v46, %v2520_v56  ;;  %v4890_v60 = vadd.f32 %v3072_v48, %v2533_v21 }
 0xfd6   :  { %v2488_v14 = vpop.xlane.xlu0 %2487 }
 0xfd7   :  { %v2507_v19 = vadd.f32 1e-05, %v2499_v58  ;;  %v2500_v40 = vmul.f32 0.03125, %v2488_v14  ;;  %v4888_v63 = vadd.f32 %v3072_v48, %v2534_v35  ;;  %v2535_v2 = vmul.f32 %v3071_v46, %v2521_v36 }
 0xfd8   :  { %v3583_v0 = vpop.eup %3582  ;;  %v2491_v16 = vpop.xlane.xlu1 %2490 }
 0xfd9   :  { %v2522_v10 = vmul.f32 %v3583_v0, %v4859_v62  ;;  %3584 = vrsqrt.f32 %v2507_v19  ;;  %v2508_v59 = vadd.f32 1e-05, %v2500_v40  ;;  %v2501_v22 = vmul.f32 0.03125, %v2491_v16 }
 0xfda   :  { %v2494_v7 = vpop.xlane.xlu0 %2493  ;;  %v2555_v61 = vpack.c.bf16 %v4888_v63, %v4890_v60  ;;  %v4896_v15 = vadd.f32 %v3072_v48, %v2535_v2  ;;  %v3080_v2 = vld [vmem:[#allocation25 + $0x1] ss:$0 sm:$0xff] }
 0xfdb   :  { %v2536_v9 = vmul.f32 %v3071_v46, %v2522_v10  ;;  %3586 = vrsqrt.f32 %v2508_v59  ;;  %v2502_v6 = vmul.f32 0.03125, %v2494_v7  ;;  %v2509_v30 = vadd.f32 1e-05, %v2501_v22 }
 0xfdc   :  { %3368 = vmatprep.mubr.msk.bf16.mxu1 %vm471_vm2, %v2555_v61 }
 0xfdd   :  { %v4898_v11 = vadd.f32 %v3072_v48, %v2536_v9  ;;  %v2510_v20 = vadd.f32 1e-05, %v2502_v6  ;;  %3588 = vrsqrt.f32 %v2509_v30 }
 0xfdf   :  { %3590 = vrsqrt.f32 %v2510_v20  ;;  %v2556_v62 = vpack.c.bf16 %v4898_v11, %v4896_v15 }
 0xfe1   :  { %3369 = vmatmul.mubr.msk.bf16.vlgmr.msra.gmra.mrb[60].mxu1 %vm471_vm2, %v2556_v62 }
 0xfe3   :  { %v3585_v26 = vpop.eup %3584 }
 0xfe4   :  { %v2523_v13 = vmul.f32 %v3585_v26, %v4865_v28 }
 0xfe5   :  { %v3587_v23 = vpop.eup %3586 }
 0xfe6   :  { %v2524_v27 = vmul.f32 %v3587_v23, %v4867_v12  ;;  %v2537_v32 = vmul.f32 %v3071_v46, %v2523_v13 }
 0xfe7   :  { %v3589_v41 = vpop.eup %3588 }
 0xfe8   :  { %v2538_v37 = vmul.f32 %v3071_v46, %v2524_v27  ;;  %v2525_v38 = vmul.f32 %v3589_v41, %v4871_v29  ;;  %v4907_v49 = vadd.f32 %v3072_v48, %v2537_v32 }
 0xfe9   :  { %v3591_v33 = vpop.eup %3590 }
 0xfea   :  { %v2526_v3 = vmul.f32 %v3591_v33, %v4876_v44  ;;  %v4909_v31 = vadd.f32 %v3072_v48, %v2538_v37  ;;  %v2539_v25 = vmul.f32 %v3071_v46, %v2525_v38  ;;  %v3446_v44 = vld [vmem:[#allocation23 + $0x30] sm:$0xff]  }
 0xfeb   :  { %3380 = vmatprep.subr.bf16.mxu0 %v3446_v44 }
 0xfec   :  { %v2557_v45 = vpack.c.bf16 %v4909_v31, %v4907_v49  ;;  %v2540_v28 = vmul.f32 %v3071_v46, %v2526_v3  ;;  %v4914_v12 = vadd.f32 %v3072_v48, %v2539_v25  ;;  %3381 = vmatpush3.bf16.msra.mxu0 %v3446_v44 }
 0xfed   :  { %3382 = vmatprep.subr.bf16.mxu0 %v3447_v39 }
 0xfee   :  { %3372 = vmatprep.mubr.msk.bf16.mxu1 %vm471_vm2, %v2557_v45  ;;  %v4916_v8 = vadd.f32 %v3072_v48, %v2540_v28 }
 0xff0   :  { %v2558_v29 = vpack.c.bf16 %v4916_v8, %v4914_v12  ;;  %3383 = vmatpush3.bf16.msra.mxu0 %v3447_v39 }
 0xff2   :  { %3373 = vmatmul.mubr.msk.bf16.gmra.mrb[64].mxu1 %vm471_vm2, %v2558_v29 }
0x10b4   :  { %v3370_v43 = vpop.f32.mrb[60].mxu1 }
0x10b5   :  { %v2632_v42 = vadd.f32 %v3370_v43, %v3073_v24  ;;  %v2623_v50 = vpop.f32.mrb[61].mxu1 }
0x10b6   :  { %v2624_v34 = vadd.f32 %v3073_v24, %v2623_v50  ;;  %v3371_v17 = vpop.f32.mrb[62].mxu1 }
0x10b7   :  { %v2635_v51 = vadd.f32 %v3371_v17, %v3073_v24  ;;  %v2626_v52 = vpop.f32.mrb[63].mxu1  ;;  %v2656_v1 = vmax.f32 %v2632_v42, 0.0 }
0x10b8   :  { %v2627_v18 = vadd.f32 %v3073_v24, %v2626_v52  ;;  %v2654_v4 = vmax.f32 %v2624_v34, 0.0 }
0x10b9   :  { %v2657_v53 = vmax.f32 %v2635_v51, 0.0 }
0x10ba   :  { %v2655_v54 = vmax.f32 %v2627_v18, 0.0 }
0x10bb   :  { %v2663_v55 = vpack.c.bf16 %v2657_v53, %v2656_v1 }
0x10bc   :  { %v2662_v46 = vpack.c.bf16 %v2655_v54, %v2654_v4 }
0x10be   :  { %3384 = vmatprep.mubr.msk.bf16.mxu0 %vm1453_vm5, %v2662_v46 }
0x10bf   :  { %3385 = vmatmul.mubr.msk.bf16.vlgmr.msra.gmra.mrb[60].mxu0 %vm1453_vm5, %v2663_v55 }
0x10c5   :  { %v3374_v5 = vpop.f32.mrb[64].mxu1 }
0x10c6   :  { %v2648_v56 = vadd.f32 %v3374_v5, %v3073_v24  ;;  %v2639_v47 = vpop.f32.mrb[65].mxu1 }
0x10c7   :  { %v2640_v57 = vadd.f32 %v3073_v24, %v2639_v47  ;;  %v3375_v21 = vpop.f32.mrb[66].mxu1 }
0x10c8   :  { %v2651_v48 = vadd.f32 %v3375_v21, %v3073_v24  ;;  %v2642_v36 = vpop.f32.mrb[67].mxu1  ;;  %v2660_v35 = vmax.f32 %v2648_v56, 0.0 }
0x10c9   :  { %v2643_v58 = vadd.f32 %v3073_v24, %v2642_v36  ;;  %v2658_v19 = vmax.f32 %v2640_v57, 0.0 }
0x10ca   :  { %v2661_v14 = vmax.f32 %v2651_v48, 0.0 }
0x10cb   :  { %v2659_v40 = vmax.f32 %v2643_v58, 0.0 }
0x10cc   :  { %v2665_v0 = vpack.c.bf16 %v2661_v14, %v2660_v35 }
0x10cd   :  { %v2664_v16 = vpack.c.bf16 %v2659_v40, %v2658_v19 }
0x10cf   :  { %3388 = vmatprep.mubr.msk.bf16.mxu0 %vm1453_vm5, %v2664_v16 }
0x10d0   :  { %3389 = vmatmul.mubr.msk.bf16.gmra.mrb[64].mxu0 %vm1453_vm5, %v2665_v0 }
0x1192   :  { %v3386_v10 = vpop.f32.mrb[60].mxu0 }
0x1193   :  { %v2751_v59 = vadd.f32 %v3386_v10, %v3080_v2  ;;  %v2742_v22 = vpop.f32.mrb[61].mxu0 }
0x1194   :  { %v2743_v7 = vadd.f32 %v3080_v2, %v2742_v22  ;;  %v3387_v61 = vpop.f32.mrb[62].mxu0 }
0x1195   :  { %v2754_v9 = vadd.f32 %v3387_v61, %v3080_v2  ;;  %v2745_v6 = vpop.f32.mrb[63].mxu0  ;;  %v2775_v30 = vadd.f32 %v2751_v59, %v4896_v15 }
0x1196   :  { %v2746_v20 = vadd.f32 %v3080_v2, %v2745_v6  ;;  %v2773_v13 = vadd.f32 %v2743_v7, %v4890_v60 }
0x1197   :  { %v2787_v62 = vsel %vm471_vm2, %v2775_v30, 0.0  ;;  %v2776_v26 = vadd.f32 %v2754_v9, %v4898_v11 }
0x1198   :  { %2788 = vadd.xlane.f32.xlu1 %v2787_v62  ;;  %v2774_v27 = vadd.f32 %v2746_v20, %v4888_v63  ;;  %v2781_v32 = vsel %vm471_vm2, %v2773_v13, 0.0 }
0x1199   :  { %v2790_v23 = vsel %vm471_vm2, %v2776_v26, 0.0 }
0x119a   :  { %2791 = vadd.xlane.f32.xlu0 %v2790_v23  ;;  %v2784_v41 = vsel %vm471_vm2, %v2774_v27, 0.0 }
0x119c   :  { %2782 = vadd.xlane.f32.xlu1 %v2781_v32 }
0x119e   :  { %2785 = vadd.xlane.f32.xlu0 %v2784_v41 }
0x11a3   :  { %v3390_v15 = vpop.f32.mrb[64].mxu0 }
0x11a4   :  { %v2758_v37 = vpop.f32.mrb[65].mxu0  ;;  %v2767_v33 = vadd.f32 %v3390_v15, %v3080_v2 }
0x11a5   :  { %v2759_v38 = vadd.f32 %v3080_v2, %v2758_v37  ;;  %v3391_v3 = vpop.f32.mrb[66].mxu0 }
0x11a6   :  { %v2761_v11 = vpop.f32.mrb[67].mxu0  ;;  %v2770_v25 = vadd.f32 %v3391_v3, %v3080_v2  ;;  %v2779_v29 = vadd.f32 %v2767_v33, %v4914_v12 }
0x11a7   :  { %v2762_v60 = vadd.f32 %v3080_v2, %v2761_v11  ;;  %v2777_v45 = vadd.f32 %v2759_v38, %v4907_v49  ;;  %v3089_v11 = vld [vmem:[#allocation26 + $0x1] ss:$0 sm:$0xff] }
0x11a8   :  { %v2780_v39 = vadd.f32 %v2770_v25, %v4916_v8  ;;  %v2799_v24 = vsel %vm471_vm2, %v2779_v29, 0.0 }
0x11a9   :  { %v2793_v28 = vsel %vm471_vm2, %v2777_v45, 0.0  ;;  %v2778_v63 = vadd.f32 %v2762_v60, %v4909_v31 }
0x11aa   :  { %2794 = vadd.xlane.f32.xlu1 %v2793_v28  ;;  %v2802_v43 = vsel %vm471_vm2, %v2780_v39, 0.0 }
0x11ab   :  { %v2796_v44 = vsel %vm471_vm2, %v2778_v63, 0.0 }
0x11ac   :  { %2797 = vadd.xlane.f32.xlu0 %v2796_v44 }
0x11ae   :  { %2800 = vadd.xlane.f32.xlu1 %v2799_v24 }
0x11b0   :  { %2803 = vadd.xlane.f32.xlu0 %v2802_v43 }
0x1225   :  { %v2789_v42 = vpop.xlane.xlu1 %2788 }
0x1226   :  { %v2807_v49 = vmul.f32 0.03125, %v2789_v42 }
0x1227   :  { %v2792_v50 = vpop.xlane.xlu0 %2791 }
0x1228   :  { %v4941_v34 = vsub.f32 %v2775_v30, %v2807_v49  ;;  %v2808_v31 = vmul.f32 0.03125, %v2792_v50 }
0x1229   :  { %v2783_v17 = vpop.xlane.xlu1 %2782 }
0x122a   :  { %v4943_v12 = vsub.f32 %v2776_v26, %v2808_v31  ;;  %v2805_v51 = vmul.f32 0.03125, %v2783_v17  ;;  %v2823_v8 = vmul.f32 %v4941_v34, %v4941_v34 }
0x122b   :  { %v2786_v52 = vpop.xlane.xlu0 %2785 }
0x122c   :  { %v4947_v18 = vsub.f32 %v2773_v13, %v2805_v51  ;;  %v2806_v1 = vmul.f32 0.03125, %v2786_v52  ;;  %v2835_v53 = vsel %vm471_vm2, %v2823_v8, 0.0  ;;  %v2824_v4 = vmul.f32 %v4943_v12, %v4943_v12 }
0x122d   :  { %2836 = vadd.xlane.f32.xlu1 %v2835_v53 }
0x122e   :  { %v4952_v54 = vsub.f32 %v2774_v27, %v2806_v1  ;;  %v2838_v55 = vsel %vm471_vm2, %v2824_v4, 0.0  ;;  %v2821_v46 = vmul.f32 %v4947_v18, %v4947_v18 }
0x122f   :  { %2839 = vadd.xlane.f32.xlu0 %v2838_v55 }
0x1230   :  { %v2829_v5 = vsel %vm471_vm2, %v2821_v46, 0.0  ;;  %v2822_v56 = vmul.f32 %v4952_v54, %v4952_v54 }
0x1231   :  { %2830 = vadd.xlane.f32.xlu1 %v2829_v5 }
0x1232   :  { %v2832_v47 = vsel %vm471_vm2, %v2822_v56, 0.0 }
0x1233   :  { %2833 = vadd.xlane.f32.xlu0 %v2832_v47 }
0x1237   :  { %v2795_v57 = vpop.xlane.xlu1 %2794 }
0x1238   :  { %v2809_v21 = vmul.f32 0.03125, %v2795_v57 }
0x1239   :  { %v2798_v48 = vpop.xlane.xlu0 %2797 }
0x123a   :  { %v4961_v36 = vsub.f32 %v2777_v45, %v2809_v21  ;;  %v2810_v58 = vmul.f32 0.03125, %v2798_v48  ;;  %v3090_v45 = vld [vmem:[#allocation28 + $0x1] ss:$0 sm:$0xff] }
0x123b   :  { %v2801_v35 = vpop.xlane.xlu1 %2800 }
0x123c   :  { %v4963_v14 = vsub.f32 %v2778_v63, %v2810_v58  ;;  %v2811_v19 = vmul.f32 0.03125, %v2801_v35  ;;  %v2825_v40 = vmul.f32 %v4961_v36, %v4961_v36 }
0x123d   :  { %v2804_v0 = vpop.xlane.xlu0 %2803 }
0x123e   :  { %v4967_v16 = vsub.f32 %v2779_v29, %v2811_v19  ;;  %v2812_v2 = vmul.f32 0.03125, %v2804_v0  ;;  %v2841_v10 = vsel %vm471_vm2, %v2825_v40, 0.0  ;;  %v2826_v59 = vmul.f32 %v4963_v14, %v4963_v14 }
0x123f   :  { %2842 = vadd.xlane.f32.xlu1 %v2841_v10 }
0x1240   :  { %v4972_v22 = vsub.f32 %v2780_v39, %v2812_v2  ;;  %v2844_v7 = vsel %vm471_vm2, %v2826_v59, 0.0  ;;  %v2827_v61 = vmul.f32 %v4967_v16, %v4967_v16 }
0x1241   :  { %2845 = vadd.xlane.f32.xlu0 %v2844_v7 }
0x1242   :  { %v2847_v9 = vsel %vm471_vm2, %v2827_v61, 0.0  ;;  %v2828_v6 = vmul.f32 %v4972_v22, %v4972_v22 }
0x1243   :  { %2848 = vadd.xlane.f32.xlu1 %v2847_v9 }
0x1244   :  { %v2850_v30 = vsel %vm471_vm2, %v2828_v6, 0.0 }
0x1245   :  { %2851 = vadd.xlane.f32.xlu0 %v2850_v30 }
0x12ba   :  { %v2837_v20 = vpop.xlane.xlu1 %2836 }
0x12bb   :  { %v2855_v62 = vmul.f32 0.03125, %v2837_v20 }
0x12bc   :  { %v2840_v26 = vpop.xlane.xlu0 %2839 }
0x12bd   :  { %v2863_v13 = vadd.f32 1e-05, %v2855_v62  ;;  %v2856_v23 = vmul.f32 0.03125, %v2840_v26 }
0x12be   :  { %v2831_v27 = vpop.xlane.xlu1 %2830 }
0x12bf   :  { %3592 = vrsqrt.f32 %v2863_v13  ;;  %v2864_v32 = vadd.f32 1e-05, %v2856_v23  ;;  %v2853_v41 = vmul.f32 0.03125, %v2831_v27 }
0x12c0   :  { %v2834_v15 = vpop.xlane.xlu0 %2833 }
0x12c1   :  { %3594 = vrsqrt.f32 %v2864_v32  ;;  %v2861_v37 = vadd.f32 1e-05, %v2853_v41  ;;  %v2854_v33 = vmul.f32 0.03125, %v2834_v15 }
0x12c3   :  { %3596 = vrsqrt.f32 %v2861_v37  ;;  %v2862_v38 = vadd.f32 1e-05, %v2854_v33 }
0x12c5   :  { %3598 = vrsqrt.f32 %v2862_v38 }
0x12c9   :  { %v3593_v3 = vpop.eup %3592 }
0x12ca   :  { %v2879_v25 = vmul.f32 %v3593_v3, %v4941_v34 }
0x12cb   :  { %v3595_v60 = vpop.eup %3594 }
0x12cc   :  { %v2893_v28 = vmul.f32 %v3089_v11, %v2879_v25  ;;  %v2880_v63 = vmul.f32 %v3595_v60, %v4943_v12  ;;  %v2843_v29 = vpop.xlane.xlu1 %2842 }
0x12cd   :  { %v3597_v44 = vpop.eup %3596  ;;  %v2857_v39 = vmul.f32 0.03125, %v2843_v29 }
0x12ce   :  { %v2907_v24 = vadd.f32 %v3090_v45, %v2893_v28  ;;  %v2894_v43 = vmul.f32 %v3089_v11, %v2880_v63  ;;  %v2877_v42 = vmul.f32 %v3597_v44, %v4947_v18  ;;  %v2846_v49 = vpop.xlane.xlu0 %2845 }
0x12cf   :  { %v3599_v50 = vpop.eup %3598  ;;  %v2865_v31 = vadd.f32 1e-05, %v2857_v39  ;;  %v2858_v17 = vmul.f32 0.03125, %v2846_v49 }
0x12d0   :  { %v3101_v51 = vpack.c.bf16 %v2907_v24, %v2907_v24  ;;  %v2908_v8 = vadd.f32 %v3090_v45, %v2894_v43  ;;  %v2891_v34 = vmul.f32 %v3089_v11, %v2877_v42  ;;  %v2878_v52 = vmul.f32 %v3599_v50, %v4952_v54  ;;  %v2849_v1 = vpop.xlane.xlu1 %2848 }
0x12d1   :  { %3600 = vrsqrt.f32 %v2865_v31  ;;  %v2866_v12 = vadd.f32 1e-05, %v2858_v17  ;;  %v2859_v53 = vmul.f32 0.03125, %v2849_v1 }
0x12d2   :  { %2948 = vst.msk [vmem:[#allocation29 + $0x8] sm:$0xf] %vm2945_vm6, %v3101_v51  ;;  %v3102_v4 = vpack.c.bf16 %v2908_v8, %v2908_v8  ;;  %v2905_v55 = vadd.f32 %v3090_v45, %v2891_v34  ;;  %v2892_v46 = vmul.f32 %v3089_v11, %v2878_v52  ;;  %v2852_v18 = vpop.xlane.xlu0 %2851 }
0x12d3   :  { %3602 = vrsqrt.f32 %v2866_v12  ;;  %v2867_v5 = vadd.f32 1e-05, %v2859_v53  ;;  %v2860_v56 = vmul.f32 0.03125, %v2852_v18 }
0x12d4   :  { %2949 = vst.msk [vmem:[#allocation29 + $0xc] sm:$0xf] %vm2945_vm6, %v3102_v4  ;;  %v3099_v47 = vpack.c.bf16 %v2905_v55, %v2905_v55  ;;  %v2906_v57 = vadd.f32 %v3090_v45, %v2892_v46 }
0x12d5   :  { %3604 = vrsqrt.f32 %v2867_v5  ;;  %v2868_v21 = vadd.f32 1e-05, %v2860_v56 }
0x12d6   :  { %2946 = vst.msk [vmem:[#allocation29] sm:$0xf] %vm2945_vm6, %v3099_v47  ;;  %v3100_v54 = vpack.c.bf16 %v2906_v57, %v2906_v57 }
0x12d7   :  { %3606 = vrsqrt.f32 %v2868_v21 }
0x12d8   :  { %2947 = vst.msk [vmem:[#allocation29 + $0x4] sm:$0xf] %vm2945_vm6, %v3100_v54 }
0x12db   :  { %v3601_v48 = vpop.eup %3600 }
0x12dc   :  { %v2881_v58 = vmul.f32 %v3601_v48, %v4961_v36 }
0x12dd   :  { %v3603_v35 = vpop.eup %3602 }
0x12de   :  { %v2895_v19 = vmul.f32 %v3089_v11, %v2881_v58  ;;  %v2882_v40 = vmul.f32 %v3603_v35, %v4963_v14 }
0x12df   :  { %v3605_v0 = vpop.eup %3604 }
0x12e0   :  { %v2909_v2 = vadd.f32 %v3090_v45, %v2895_v19  ;;  %v2896_v10 = vmul.f32 %v3089_v11, %v2882_v40  ;;  %v2883_v59 = vmul.f32 %v3605_v0, %v4967_v16 }
0x12e1   :  { %v3607_v7 = vpop.eup %3606 }
0x12e2   :  { %v3103_v61 = vpack.c.bf16 %v2909_v2, %v2909_v2  ;;  %v2910_v9 = vadd.f32 %v3090_v45, %v2896_v10  ;;  %v2897_v6 = vmul.f32 %v3089_v11, %v2883_v59  ;;  %v2884_v30 = vmul.f32 %v3607_v7, %v4972_v22 }
0x12e4   :  { %2950 = vst.msk [vmem:[#allocation29 + $0x10] sm:$0xf] %vm2945_vm6, %v3103_v61  ;;  %v3104_v20 = vpack.c.bf16 %v2910_v9, %v2910_v9  ;;  %v2911_v62 = vadd.f32 %v3090_v45, %v2897_v6  ;;  %v2898_v36 = vmul.f32 %v3089_v11, %v2884_v30 }
0x12e6   :  { %2951 = vst.msk [vmem:[#allocation29 + $0x14] sm:$0xf] %vm2945_vm6, %v3104_v20  ;;  %v3105_v14 = vpack.c.bf16 %v2911_v62, %v2911_v62  ;;  %v2912_v26 = vadd.f32 %v3090_v45, %v2898_v36 }
0x12e8   :  { %2952 = vst.msk [vmem:[#allocation29 + $0x18] sm:$0xf] %vm2945_vm6, %v3105_v14  ;;  %v3106_v16 = vpack.c.bf16 %v2912_v26, %v2912_v26 }
0x12ea   :  { %2953 = vst.msk [vmem:[#allocation29 + $0x1c] sm:$0xf] %vm2945_vm6, %v3106_v16 }
0x12eb   :  { %3996 = shalt.err (!%p3993_p0)
}
0x12ec   :  { %s5038_s11 = sld [smem:[#allocation42_spill]] }
0x12f2   :  { %s3997_s27 = scalar_lea.hbm %s5038_s11, 512 }
0x12f3   :  { %p3998_p1 = scmp.ne.s32.totalorder %s5038_s11, %s3997_s27  ;;  %p4001_p2 = scmp.lt.u32.totalorder %s3997_s27, %s5038_s11 }
0x12f5   :  { %p4003_p3 = pnand %p4001_p2, %p3998_p1 }
0x12f7   :  { %4006 = shalt.err (!%p4003_p3)
}
0x12f8   :  { %2965 = dma.vmem_to_hbm [thread:$0]  %s2960_s19, 512, %s5038_s11, [#allocation4], %s4029_s22, %s4029_s22, %s4030_s23  }
0x12f9   :  { %4025 = dma.done.wait [#allocation4], 512  }
0x12fa   :  { %4026 = vsyncadd [#allocation4], 4294966784 }
0x12fb   :  { %2969 = vsyncpa [#allocation3], 1 }
0x12fc   :  { %2970 = vsyncpa [#allocation6], 1 }
0x12fd   :  { %2971 = vsyncpa [#allocation9], 1 }
0x12fe   :  { %2972 = vsyncpa [#allocation12], 1 }
0x12ff   :  { %2973 = vsyncpa [#allocation15], 1 }
0x1300   :  { %2974 = vsyncpa [#allocation18], 1 }
0x1301   :  { %2975 = vsyncpa [#allocation21], 1 }
0x1302   :  { %2976 = vsyncpa [#allocation24], 1 }
0x1303   :  { %2977 = vsyncpa [#allocation27], 1 }
0x1304   :  { %2978 = vsyncpa [#allocation4], 1 }

</bundles_post_ra>
